<compile_context>
chip_gen: v7x
topology: tpu7x:2x2x1
jax: 0.10.0
libtpu: 0.0.40
codegen_flags: <defaults>
</compile_context>

<pallas_src>
import math
import numpy as np

import jax
import jax.numpy as jnp
from jax.experimental import pallas as pl
from jax.experimental.pallas import tpu as pltpu

# ----------------------------- tiny-Whisper config -----------------------------
B          = 2        # batch
N_SAMPLES  = 544      # raw audio samples per item
FRAME      = 64       # STFT frame length
HOP        = 32       # STFT hop
N_FRAMES   = 1 + (N_SAMPLES - FRAME) // HOP        # 16 mel frames
N_FREQ     = 32       # rfft-like bins kept
N_MELS     = 16       # mel channels (Whisper: 80)
D_MODEL    = 32       # model width (Whisper: 384+)
N_HEADS    = 4
D_HEAD     = D_MODEL // N_HEADS
D_MLP      = 64
N_ENC      = 2
N_DEC      = 2
T_ENC      = N_FRAMES // 2                          # 8 (stride-2 conv)
VOCAB      = 50
VPAD       = 128                                    # vocab padded to a lane-dense 128
MAX_LEN    = 8                                      # Whisper max_length analogue
FORCED_IDS = [1, 2, 3]                              # <sot>, <lang=en>, <task=transcribe>
NEG_INF    = -1e9

# ====================== in-kernel helpers (pure value math) =====================

def _ln(x, g, b):
    """LayerNorm over the last dim.  x:[M,D]  g,b:[1,D]."""
    mu = jnp.mean(x, axis=-1, keepdims=True)
    var = jnp.mean(jnp.square(x - mu), axis=-1, keepdims=True)
    return (x - mu) * jax.lax.rsqrt(var + 1e-5) * g + b


def _mha(q_all, k_all, v_all, add_mask):
    """Multi-head attention over batch-major packed rows.

    q_all:[Rq, D]  k_all,v_all:[Rk, D]  add_mask:[Rq, Rk] additive mask that
    already encodes both the block-diagonal batch structure and (if needed)
    causality.  All batches are handled by ONE matmul pair per head.
    """
    scale = D_HEAD ** -0.5
    heads = []
    for hh in range(N_HEADS):
        lo, hi = hh * D_HEAD, (hh + 1) * D_HEAD
        q = q_all[:, lo:hi]
        k = k_all[:, lo:hi]
        v = v_all[:, lo:hi]
        s = jax.lax.dot_general(q, k, (((1,), (1,)), ((), ())),
                                preferred_element_type=jnp.float32) * scale
        s = s + add_mask
        s = s - jnp.max(s, axis=-1, keepdims=True)
        p = jnp.exp(s)
        p = p / jnp.sum(p, axis=-1, keepdims=True)
        heads.append(jnp.dot(p, v, preferred_element_type=jnp.float32))
    return jnp.concatenate(heads, axis=-1)


# ============================ fused encoder kernel ==============================

def _encoder_kernel(frames_ref, cos_ref, sin_ref, fb_ref, s1_ref, s2_ref,
                    c1w_ref, c1b_ref, c2w_ref, c2b_ref, pos_ref, mask_ref,
                    ln1g_ref, ln1b_ref, wqkv_ref, bqkv_ref, wo_ref, bo_ref,
                    ln2g_ref, ln2b_ref, w1_ref, b1_ref, w2_ref, b2_ref,
                    lnfg_ref, lnfb_ref, o_ref):
    Bn = frames_ref.shape[0] // N_FRAMES

    # ---- log-mel frontend (window folded into cos/sin on the host) ----
    f = frames_ref[...]                                         # [B*T0, FRAME]
    re = jnp.dot(f, cos_ref[...], preferred_element_type=jnp.float32)
    im = jnp.dot(f, sin_ref[...], preferred_element_type=jnp.float32)
    power = re * re + im * im                                   # [B*T0, N_FREQ]
    mel = jnp.dot(power, fb_ref[...], preferred_element_type=jnp.float32)
    logmel = jnp.log10(jnp.maximum(mel, 1e-10))                 # [B*T0, N_MELS]

    # Whisper dynamic-range clamp: per SAMPLE max (tiny per-b loop, max only).
    mx_rows = []
    for b in range(Bn):
        mx_b = jnp.max(logmel[b * N_FRAMES:(b + 1) * N_FRAMES, :])
        mx_rows.append(jnp.zeros((N_FRAMES, 1), jnp.float32) + mx_b)
    mx = jnp.concatenate(mx_rows, axis=0)                       # [B*T0, 1]
    feats = (jnp.maximum(logmel, mx - 8.0) + 4.0) / 4.0         # [B*T0, N_MELS]

    c1w = c1w_ref[...]
    c2w = c2w_ref[...]

    # conv1: k=3, stride=1, pad=1 -> batch-fused block-diag selection matmuls + GELU
    y = jnp.zeros((Bn * N_FRAMES, D_MODEL), jnp.float32) + c1b_ref[...]
    for d in range(3):
        tap = jnp.dot(s1_ref[d], feats, preferred_element_type=jnp.float32)
        y = y + jnp.dot(tap, c1w[d * N_MELS:(d + 1) * N_MELS, :],
                        preferred_element_type=jnp.float32)
    y = jax.nn.gelu(y, approximate=True)                        # [B*T0, D]

    # conv2: k=3, stride=2, pad=1
    z = jnp.zeros((Bn * T_ENC, D_MODEL), jnp.float32) + c2b_ref[...]
    for d in range(3):
        tap = jnp.dot(s2_ref[d], y, preferred_element_type=jnp.float32)
        z = z + jnp.dot(tap, c2w[d * D_MODEL:(d + 1) * D_MODEL, :],
                        preferred_element_type=jnp.float32)
    x = jax.nn.gelu(z, approximate=True) + pos_ref[...]         # [B*T_ENC, D]

    # ---- transformer encoder blocks (pre-LN), fused QKV, block-diag batch mask ----
    mask = mask_ref[...]
    for l in range(N_ENC):
        h = _ln(x, ln1g_ref[l], ln1b_ref[l])
        qkv = jnp.dot(h, wqkv_ref[l], preferred_element_type=jnp.float32) + bqkv_ref[l]
        attn = _mha(qkv[:, :D_MODEL], qkv[:, D_MODEL:2 * D_MODEL],
                    qkv[:, 2 * D_MODEL:], mask)
        x = x + jnp.dot(attn, wo_ref[l], preferred_element_type=jnp.float32) + bo_ref[l]

        h = _ln(x, ln2g_ref[l], ln2b_ref[l])
        hmid = jax.nn.gelu(jnp.dot(h, w1_ref[l], preferred_element_type=jnp.float32)
                           + b1_ref[l], approximate=True)
        x = x + jnp.dot(hmid, w2_ref[l], preferred_element_type=jnp.float32) + b2_ref[l]

    o_ref[...] = _ln(x, lnfg_ref[...], lnfb_ref[...])


# ====================== fused decoder + greedy-generate kernel ==================

def _decode_kernel(enc_ref, init_ref, emb_ref, lmh_ref, pos_ref,
                   smask_ref, cmask_ref,
                   ln1g_ref, ln1b_ref, wqkv_ref, bqkv_ref, wo_s_ref, bo_s_ref,
                   ln2g_ref, ln2b_ref, wq_c_ref, bq_c_ref, wkv_c_ref, bkv_c_ref,
                   wo_c_ref, bo_c_ref, ln3g_ref, ln3b_ref,
                   w1_ref, b1_ref, w2_ref, b2_ref, lnfg_ref, lnfb_ref,
                   o_ref, kv_sc):
    Bn = enc_ref.shape[0] // T_ENC
    L = MAX_LEN

    # token state lives in the (lane-dense [B*L, 128]) output ref as one-hot rows
    o_ref[...] = init_ref[...]

    # precompute cross-attention K/V once per layer (per-forward KV cache)
    enc = enc_ref[...]                                          # [B*T_ENC, D]
    for l in range(N_DEC):
        kv_sc[l, :, :] = (jnp.dot(enc, wkv_c_ref[l], preferred_element_type=jnp.float32)
                          + bkv_c_ref[l])

    # ---- loop-invariant values hoisted out of the decode loop ----
    self_mask = smask_ref[...]                                  # [B*L, B*L]
    cross_mask = cmask_ref[...]                                 # [B*L, B*T_ENC]
    pos = pos_ref[...]                                          # [B*L, D]
    emb = emb_ref[...]                                          # [VPAD, D]
    lmh = lmh_ref[...]                                          # [D, VPAD]
    b_i = jax.lax.broadcasted_iota(jnp.int32, (Bn, Bn * L), 0)
    j_i = jax.lax.broadcasted_iota(jnp.int32, (Bn, Bn * L), 1)
    v_i = jax.lax.broadcasted_iota(jnp.int32, (Bn, VPAD), 1)
    vf = v_i.astype(jnp.float32)
    vocab_ok = v_i < VOCAB

    @pl.loop(len(FORCED_IDS), MAX_LEN)
    def _step(step):
        # token embedding via one-hot @ table (gather-free), + positions
        x = jnp.dot(o_ref[...], emb, preferred_element_type=jnp.float32) + pos

        for l in range(N_DEC):
            # self-attention (causal + block-diag batch mask), fused QKV
            h = _ln(x, ln1g_ref[l], ln1b_ref[l])
            qkv = jnp.dot(h, wqkv_ref[l], preferred_element_type=jnp.float32) + bqkv_ref[l]
            attn = _mha(qkv[:, :D_MODEL], qkv[:, D_MODEL:2 * D_MODEL],
                        qkv[:, 2 * D_MODEL:], self_mask)
            x = x + jnp.dot(attn, wo_s_ref[l],
                            preferred_element_type=jnp.float32) + bo_s_ref[l]

            # cross-attention against cached encoder K/V
            h = _ln(x, ln2g_ref[l], ln2b_ref[l])
            q_c = jnp.dot(h, wq_c_ref[l], preferred_element_type=jnp.float32) + bq_c_ref[l]
            kv = kv_sc[l]                                       # [B*T_ENC, 2D]
            attn = _mha(q_c, kv[:, :D_MODEL], kv[:, D_MODEL:], cross_mask)
            x = x + jnp.dot(attn, wo_c_ref[l],
                            preferred_element_type=jnp.float32) + bo_c_ref[l]

            # MLP
            h = _ln(x, ln3g_ref[l], ln3b_ref[l])
            hmid = jax.nn.gelu(jnp.dot(h, w1_ref[l], preferred_element_type=jnp.float32)
                               + b1_ref[l], approximate=True)
            x = x + jnp.dot(hmid, w2_ref[l],
                            preferred_element_type=jnp.float32) + b2_ref[l]

        # pick row (step-1) of each sample via a selection matmul, THEN final LN
        # (LN is row-wise so it commutes with row selection), project to vocab.
        sel = (j_i == b_i * MAX_LEN + (step - 1)).astype(jnp.float32)   # [B, B*L]
        xsel = jnp.dot(sel, x, preferred_element_type=jnp.float32)      # [B, D]
        xsel = _ln(xsel, lnfg_ref[...], lnfb_ref[...])
        logits = jnp.dot(xsel, lmh, preferred_element_type=jnp.float32) # [B, 128]
        logits = jnp.where(vocab_ok, logits, NEG_INF)                   # mask pad lanes

        # greedy argmax (first max), expressed with vector ops only
        mxl = jnp.max(logits, axis=-1, keepdims=True)
        idx = jnp.min(jnp.where(logits >= mxl, vf, float(VPAD)),
                      axis=-1, keepdims=True)                           # [B, 1]
        new_oh = (vf == idx).astype(jnp.float32)                        # [B, 128]

        for b in range(Bn):
            o_ref[pl.ds(b * MAX_LEN + step, 1), :] = new_oh[b:b + 1, :]


# ============================== JAX glue (jitted) ===============================

def _full_spec(a):
    nd = a.ndim
    return pl.BlockSpec(a.shape, lambda i, _nd=nd: (0,) * _nd)


def _block_diag_mask(Bn, Tq, Tk, causal=False):
    """Additive mask [Bn*Tq, Bn*Tk]: 0 within each sample's block (respecting
    causality if requested), NEG_INF elsewhere.  Built on host at trace time."""
    m = np.full((Bn * Tq, Bn * Tk), NEG_INF, np.float32)
    blk = np.zeros((Tq, Tk), np.float32)
    if causal:
        blk = np.where(np.arange(Tq)[:, None] >= np.arange(Tk)[None, :],
                       0.0, NEG_INF).astype(np.float32)
    for b in range(Bn):
        m[b * Tq:(b + 1) * Tq, b * Tk:(b + 1) * Tk] = blk
    return jnp.asarray(m)


def _conv_select(Bn, Tout, Tin, stride):
    """Batch-fused block-diagonal shift/stride selection matrices [3, Bn*Tout, Bn*Tin]
    for a k=3, pad=1 conv.  Built on host at trace time (no in-kernel div/mod)."""
    s = np.zeros((3, Bn * Tout, Bn * Tin), np.float32)
    for d in range(3):
        for b in range(Bn):
            for r in range(Tout):
                c = stride * r + d - 1
                if 0 <= c < Tin:
                    s[d, b * Tout + r, b * Tin + c] = 1.0
    return jnp.asarray(s)


def whisper_generate(audio, params):
    """audio:[B, n_samples] -> greedy token ids [B, MAX_LEN] (forced prompt included)."""
    Bn = audio.shape[0]

    # framing (glue: gather)
    idx = jnp.arange(N_FRAMES)[:, None] * HOP + jnp.arange(FRAME)[None, :]
    frames = audio[:, idx].reshape(Bn * N_FRAMES, FRAME)

    # fold the analysis window into the DFT matrices (saves an in-kernel mul)
    win_col = params['window'].reshape(FRAME, 1)
    cos_w = win_col * params['cos']
    sin_w = win_col * params['sin']

    # trace-time constants: conv selection matrices + attention masks
    s1 = _conv_select(Bn, N_FRAMES, N_FRAMES, stride=1)
    s2 = _conv_select(Bn, T_ENC, N_FRAMES, stride=2)
    enc_mask = _block_diag_mask(Bn, T_ENC, T_ENC, causal=False)
    self_mask = _block_diag_mask(Bn, MAX_LEN, MAX_LEN, causal=True)
    cross_mask = _block_diag_mask(Bn, MAX_LEN, T_ENC, causal=False)

    pos_enc = jnp.tile(params['enc_pos'], (Bn, 1))
    enc_args = (frames, cos_w, sin_w, params['mel_fb'], s1, s2,
                params['conv1_w'], params['conv1_b'], params['conv2_w'], params['conv2_b'],
                pos_enc, enc_mask,
                params['enc_ln1_g'], params['enc_ln1_b'],
                params['enc_wqkv'], params['enc_bqkv'],
                params['enc_wo'], params['enc_bo'],
                params['enc_ln2_g'], params['enc_ln2_b'],
                params['enc_w1'], params['enc_b1'],
                params['enc_w2'], params['enc_b2'],
                params['enc_lnf_g'], params['enc_lnf_b'])
    enc2d = pl.pallas_call(
        _encoder_kernel,
        out_shape=jax.ShapeDtypeStruct((Bn * T_ENC, D_MODEL), jnp.float32),
        grid=(1,),
        in_specs=[_full_spec(a) for a in enc_args],
        out_specs=pl.BlockSpec((Bn * T_ENC, D_MODEL), lambda i: (0, 0)),
    )(*enc_args)

    # initial tokens: forced decoder prompt + zeros (same as torch reference loop)
    init_tok = jnp.zeros((Bn, MAX_LEN), jnp.int32).at[:, :len(FORCED_IDS)].set(
        jnp.asarray(FORCED_IDS, jnp.int32))
    onehot_init = jax.nn.one_hot(init_tok.reshape(-1), VPAD, dtype=jnp.float32)

    pos_dec = jnp.tile(params['pos_emb'], (Bn, 1))
    dec_args = (enc2d, onehot_init, params['tok_emb'], params['lm_head'], pos_dec,
                self_mask, cross_mask,
                params['dec_ln1_g'], params['dec_ln1_b'],
                params['dec_wqkv'], params['dec_bqkv'],
                params['dec_wo_s'], params['dec_bo_s'],
                params['dec_ln2_g'], params['dec_ln2_b'],
                params['dec_wq_c'], params['dec_bq_c'],
                params['dec_wkv_c'], params['dec_bkv_c'],
                params['dec_wo_c'], params['dec_bo_c'],
                params['dec_ln3_g'], params['dec_ln3_b'],
                params['dec_w1'], params['dec_b1'],
                params['dec_w2'], params['dec_b2'],
                params['dec_lnf_g'], params['dec_lnf_b'])
    onehot = pl.pallas_call(
        _decode_kernel,
        out_shape=jax.ShapeDtypeStruct((Bn * MAX_LEN, VPAD), jnp.float32),
        grid=(1,),
        in_specs=[_full_spec(a) for a in dec_args],
        out_specs=pl.BlockSpec((Bn * MAX_LEN, VPAD), lambda i: (0, 0)),
        scratch_shapes=[pltpu.VMEM((N_DEC, Bn * T_ENC, 2 * D_MODEL), jnp.float32)],
    )(*dec_args)

    tokens = jnp.argmax(onehot, axis=-1).astype(jnp.int32).reshape(Bn, MAX_LEN)
    return tokens


# ================================ parameter init ================================

def sinusoids(length, channels):
    log_ts = math.log(10000.0) / (channels // 2 - 1)
    inv = np.exp(-log_ts * np.arange(channels // 2))
    scaled = np.arange(length)[:, None] * inv[None, :]
    return jnp.asarray(np.concatenate([np.sin(scaled), np.cos(scaled)], axis=1),
                       jnp.float32)


def make_mel_fb(n_freq, n_mels):
    fb = np.zeros((n_freq, n_mels), np.float32)
    edges = np.linspace(0, n_freq - 1, n_mels + 2)
    for m in range(n_mels):
        l, c, r = edges[m], edges[m + 1], edges[m + 2]
        for f in range(n_freq):
            if l <= f <= c and c > l:
                fb[f, m] = (f - l) / (c - l)
            elif c < f <= r and r > c:
                fb[f, m] = (r - f) / (r - c)
    return jnp.asarray(fb)


def init_params(key):
    keys = iter(jax.random.split(key, 64))

    def nrm(shape, scale=0.02):
        return scale * jax.random.normal(next(keys), shape, dtype=jnp.float32)

    def ones_l(n, d=D_MODEL):
        return jnp.ones((n, 1, d), jnp.float32)

    def zeros_l(n, d=D_MODEL):
        return jnp.zeros((n, 1, d), jnp.float32)

    n = np.arange(FRAME)
    kk = np.arange(N_FREQ)
    ang = 2.0 * np.pi * np.outer(n, kk) / FRAME

    tok_emb = nrm((VOCAB, D_MODEL))
    tok_emb_pad = jnp.zeros((VPAD, D_MODEL), jnp.float32).at[:VOCAB].set(tok_emb)

    return dict(
        # frontend
        window=jnp.asarray(np.hanning(FRAME), jnp.float32).reshape(1, FRAME),
        cos=jnp.asarray(np.cos(ang), jnp.float32),
        sin=jnp.asarray(-np.sin(ang), jnp.float32),
        mel_fb=make_mel_fb(N_FREQ, N_MELS),
        # convs: weights laid out [(tap, c_in), c_out]
        conv1_w=nrm((3 * N_MELS, D_MODEL)),
        conv1_b=jnp.zeros((1, D_MODEL), jnp.float32),
        conv2_w=nrm((3 * D_MODEL, D_MODEL)),
        conv2_b=jnp.zeros((1, D_MODEL), jnp.float32),
        enc_pos=sinusoids(T_ENC, D_MODEL),
        # encoder blocks (stacked over layers)
        enc_ln1_g=ones_l(N_ENC), enc_ln1_b=zeros_l(N_ENC),
        enc_wqkv=nrm((N_ENC, D_MODEL, 3 * D_MODEL)),
        enc_bqkv=jnp.zeros((N_ENC, 1, 3 * D_MODEL), jnp.float32),
        enc_wo=nrm((N_ENC, D_MODEL, D_MODEL)), enc_bo=zeros_l(N_ENC),
        enc_ln2_g=ones_l(N_ENC), enc_ln2_b=zeros_l(N_ENC),
        enc_w1=nrm((N_ENC, D_MODEL, D_MLP)),
        enc_b1=jnp.zeros((N_ENC, 1, D_MLP), jnp.float32),
        enc_w2=nrm((N_ENC, D_MLP, D_MODEL)), enc_b2=zeros_l(N_ENC),
        enc_lnf_g=jnp.ones((1, D_MODEL), jnp.float32),
        enc_lnf_b=jnp.zeros((1, D_MODEL), jnp.float32),
        # decoder embeddings (tied lm head, pre-transposed and lane-padded to 128)
        tok_emb=tok_emb_pad,
        lm_head=tok_emb_pad.T,
        pos_emb=nrm((MAX_LEN, D_MODEL)),
        # decoder blocks (stacked over layers)
        dec_ln1_g=ones_l(N_DEC), dec_ln1_b=zeros_l(N_DEC),
        dec_wqkv=nrm((N_DEC, D_MODEL, 3 * D_MODEL)),
        dec_bqkv=jnp.zeros((N_DEC, 1, 3 * D_MODEL), jnp.float32),
        dec_wo_s=nrm((N_DEC, D_MODEL, D_MODEL)), dec_bo_s=zeros_l(N_DEC),
        dec_ln2_g=ones_l(N_DEC), dec_ln2_b=zeros_l(N_DEC),
        dec_wq_c=nrm((N_DEC, D_MODEL, D_MODEL)), dec_bq_c=zeros_l(N_DEC),
        dec_wkv_c=nrm((N_DEC, D_MODEL, 2 * D_MODEL)),
        dec_bkv_c=jnp.zeros((N_DEC, 1, 2 * D_MODEL), jnp.float32),
        dec_wo_c=nrm((N_DEC, D_MODEL, D_MODEL)), dec_bo_c=zeros_l(N_DEC),
        dec_ln3_g=ones_l(N_DEC), dec_ln3_b=zeros_l(N_DEC),
        dec_w1=nrm((N_DEC, D_MODEL, D_MLP)),
        dec_b1=jnp.zeros((N_DEC, 1, D_MLP), jnp.float32),
        dec_w2=nrm((N_DEC, D_MLP, D_MODEL)), dec_b2=zeros_l(N_DEC),
        dec_lnf_g=jnp.ones((1, D_MODEL), jnp.float32),
        dec_lnf_b=jnp.zeros((1, D_MODEL), jnp.float32),
    )


# =============================== top-level "module" =============================

_VOCAB_CHARS = [''] * len(FORCED_IDS + [0]) + [chr(ord('a') + i % 26)
                                               for i in range(VOCAB - 4)]


def batch_decode(tokens):
    out = []
    for row in np.asarray(tokens):
        out.append(''.join(_VOCAB_CHARS[int(t)] for t in row if 4 <= int(t) < VOCAB))
    return out


class SimpleWhisperASRPallas:
    """Mirrors SimpleWhisperASR.forward -> transcribe -> (transcriptions, None)."""

    def __init__(self, params):
        self.params = params
        self._run = jax.jit(whisper_generate)   # one dispatch per forward
        self._tokens = None

    def forward(self, audio):
        return self.transcribe(audio)

    def transcribe(self, audio, language='en', task='transcribe'):
        # audio: [B, n_samples] float32 waveform batch (the 2-D tensor branch of torch code)
        tokens = self._run(audio, self.params)
        self._tokens = jax.block_until_ready(tokens)
        return batch_decode(self._tokens), None

    def transcribe_batch(self, wavs, wav_lens=None):
        transcriptions, _ = self.transcribe(wavs)
        return transcriptions


if __name__ == "__main__":
    key = jax.random.PRNGKey(0)
    pkey, akey = jax.random.split(key)
    params = init_params(pkey)
    audio = jax.random.normal(akey, (B, N_SAMPLES), dtype=jnp.float32)

    asr = SimpleWhisperASRPallas(params)
    transcription, _ = asr.forward(audio)
    jax.block_until_ready(asr._tokens)
    assert len(transcription) == B
    assert asr._tokens.shape == (B, MAX_LEN)
    print("KERNEL_OK")
</pallas_src>

<mosaic_0001>
module attributes {stable_mosaic.version = 11 : i64} {
  func.func @_encoder_kernel(%arg0: i32, %arg1: memref<32x64xf32, #tpu.memory_space<vmem>>, %arg2: memref<64x32xf32, #tpu.memory_space<vmem>>, %arg3: memref<64x32xf32, #tpu.memory_space<vmem>>, %arg4: memref<32x16xf32, #tpu.memory_space<vmem>>, %arg5: memref<3x32x32xf32, #tpu.memory_space<vmem>>, %arg6: memref<3x16x32xf32, #tpu.memory_space<vmem>>, %arg7: memref<48x32xf32, #tpu.memory_space<vmem>>, %arg8: memref<1x32xf32, #tpu.memory_space<vmem>>, %arg9: memref<96x32xf32, #tpu.memory_space<vmem>>, %arg10: memref<1x32xf32, #tpu.memory_space<vmem>>, %arg11: memref<16x32xf32, #tpu.memory_space<vmem>>, %arg12: memref<16x16xf32, #tpu.memory_space<vmem>>, %arg13: memref<2x1x32xf32, #tpu.memory_space<vmem>>, %arg14: memref<2x1x32xf32, #tpu.memory_space<vmem>>, %arg15: memref<2x32x96xf32, #tpu.memory_space<vmem>>, %arg16: memref<2x1x96xf32, #tpu.memory_space<vmem>>, %arg17: memref<2x32x32xf32, #tpu.memory_space<vmem>>, %arg18: memref<2x1x32xf32, #tpu.memory_space<vmem>>, %arg19: memref<2x1x32xf32, #tpu.memory_space<vmem>>, %arg20: memref<2x1x32xf32, #tpu.memory_space<vmem>>, %arg21: memref<2x32x64xf32, #tpu.memory_space<vmem>>, %arg22: memref<2x1x64xf32, #tpu.memory_space<vmem>>, %arg23: memref<2x64x32xf32, #tpu.memory_space<vmem>>, %arg24: memref<2x1x32xf32, #tpu.memory_space<vmem>>, %arg25: memref<1x32xf32, #tpu.memory_space<vmem>>, %arg26: memref<1x32xf32, #tpu.memory_space<vmem>>, %arg27: memref<16x32xf32, #tpu.memory_space<vmem>>) attributes {dimension_semantics = [#tpu.dimension_semantics<arbitrary>], iteration_bounds = array<i64: 1>, scalar_prefetch = 0 : i64, scratch_operands = 0 : i64, tpu.core_type = #tpu.core_type<tc>, window_params = [{pipeline_mode = #tpu.pipeline_mode<synchronous>, transform_indices = @transform_0, window_bounds = array<i64: 32, 64>}, {pipeline_mode = #tpu.pipeline_mode<synchronous>, transform_indices = @transform_1, window_bounds = array<i64: 64, 32>}, {pipeline_mode = #tpu.pipeline_mode<synchronous>, transform_indices = @transform_2, window_bounds = array<i64: 64, 32>}, {pipeline_mode = #tpu.pipeline_mode<synchronous>, transform_indices = @transform_3, window_bounds = array<i64: 32, 16>}, {pipeline_mode = #tpu.pipeline_mode<synchronous>, transform_indices = @transform_4, window_bounds = array<i64: 3, 32, 32>}, {pipeline_mode = #tpu.pipeline_mode<synchronous>, transform_indices = @transform_5, window_bounds = array<i64: 3, 16, 32>}, {pipeline_mode = #tpu.pipeline_mode<synchronous>, transform_indices = @transform_6, window_bounds = array<i64: 48, 32>}, {pipeline_mode = #tpu.pipeline_mode<synchronous>, transform_indices = @transform_7, window_bounds = array<i64: 1, 32>}, {pipeline_mode = #tpu.pipeline_mode<synchronous>, transform_indices = @transform_8, window_bounds = array<i64: 96, 32>}, {pipeline_mode = #tpu.pipeline_mode<synchronous>, transform_indices = @transform_9, window_bounds = array<i64: 1, 32>}, {pipeline_mode = #tpu.pipeline_mode<synchronous>, transform_indices = @transform_10, window_bounds = array<i64: 16, 32>}, {pipeline_mode = #tpu.pipeline_mode<synchronous>, transform_indices = @transform_11, window_bounds = array<i64: 16, 16>}, {pipeline_mode = #tpu.pipeline_mode<synchronous>, transform_indices = @transform_12, window_bounds = array<i64: 2, 1, 32>}, {pipeline_mode = #tpu.pipeline_mode<synchronous>, transform_indices = @transform_13, window_bounds = array<i64: 2, 1, 32>}, {pipeline_mode = #tpu.pipeline_mode<synchronous>, transform_indices = @transform_14, window_bounds = array<i64: 2, 32, 96>}, {pipeline_mode = #tpu.pipeline_mode<synchronous>, transform_indices = @transform_15, window_bounds = array<i64: 2, 1, 96>}, {pipeline_mode = #tpu.pipeline_mode<synchronous>, transform_indices = @transform_16, window_bounds = array<i64: 2, 32, 32>}, {pipeline_mode = #tpu.pipeline_mode<synchronous>, transform_indices = @transform_17, window_bounds = array<i64: 2, 1, 32>}, {pipeline_mode = #tpu.pipeline_mode<synchronous>, transform_indices = @transform_18, window_bounds = array<i64: 2, 1, 32>}, {pipeline_mode = #tpu.pipeline_mode<synchronous>, transform_indices = @transform_19, window_bounds = array<i64: 2, 1, 32>}, {pipeline_mode = #tpu.pipeline_mode<synchronous>, transform_indices = @transform_20, window_bounds = array<i64: 2, 32, 64>}, {pipeline_mode = #tpu.pipeline_mode<synchronous>, transform_indices = @transform_21, window_bounds = array<i64: 2, 1, 64>}, {pipeline_mode = #tpu.pipeline_mode<synchronous>, transform_indices = @transform_22, window_bounds = array<i64: 2, 64, 32>}, {pipeline_mode = #tpu.pipeline_mode<synchronous>, transform_indices = @transform_23, window_bounds = array<i64: 2, 1, 32>}, {pipeline_mode = #tpu.pipeline_mode<synchronous>, transform_indices = @transform_24, window_bounds = array<i64: 1, 32>}, {pipeline_mode = #tpu.pipeline_mode<synchronous>, transform_indices = @transform_25, window_bounds = array<i64: 1, 32>}, {pipeline_mode = #tpu.pipeline_mode<synchronous>, transform_indices = @transform_26, window_bounds = array<i64: 16, 32>}]} {
    %c0 = arith.constant 0 : index
    %c0_0 = arith.constant 0 : index
    %0 = vector.load %arg1[%c0, %c0_0] : memref<32x64xf32, #tpu.memory_space<vmem>>, vector<32x64xf32>
    %c0_1 = arith.constant 0 : index
    %c0_2 = arith.constant 0 : index
    %1 = vector.load %arg2[%c0_1, %c0_2] : memref<64x32xf32, #tpu.memory_space<vmem>>, vector<64x32xf32>
    %cst = arith.constant dense<0.000000e+00> : vector<32x32xf32>
    %2 = tpu.matmul %0, %1, %cst {dimension_numbers = #tpu.dot_dimension_numbers<[1], [0], [0], [1], [0, 0, 1, 1], [], []>} : vector<32x64xf32>, vector<64x32xf32>, vector<32x32xf32> -> vector<32x32xf32>
    %c0_3 = arith.constant 0 : index
    %c0_4 = arith.constant 0 : index
    %3 = vector.load %arg3[%c0_3, %c0_4] : memref<64x32xf32, #tpu.memory_space<vmem>>, vector<64x32xf32>
    %cst_5 = arith.constant dense<0.000000e+00> : vector<32x32xf32>
    %4 = tpu.matmul %0, %3, %cst_5 {dimension_numbers = #tpu.dot_dimension_numbers<[1], [0], [0], [1], [0, 0, 1, 1], [], []>} : vector<32x64xf32>, vector<64x32xf32>, vector<32x32xf32> -> vector<32x32xf32>
    %5 = arith.mulf %2, %2 : vector<32x32xf32>
    %6 = arith.mulf %4, %4 : vector<32x32xf32>
    %7 = arith.addf %5, %6 : vector<32x32xf32>
    %c0_6 = arith.constant 0 : index
    %c0_7 = arith.constant 0 : index
    %8 = vector.load %arg4[%c0_6, %c0_7] : memref<32x16xf32, #tpu.memory_space<vmem>>, vector<32x16xf32>
    %cst_8 = arith.constant dense<0.000000e+00> : vector<32x16xf32>
    %9 = tpu.matmul %7, %8, %cst_8 {dimension_numbers = #tpu.dot_dimension_numbers<[1], [0], [0], [1], [0, 0, 1, 1], [], []>} : vector<32x32xf32>, vector<32x16xf32>, vector<32x16xf32> -> vector<32x16xf32>
    %cst_9 = arith.constant 1.000000e-10 : f32
    %10 = vector.broadcast %cst_9 : f32 to vector<32x16xf32>
    %11 = arith.maximumf %9, %10 : vector<32x16xf32>
    %12 = math.log %11 : vector<32x16xf32>
    %cst_10 = arith.constant 0.434294492 : f32
    %13 = vector.broadcast %cst_10 : f32 to vector<32x16xf32>
    %14 = arith.mulf %12, %13 : vector<32x16xf32>
    %15 = vector.extract_strided_slice %14 {offsets = [0, 0], sizes = [16, 16], strides = [1, 1]} : vector<32x16xf32> to vector<16x16xf32>
    %16 = vector.shape_cast %15 : vector<16x16xf32> to vector<1x16x16xf32>
    %cst_11 = arith.constant dense<0xFF800000> : vector<1xf32>
    %17 = vector.multi_reduction <maximumf>, %16, %cst_11 [1, 2] : vector<1x16x16xf32> to vector<1xf32>
    %18 = vector.shape_cast %17 : vector<1xf32> to vector<1x1x1xf32>
    %19 = vector.extract %18[0, 0, 0] : f32 from vector<1x1x1xf32>
    %cst_12 = arith.constant 0.000000e+00 : f32
    %20 = vector.broadcast %cst_12 : f32 to vector<16x1xf32>
    %21 = vector.broadcast %19 : f32 to vector<16x1xf32>
    %22 = arith.addf %20, %21 : vector<16x1xf32>
    %23 = vector.extract_strided_slice %14 {offsets = [16, 0], sizes = [16, 16], strides = [1, 1]} : vector<32x16xf32> to vector<16x16xf32>
    %24 = vector.shape_cast %23 : vector<16x16xf32> to vector<1x16x16xf32>
    %cst_13 = arith.constant dense<0xFF800000> : vector<1xf32>
    %25 = vector.multi_reduction <maximumf>, %24, %cst_13 [1, 2] : vector<1x16x16xf32> to vector<1xf32>
    %26 = vector.shape_cast %25 : vector<1xf32> to vector<1x1x1xf32>
    %27 = vector.extract %26[0, 0, 0] : f32 from vector<1x1x1xf32>
    %cst_14 = arith.constant 0.000000e+00 : f32
    %28 = vector.broadcast %cst_14 : f32 to vector<16x1xf32>
    %29 = vector.broadcast %27 : f32 to vector<16x1xf32>
    %30 = arith.addf %28, %29 : vector<16x1xf32>
    %31 = tpu.concatenate %22, %30 in 0 : vector<16x1xf32>, vector<16x1xf32> -> vector<32x1xf32>
    %cst_15 = arith.constant 8.000000e+00 : f32
    %32 = vector.broadcast %cst_15 : f32 to vector<32x1xf32>
    %33 = arith.subf %31, %32 : vector<32x1xf32>
    %34 = vector.broadcast %33 : vector<32x1xf32> to vector<32x16xf32>
    %35 = arith.maximumf %14, %34 : vector<32x16xf32>
    %cst_16 = arith.constant 4.000000e+00 : f32
    %36 = vector.broadcast %cst_16 : f32 to vector<32x16xf32>
    %37 = arith.addf %35, %36 : vector<32x16xf32>
    %cst_17 = arith.constant 4.000000e+00 : f32
    %38 = vector.broadcast %cst_17 : f32 to vector<32x16xf32>
    %39 = arith.divf %37, %38 : vector<32x16xf32>
    %c0_18 = arith.constant 0 : index
    %c0_19 = arith.constant 0 : index
    %40 = vector.load %arg7[%c0_18, %c0_19] : memref<48x32xf32, #tpu.memory_space<vmem>>, vector<48x32xf32>
    %c0_20 = arith.constant 0 : index
    %c0_21 = arith.constant 0 : index
    %41 = vector.load %arg9[%c0_20, %c0_21] : memref<96x32xf32, #tpu.memory_space<vmem>>, vector<96x32xf32>
    %cst_22 = arith.constant 0.000000e+00 : f32
    %42 = vector.broadcast %cst_22 : f32 to vector<32x32xf32>
    %c0_23 = arith.constant 0 : index
    %c0_24 = arith.constant 0 : index
    %43 = vector.load %arg8[%c0_23, %c0_24] : memref<1x32xf32, #tpu.memory_space<vmem>>, vector<1x32xf32>
    %44 = vector.broadcast %43 : vector<1x32xf32> to vector<32x32xf32>
    %45 = arith.addf %42, %44 : vector<32x32xf32>
    %c0_25 = arith.constant 0 : index
    %c0_26 = arith.constant 0 : index
    %c0_27 = arith.constant 0 : index
    %46 = vector.load %arg5[%c0_25, %c0_26, %c0_27] : memref<3x32x32xf32, #tpu.memory_space<vmem>>, vector<1x32x32xf32>
    %47 = vector.shape_cast %46 : vector<1x32x32xf32> to vector<32x32xf32>
    %cst_28 = arith.constant dense<0.000000e+00> : vector<32x16xf32>
    %48 = tpu.matmul %47, %39, %cst_28 {dimension_numbers = #tpu.dot_dimension_numbers<[1], [0], [0], [1], [0, 0, 1, 1], [], []>} : vector<32x32xf32>, vector<32x16xf32>, vector<32x16xf32> -> vector<32x16xf32>
    %49 = vector.extract_strided_slice %40 {offsets = [0, 0], sizes = [16, 32], strides = [1, 1]} : vector<48x32xf32> to vector<16x32xf32>
    %cst_29 = arith.constant dense<0.000000e+00> : vector<32x32xf32>
    %50 = tpu.matmul %48, %49, %cst_29 {dimension_numbers = #tpu.dot_dimension_numbers<[1], [0], [0], [1], [0, 0, 1, 1], [], []>} : vector<32x16xf32>, vector<16x32xf32>, vector<32x32xf32> -> vector<32x32xf32>
    %51 = arith.addf %45, %50 : vector<32x32xf32>
    %c1 = arith.constant 1 : index
    %c0_30 = arith.constant 0 : index
    %c0_31 = arith.constant 0 : index
    %52 = vector.load %arg5[%c1, %c0_30, %c0_31] : memref<3x32x32xf32, #tpu.memory_space<vmem>>, vector<1x32x32xf32>
    %53 = vector.shape_cast %52 : vector<1x32x32xf32> to vector<32x32xf32>
    %cst_32 = arith.constant dense<0.000000e+00> : vector<32x16xf32>
    %54 = tpu.matmul %53, %39, %cst_32 {dimension_numbers = #tpu.dot_dimension_numbers<[1], [0], [0], [1], [0, 0, 1, 1], [], []>} : vector<32x32xf32>, vector<32x16xf32>, vector<32x16xf32> -> vector<32x16xf32>
    %55 = vector.extract_strided_slice %40 {offsets = [16, 0], sizes = [16, 32], strides = [1, 1]} : vector<48x32xf32> to vector<16x32xf32>
    %cst_33 = arith.constant dense<0.000000e+00> : vector<32x32xf32>
    %56 = tpu.matmul %54, %55, %cst_33 {dimension_numbers = #tpu.dot_dimension_numbers<[1], [0], [0], [1], [0, 0, 1, 1], [], []>} : vector<32x16xf32>, vector<16x32xf32>, vector<32x32xf32> -> vector<32x32xf32>
    %57 = arith.addf %51, %56 : vector<32x32xf32>
    %c2 = arith.constant 2 : index
    %c0_34 = arith.constant 0 : index
    %c0_35 = arith.constant 0 : index
    %58 = vector.load %arg5[%c2, %c0_34, %c0_35] : memref<3x32x32xf32, #tpu.memory_space<vmem>>, vector<1x32x32xf32>
    %59 = vector.shape_cast %58 : vector<1x32x32xf32> to vector<32x32xf32>
    %cst_36 = arith.constant dense<0.000000e+00> : vector<32x16xf32>
    %60 = tpu.matmul %59, %39, %cst_36 {dimension_numbers = #tpu.dot_dimension_numbers<[1], [0], [0], [1], [0, 0, 1, 1], [], []>} : vector<32x32xf32>, vector<32x16xf32>, vector<32x16xf32> -> vector<32x16xf32>
    %61 = vector.extract_strided_slice %40 {offsets = [32, 0], sizes = [16, 32], strides = [1, 1]} : vector<48x32xf32> to vector<16x32xf32>
    %cst_37 = arith.constant dense<0.000000e+00> : vector<32x32xf32>
    %62 = tpu.matmul %60, %61, %cst_37 {dimension_numbers = #tpu.dot_dimension_numbers<[1], [0], [0], [1], [0, 0, 1, 1], [], []>} : vector<32x16xf32>, vector<16x32xf32>, vector<32x32xf32> -> vector<32x32xf32>
    %63 = arith.addf %57, %62 : vector<32x32xf32>
    %64 = arith.mulf %63, %63 : vector<32x32xf32>
    %65 = arith.mulf %63, %64 : vector<32x32xf32>
    %cst_38 = arith.constant 4.471500e-02 : f32
    %66 = vector.broadcast %cst_38 : f32 to vector<32x32xf32>
    %67 = arith.mulf %66, %65 : vector<32x32xf32>
    %68 = arith.addf %63, %67 : vector<32x32xf32>
    %cst_39 = arith.constant 0.797884583 : f32
    %69 = vector.broadcast %cst_39 : f32 to vector<32x32xf32>
    %70 = arith.mulf %69, %68 : vector<32x32xf32>
    %71 = math.tanh %70 : vector<32x32xf32>
    %cst_40 = arith.constant 1.000000e+00 : f32
    %72 = vector.broadcast %cst_40 : f32 to vector<32x32xf32>
    %73 = arith.addf %72, %71 : vector<32x32xf32>
    %cst_41 = arith.constant 5.000000e-01 : f32
    %74 = vector.broadcast %cst_41 : f32 to vector<32x32xf32>
    %75 = arith.mulf %74, %73 : vector<32x32xf32>
    %76 = arith.mulf %63, %75 : vector<32x32xf32>
    %cst_42 = arith.constant 0.000000e+00 : f32
    %77 = vector.broadcast %cst_42 : f32 to vector<16x32xf32>
    %c0_43 = arith.constant 0 : index
    %c0_44 = arith.constant 0 : index
    %78 = vector.load %arg10[%c0_43, %c0_44] : memref<1x32xf32, #tpu.memory_space<vmem>>, vector<1x32xf32>
    %79 = vector.broadcast %78 : vector<1x32xf32> to vector<16x32xf32>
    %80 = arith.addf %77, %79 : vector<16x32xf32>
    %c0_45 = arith.constant 0 : index
    %c0_46 = arith.constant 0 : index
    %c0_47 = arith.constant 0 : index
    %81 = vector.load %arg6[%c0_45, %c0_46, %c0_47] : memref<3x16x32xf32, #tpu.memory_space<vmem>>, vector<1x16x32xf32>
    %82 = vector.shape_cast %81 : vector<1x16x32xf32> to vector<16x32xf32>
    %cst_48 = arith.constant dense<0.000000e+00> : vector<16x32xf32>
    %83 = tpu.matmul %82, %76, %cst_48 {dimension_numbers = #tpu.dot_dimension_numbers<[1], [0], [0], [1], [0, 0, 1, 1], [], []>} : vector<16x32xf32>, vector<32x32xf32>, vector<16x32xf32> -> vector<16x32xf32>
    %84 = vector.extract_strided_slice %41 {offsets = [0, 0], sizes = [32, 32], strides = [1, 1]} : vector<96x32xf32> to vector<32x32xf32>
    %cst_49 = arith.constant dense<0.000000e+00> : vector<16x32xf32>
    %85 = tpu.matmul %83, %84, %cst_49 {dimension_numbers = #tpu.dot_dimension_numbers<[1], [0], [0], [1], [0, 0, 1, 1], [], []>} : vector<16x32xf32>, vector<32x32xf32>, vector<16x32xf32> -> vector<16x32xf32>
    %86 = arith.addf %80, %85 : vector<16x32xf32>
    %c1_50 = arith.constant 1 : index
    %c0_51 = arith.constant 0 : index
    %c0_52 = arith.constant 0 : index
    %87 = vector.load %arg6[%c1_50, %c0_51, %c0_52] : memref<3x16x32xf32, #tpu.memory_space<vmem>>, vector<1x16x32xf32>
    %88 = vector.shape_cast %87 : vector<1x16x32xf32> to vector<16x32xf32>
    %cst_53 = arith.constant dense<0.000000e+00> : vector<16x32xf32>
    %89 = tpu.matmul %88, %76, %cst_53 {dimension_numbers = #tpu.dot_dimension_numbers<[1], [0], [0], [1], [0, 0, 1, 1], [], []>} : vector<16x32xf32>, vector<32x32xf32>, vector<16x32xf32> -> vector<16x32xf32>
    %90 = vector.extract_strided_slice %41 {offsets = [32, 0], sizes = [32, 32], strides = [1, 1]} : vector<96x32xf32> to vector<32x32xf32>
    %cst_54 = arith.constant dense<0.000000e+00> : vector<16x32xf32>
    %91 = tpu.matmul %89, %90, %cst_54 {dimension_numbers = #tpu.dot_dimension_numbers<[1], [0], [0], [1], [0, 0, 1, 1], [], []>} : vector<16x32xf32>, vector<32x32xf32>, vector<16x32xf32> -> vector<16x32xf32>
    %92 = arith.addf %86, %91 : vector<16x32xf32>
    %c2_55 = arith.constant 2 : index
    %c0_56 = arith.constant 0 : index
    %c0_57 = arith.constant 0 : index
    %93 = vector.load %arg6[%c2_55, %c0_56, %c0_57] : memref<3x16x32xf32, #tpu.memory_space<vmem>>, vector<1x16x32xf32>
    %94 = vector.shape_cast %93 : vector<1x16x32xf32> to vector<16x32xf32>
    %cst_58 = arith.constant dense<0.000000e+00> : vector<16x32xf32>
    %95 = tpu.matmul %94, %76, %cst_58 {dimension_numbers = #tpu.dot_dimension_numbers<[1], [0], [0], [1], [0, 0, 1, 1], [], []>} : vector<16x32xf32>, vector<32x32xf32>, vector<16x32xf32> -> vector<16x32xf32>
    %96 = vector.extract_strided_slice %41 {offsets = [64, 0], sizes = [32, 32], strides = [1, 1]} : vector<96x32xf32> to vector<32x32xf32>
    %cst_59 = arith.constant dense<0.000000e+00> : vector<16x32xf32>
    %97 = tpu.matmul %95, %96, %cst_59 {dimension_numbers = #tpu.dot_dimension_numbers<[1], [0], [0], [1], [0, 0, 1, 1], [], []>} : vector<16x32xf32>, vector<32x32xf32>, vector<16x32xf32> -> vector<16x32xf32>
    %98 = arith.addf %92, %97 : vector<16x32xf32>
    %99 = arith.mulf %98, %98 : vector<16x32xf32>
    %100 = arith.mulf %98, %99 : vector<16x32xf32>
    %cst_60 = arith.constant 4.471500e-02 : f32
    %101 = vector.broadcast %cst_60 : f32 to vector<16x32xf32>
    %102 = arith.mulf %101, %100 : vector<16x32xf32>
    %103 = arith.addf %98, %102 : vector<16x32xf32>
    %cst_61 = arith.constant 0.797884583 : f32
    %104 = vector.broadcast %cst_61 : f32 to vector<16x32xf32>
    %105 = arith.mulf %104, %103 : vector<16x32xf32>
    %106 = math.tanh %105 : vector<16x32xf32>
    %cst_62 = arith.constant 1.000000e+00 : f32
    %107 = vector.broadcast %cst_62 : f32 to vector<16x32xf32>
    %108 = arith.addf %107, %106 : vector<16x32xf32>
    %cst_63 = arith.constant 5.000000e-01 : f32
    %109 = vector.broadcast %cst_63 : f32 to vector<16x32xf32>
    %110 = arith.mulf %109, %108 : vector<16x32xf32>
    %111 = arith.mulf %98, %110 : vector<16x32xf32>
    %c0_64 = arith.constant 0 : index
    %c0_65 = arith.constant 0 : index
    %112 = vector.load %arg11[%c0_64, %c0_65] : memref<16x32xf32, #tpu.memory_space<vmem>>, vector<16x32xf32>
    %113 = arith.addf %111, %112 : vector<16x32xf32>
    %c0_66 = arith.constant 0 : index
    %c0_67 = arith.constant 0 : index
    %114 = vector.load %arg12[%c0_66, %c0_67] : memref<16x16xf32, #tpu.memory_space<vmem>>, vector<16x16xf32>
    %c0_68 = arith.constant 0 : index
    %c0_69 = arith.constant 0 : index
    %c0_70 = arith.constant 0 : index
    %115 = vector.load %arg13[%c0_68, %c0_69, %c0_70] : memref<2x1x32xf32, #tpu.memory_space<vmem>>, vector<1x1x32xf32>
    %116 = vector.shape_cast %115 : vector<1x1x32xf32> to vector<1x32xf32>
    %c0_71 = arith.constant 0 : index
    %c0_72 = arith.constant 0 : index
    %c0_73 = arith.constant 0 : index
    %117 = vector.load %arg14[%c0_71, %c0_72, %c0_73] : memref<2x1x32xf32, #tpu.memory_space<vmem>>, vector<1x1x32xf32>
    %118 = vector.shape_cast %117 : vector<1x1x32xf32> to vector<1x32xf32>
    %cst_74 = arith.constant dense<0.000000e+00> : vector<16xf32>
    %119 = vector.multi_reduction <add>, %113, %cst_74 [1] : vector<16x32xf32> to vector<16xf32>
    %120 = vector.shape_cast %119 : vector<16xf32> to vector<16x1xf32>
    %cst_75 = arith.constant 3.200000e+01 : f32
    %121 = vector.broadcast %cst_75 : f32 to vector<16x1xf32>
    %122 = arith.divf %120, %121 : vector<16x1xf32>
    %123 = vector.broadcast %122 : vector<16x1xf32> to vector<16x32xf32>
    %124 = arith.subf %113, %123 : vector<16x32xf32>
    %125 = arith.mulf %124, %124 : vector<16x32xf32>
    %cst_76 = arith.constant dense<0.000000e+00> : vector<16xf32>
    %126 = vector.multi_reduction <add>, %125, %cst_76 [1] : vector<16x32xf32> to vector<16xf32>
    %127 = vector.shape_cast %126 : vector<16xf32> to vector<16x1xf32>
    %cst_77 = arith.constant 3.200000e+01 : f32
    %128 = vector.broadcast %cst_77 : f32 to vector<16x1xf32>
    %129 = arith.divf %127, %128 : vector<16x1xf32>
    %130 = vector.broadcast %122 : vector<16x1xf32> to vector<16x32xf32>
    %131 = arith.subf %113, %130 : vector<16x32xf32>
    %cst_78 = arith.constant 9.99999974E-6 : f32
    %132 = vector.broadcast %cst_78 : f32 to vector<16x1xf32>
    %133 = arith.addf %129, %132 : vector<16x1xf32>
    %134 = math.rsqrt %133 : vector<16x1xf32>
    %135 = vector.broadcast %134 : vector<16x1xf32> to vector<16x32xf32>
    %136 = arith.mulf %131, %135 : vector<16x32xf32>
    %137 = vector.broadcast %116 : vector<1x32xf32> to vector<16x32xf32>
    %138 = arith.mulf %136, %137 : vector<16x32xf32>
    %139 = vector.broadcast %118 : vector<1x32xf32> to vector<16x32xf32>
    %140 = arith.addf %138, %139 : vector<16x32xf32>
    %c0_79 = arith.constant 0 : index
    %c0_80 = arith.constant 0 : index
    %c0_81 = arith.constant 0 : index
    %141 = vector.load %arg15[%c0_79, %c0_80, %c0_81] : memref<2x32x96xf32, #tpu.memory_space<vmem>>, vector<1x32x96xf32>
    %142 = vector.shape_cast %141 : vector<1x32x96xf32> to vector<32x96xf32>
    %cst_82 = arith.constant dense<0.000000e+00> : vector<16x96xf32>
    %143 = tpu.matmul %140, %142, %cst_82 {dimension_numbers = #tpu.dot_dimension_numbers<[1], [0], [0], [1], [0, 0, 1, 1], [], []>} : vector<16x32xf32>, vector<32x96xf32>, vector<16x96xf32> -> vector<16x96xf32>
    %c0_83 = arith.constant 0 : index
    %c0_84 = arith.constant 0 : index
    %c0_85 = arith.constant 0 : index
    %144 = vector.load %arg16[%c0_83, %c0_84, %c0_85] : memref<2x1x96xf32, #tpu.memory_space<vmem>>, vector<1x1x96xf32>
    %145 = vector.shape_cast %144 : vector<1x1x96xf32> to vector<1x96xf32>
    %146 = vector.broadcast %145 : vector<1x96xf32> to vector<16x96xf32>
    %147 = arith.addf %143, %146 : vector<16x96xf32>
    %148 = vector.extract_strided_slice %147 {offsets = [0, 0], sizes = [16, 32], strides = [1, 1]} : vector<16x96xf32> to vector<16x32xf32>
    %149 = vector.extract_strided_slice %147 {offsets = [0, 32], sizes = [16, 32], strides = [1, 1]} : vector<16x96xf32> to vector<16x32xf32>
    %150 = vector.extract_strided_slice %147 {offsets = [0, 64], sizes = [16, 32], strides = [1, 1]} : vector<16x96xf32> to vector<16x32xf32>
    %151 = vector.extract_strided_slice %148 {offsets = [0, 0], sizes = [16, 8], strides = [1, 1]} : vector<16x32xf32> to vector<16x8xf32>
    %152 = vector.extract_strided_slice %149 {offsets = [0, 0], sizes = [16, 8], strides = [1, 1]} : vector<16x32xf32> to vector<16x8xf32>
    %153 = vector.extract_strided_slice %150 {offsets = [0, 0], sizes = [16, 8], strides = [1, 1]} : vector<16x32xf32> to vector<16x8xf32>
    %cst_86 = arith.constant dense<0.000000e+00> : vector<16x16xf32>
    %154 = tpu.matmul %151, %152, %cst_86 {dimension_numbers = #tpu.dot_dimension_numbers<[1], [1], [0], [0], [0, 0, 1, 0], [], []>} : vector<16x8xf32>, vector<16x8xf32>, vector<16x16xf32> -> vector<16x16xf32>
    %cst_87 = arith.constant 0.353553385 : f32
    %155 = vector.broadcast %cst_87 : f32 to vector<16x16xf32>
    %156 = arith.mulf %154, %155 : vector<16x16xf32>
    %157 = arith.addf %156, %114 : vector<16x16xf32>
    %cst_88 = arith.constant dense<0xFF800000> : vector<16xf32>
    %158 = vector.multi_reduction <maximumf>, %157, %cst_88 [1] : vector<16x16xf32> to vector<16xf32>
    %159 = vector.shape_cast %158 : vector<16xf32> to vector<16x1xf32>
    %160 = vector.broadcast %159 : vector<16x1xf32> to vector<16x16xf32>
    %161 = arith.subf %157, %160 : vector<16x16xf32>
    %162 = math.exp %161 : vector<16x16xf32>
    %cst_89 = arith.constant dense<0.000000e+00> : vector<16xf32>
    %163 = vector.multi_reduction <add>, %162, %cst_89 [1] : vector<16x16xf32> to vector<16xf32>
    %164 = vector.shape_cast %163 : vector<16xf32> to vector<16x1xf32>
    %165 = vector.broadcast %164 : vector<16x1xf32> to vector<16x16xf32>
    %166 = arith.divf %162, %165 : vector<16x16xf32>
    %cst_90 = arith.constant dense<0.000000e+00> : vector<16x8xf32>
    %167 = tpu.matmul %166, %153, %cst_90 {dimension_numbers = #tpu.dot_dimension_numbers<[1], [0], [0], [1], [0, 0, 1, 1], [], []>} : vector<16x16xf32>, vector<16x8xf32>, vector<16x8xf32> -> vector<16x8xf32>
    %168 = vector.extract_strided_slice %148 {offsets = [0, 8], sizes = [16, 8], strides = [1, 1]} : vector<16x32xf32> to vector<16x8xf32>
    %169 = vector.extract_strided_slice %149 {offsets = [0, 8], sizes = [16, 8], strides = [1, 1]} : vector<16x32xf32> to vector<16x8xf32>
    %170 = vector.extract_strided_slice %150 {offsets = [0, 8], sizes = [16, 8], strides = [1, 1]} : vector<16x32xf32> to vector<16x8xf32>
    %cst_91 = arith.constant dense<0.000000e+00> : vector<16x16xf32>
    %171 = tpu.matmul %168, %169, %cst_91 {dimension_numbers = #tpu.dot_dimension_numbers<[1], [1], [0], [0], [0, 0, 1, 0], [], []>} : vector<16x8xf32>, vector<16x8xf32>, vector<16x16xf32> -> vector<16x16xf32>
    %cst_92 = arith.constant 0.353553385 : f32
    %172 = vector.broadcast %cst_92 : f32 to vector<16x16xf32>
    %173 = arith.mulf %171, %172 : vector<16x16xf32>
    %174 = arith.addf %173, %114 : vector<16x16xf32>
    %cst_93 = arith.constant dense<0xFF800000> : vector<16xf32>
    %175 = vector.multi_reduction <maximumf>, %174, %cst_93 [1] : vector<16x16xf32> to vector<16xf32>
    %176 = vector.shape_cast %175 : vector<16xf32> to vector<16x1xf32>
    %177 = vector.broadcast %176 : vector<16x1xf32> to vector<16x16xf32>
    %178 = arith.subf %174, %177 : vector<16x16xf32>
    %179 = math.exp %178 : vector<16x16xf32>
    %cst_94 = arith.constant dense<0.000000e+00> : vector<16xf32>
    %180 = vector.multi_reduction <add>, %179, %cst_94 [1] : vector<16x16xf32> to vector<16xf32>
    %181 = vector.shape_cast %180 : vector<16xf32> to vector<16x1xf32>
    %182 = vector.broadcast %181 : vector<16x1xf32> to vector<16x16xf32>
    %183 = arith.divf %179, %182 : vector<16x16xf32>
    %cst_95 = arith.constant dense<0.000000e+00> : vector<16x8xf32>
    %184 = tpu.matmul %183, %170, %cst_95 {dimension_numbers = #tpu.dot_dimension_numbers<[1], [0], [0], [1], [0, 0, 1, 1], [], []>} : vector<16x16xf32>, vector<16x8xf32>, vector<16x8xf32> -> vector<16x8xf32>
    %185 = vector.extract_strided_slice %148 {offsets = [0, 16], sizes = [16, 8], strides = [1, 1]} : vector<16x32xf32> to vector<16x8xf32>
    %186 = vector.extract_strided_slice %149 {offsets = [0, 16], sizes = [16, 8], strides = [1, 1]} : vector<16x32xf32> to vector<16x8xf32>
    %187 = vector.extract_strided_slice %150 {offsets = [0, 16], sizes = [16, 8], strides = [1, 1]} : vector<16x32xf32> to vector<16x8xf32>
    %cst_96 = arith.constant dense<0.000000e+00> : vector<16x16xf32>
    %188 = tpu.matmul %185, %186, %cst_96 {dimension_numbers = #tpu.dot_dimension_numbers<[1], [1], [0], [0], [0, 0, 1, 0], [], []>} : vector<16x8xf32>, vector<16x8xf32>, vector<16x16xf32> -> vector<16x16xf32>
    %cst_97 = arith.constant 0.353553385 : f32
    %189 = vector.broadcast %cst_97 : f32 to vector<16x16xf32>
    %190 = arith.mulf %188, %189 : vector<16x16xf32>
    %191 = arith.addf %190, %114 : vector<16x16xf32>
    %cst_98 = arith.constant dense<0xFF800000> : vector<16xf32>
    %192 = vector.multi_reduction <maximumf>, %191, %cst_98 [1] : vector<16x16xf32> to vector<16xf32>
    %193 = vector.shape_cast %192 : vector<16xf32> to vector<16x1xf32>
    %194 = vector.broadcast %193 : vector<16x1xf32> to vector<16x16xf32>
    %195 = arith.subf %191, %194 : vector<16x16xf32>
    %196 = math.exp %195 : vector<16x16xf32>
    %cst_99 = arith.constant dense<0.000000e+00> : vector<16xf32>
    %197 = vector.multi_reduction <add>, %196, %cst_99 [1] : vector<16x16xf32> to vector<16xf32>
    %198 = vector.shape_cast %197 : vector<16xf32> to vector<16x1xf32>
    %199 = vector.broadcast %198 : vector<16x1xf32> to vector<16x16xf32>
    %200 = arith.divf %196, %199 : vector<16x16xf32>
    %cst_100 = arith.constant dense<0.000000e+00> : vector<16x8xf32>
    %201 = tpu.matmul %200, %187, %cst_100 {dimension_numbers = #tpu.dot_dimension_numbers<[1], [0], [0], [1], [0, 0, 1, 1], [], []>} : vector<16x16xf32>, vector<16x8xf32>, vector<16x8xf32> -> vector<16x8xf32>
    %202 = vector.extract_strided_slice %148 {offsets = [0, 24], sizes = [16, 8], strides = [1, 1]} : vector<16x32xf32> to vector<16x8xf32>
    %203 = vector.extract_strided_slice %149 {offsets = [0, 24], sizes = [16, 8], strides = [1, 1]} : vector<16x32xf32> to vector<16x8xf32>
    %204 = vector.extract_strided_slice %150 {offsets = [0, 24], sizes = [16, 8], strides = [1, 1]} : vector<16x32xf32> to vector<16x8xf32>
    %cst_101 = arith.constant dense<0.000000e+00> : vector<16x16xf32>
    %205 = tpu.matmul %202, %203, %cst_101 {dimension_numbers = #tpu.dot_dimension_numbers<[1], [1], [0], [0], [0, 0, 1, 0], [], []>} : vector<16x8xf32>, vector<16x8xf32>, vector<16x16xf32> -> vector<16x16xf32>
    %cst_102 = arith.constant 0.353553385 : f32
    %206 = vector.broadcast %cst_102 : f32 to vector<16x16xf32>
    %207 = arith.mulf %205, %206 : vector<16x16xf32>
    %208 = arith.addf %207, %114 : vector<16x16xf32>
    %cst_103 = arith.constant dense<0xFF800000> : vector<16xf32>
    %209 = vector.multi_reduction <maximumf>, %208, %cst_103 [1] : vector<16x16xf32> to vector<16xf32>
    %210 = vector.shape_cast %209 : vector<16xf32> to vector<16x1xf32>
    %211 = vector.broadcast %210 : vector<16x1xf32> to vector<16x16xf32>
    %212 = arith.subf %208, %211 : vector<16x16xf32>
    %213 = math.exp %212 : vector<16x16xf32>
    %cst_104 = arith.constant dense<0.000000e+00> : vector<16xf32>
    %214 = vector.multi_reduction <add>, %213, %cst_104 [1] : vector<16x16xf32> to vector<16xf32>
    %215 = vector.shape_cast %214 : vector<16xf32> to vector<16x1xf32>
    %216 = vector.broadcast %215 : vector<16x1xf32> to vector<16x16xf32>
    %217 = arith.divf %213, %216 : vector<16x16xf32>
    %cst_105 = arith.constant dense<0.000000e+00> : vector<16x8xf32>
    %218 = tpu.matmul %217, %204, %cst_105 {dimension_numbers = #tpu.dot_dimension_numbers<[1], [0], [0], [1], [0, 0, 1, 1], [], []>} : vector<16x16xf32>, vector<16x8xf32>, vector<16x8xf32> -> vector<16x8xf32>
    %219 = tpu.concatenate %167, %184, %201, %218 in 1 : vector<16x8xf32>, vector<16x8xf32>, vector<16x8xf32>, vector<16x8xf32> -> vector<16x32xf32>
    %c0_106 = arith.constant 0 : index
    %c0_107 = arith.constant 0 : index
    %c0_108 = arith.constant 0 : index
    %220 = vector.load %arg17[%c0_106, %c0_107, %c0_108] : memref<2x32x32xf32, #tpu.memory_space<vmem>>, vector<1x32x32xf32>
    %221 = vector.shape_cast %220 : vector<1x32x32xf32> to vector<32x32xf32>
    %cst_109 = arith.constant dense<0.000000e+00> : vector<16x32xf32>
    %222 = tpu.matmul %219, %221, %cst_109 {dimension_numbers = #tpu.dot_dimension_numbers<[1], [0], [0], [1], [0, 0, 1, 1], [], []>} : vector<16x32xf32>, vector<32x32xf32>, vector<16x32xf32> -> vector<16x32xf32>
    %223 = arith.addf %113, %222 : vector<16x32xf32>
    %c0_110 = arith.constant 0 : index
    %c0_111 = arith.constant 0 : index
    %c0_112 = arith.constant 0 : index
    %224 = vector.load %arg18[%c0_110, %c0_111, %c0_112] : memref<2x1x32xf32, #tpu.memory_space<vmem>>, vector<1x1x32xf32>
    %225 = vector.shape_cast %224 : vector<1x1x32xf32> to vector<1x32xf32>
    %226 = vector.broadcast %225 : vector<1x32xf32> to vector<16x32xf32>
    %227 = arith.addf %223, %226 : vector<16x32xf32>
    %c0_113 = arith.constant 0 : index
    %c0_114 = arith.constant 0 : index
    %c0_115 = arith.constant 0 : index
    %228 = vector.load %arg19[%c0_113, %c0_114, %c0_115] : memref<2x1x32xf32, #tpu.memory_space<vmem>>, vector<1x1x32xf32>
    %229 = vector.shape_cast %228 : vector<1x1x32xf32> to vector<1x32xf32>
    %c0_116 = arith.constant 0 : index
    %c0_117 = arith.constant 0 : index
    %c0_118 = arith.constant 0 : index
    %230 = vector.load %arg20[%c0_116, %c0_117, %c0_118] : memref<2x1x32xf32, #tpu.memory_space<vmem>>, vector<1x1x32xf32>
    %231 = vector.shape_cast %230 : vector<1x1x32xf32> to vector<1x32xf32>
    %cst_119 = arith.constant dense<0.000000e+00> : vector<16xf32>
    %232 = vector.multi_reduction <add>, %227, %cst_119 [1] : vector<16x32xf32> to vector<16xf32>
    %233 = vector.shape_cast %232 : vector<16xf32> to vector<16x1xf32>
    %cst_120 = arith.constant 3.200000e+01 : f32
    %234 = vector.broadcast %cst_120 : f32 to vector<16x1xf32>
    %235 = arith.divf %233, %234 : vector<16x1xf32>
    %236 = vector.broadcast %235 : vector<16x1xf32> to vector<16x32xf32>
    %237 = arith.subf %227, %236 : vector<16x32xf32>
    %238 = arith.mulf %237, %237 : vector<16x32xf32>
    %cst_121 = arith.constant dense<0.000000e+00> : vector<16xf32>
    %239 = vector.multi_reduction <add>, %238, %cst_121 [1] : vector<16x32xf32> to vector<16xf32>
    %240 = vector.shape_cast %239 : vector<16xf32> to vector<16x1xf32>
    %cst_122 = arith.constant 3.200000e+01 : f32
    %241 = vector.broadcast %cst_122 : f32 to vector<16x1xf32>
    %242 = arith.divf %240, %241 : vector<16x1xf32>
    %243 = vector.broadcast %235 : vector<16x1xf32> to vector<16x32xf32>
    %244 = arith.subf %227, %243 : vector<16x32xf32>
    %cst_123 = arith.constant 9.99999974E-6 : f32
    %245 = vector.broadcast %cst_123 : f32 to vector<16x1xf32>
    %246 = arith.addf %242, %245 : vector<16x1xf32>
    %247 = math.rsqrt %246 : vector<16x1xf32>
    %248 = vector.broadcast %247 : vector<16x1xf32> to vector<16x32xf32>
    %249 = arith.mulf %244, %248 : vector<16x32xf32>
    %250 = vector.broadcast %229 : vector<1x32xf32> to vector<16x32xf32>
    %251 = arith.mulf %249, %250 : vector<16x32xf32>
    %252 = vector.broadcast %231 : vector<1x32xf32> to vector<16x32xf32>
    %253 = arith.addf %251, %252 : vector<16x32xf32>
    %c0_124 = arith.constant 0 : index
    %c0_125 = arith.constant 0 : index
    %c0_126 = arith.constant 0 : index
    %254 = vector.load %arg21[%c0_124, %c0_125, %c0_126] : memref<2x32x64xf32, #tpu.memory_space<vmem>>, vector<1x32x64xf32>
    %255 = vector.shape_cast %254 : vector<1x32x64xf32> to vector<32x64xf32>
    %cst_127 = arith.constant dense<0.000000e+00> : vector<16x64xf32>
    %256 = tpu.matmul %253, %255, %cst_127 {dimension_numbers = #tpu.dot_dimension_numbers<[1], [0], [0], [1], [0, 0, 1, 1], [], []>} : vector<16x32xf32>, vector<32x64xf32>, vector<16x64xf32> -> vector<16x64xf32>
    %c0_128 = arith.constant 0 : index
    %c0_129 = arith.constant 0 : index
    %c0_130 = arith.constant 0 : index
    %257 = vector.load %arg22[%c0_128, %c0_129, %c0_130] : memref<2x1x64xf32, #tpu.memory_space<vmem>>, vector<1x1x64xf32>
    %258 = vector.shape_cast %257 : vector<1x1x64xf32> to vector<1x64xf32>
    %259 = vector.broadcast %258 : vector<1x64xf32> to vector<16x64xf32>
    %260 = arith.addf %256, %259 : vector<16x64xf32>
    %261 = arith.mulf %260, %260 : vector<16x64xf32>
    %262 = arith.mulf %260, %261 : vector<16x64xf32>
    %cst_131 = arith.constant 4.471500e-02 : f32
    %263 = vector.broadcast %cst_131 : f32 to vector<16x64xf32>
    %264 = arith.mulf %263, %262 : vector<16x64xf32>
    %265 = arith.addf %260, %264 : vector<16x64xf32>
    %cst_132 = arith.constant 0.797884583 : f32
    %266 = vector.broadcast %cst_132 : f32 to vector<16x64xf32>
    %267 = arith.mulf %266, %265 : vector<16x64xf32>
    %268 = math.tanh %267 : vector<16x64xf32>
    %cst_133 = arith.constant 1.000000e+00 : f32
    %269 = vector.broadcast %cst_133 : f32 to vector<16x64xf32>
    %270 = arith.addf %269, %268 : vector<16x64xf32>
    %cst_134 = arith.constant 5.000000e-01 : f32
    %271 = vector.broadcast %cst_134 : f32 to vector<16x64xf32>
    %272 = arith.mulf %271, %270 : vector<16x64xf32>
    %273 = arith.mulf %260, %272 : vector<16x64xf32>
    %c0_135 = arith.constant 0 : index
    %c0_136 = arith.constant 0 : index
    %c0_137 = arith.constant 0 : index
    %274 = vector.load %arg23[%c0_135, %c0_136, %c0_137] : memref<2x64x32xf32, #tpu.memory_space<vmem>>, vector<1x64x32xf32>
    %275 = vector.shape_cast %274 : vector<1x64x32xf32> to vector<64x32xf32>
    %cst_138 = arith.constant dense<0.000000e+00> : vector<16x32xf32>
    %276 = tpu.matmul %273, %275, %cst_138 {dimension_numbers = #tpu.dot_dimension_numbers<[1], [0], [0], [1], [0, 0, 1, 1], [], []>} : vector<16x64xf32>, vector<64x32xf32>, vector<16x32xf32> -> vector<16x32xf32>
    %277 = arith.addf %227, %276 : vector<16x32xf32>
    %c0_139 = arith.constant 0 : index
    %c0_140 = arith.constant 0 : index
    %c0_141 = arith.constant 0 : index
    %278 = vector.load %arg24[%c0_139, %c0_140, %c0_141] : memref<2x1x32xf32, #tpu.memory_space<vmem>>, vector<1x1x32xf32>
    %279 = vector.shape_cast %278 : vector<1x1x32xf32> to vector<1x32xf32>
    %280 = vector.broadcast %279 : vector<1x32xf32> to vector<16x32xf32>
    %281 = arith.addf %277, %280 : vector<16x32xf32>
    %c1_142 = arith.constant 1 : index
    %c0_143 = arith.constant 0 : index
    %c0_144 = arith.constant 0 : index
    %282 = vector.load %arg13[%c1_142, %c0_143, %c0_144] : memref<2x1x32xf32, #tpu.memory_space<vmem>>, vector<1x1x32xf32>
    %283 = vector.shape_cast %282 : vector<1x1x32xf32> to vector<1x32xf32>
    %c1_145 = arith.constant 1 : index
    %c0_146 = arith.constant 0 : index
    %c0_147 = arith.constant 0 : index
    %284 = vector.load %arg14[%c1_145, %c0_146, %c0_147] : memref<2x1x32xf32, #tpu.memory_space<vmem>>, vector<1x1x32xf32>
    %285 = vector.shape_cast %284 : vector<1x1x32xf32> to vector<1x32xf32>
    %cst_148 = arith.constant dense<0.000000e+00> : vector<16xf32>
    %286 = vector.multi_reduction <add>, %281, %cst_148 [1] : vector<16x32xf32> to vector<16xf32>
    %287 = vector.shape_cast %286 : vector<16xf32> to vector<16x1xf32>
    %cst_149 = arith.constant 3.200000e+01 : f32
    %288 = vector.broadcast %cst_149 : f32 to vector<16x1xf32>
    %289 = arith.divf %287, %288 : vector<16x1xf32>
    %290 = vector.broadcast %289 : vector<16x1xf32> to vector<16x32xf32>
    %291 = arith.subf %281, %290 : vector<16x32xf32>
    %292 = arith.mulf %291, %291 : vector<16x32xf32>
    %cst_150 = arith.constant dense<0.000000e+00> : vector<16xf32>
    %293 = vector.multi_reduction <add>, %292, %cst_150 [1] : vector<16x32xf32> to vector<16xf32>
    %294 = vector.shape_cast %293 : vector<16xf32> to vector<16x1xf32>
    %cst_151 = arith.constant 3.200000e+01 : f32
    %295 = vector.broadcast %cst_151 : f32 to vector<16x1xf32>
    %296 = arith.divf %294, %295 : vector<16x1xf32>
    %297 = vector.broadcast %289 : vector<16x1xf32> to vector<16x32xf32>
    %298 = arith.subf %281, %297 : vector<16x32xf32>
    %cst_152 = arith.constant 9.99999974E-6 : f32
    %299 = vector.broadcast %cst_152 : f32 to vector<16x1xf32>
    %300 = arith.addf %296, %299 : vector<16x1xf32>
    %301 = math.rsqrt %300 : vector<16x1xf32>
    %302 = vector.broadcast %301 : vector<16x1xf32> to vector<16x32xf32>
    %303 = arith.mulf %298, %302 : vector<16x32xf32>
    %304 = vector.broadcast %283 : vector<1x32xf32> to vector<16x32xf32>
    %305 = arith.mulf %303, %304 : vector<16x32xf32>
    %306 = vector.broadcast %285 : vector<1x32xf32> to vector<16x32xf32>
    %307 = arith.addf %305, %306 : vector<16x32xf32>
    %c1_153 = arith.constant 1 : index
    %c0_154 = arith.constant 0 : index
    %c0_155 = arith.constant 0 : index
    %308 = vector.load %arg15[%c1_153, %c0_154, %c0_155] : memref<2x32x96xf32, #tpu.memory_space<vmem>>, vector<1x32x96xf32>
    %309 = vector.shape_cast %308 : vector<1x32x96xf32> to vector<32x96xf32>
    %cst_156 = arith.constant dense<0.000000e+00> : vector<16x96xf32>
    %310 = tpu.matmul %307, %309, %cst_156 {dimension_numbers = #tpu.dot_dimension_numbers<[1], [0], [0], [1], [0, 0, 1, 1], [], []>} : vector<16x32xf32>, vector<32x96xf32>, vector<16x96xf32> -> vector<16x96xf32>
    %c1_157 = arith.constant 1 : index
    %c0_158 = arith.constant 0 : index
    %c0_159 = arith.constant 0 : index
    %311 = vector.load %arg16[%c1_157, %c0_158, %c0_159] : memref<2x1x96xf32, #tpu.memory_space<vmem>>, vector<1x1x96xf32>
    %312 = vector.shape_cast %311 : vector<1x1x96xf32> to vector<1x96xf32>
    %313 = vector.broadcast %312 : vector<1x96xf32> to vector<16x96xf32>
    %314 = arith.addf %310, %313 : vector<16x96xf32>
    %315 = vector.extract_strided_slice %314 {offsets = [0, 0], sizes = [16, 32], strides = [1, 1]} : vector<16x96xf32> to vector<16x32xf32>
    %316 = vector.extract_strided_slice %314 {offsets = [0, 32], sizes = [16, 32], strides = [1, 1]} : vector<16x96xf32> to vector<16x32xf32>
    %317 = vector.extract_strided_slice %314 {offsets = [0, 64], sizes = [16, 32], strides = [1, 1]} : vector<16x96xf32> to vector<16x32xf32>
    %318 = vector.extract_strided_slice %315 {offsets = [0, 0], sizes = [16, 8], strides = [1, 1]} : vector<16x32xf32> to vector<16x8xf32>
    %319 = vector.extract_strided_slice %316 {offsets = [0, 0], sizes = [16, 8], strides = [1, 1]} : vector<16x32xf32> to vector<16x8xf32>
    %320 = vector.extract_strided_slice %317 {offsets = [0, 0], sizes = [16, 8], strides = [1, 1]} : vector<16x32xf32> to vector<16x8xf32>
    %cst_160 = arith.constant dense<0.000000e+00> : vector<16x16xf32>
    %321 = tpu.matmul %318, %319, %cst_160 {dimension_numbers = #tpu.dot_dimension_numbers<[1], [1], [0], [0], [0, 0, 1, 0], [], []>} : vector<16x8xf32>, vector<16x8xf32>, vector<16x16xf32> -> vector<16x16xf32>
    %cst_161 = arith.constant 0.353553385 : f32
    %322 = vector.broadcast %cst_161 : f32 to vector<16x16xf32>
    %323 = arith.mulf %321, %322 : vector<16x16xf32>
    %324 = arith.addf %323, %114 : vector<16x16xf32>
    %cst_162 = arith.constant dense<0xFF800000> : vector<16xf32>
    %325 = vector.multi_reduction <maximumf>, %324, %cst_162 [1] : vector<16x16xf32> to vector<16xf32>
    %326 = vector.shape_cast %325 : vector<16xf32> to vector<16x1xf32>
    %327 = vector.broadcast %326 : vector<16x1xf32> to vector<16x16xf32>
    %328 = arith.subf %324, %327 : vector<16x16xf32>
    %329 = math.exp %328 : vector<16x16xf32>
    %cst_163 = arith.constant dense<0.000000e+00> : vector<16xf32>
    %330 = vector.multi_reduction <add>, %329, %cst_163 [1] : vector<16x16xf32> to vector<16xf32>
    %331 = vector.shape_cast %330 : vector<16xf32> to vector<16x1xf32>
    %332 = vector.broadcast %331 : vector<16x1xf32> to vector<16x16xf32>
    %333 = arith.divf %329, %332 : vector<16x16xf32>
    %cst_164 = arith.constant dense<0.000000e+00> : vector<16x8xf32>
    %334 = tpu.matmul %333, %320, %cst_164 {dimension_numbers = #tpu.dot_dimension_numbers<[1], [0], [0], [1], [0, 0, 1, 1], [], []>} : vector<16x16xf32>, vector<16x8xf32>, vector<16x8xf32> -> vector<16x8xf32>
    %335 = vector.extract_strided_slice %315 {offsets = [0, 8], sizes = [16, 8], strides = [1, 1]} : vector<16x32xf32> to vector<16x8xf32>
    %336 = vector.extract_strided_slice %316 {offsets = [0, 8], sizes = [16, 8], strides = [1, 1]} : vector<16x32xf32> to vector<16x8xf32>
    %337 = vector.extract_strided_slice %317 {offsets = [0, 8], sizes = [16, 8], strides = [1, 1]} : vector<16x32xf32> to vector<16x8xf32>
    %cst_165 = arith.constant dense<0.000000e+00> : vector<16x16xf32>
    %338 = tpu.matmul %335, %336, %cst_165 {dimension_numbers = #tpu.dot_dimension_numbers<[1], [1], [0], [0], [0, 0, 1, 0], [], []>} : vector<16x8xf32>, vector<16x8xf32>, vector<16x16xf32> -> vector<16x16xf32>
    %cst_166 = arith.constant 0.353553385 : f32
    %339 = vector.broadcast %cst_166 : f32 to vector<16x16xf32>
    %340 = arith.mulf %338, %339 : vector<16x16xf32>
    %341 = arith.addf %340, %114 : vector<16x16xf32>
    %cst_167 = arith.constant dense<0xFF800000> : vector<16xf32>
    %342 = vector.multi_reduction <maximumf>, %341, %cst_167 [1] : vector<16x16xf32> to vector<16xf32>
    %343 = vector.shape_cast %342 : vector<16xf32> to vector<16x1xf32>
    %344 = vector.broadcast %343 : vector<16x1xf32> to vector<16x16xf32>
    %345 = arith.subf %341, %344 : vector<16x16xf32>
    %346 = math.exp %345 : vector<16x16xf32>
    %cst_168 = arith.constant dense<0.000000e+00> : vector<16xf32>
    %347 = vector.multi_reduction <add>, %346, %cst_168 [1] : vector<16x16xf32> to vector<16xf32>
    %348 = vector.shape_cast %347 : vector<16xf32> to vector<16x1xf32>
    %349 = vector.broadcast %348 : vector<16x1xf32> to vector<16x16xf32>
    %350 = arith.divf %346, %349 : vector<16x16xf32>
    %cst_169 = arith.constant dense<0.000000e+00> : vector<16x8xf32>
    %351 = tpu.matmul %350, %337, %cst_169 {dimension_numbers = #tpu.dot_dimension_numbers<[1], [0], [0], [1], [0, 0, 1, 1], [], []>} : vector<16x16xf32>, vector<16x8xf32>, vector<16x8xf32> -> vector<16x8xf32>
    %352 = vector.extract_strided_slice %315 {offsets = [0, 16], sizes = [16, 8], strides = [1, 1]} : vector<16x32xf32> to vector<16x8xf32>
    %353 = vector.extract_strided_slice %316 {offsets = [0, 16], sizes = [16, 8], strides = [1, 1]} : vector<16x32xf32> to vector<16x8xf32>
    %354 = vector.extract_strided_slice %317 {offsets = [0, 16], sizes = [16, 8], strides = [1, 1]} : vector<16x32xf32> to vector<16x8xf32>
    %cst_170 = arith.constant dense<0.000000e+00> : vector<16x16xf32>
    %355 = tpu.matmul %352, %353, %cst_170 {dimension_numbers = #tpu.dot_dimension_numbers<[1], [1], [0], [0], [0, 0, 1, 0], [], []>} : vector<16x8xf32>, vector<16x8xf32>, vector<16x16xf32> -> vector<16x16xf32>
    %cst_171 = arith.constant 0.353553385 : f32
    %356 = vector.broadcast %cst_171 : f32 to vector<16x16xf32>
    %357 = arith.mulf %355, %356 : vector<16x16xf32>
    %358 = arith.addf %357, %114 : vector<16x16xf32>
    %cst_172 = arith.constant dense<0xFF800000> : vector<16xf32>
    %359 = vector.multi_reduction <maximumf>, %358, %cst_172 [1] : vector<16x16xf32> to vector<16xf32>
    %360 = vector.shape_cast %359 : vector<16xf32> to vector<16x1xf32>
    %361 = vector.broadcast %360 : vector<16x1xf32> to vector<16x16xf32>
    %362 = arith.subf %358, %361 : vector<16x16xf32>
    %363 = math.exp %362 : vector<16x16xf32>
    %cst_173 = arith.constant dense<0.000000e+00> : vector<16xf32>
    %364 = vector.multi_reduction <add>, %363, %cst_173 [1] : vector<16x16xf32> to vector<16xf32>
    %365 = vector.shape_cast %364 : vector<16xf32> to vector<16x1xf32>
    %366 = vector.broadcast %365 : vector<16x1xf32> to vector<16x16xf32>
    %367 = arith.divf %363, %366 : vector<16x16xf32>
    %cst_174 = arith.constant dense<0.000000e+00> : vector<16x8xf32>
    %368 = tpu.matmul %367, %354, %cst_174 {dimension_numbers = #tpu.dot_dimension_numbers<[1], [0], [0], [1], [0, 0, 1, 1], [], []>} : vector<16x16xf32>, vector<16x8xf32>, vector<16x8xf32> -> vector<16x8xf32>
    %369 = vector.extract_strided_slice %315 {offsets = [0, 24], sizes = [16, 8], strides = [1, 1]} : vector<16x32xf32> to vector<16x8xf32>
    %370 = vector.extract_strided_slice %316 {offsets = [0, 24], sizes = [16, 8], strides = [1, 1]} : vector<16x32xf32> to vector<16x8xf32>
    %371 = vector.extract_strided_slice %317 {offsets = [0, 24], sizes = [16, 8], strides = [1, 1]} : vector<16x32xf32> to vector<16x8xf32>
    %cst_175 = arith.constant dense<0.000000e+00> : vector<16x16xf32>
    %372 = tpu.matmul %369, %370, %cst_175 {dimension_numbers = #tpu.dot_dimension_numbers<[1], [1], [0], [0], [0, 0, 1, 0], [], []>} : vector<16x8xf32>, vector<16x8xf32>, vector<16x16xf32> -> vector<16x16xf32>
    %cst_176 = arith.constant 0.353553385 : f32
    %373 = vector.broadcast %cst_176 : f32 to vector<16x16xf32>
    %374 = arith.mulf %372, %373 : vector<16x16xf32>
    %375 = arith.addf %374, %114 : vector<16x16xf32>
    %cst_177 = arith.constant dense<0xFF800000> : vector<16xf32>
    %376 = vector.multi_reduction <maximumf>, %375, %cst_177 [1] : vector<16x16xf32> to vector<16xf32>
    %377 = vector.shape_cast %376 : vector<16xf32> to vector<16x1xf32>
    %378 = vector.broadcast %377 : vector<16x1xf32> to vector<16x16xf32>
    %379 = arith.subf %375, %378 : vector<16x16xf32>
    %380 = math.exp %379 : vector<16x16xf32>
    %cst_178 = arith.constant dense<0.000000e+00> : vector<16xf32>
    %381 = vector.multi_reduction <add>, %380, %cst_178 [1] : vector<16x16xf32> to vector<16xf32>
    %382 = vector.shape_cast %381 : vector<16xf32> to vector<16x1xf32>
    %383 = vector.broadcast %382 : vector<16x1xf32> to vector<16x16xf32>
    %384 = arith.divf %380, %383 : vector<16x16xf32>
    %cst_179 = arith.constant dense<0.000000e+00> : vector<16x8xf32>
    %385 = tpu.matmul %384, %371, %cst_179 {dimension_numbers = #tpu.dot_dimension_numbers<[1], [0], [0], [1], [0, 0, 1, 1], [], []>} : vector<16x16xf32>, vector<16x8xf32>, vector<16x8xf32> -> vector<16x8xf32>
    %386 = tpu.concatenate %334, %351, %368, %385 in 1 : vector<16x8xf32>, vector<16x8xf32>, vector<16x8xf32>, vector<16x8xf32> -> vector<16x32xf32>
    %c1_180 = arith.constant 1 : index
    %c0_181 = arith.constant 0 : index
    %c0_182 = arith.constant 0 : index
    %387 = vector.load %arg17[%c1_180, %c0_181, %c0_182] : memref<2x32x32xf32, #tpu.memory_space<vmem>>, vector<1x32x32xf32>
    %388 = vector.shape_cast %387 : vector<1x32x32xf32> to vector<32x32xf32>
    %cst_183 = arith.constant dense<0.000000e+00> : vector<16x32xf32>
    %389 = tpu.matmul %386, %388, %cst_183 {dimension_numbers = #tpu.dot_dimension_numbers<[1], [0], [0], [1], [0, 0, 1, 1], [], []>} : vector<16x32xf32>, vector<32x32xf32>, vector<16x32xf32> -> vector<16x32xf32>
    %390 = arith.addf %281, %389 : vector<16x32xf32>
    %c1_184 = arith.constant 1 : index
    %c0_185 = arith.constant 0 : index
    %c0_186 = arith.constant 0 : index
    %391 = vector.load %arg18[%c1_184, %c0_185, %c0_186] : memref<2x1x32xf32, #tpu.memory_space<vmem>>, vector<1x1x32xf32>
    %392 = vector.shape_cast %391 : vector<1x1x32xf32> to vector<1x32xf32>
    %393 = vector.broadcast %392 : vector<1x32xf32> to vector<16x32xf32>
    %394 = arith.addf %390, %393 : vector<16x32xf32>
    %c1_187 = arith.constant 1 : index
    %c0_188 = arith.constant 0 : index
    %c0_189 = arith.constant 0 : index
    %395 = vector.load %arg19[%c1_187, %c0_188, %c0_189] : memref<2x1x32xf32, #tpu.memory_space<vmem>>, vector<1x1x32xf32>
    %396 = vector.shape_cast %395 : vector<1x1x32xf32> to vector<1x32xf32>
    %c1_190 = arith.constant 1 : index
    %c0_191 = arith.constant 0 : index
    %c0_192 = arith.constant 0 : index
    %397 = vector.load %arg20[%c1_190, %c0_191, %c0_192] : memref<2x1x32xf32, #tpu.memory_space<vmem>>, vector<1x1x32xf32>
    %398 = vector.shape_cast %397 : vector<1x1x32xf32> to vector<1x32xf32>
    %cst_193 = arith.constant dense<0.000000e+00> : vector<16xf32>
    %399 = vector.multi_reduction <add>, %394, %cst_193 [1] : vector<16x32xf32> to vector<16xf32>
    %400 = vector.shape_cast %399 : vector<16xf32> to vector<16x1xf32>
    %cst_194 = arith.constant 3.200000e+01 : f32
    %401 = vector.broadcast %cst_194 : f32 to vector<16x1xf32>
    %402 = arith.divf %400, %401 : vector<16x1xf32>
    %403 = vector.broadcast %402 : vector<16x1xf32> to vector<16x32xf32>
    %404 = arith.subf %394, %403 : vector<16x32xf32>
    %405 = arith.mulf %404, %404 : vector<16x32xf32>
    %cst_195 = arith.constant dense<0.000000e+00> : vector<16xf32>
    %406 = vector.multi_reduction <add>, %405, %cst_195 [1] : vector<16x32xf32> to vector<16xf32>
    %407 = vector.shape_cast %406 : vector<16xf32> to vector<16x1xf32>
    %cst_196 = arith.constant 3.200000e+01 : f32
    %408 = vector.broadcast %cst_196 : f32 to vector<16x1xf32>
    %409 = arith.divf %407, %408 : vector<16x1xf32>
    %410 = vector.broadcast %402 : vector<16x1xf32> to vector<16x32xf32>
    %411 = arith.subf %394, %410 : vector<16x32xf32>
    %cst_197 = arith.constant 9.99999974E-6 : f32
    %412 = vector.broadcast %cst_197 : f32 to vector<16x1xf32>
    %413 = arith.addf %409, %412 : vector<16x1xf32>
    %414 = math.rsqrt %413 : vector<16x1xf32>
    %415 = vector.broadcast %414 : vector<16x1xf32> to vector<16x32xf32>
    %416 = arith.mulf %411, %415 : vector<16x32xf32>
    %417 = vector.broadcast %396 : vector<1x32xf32> to vector<16x32xf32>
    %418 = arith.mulf %416, %417 : vector<16x32xf32>
    %419 = vector.broadcast %398 : vector<1x32xf32> to vector<16x32xf32>
    %420 = arith.addf %418, %419 : vector<16x32xf32>
    %c1_198 = arith.constant 1 : index
    %c0_199 = arith.constant 0 : index
    %c0_200 = arith.constant 0 : index
    %421 = vector.load %arg21[%c1_198, %c0_199, %c0_200] : memref<2x32x64xf32, #tpu.memory_space<vmem>>, vector<1x32x64xf32>
    %422 = vector.shape_cast %421 : vector<1x32x64xf32> to vector<32x64xf32>
    %cst_201 = arith.constant dense<0.000000e+00> : vector<16x64xf32>
    %423 = tpu.matmul %420, %422, %cst_201 {dimension_numbers = #tpu.dot_dimension_numbers<[1], [0], [0], [1], [0, 0, 1, 1], [], []>} : vector<16x32xf32>, vector<32x64xf32>, vector<16x64xf32> -> vector<16x64xf32>
    %c1_202 = arith.constant 1 : index
    %c0_203 = arith.constant 0 : index
    %c0_204 = arith.constant 0 : index
    %424 = vector.load %arg22[%c1_202, %c0_203, %c0_204] : memref<2x1x64xf32, #tpu.memory_space<vmem>>, vector<1x1x64xf32>
    %425 = vector.shape_cast %424 : vector<1x1x64xf32> to vector<1x64xf32>
    %426 = vector.broadcast %425 : vector<1x64xf32> to vector<16x64xf32>
    %427 = arith.addf %423, %426 : vector<16x64xf32>
    %428 = arith.mulf %427, %427 : vector<16x64xf32>
    %429 = arith.mulf %427, %428 : vector<16x64xf32>
    %cst_205 = arith.constant 4.471500e-02 : f32
    %430 = vector.broadcast %cst_205 : f32 to vector<16x64xf32>
    %431 = arith.mulf %430, %429 : vector<16x64xf32>
    %432 = arith.addf %427, %431 : vector<16x64xf32>
    %cst_206 = arith.constant 0.797884583 : f32
    %433 = vector.broadcast %cst_206 : f32 to vector<16x64xf32>
    %434 = arith.mulf %433, %432 : vector<16x64xf32>
    %435 = math.tanh %434 : vector<16x64xf32>
    %cst_207 = arith.constant 1.000000e+00 : f32
    %436 = vector.broadcast %cst_207 : f32 to vector<16x64xf32>
    %437 = arith.addf %436, %435 : vector<16x64xf32>
    %cst_208 = arith.constant 5.000000e-01 : f32
    %438 = vector.broadcast %cst_208 : f32 to vector<16x64xf32>
    %439 = arith.mulf %438, %437 : vector<16x64xf32>
    %440 = arith.mulf %427, %439 : vector<16x64xf32>
    %c1_209 = arith.constant 1 : index
    %c0_210 = arith.constant 0 : index
    %c0_211 = arith.constant 0 : index
    %441 = vector.load %arg23[%c1_209, %c0_210, %c0_211] : memref<2x64x32xf32, #tpu.memory_space<vmem>>, vector<1x64x32xf32>
    %442 = vector.shape_cast %441 : vector<1x64x32xf32> to vector<64x32xf32>
    %cst_212 = arith.constant dense<0.000000e+00> : vector<16x32xf32>
    %443 = tpu.matmul %440, %442, %cst_212 {dimension_numbers = #tpu.dot_dimension_numbers<[1], [0], [0], [1], [0, 0, 1, 1], [], []>} : vector<16x64xf32>, vector<64x32xf32>, vector<16x32xf32> -> vector<16x32xf32>
    %444 = arith.addf %394, %443 : vector<16x32xf32>
    %c1_213 = arith.constant 1 : index
    %c0_214 = arith.constant 0 : index
    %c0_215 = arith.constant 0 : index
    %445 = vector.load %arg24[%c1_213, %c0_214, %c0_215] : memref<2x1x32xf32, #tpu.memory_space<vmem>>, vector<1x1x32xf32>
    %446 = vector.shape_cast %445 : vector<1x1x32xf32> to vector<1x32xf32>
    %447 = vector.broadcast %446 : vector<1x32xf32> to vector<16x32xf32>
    %448 = arith.addf %444, %447 : vector<16x32xf32>
    %c0_216 = arith.constant 0 : index
    %c0_217 = arith.constant 0 : index
    %449 = vector.load %arg25[%c0_216, %c0_217] : memref<1x32xf32, #tpu.memory_space<vmem>>, vector<1x32xf32>
    %c0_218 = arith.constant 0 : index
    %c0_219 = arith.constant 0 : index
    %450 = vector.load %arg26[%c0_218, %c0_219] : memref<1x32xf32, #tpu.memory_space<vmem>>, vector<1x32xf32>
    %cst_220 = arith.constant dense<0.000000e+00> : vector<16xf32>
    %451 = vector.multi_reduction <add>, %448, %cst_220 [1] : vector<16x32xf32> to vector<16xf32>
    %452 = vector.shape_cast %451 : vector<16xf32> to vector<16x1xf32>
    %cst_221 = arith.constant 3.200000e+01 : f32
    %453 = vector.broadcast %cst_221 : f32 to vector<16x1xf32>
    %454 = arith.divf %452, %453 : vector<16x1xf32>
    %455 = vector.broadcast %454 : vector<16x1xf32> to vector<16x32xf32>
    %456 = arith.subf %448, %455 : vector<16x32xf32>
    %457 = arith.mulf %456, %456 : vector<16x32xf32>
    %cst_222 = arith.constant dense<0.000000e+00> : vector<16xf32>
    %458 = vector.multi_reduction <add>, %457, %cst_222 [1] : vector<16x32xf32> to vector<16xf32>
    %459 = vector.shape_cast %458 : vector<16xf32> to vector<16x1xf32>
    %cst_223 = arith.constant 3.200000e+01 : f32
    %460 = vector.broadcast %cst_223 : f32 to vector<16x1xf32>
    %461 = arith.divf %459, %460 : vector<16x1xf32>
    %462 = vector.broadcast %454 : vector<16x1xf32> to vector<16x32xf32>
    %463 = arith.subf %448, %462 : vector<16x32xf32>
    %cst_224 = arith.constant 9.99999974E-6 : f32
    %464 = vector.broadcast %cst_224 : f32 to vector<16x1xf32>
    %465 = arith.addf %461, %464 : vector<16x1xf32>
    %466 = math.rsqrt %465 : vector<16x1xf32>
    %467 = vector.broadcast %466 : vector<16x1xf32> to vector<16x32xf32>
    %468 = arith.mulf %463, %467 : vector<16x32xf32>
    %469 = vector.broadcast %449 : vector<1x32xf32> to vector<16x32xf32>
    %470 = arith.mulf %468, %469 : vector<16x32xf32>
    %471 = vector.broadcast %450 : vector<1x32xf32> to vector<16x32xf32>
    %472 = arith.addf %470, %471 : vector<16x32xf32>
    %c0_225 = arith.constant 0 : index
    %c0_226 = arith.constant 0 : index
    %473 = vector.load %arg27[%c0_225, %c0_226] : memref<16x32xf32, #tpu.memory_space<vmem>>, vector<16x32xf32>
    tpu.vector_store %arg27[%c0_225, %c0_226], %472 {strides = array<i32>} : memref<16x32xf32, #tpu.memory_space<vmem>>, vector<16x32xf32>,
    return
  }
  func.func @transform_0(%arg0: i32) -> (i32, i32) {
    %c0_i32 = arith.constant 0 : i32
    %c0_i32_0 = arith.constant 0 : i32
    %c0_i32_1 = arith.constant 0 : i32
    return %c0_i32, %c0_i32_0 : i32, i32
  }
  func.func @transform_1(%arg0: i32) -> (i32, i32) {
    %c0_i32 = arith.constant 0 : i32
    %c0_i32_0 = arith.constant 0 : i32
    %c0_i32_1 = arith.constant 0 : i32
    return %c0_i32, %c0_i32_0 : i32, i32
  }
  func.func @transform_2(%arg0: i32) -> (i32, i32) {
    %c0_i32 = arith.constant 0 : i32
    %c0_i32_0 = arith.constant 0 : i32
    %c0_i32_1 = arith.constant 0 : i32
    return %c0_i32, %c0_i32_0 : i32, i32
  }
  func.func @transform_3(%arg0: i32) -> (i32, i32) {
    %c0_i32 = arith.constant 0 : i32
    %c0_i32_0 = arith.constant 0 : i32
    %c0_i32_1 = arith.constant 0 : i32
    return %c0_i32, %c0_i32_0 : i32, i32
  }
  func.func @transform_4(%arg0: i32) -> (i32, i32, i32) {
    %c0_i32 = arith.constant 0 : i32
    %c0_i32_0 = arith.constant 0 : i32
    %c0_i32_1 = arith.constant 0 : i32
    %c0_i32_2 = arith.constant 0 : i32
    return %c0_i32, %c0_i32_0, %c0_i32_1 : i32, i32, i32
  }
  func.func @transform_5(%arg0: i32) -> (i32, i32, i32) {
    %c0_i32 = arith.constant 0 : i32
    %c0_i32_0 = arith.constant 0 : i32
    %c0_i32_1 = arith.constant 0 : i32
    %c0_i32_2 = arith.constant 0 : i32
    return %c0_i32, %c0_i32_0, %c0_i32_1 : i32, i32, i32
  }
  func.func @transform_6(%arg0: i32) -> (i32, i32) {
    %c0_i32 = arith.constant 0 : i32
    %c0_i32_0 = arith.constant 0 : i32
    %c0_i32_1 = arith.constant 0 : i32
    return %c0_i32, %c0_i32_0 : i32, i32
  }
  func.func @transform_7(%arg0: i32) -> (i32, i32) {
    %c0_i32 = arith.constant 0 : i32
    %c0_i32_0 = arith.constant 0 : i32
    %c0_i32_1 = arith.constant 0 : i32
    return %c0_i32, %c0_i32_0 : i32, i32
  }
  func.func @transform_8(%arg0: i32) -> (i32, i32) {
    %c0_i32 = arith.constant 0 : i32
    %c0_i32_0 = arith.constant 0 : i32
    %c0_i32_1 = arith.constant 0 : i32
    return %c0_i32, %c0_i32_0 : i32, i32
  }
  func.func @transform_9(%arg0: i32) -> (i32, i32) {
    %c0_i32 = arith.constant 0 : i32
    %c0_i32_0 = arith.constant 0 : i32
    %c0_i32_1 = arith.constant 0 : i32
    return %c0_i32, %c0_i32_0 : i32, i32
  }
  func.func @transform_10(%arg0: i32) -> (i32, i32) {
    %c0_i32 = arith.constant 0 : i32
    %c0_i32_0 = arith.constant 0 : i32
    %c0_i32_1 = arith.constant 0 : i32
    return %c0_i32, %c0_i32_0 : i32, i32
  }
  func.func @transform_11(%arg0: i32) -> (i32, i32) {
    %c0_i32 = arith.constant 0 : i32
    %c0_i32_0 = arith.constant 0 : i32
    %c0_i32_1 = arith.constant 0 : i32
    return %c0_i32, %c0_i32_0 : i32, i32
  }
  func.func @transform_12(%arg0: i32) -> (i32, i32, i32) {
    %c0_i32 = arith.constant 0 : i32
    %c0_i32_0 = arith.constant 0 : i32
    %c0_i32_1 = arith.constant 0 : i32
    %c0_i32_2 = arith.constant 0 : i32
    return %c0_i32, %c0_i32_0, %c0_i32_1 : i32, i32, i32
  }
  func.func @transform_13(%arg0: i32) -> (i32, i32, i32) {
    %c0_i32 = arith.constant 0 : i32
    %c0_i32_0 = arith.constant 0 : i32
    %c0_i32_1 = arith.constant 0 : i32
    %c0_i32_2 = arith.constant 0 : i32
    return %c0_i32, %c0_i32_0, %c0_i32_1 : i32, i32, i32
  }
  func.func @transform_14(%arg0: i32) -> (i32, i32, i32) {
    %c0_i32 = arith.constant 0 : i32
    %c0_i32_0 = arith.constant 0 : i32
    %c0_i32_1 = arith.constant 0 : i32
    %c0_i32_2 = arith.constant 0 : i32
    return %c0_i32, %c0_i32_0, %c0_i32_1 : i32, i32, i32
  }
  func.func @transform_15(%arg0: i32) -> (i32, i32, i32) {
    %c0_i32 = arith.constant 0 : i32
    %c0_i32_0 = arith.constant 0 : i32
    %c0_i32_1 = arith.constant 0 : i32
    %c0_i32_2 = arith.constant 0 : i32
    return %c0_i32, %c0_i32_0, %c0_i32_1 : i32, i32, i32
  }
  func.func @transform_16(%arg0: i32) -> (i32, i32, i32) {
    %c0_i32 = arith.constant 0 : i32
    %c0_i32_0 = arith.constant 0 : i32
    %c0_i32_1 = arith.constant 0 : i32
    %c0_i32_2 = arith.constant 0 : i32
    return %c0_i32, %c0_i32_0, %c0_i32_1 : i32, i32, i32
  }
  func.func @transform_17(%arg0: i32) -> (i32, i32, i32) {
    %c0_i32 = arith.constant 0 : i32
    %c0_i32_0 = arith.constant 0 : i32
    %c0_i32_1 = arith.constant 0 : i32
    %c0_i32_2 = arith.constant 0 : i32
    return %c0_i32, %c0_i32_0, %c0_i32_1 : i32, i32, i32
  }
  func.func @transform_18(%arg0: i32) -> (i32, i32, i32) {
    %c0_i32 = arith.constant 0 : i32
    %c0_i32_0 = arith.constant 0 : i32
    %c0_i32_1 = arith.constant 0 : i32
    %c0_i32_2 = arith.constant 0 : i32
    return %c0_i32, %c0_i32_0, %c0_i32_1 : i32, i32, i32
  }
  func.func @transform_19(%arg0: i32) -> (i32, i32, i32) {
    %c0_i32 = arith.constant 0 : i32
    %c0_i32_0 = arith.constant 0 : i32
    %c0_i32_1 = arith.constant 0 : i32
    %c0_i32_2 = arith.constant 0 : i32
    return %c0_i32, %c0_i32_0, %c0_i32_1 : i32, i32, i32
  }
  func.func @transform_20(%arg0: i32) -> (i32, i32, i32) {
    %c0_i32 = arith.constant 0 : i32
    %c0_i32_0 = arith.constant 0 : i32
    %c0_i32_1 = arith.constant 0 : i32
    %c0_i32_2 = arith.constant 0 : i32
    return %c0_i32, %c0_i32_0, %c0_i32_1 : i32, i32, i32
  }
  func.func @transform_21(%arg0: i32) -> (i32, i32, i32) {
    %c0_i32 = arith.constant 0 : i32
    %c0_i32_0 = arith.constant 0 : i32
    %c0_i32_1 = arith.constant 0 : i32
    %c0_i32_2 = arith.constant 0 : i32
    return %c0_i32, %c0_i32_0, %c0_i32_1 : i32, i32, i32
  }
  func.func @transform_22(%arg0: i32) -> (i32, i32, i32) {
    %c0_i32 = arith.constant 0 : i32
    %c0_i32_0 = arith.constant 0 : i32
    %c0_i32_1 = arith.constant 0 : i32
    %c0_i32_2 = arith.constant 0 : i32
    return %c0_i32, %c0_i32_0, %c0_i32_1 : i32, i32, i32
  }
  func.func @transform_23(%arg0: i32) -> (i32, i32, i32) {
    %c0_i32 = arith.constant 0 : i32
    %c0_i32_0 = arith.constant 0 : i32
    %c0_i32_1 = arith.constant 0 : i32
    %c0_i32_2 = arith.constant 0 : i32
    return %c0_i32, %c0_i32_0, %c0_i32_1 : i32, i32, i32
  }
  func.func @transform_24(%arg0: i32) -> (i32, i32) {
    %c0_i32 = arith.constant 0 : i32
    %c0_i32_0 = arith.constant 0 : i32
    %c0_i32_1 = arith.constant 0 : i32
    return %c0_i32, %c0_i32_0 : i32, i32
  }
  func.func @transform_25(%arg0: i32) -> (i32, i32) {
    %c0_i32 = arith.constant 0 : i32
    %c0_i32_0 = arith.constant 0 : i32
    %c0_i32_1 = arith.constant 0 : i32
    return %c0_i32, %c0_i32_0 : i32, i32
  }
  func.func @transform_26(%arg0: i32) -> (i32, i32) {
    %c0_i32 = arith.constant 0 : i32
    %c0_i32_0 = arith.constant 0 : i32
    %c0_i32_1 = arith.constant 0 : i32
    return %c0_i32, %c0_i32_0 : i32, i32
  }
}

module attributes {stable_mosaic.version = 11 : i64} {
  func.func @_decode_kernel(%arg0: i32, %arg1: memref<16x32xf32, #tpu.memory_space<vmem>>, %arg2: memref<16x128xf32, #tpu.memory_space<vmem>>, %arg3: memref<128x32xf32, #tpu.memory_space<vmem>>, %arg4: memref<32x128xf32, #tpu.memory_space<vmem>>, %arg5: memref<16x32xf32, #tpu.memory_space<vmem>>, %arg6: memref<16x16xf32, #tpu.memory_space<vmem>>, %arg7: memref<16x16xf32, #tpu.memory_space<vmem>>, %arg8: memref<2x1x32xf32, #tpu.memory_space<vmem>>, %arg9: memref<2x1x32xf32, #tpu.memory_space<vmem>>, %arg10: memref<2x32x96xf32, #tpu.memory_space<vmem>>, %arg11: memref<2x1x96xf32, #tpu.memory_space<vmem>>, %arg12: memref<2x32x32xf32, #tpu.memory_space<vmem>>, %arg13: memref<2x1x32xf32, #tpu.memory_space<vmem>>, %arg14: memref<2x1x32xf32, #tpu.memory_space<vmem>>, %arg15: memref<2x1x32xf32, #tpu.memory_space<vmem>>, %arg16: memref<2x32x32xf32, #tpu.memory_space<vmem>>, %arg17: memref<2x1x32xf32, #tpu.memory_space<vmem>>, %arg18: memref<2x32x64xf32, #tpu.memory_space<vmem>>, %arg19: memref<2x1x64xf32, #tpu.memory_space<vmem>>, %arg20: memref<2x32x32xf32, #tpu.memory_space<vmem>>, %arg21: memref<2x1x32xf32, #tpu.memory_space<vmem>>, %arg22: memref<2x1x32xf32, #tpu.memory_space<vmem>>, %arg23: memref<2x1x32xf32, #tpu.memory_space<vmem>>, %arg24: memref<2x32x64xf32, #tpu.memory_space<vmem>>, %arg25: memref<2x1x64xf32, #tpu.memory_space<vmem>>, %arg26: memref<2x64x32xf32, #tpu.memory_space<vmem>>, %arg27: memref<2x1x32xf32, #tpu.memory_space<vmem>>, %arg28: memref<1x32xf32, #tpu.memory_space<vmem>>, %arg29: memref<1x32xf32, #tpu.memory_space<vmem>>, %arg30: memref<16x128xf32, #tpu.memory_space<vmem>>, %arg31: memref<2x16x64xf32, #tpu.memory_space<vmem>>) attributes {dimension_semantics = [#tpu.dimension_semantics<arbitrary>], iteration_bounds = array<i64: 1>, scalar_prefetch = 0 : i64, scratch_operands = 1 : i64, tpu.core_type = #tpu.core_type<tc>, window_params = [{pipeline_mode = #tpu.pipeline_mode<synchronous>, transform_indices = @transform_0, window_bounds = array<i64: 16, 32>}, {pipeline_mode = #tpu.pipeline_mode<synchronous>, transform_indices = @transform_1, window_bounds = array<i64: 16, 128>}, {pipeline_mode = #tpu.pipeline_mode<synchronous>, transform_indices = @transform_2, window_bounds = array<i64: 128, 32>}, {pipeline_mode = #tpu.pipeline_mode<synchronous>, transform_indices = @transform_3, window_bounds = array<i64: 32, 128>}, {pipeline_mode = #tpu.pipeline_mode<synchronous>, transform_indices = @transform_4, window_bounds = array<i64: 16, 32>}, {pipeline_mode = #tpu.pipeline_mode<synchronous>, transform_indices = @transform_5, window_bounds = array<i64: 16, 16>}, {pipeline_mode = #tpu.pipeline_mode<synchronous>, transform_indices = @transform_6, window_bounds = array<i64: 16, 16>}, {pipeline_mode = #tpu.pipeline_mode<synchronous>, transform_indices = @transform_7, window_bounds = array<i64: 2, 1, 32>}, {pipeline_mode = #tpu.pipeline_mode<synchronous>, transform_indices = @transform_8, window_bounds = array<i64: 2, 1, 32>}, {pipeline_mode = #tpu.pipeline_mode<synchronous>, transform_indices = @transform_9, window_bounds = array<i64: 2, 32, 96>}, {pipeline_mode = #tpu.pipeline_mode<synchronous>, transform_indices = @transform_10, window_bounds = array<i64: 2, 1, 96>}, {pipeline_mode = #tpu.pipeline_mode<synchronous>, transform_indices = @transform_11, window_bounds = array<i64: 2, 32, 32>}, {pipeline_mode = #tpu.pipeline_mode<synchronous>, transform_indices = @transform_12, window_bounds = array<i64: 2, 1, 32>}, {pipeline_mode = #tpu.pipeline_mode<synchronous>, transform_indices = @transform_13, window_bounds = array<i64: 2, 1, 32>}, {pipeline_mode = #tpu.pipeline_mode<synchronous>, transform_indices = @transform_14, window_bounds = array<i64: 2, 1, 32>}, {pipeline_mode = #tpu.pipeline_mode<synchronous>, transform_indices = @transform_15, window_bounds = array<i64: 2, 32, 32>}, {pipeline_mode = #tpu.pipeline_mode<synchronous>, transform_indices = @transform_16, window_bounds = array<i64: 2, 1, 32>}, {pipeline_mode = #tpu.pipeline_mode<synchronous>, transform_indices = @transform_17, window_bounds = array<i64: 2, 32, 64>}, {pipeline_mode = #tpu.pipeline_mode<synchronous>, transform_indices = @transform_18, window_bounds = array<i64: 2, 1, 64>}, {pipeline_mode = #tpu.pipeline_mode<synchronous>, transform_indices = @transform_19, window_bounds = array<i64: 2, 32, 32>}, {pipeline_mode = #tpu.pipeline_mode<synchronous>, transform_indices = @transform_20, window_bounds = array<i64: 2, 1, 32>}, {pipeline_mode = #tpu.pipeline_mode<synchronous>, transform_indices = @transform_21, window_bounds = array<i64: 2, 1, 32>}, {pipeline_mode = #tpu.pipeline_mode<synchronous>, transform_indices = @transform_22, window_bounds = array<i64: 2, 1, 32>}, {pipeline_mode = #tpu.pipeline_mode<synchronous>, transform_indices = @transform_23, window_bounds = array<i64: 2, 32, 64>}, {pipeline_mode = #tpu.pipeline_mode<synchronous>, transform_indices = @transform_24, window_bounds = array<i64: 2, 1, 64>}, {pipeline_mode = #tpu.pipeline_mode<synchronous>, transform_indices = @transform_25, window_bounds = array<i64: 2, 64, 32>}, {pipeline_mode = #tpu.pipeline_mode<synchronous>, transform_indices = @transform_26, window_bounds = array<i64: 2, 1, 32>}, {pipeline_mode = #tpu.pipeline_mode<synchronous>, transform_indices = @transform_27, window_bounds = array<i64: 1, 32>}, {pipeline_mode = #tpu.pipeline_mode<synchronous>, transform_indices = @transform_28, window_bounds = array<i64: 1, 32>}, {pipeline_mode = #tpu.pipeline_mode<synchronous>, transform_indices = @transform_29, window_bounds = array<i64: 16, 128>}]} {
    %c0 = arith.constant 0 : index
    %c0_0 = arith.constant 0 : index
    %0 = vector.load %arg2[%c0, %c0_0] : memref<16x128xf32, #tpu.memory_space<vmem>>, vector<16x128xf32>
    %c0_1 = arith.constant 0 : index
    %c0_2 = arith.constant 0 : index
    %1 = vector.load %arg30[%c0_1, %c0_2] : memref<16x128xf32, #tpu.memory_space<vmem>>, vector<16x128xf32>
    tpu.vector_store %arg30[%c0_1, %c0_2], %0 {strides = array<i32>} : memref<16x128xf32, #tpu.memory_space<vmem>>, vector<16x128xf32>,
    %c0_3 = arith.constant 0 : index
    %c0_4 = arith.constant 0 : index
    %2 = vector.load %arg1[%c0_3, %c0_4] : memref<16x32xf32, #tpu.memory_space<vmem>>, vector<16x32xf32>
    %c0_5 = arith.constant 0 : index
    %c0_6 = arith.constant 0 : index
    %c0_7 = arith.constant 0 : index
    %3 = vector.load %arg18[%c0_5, %c0_6, %c0_7] : memref<2x32x64xf32, #tpu.memory_space<vmem>>, vector<1x32x64xf32>
    %4 = vector.shape_cast %3 : vector<1x32x64xf32> to vector<32x64xf32>
    %cst = arith.constant dense<0.000000e+00> : vector<16x64xf32>
    %5 = tpu.matmul %2, %4, %cst {dimension_numbers = #tpu.dot_dimension_numbers<[1], [0], [0], [1], [0, 0, 1, 1], [], []>} : vector<16x32xf32>, vector<32x64xf32>, vector<16x64xf32> -> vector<16x64xf32>
    %c0_8 = arith.constant 0 : index
    %c0_9 = arith.constant 0 : index
    %c0_10 = arith.constant 0 : index
    %6 = vector.load %arg19[%c0_8, %c0_9, %c0_10] : memref<2x1x64xf32, #tpu.memory_space<vmem>>, vector<1x1x64xf32>
    %7 = vector.shape_cast %6 : vector<1x1x64xf32> to vector<1x64xf32>
    %8 = vector.broadcast %7 : vector<1x64xf32> to vector<16x64xf32>
    %9 = arith.addf %5, %8 : vector<16x64xf32>
    %c0_11 = arith.constant 0 : index
    %c0_12 = arith.constant 0 : index
    %c0_13 = arith.constant 0 : index
    %10 = vector.load %arg31[%c0_11, %c0_12, %c0_13] : memref<2x16x64xf32, #tpu.memory_space<vmem>>, vector<1x16x64xf32>
    %11 = vector.shape_cast %10 : vector<1x16x64xf32> to vector<16x64xf32>
    %12 = vector.shape_cast %9 : vector<16x64xf32> to vector<1x16x64xf32>
    tpu.vector_store %arg31[%c0_11, %c0_12, %c0_13], %12 {strides = array<i32>} : memref<2x16x64xf32, #tpu.memory_space<vmem>>, vector<1x16x64xf32>,
    %c1 = arith.constant 1 : index
    %c0_14 = arith.constant 0 : index
    %c0_15 = arith.constant 0 : index
    %13 = vector.load %arg18[%c1, %c0_14, %c0_15] : memref<2x32x64xf32, #tpu.memory_space<vmem>>, vector<1x32x64xf32>
    %14 = vector.shape_cast %13 : vector<1x32x64xf32> to vector<32x64xf32>
    %cst_16 = arith.constant dense<0.000000e+00> : vector<16x64xf32>
    %15 = tpu.matmul %2, %14, %cst_16 {dimension_numbers = #tpu.dot_dimension_numbers<[1], [0], [0], [1], [0, 0, 1, 1], [], []>} : vector<16x32xf32>, vector<32x64xf32>, vector<16x64xf32> -> vector<16x64xf32>
    %c1_17 = arith.constant 1 : index
    %c0_18 = arith.constant 0 : index
    %c0_19 = arith.constant 0 : index
    %16 = vector.load %arg19[%c1_17, %c0_18, %c0_19] : memref<2x1x64xf32, #tpu.memory_space<vmem>>, vector<1x1x64xf32>
    %17 = vector.shape_cast %16 : vector<1x1x64xf32> to vector<1x64xf32>
    %18 = vector.broadcast %17 : vector<1x64xf32> to vector<16x64xf32>
    %19 = arith.addf %15, %18 : vector<16x64xf32>
    %c1_20 = arith.constant 1 : index
    %c0_21 = arith.constant 0 : index
    %c0_22 = arith.constant 0 : index
    %20 = vector.load %arg31[%c1_20, %c0_21, %c0_22] : memref<2x16x64xf32, #tpu.memory_space<vmem>>, vector<1x16x64xf32>
    %21 = vector.shape_cast %20 : vector<1x16x64xf32> to vector<16x64xf32>
    %22 = vector.shape_cast %19 : vector<16x64xf32> to vector<1x16x64xf32>
    tpu.vector_store %arg31[%c1_20, %c0_21, %c0_22], %22 {strides = array<i32>} : memref<2x16x64xf32, #tpu.memory_space<vmem>>, vector<1x16x64xf32>,
    %c0_23 = arith.constant 0 : index
    %c0_24 = arith.constant 0 : index
    %23 = vector.load %arg6[%c0_23, %c0_24] : memref<16x16xf32, #tpu.memory_space<vmem>>, vector<16x16xf32>
    %c0_25 = arith.constant 0 : index
    %c0_26 = arith.constant 0 : index
    %24 = vector.load %arg7[%c0_25, %c0_26] : memref<16x16xf32, #tpu.memory_space<vmem>>, vector<16x16xf32>
    %c0_27 = arith.constant 0 : index
    %c0_28 = arith.constant 0 : index
    %25 = vector.load %arg5[%c0_27, %c0_28] : memref<16x32xf32, #tpu.memory_space<vmem>>, vector<16x32xf32>
    %c0_29 = arith.constant 0 : index
    %c0_30 = arith.constant 0 : index
    %26 = vector.load %arg3[%c0_29, %c0_30] : memref<128x32xf32, #tpu.memory_space<vmem>>, vector<128x32xf32>
    %c0_31 = arith.constant 0 : index
    %c0_32 = arith.constant 0 : index
    %27 = vector.load %arg4[%c0_31, %c0_32] : memref<32x128xf32, #tpu.memory_space<vmem>>, vector<32x128xf32>
    %28 = tpu.iota {dimensions = array<i32: 0>} : vector<2x16xi32>
    %29 = tpu.iota {dimensions = array<i32: 1>} : vector<2x16xi32>
    %30 = tpu.iota {dimensions = array<i32: 1>} : vector<2x128xi32>
    %31 = arith.sitofp %30 : vector<2x128xi32> to vector<2x128xf32>
    %c50_i32 = arith.constant 50 : i32
    %32 = vector.broadcast %c50_i32 : i32 to vector<2x128xi32>
    %33 = arith.cmpi slt, %30, %32 : vector<2x128xi32>
    %c0_i32 = arith.constant 0 : i32
    %c5_i32 = arith.constant 5 : i32
    %34 = arith.addi %c0_i32, %c5_i32 : i32
    %c1_i32 = arith.constant 1 : i32
    scf.for %arg32 = %c0_i32 to %34 step %c1_i32  : i32 {
      %c1_i32_34 = arith.constant 1 : i32
      %35 = arith.muli %arg32, %c1_i32_34 : i32
      %c3_i32 = arith.constant 3 : i32
      %36 = arith.addi %c3_i32, %35 : i32
      %c0_35 = arith.constant 0 : index
      %c0_36 = arith.constant 0 : index
      %37 = vector.load %arg30[%c0_35, %c0_36] : memref<16x128xf32, #tpu.memory_space<vmem>>, vector<16x128xf32>
      %cst_37 = arith.constant dense<0.000000e+00> : vector<16x32xf32>
      %38 = tpu.matmul %37, %26, %cst_37 {dimension_numbers = #tpu.dot_dimension_numbers<[1], [0], [0], [1], [0, 0, 1, 1], [], []>} : vector<16x128xf32>, vector<128x32xf32>, vector<16x32xf32> -> vector<16x32xf32>
      %39 = arith.addf %38, %25 : vector<16x32xf32>
      %c0_38 = arith.constant 0 : index
      %c0_39 = arith.constant 0 : index
      %c0_40 = arith.constant 0 : index
      %40 = vector.load %arg8[%c0_38, %c0_39, %c0_40] : memref<2x1x32xf32, #tpu.memory_space<vmem>>, vector<1x1x32xf32>
      %41 = vector.shape_cast %40 : vector<1x1x32xf32> to vector<1x32xf32>
      %c0_41 = arith.constant 0 : index
      %c0_42 = arith.constant 0 : index
      %c0_43 = arith.constant 0 : index
      %42 = vector.load %arg9[%c0_41, %c0_42, %c0_43] : memref<2x1x32xf32, #tpu.memory_space<vmem>>, vector<1x1x32xf32>
      %43 = vector.shape_cast %42 : vector<1x1x32xf32> to vector<1x32xf32>
      %cst_44 = arith.constant dense<0.000000e+00> : vector<16xf32>
      %44 = vector.multi_reduction <add>, %39, %cst_44 [1] : vector<16x32xf32> to vector<16xf32>
      %45 = vector.shape_cast %44 : vector<16xf32> to vector<16x1xf32>
      %cst_45 = arith.constant 3.200000e+01 : f32
      %46 = vector.broadcast %cst_45 : f32 to vector<16x1xf32>
      %47 = arith.divf %45, %46 : vector<16x1xf32>
      %48 = vector.broadcast %47 : vector<16x1xf32> to vector<16x32xf32>
      %49 = arith.subf %39, %48 : vector<16x32xf32>
      %50 = arith.mulf %49, %49 : vector<16x32xf32>
      %cst_46 = arith.constant dense<0.000000e+00> : vector<16xf32>
      %51 = vector.multi_reduction <add>, %50, %cst_46 [1] : vector<16x32xf32> to vector<16xf32>
      %52 = vector.shape_cast %51 : vector<16xf32> to vector<16x1xf32>
      %cst_47 = arith.constant 3.200000e+01 : f32
      %53 = vector.broadcast %cst_47 : f32 to vector<16x1xf32>
      %54 = arith.divf %52, %53 : vector<16x1xf32>
      %55 = vector.broadcast %47 : vector<16x1xf32> to vector<16x32xf32>
      %56 = arith.subf %39, %55 : vector<16x32xf32>
      %cst_48 = arith.constant 9.99999974E-6 : f32
      %57 = vector.broadcast %cst_48 : f32 to vector<16x1xf32>
      %58 = arith.addf %54, %57 : vector<16x1xf32>
      %59 = math.rsqrt %58 : vector<16x1xf32>
      %60 = vector.broadcast %59 : vector<16x1xf32> to vector<16x32xf32>
      %61 = arith.mulf %56, %60 : vector<16x32xf32>
      %62 = vector.broadcast %41 : vector<1x32xf32> to vector<16x32xf32>
      %63 = arith.mulf %61, %62 : vector<16x32xf32>
      %64 = vector.broadcast %43 : vector<1x32xf32> to vector<16x32xf32>
      %65 = arith.addf %63, %64 : vector<16x32xf32>
      %c0_49 = arith.constant 0 : index
      %c0_50 = arith.constant 0 : index
      %c0_51 = arith.constant 0 : index
      %66 = vector.load %arg10[%c0_49, %c0_50, %c0_51] : memref<2x32x96xf32, #tpu.memory_space<vmem>>, vector<1x32x96xf32>
      %67 = vector.shape_cast %66 : vector<1x32x96xf32> to vector<32x96xf32>
      %cst_52 = arith.constant dense<0.000000e+00> : vector<16x96xf32>
      %68 = tpu.matmul %65, %67, %cst_52 {dimension_numbers = #tpu.dot_dimension_numbers<[1], [0], [0], [1], [0, 0, 1, 1], [], []>} : vector<16x32xf32>, vector<32x96xf32>, vector<16x96xf32> -> vector<16x96xf32>
      %c0_53 = arith.constant 0 : index
      %c0_54 = arith.constant 0 : index
      %c0_55 = arith.constant 0 : index
      %69 = vector.load %arg11[%c0_53, %c0_54, %c0_55] : memref<2x1x96xf32, #tpu.memory_space<vmem>>, vector<1x1x96xf32>
      %70 = vector.shape_cast %69 : vector<1x1x96xf32> to vector<1x96xf32>
      %71 = vector.broadcast %70 : vector<1x96xf32> to vector<16x96xf32>
      %72 = arith.addf %68, %71 : vector<16x96xf32>
      %73 = vector.extract_strided_slice %72 {offsets = [0, 0], sizes = [16, 32], strides = [1, 1]} : vector<16x96xf32> to vector<16x32xf32>
      %74 = vector.extract_strided_slice %72 {offsets = [0, 32], sizes = [16, 32], strides = [1, 1]} : vector<16x96xf32> to vector<16x32xf32>
      %75 = vector.extract_strided_slice %72 {offsets = [0, 64], sizes = [16, 32], strides = [1, 1]} : vector<16x96xf32> to vector<16x32xf32>
      %76 = vector.extract_strided_slice %73 {offsets = [0, 0], sizes = [16, 8], strides = [1, 1]} : vector<16x32xf32> to vector<16x8xf32>
      %77 = vector.extract_strided_slice %74 {offsets = [0, 0], sizes = [16, 8], strides = [1, 1]} : vector<16x32xf32> to vector<16x8xf32>
      %78 = vector.extract_strided_slice %75 {offsets = [0, 0], sizes = [16, 8], strides = [1, 1]} : vector<16x32xf32> to vector<16x8xf32>
      %cst_56 = arith.constant dense<0.000000e+00> : vector<16x16xf32>
      %79 = tpu.matmul %76, %77, %cst_56 {dimension_numbers = #tpu.dot_dimension_numbers<[1], [1], [0], [0], [0, 0, 1, 0], [], []>} : vector<16x8xf32>, vector<16x8xf32>, vector<16x16xf32> -> vector<16x16xf32>
      %cst_57 = arith.constant 0.353553385 : f32
      %80 = vector.broadcast %cst_57 : f32 to vector<16x16xf32>
      %81 = arith.mulf %79, %80 : vector<16x16xf32>
      %82 = arith.addf %81, %23 : vector<16x16xf32>
      %cst_58 = arith.constant dense<0xFF800000> : vector<16xf32>
      %83 = vector.multi_reduction <maximumf>, %82, %cst_58 [1] : vector<16x16xf32> to vector<16xf32>
      %84 = vector.shape_cast %83 : vector<16xf32> to vector<16x1xf32>
      %85 = vector.broadcast %84 : vector<16x1xf32> to vector<16x16xf32>
      %86 = arith.subf %82, %85 : vector<16x16xf32>
      %87 = math.exp %86 : vector<16x16xf32>
      %cst_59 = arith.constant dense<0.000000e+00> : vector<16xf32>
      %88 = vector.multi_reduction <add>, %87, %cst_59 [1] : vector<16x16xf32> to vector<16xf32>
      %89 = vector.shape_cast %88 : vector<16xf32> to vector<16x1xf32>
      %90 = vector.broadcast %89 : vector<16x1xf32> to vector<16x16xf32>
      %91 = arith.divf %87, %90 : vector<16x16xf32>
      %cst_60 = arith.constant dense<0.000000e+00> : vector<16x8xf32>
      %92 = tpu.matmul %91, %78, %cst_60 {dimension_numbers = #tpu.dot_dimension_numbers<[1], [0], [0], [1], [0, 0, 1, 1], [], []>} : vector<16x16xf32>, vector<16x8xf32>, vector<16x8xf32> -> vector<16x8xf32>
      %93 = vector.extract_strided_slice %73 {offsets = [0, 8], sizes = [16, 8], strides = [1, 1]} : vector<16x32xf32> to vector<16x8xf32>
      %94 = vector.extract_strided_slice %74 {offsets = [0, 8], sizes = [16, 8], strides = [1, 1]} : vector<16x32xf32> to vector<16x8xf32>
      %95 = vector.extract_strided_slice %75 {offsets = [0, 8], sizes = [16, 8], strides = [1, 1]} : vector<16x32xf32> to vector<16x8xf32>
      %cst_61 = arith.constant dense<0.000000e+00> : vector<16x16xf32>
      %96 = tpu.matmul %93, %94, %cst_61 {dimension_numbers = #tpu.dot_dimension_numbers<[1], [1], [0], [0], [0, 0, 1, 0], [], []>} : vector<16x8xf32>, vector<16x8xf32>, vector<16x16xf32> -> vector<16x16xf32>
      %cst_62 = arith.constant 0.353553385 : f32
      %97 = vector.broadcast %cst_62 : f32 to vector<16x16xf32>
      %98 = arith.mulf %96, %97 : vector<16x16xf32>
      %99 = arith.addf %98, %23 : vector<16x16xf32>
      %cst_63 = arith.constant dense<0xFF800000> : vector<16xf32>
      %100 = vector.multi_reduction <maximumf>, %99, %cst_63 [1] : vector<16x16xf32> to vector<16xf32>
      %101 = vector.shape_cast %100 : vector<16xf32> to vector<16x1xf32>
      %102 = vector.broadcast %101 : vector<16x1xf32> to vector<16x16xf32>
      %103 = arith.subf %99, %102 : vector<16x16xf32>
      %104 = math.exp %103 : vector<16x16xf32>
      %cst_64 = arith.constant dense<0.000000e+00> : vector<16xf32>
      %105 = vector.multi_reduction <add>, %104, %cst_64 [1] : vector<16x16xf32> to vector<16xf32>
      %106 = vector.shape_cast %105 : vector<16xf32> to vector<16x1xf32>
      %107 = vector.broadcast %106 : vector<16x1xf32> to vector<16x16xf32>
      %108 = arith.divf %104, %107 : vector<16x16xf32>
      %cst_65 = arith.constant dense<0.000000e+00> : vector<16x8xf32>
      %109 = tpu.matmul %108, %95, %cst_65 {dimension_numbers = #tpu.dot_dimension_numbers<[1], [0], [0], [1], [0, 0, 1, 1], [], []>} : vector<16x16xf32>, vector<16x8xf32>, vector<16x8xf32> -> vector<16x8xf32>
      %110 = vector.extract_strided_slice %73 {offsets = [0, 16], sizes = [16, 8], strides = [1, 1]} : vector<16x32xf32> to vector<16x8xf32>
      %111 = vector.extract_strided_slice %74 {offsets = [0, 16], sizes = [16, 8], strides = [1, 1]} : vector<16x32xf32> to vector<16x8xf32>
      %112 = vector.extract_strided_slice %75 {offsets = [0, 16], sizes = [16, 8], strides = [1, 1]} : vector<16x32xf32> to vector<16x8xf32>
      %cst_66 = arith.constant dense<0.000000e+00> : vector<16x16xf32>
      %113 = tpu.matmul %110, %111, %cst_66 {dimension_numbers = #tpu.dot_dimension_numbers<[1], [1], [0], [0], [0, 0, 1, 0], [], []>} : vector<16x8xf32>, vector<16x8xf32>, vector<16x16xf32> -> vector<16x16xf32>
      %cst_67 = arith.constant 0.353553385 : f32
      %114 = vector.broadcast %cst_67 : f32 to vector<16x16xf32>
      %115 = arith.mulf %113, %114 : vector<16x16xf32>
      %116 = arith.addf %115, %23 : vector<16x16xf32>
      %cst_68 = arith.constant dense<0xFF800000> : vector<16xf32>
      %117 = vector.multi_reduction <maximumf>, %116, %cst_68 [1] : vector<16x16xf32> to vector<16xf32>
      %118 = vector.shape_cast %117 : vector<16xf32> to vector<16x1xf32>
      %119 = vector.broadcast %118 : vector<16x1xf32> to vector<16x16xf32>
      %120 = arith.subf %116, %119 : vector<16x16xf32>
      %121 = math.exp %120 : vector<16x16xf32>
      %cst_69 = arith.constant dense<0.000000e+00> : vector<16xf32>
      %122 = vector.multi_reduction <add>, %121, %cst_69 [1] : vector<16x16xf32> to vector<16xf32>
      %123 = vector.shape_cast %122 : vector<16xf32> to vector<16x1xf32>
      %124 = vector.broadcast %123 : vector<16x1xf32> to vector<16x16xf32>
      %125 = arith.divf %121, %124 : vector<16x16xf32>
      %cst_70 = arith.constant dense<0.000000e+00> : vector<16x8xf32>
      %126 = tpu.matmul %125, %112, %cst_70 {dimension_numbers = #tpu.dot_dimension_numbers<[1], [0], [0], [1], [0, 0, 1, 1], [], []>} : vector<16x16xf32>, vector<16x8xf32>, vector<16x8xf32> -> vector<16x8xf32>
      %127 = vector.extract_strided_slice %73 {offsets = [0, 24], sizes = [16, 8], strides = [1, 1]} : vector<16x32xf32> to vector<16x8xf32>
      %128 = vector.extract_strided_slice %74 {offsets = [0, 24], sizes = [16, 8], strides = [1, 1]} : vector<16x32xf32> to vector<16x8xf32>
      %129 = vector.extract_strided_slice %75 {offsets = [0, 24], sizes = [16, 8], strides = [1, 1]} : vector<16x32xf32> to vector<16x8xf32>
      %cst_71 = arith.constant dense<0.000000e+00> : vector<16x16xf32>
      %130 = tpu.matmul %127, %128, %cst_71 {dimension_numbers = #tpu.dot_dimension_numbers<[1], [1], [0], [0], [0, 0, 1, 0], [], []>} : vector<16x8xf32>, vector<16x8xf32>, vector<16x16xf32> -> vector<16x16xf32>
      %cst_72 = arith.constant 0.353553385 : f32
      %131 = vector.broadcast %cst_72 : f32 to vector<16x16xf32>
      %132 = arith.mulf %130, %131 : vector<16x16xf32>
      %133 = arith.addf %132, %23 : vector<16x16xf32>
      %cst_73 = arith.constant dense<0xFF800000> : vector<16xf32>
      %134 = vector.multi_reduction <maximumf>, %133, %cst_73 [1] : vector<16x16xf32> to vector<16xf32>
      %135 = vector.shape_cast %134 : vector<16xf32> to vector<16x1xf32>
      %136 = vector.broadcast %135 : vector<16x1xf32> to vector<16x16xf32>
      %137 = arith.subf %133, %136 : vector<16x16xf32>
      %138 = math.exp %137 : vector<16x16xf32>
      %cst_74 = arith.constant dense<0.000000e+00> : vector<16xf32>
      %139 = vector.multi_reduction <add>, %138, %cst_74 [1] : vector<16x16xf32> to vector<16xf32>
      %140 = vector.shape_cast %139 : vector<16xf32> to vector<16x1xf32>
      %141 = vector.broadcast %140 : vector<16x1xf32> to vector<16x16xf32>
      %142 = arith.divf %138, %141 : vector<16x16xf32>
      %cst_75 = arith.constant dense<0.000000e+00> : vector<16x8xf32>
      %143 = tpu.matmul %142, %129, %cst_75 {dimension_numbers = #tpu.dot_dimension_numbers<[1], [0], [0], [1], [0, 0, 1, 1], [], []>} : vector<16x16xf32>, vector<16x8xf32>, vector<16x8xf32> -> vector<16x8xf32>
      %144 = tpu.concatenate %92, %109, %126, %143 in 1 : vector<16x8xf32>, vector<16x8xf32>, vector<16x8xf32>, vector<16x8xf32> -> vector<16x32xf32>
      %c0_76 = arith.constant 0 : index
      %c0_77 = arith.constant 0 : index
      %c0_78 = arith.constant 0 : index
      %145 = vector.load %arg12[%c0_76, %c0_77, %c0_78] : memref<2x32x32xf32, #tpu.memory_space<vmem>>, vector<1x32x32xf32>
      %146 = vector.shape_cast %145 : vector<1x32x32xf32> to vector<32x32xf32>
      %cst_79 = arith.constant dense<0.000000e+00> : vector<16x32xf32>
      %147 = tpu.matmul %144, %146, %cst_79 {dimension_numbers = #tpu.dot_dimension_numbers<[1], [0], [0], [1], [0, 0, 1, 1], [], []>} : vector<16x32xf32>, vector<32x32xf32>, vector<16x32xf32> -> vector<16x32xf32>
      %148 = arith.addf %39, %147 : vector<16x32xf32>
      %c0_80 = arith.constant 0 : index
      %c0_81 = arith.constant 0 : index
      %c0_82 = arith.constant 0 : index
      %149 = vector.load %arg13[%c0_80, %c0_81, %c0_82] : memref<2x1x32xf32, #tpu.memory_space<vmem>>, vector<1x1x32xf32>
      %150 = vector.shape_cast %149 : vector<1x1x32xf32> to vector<1x32xf32>
      %151 = vector.broadcast %150 : vector<1x32xf32> to vector<16x32xf32>
      %152 = arith.addf %148, %151 : vector<16x32xf32>
      %c0_83 = arith.constant 0 : index
      %c0_84 = arith.constant 0 : index
      %c0_85 = arith.constant 0 : index
      %153 = vector.load %arg14[%c0_83, %c0_84, %c0_85] : memref<2x1x32xf32, #tpu.memory_space<vmem>>, vector<1x1x32xf32>
      %154 = vector.shape_cast %153 : vector<1x1x32xf32> to vector<1x32xf32>
      %c0_86 = arith.constant 0 : index
      %c0_87 = arith.constant 0 : index
      %c0_88 = arith.constant 0 : index
      %155 = vector.load %arg15[%c0_86, %c0_87, %c0_88] : memref<2x1x32xf32, #tpu.memory_space<vmem>>, vector<1x1x32xf32>
      %156 = vector.shape_cast %155 : vector<1x1x32xf32> to vector<1x32xf32>
      %cst_89 = arith.constant dense<0.000000e+00> : vector<16xf32>
      %157 = vector.multi_reduction <add>, %152, %cst_89 [1] : vector<16x32xf32> to vector<16xf32>
      %158 = vector.shape_cast %157 : vector<16xf32> to vector<16x1xf32>
      %cst_90 = arith.constant 3.200000e+01 : f32
      %159 = vector.broadcast %cst_90 : f32 to vector<16x1xf32>
      %160 = arith.divf %158, %159 : vector<16x1xf32>
      %161 = vector.broadcast %160 : vector<16x1xf32> to vector<16x32xf32>
      %162 = arith.subf %152, %161 : vector<16x32xf32>
      %163 = arith.mulf %162, %162 : vector<16x32xf32>
      %cst_91 = arith.constant dense<0.000000e+00> : vector<16xf32>
      %164 = vector.multi_reduction <add>, %163, %cst_91 [1] : vector<16x32xf32> to vector<16xf32>
      %165 = vector.shape_cast %164 : vector<16xf32> to vector<16x1xf32>
      %cst_92 = arith.constant 3.200000e+01 : f32
      %166 = vector.broadcast %cst_92 : f32 to vector<16x1xf32>
      %167 = arith.divf %165, %166 : vector<16x1xf32>
      %168 = vector.broadcast %160 : vector<16x1xf32> to vector<16x32xf32>
      %169 = arith.subf %152, %168 : vector<16x32xf32>
      %cst_93 = arith.constant 9.99999974E-6 : f32
      %170 = vector.broadcast %cst_93 : f32 to vector<16x1xf32>
      %171 = arith.addf %167, %170 : vector<16x1xf32>
      %172 = math.rsqrt %171 : vector<16x1xf32>
      %173 = vector.broadcast %172 : vector<16x1xf32> to vector<16x32xf32>
      %174 = arith.mulf %169, %173 : vector<16x32xf32>
      %175 = vector.broadcast %154 : vector<1x32xf32> to vector<16x32xf32>
      %176 = arith.mulf %174, %175 : vector<16x32xf32>
      %177 = vector.broadcast %156 : vector<1x32xf32> to vector<16x32xf32>
      %178 = arith.addf %176, %177 : vector<16x32xf32>
      %c0_94 = arith.constant 0 : index
      %c0_95 = arith.constant 0 : index
      %c0_96 = arith.constant 0 : index
      %179 = vector.load %arg16[%c0_94, %c0_95, %c0_96] : memref<2x32x32xf32, #tpu.memory_space<vmem>>, vector<1x32x32xf32>
      %180 = vector.shape_cast %179 : vector<1x32x32xf32> to vector<32x32xf32>
      %cst_97 = arith.constant dense<0.000000e+00> : vector<16x32xf32>
      %181 = tpu.matmul %178, %180, %cst_97 {dimension_numbers = #tpu.dot_dimension_numbers<[1], [0], [0], [1], [0, 0, 1, 1], [], []>} : vector<16x32xf32>, vector<32x32xf32>, vector<16x32xf32> -> vector<16x32xf32>
      %c0_98 = arith.constant 0 : index
      %c0_99 = arith.constant 0 : index
      %c0_100 = arith.constant 0 : index
      %182 = vector.load %arg17[%c0_98, %c0_99, %c0_100] : memref<2x1x32xf32, #tpu.memory_space<vmem>>, vector<1x1x32xf32>
      %183 = vector.shape_cast %182 : vector<1x1x32xf32> to vector<1x32xf32>
      %184 = vector.broadcast %183 : vector<1x32xf32> to vector<16x32xf32>
      %185 = arith.addf %181, %184 : vector<16x32xf32>
      %c0_101 = arith.constant 0 : index
      %c0_102 = arith.constant 0 : index
      %c0_103 = arith.constant 0 : index
      %186 = vector.load %arg31[%c0_101, %c0_102, %c0_103] : memref<2x16x64xf32, #tpu.memory_space<vmem>>, vector<1x16x64xf32>
      %187 = vector.shape_cast %186 : vector<1x16x64xf32> to vector<16x64xf32>
      %188 = vector.extract_strided_slice %187 {offsets = [0, 0], sizes = [16, 32], strides = [1, 1]} : vector<16x64xf32> to vector<16x32xf32>
      %189 = vector.extract_strided_slice %187 {offsets = [0, 32], sizes = [16, 32], strides = [1, 1]} : vector<16x64xf32> to vector<16x32xf32>
      %190 = vector.extract_strided_slice %185 {offsets = [0, 0], sizes = [16, 8], strides = [1, 1]} : vector<16x32xf32> to vector<16x8xf32>
      %191 = vector.extract_strided_slice %188 {offsets = [0, 0], sizes = [16, 8], strides = [1, 1]} : vector<16x32xf32> to vector<16x8xf32>
      %192 = vector.extract_strided_slice %189 {offsets = [0, 0], sizes = [16, 8], strides = [1, 1]} : vector<16x32xf32> to vector<16x8xf32>
      %cst_104 = arith.constant dense<0.000000e+00> : vector<16x16xf32>
      %193 = tpu.matmul %190, %191, %cst_104 {dimension_numbers = #tpu.dot_dimension_numbers<[1], [1], [0], [0], [0, 0, 1, 0], [], []>} : vector<16x8xf32>, vector<16x8xf32>, vector<16x16xf32> -> vector<16x16xf32>
      %cst_105 = arith.constant 0.353553385 : f32
      %194 = vector.broadcast %cst_105 : f32 to vector<16x16xf32>
      %195 = arith.mulf %193, %194 : vector<16x16xf32>
      %196 = arith.addf %195, %24 : vector<16x16xf32>
      %cst_106 = arith.constant dense<0xFF800000> : vector<16xf32>
      %197 = vector.multi_reduction <maximumf>, %196, %cst_106 [1] : vector<16x16xf32> to vector<16xf32>
      %198 = vector.shape_cast %197 : vector<16xf32> to vector<16x1xf32>
      %199 = vector.broadcast %198 : vector<16x1xf32> to vector<16x16xf32>
      %200 = arith.subf %196, %199 : vector<16x16xf32>
      %201 = math.exp %200 : vector<16x16xf32>
      %cst_107 = arith.constant dense<0.000000e+00> : vector<16xf32>
      %202 = vector.multi_reduction <add>, %201, %cst_107 [1] : vector<16x16xf32> to vector<16xf32>
      %203 = vector.shape_cast %202 : vector<16xf32> to vector<16x1xf32>
      %204 = vector.broadcast %203 : vector<16x1xf32> to vector<16x16xf32>
      %205 = arith.divf %201, %204 : vector<16x16xf32>
      %cst_108 = arith.constant dense<0.000000e+00> : vector<16x8xf32>
      %206 = tpu.matmul %205, %192, %cst_108 {dimension_numbers = #tpu.dot_dimension_numbers<[1], [0], [0], [1], [0, 0, 1, 1], [], []>} : vector<16x16xf32>, vector<16x8xf32>, vector<16x8xf32> -> vector<16x8xf32>
      %207 = vector.extract_strided_slice %185 {offsets = [0, 8], sizes = [16, 8], strides = [1, 1]} : vector<16x32xf32> to vector<16x8xf32>
      %208 = vector.extract_strided_slice %188 {offsets = [0, 8], sizes = [16, 8], strides = [1, 1]} : vector<16x32xf32> to vector<16x8xf32>
      %209 = vector.extract_strided_slice %189 {offsets = [0, 8], sizes = [16, 8], strides = [1, 1]} : vector<16x32xf32> to vector<16x8xf32>
      %cst_109 = arith.constant dense<0.000000e+00> : vector<16x16xf32>
      %210 = tpu.matmul %207, %208, %cst_109 {dimension_numbers = #tpu.dot_dimension_numbers<[1], [1], [0], [0], [0, 0, 1, 0], [], []>} : vector<16x8xf32>, vector<16x8xf32>, vector<16x16xf32> -> vector<16x16xf32>
      %cst_110 = arith.constant 0.353553385 : f32
      %211 = vector.broadcast %cst_110 : f32 to vector<16x16xf32>
      %212 = arith.mulf %210, %211 : vector<16x16xf32>
      %213 = arith.addf %212, %24 : vector<16x16xf32>
      %cst_111 = arith.constant dense<0xFF800000> : vector<16xf32>
      %214 = vector.multi_reduction <maximumf>, %213, %cst_111 [1] : vector<16x16xf32> to vector<16xf32>
      %215 = vector.shape_cast %214 : vector<16xf32> to vector<16x1xf32>
      %216 = vector.broadcast %215 : vector<16x1xf32> to vector<16x16xf32>
      %217 = arith.subf %213, %216 : vector<16x16xf32>
      %218 = math.exp %217 : vector<16x16xf32>
      %cst_112 = arith.constant dense<0.000000e+00> : vector<16xf32>
      %219 = vector.multi_reduction <add>, %218, %cst_112 [1] : vector<16x16xf32> to vector<16xf32>
      %220 = vector.shape_cast %219 : vector<16xf32> to vector<16x1xf32>
      %221 = vector.broadcast %220 : vector<16x1xf32> to vector<16x16xf32>
      %222 = arith.divf %218, %221 : vector<16x16xf32>
      %cst_113 = arith.constant dense<0.000000e+00> : vector<16x8xf32>
      %223 = tpu.matmul %222, %209, %cst_113 {dimension_numbers = #tpu.dot_dimension_numbers<[1], [0], [0], [1], [0, 0, 1, 1], [], []>} : vector<16x16xf32>, vector<16x8xf32>, vector<16x8xf32> -> vector<16x8xf32>
      %224 = vector.extract_strided_slice %185 {offsets = [0, 16], sizes = [16, 8], strides = [1, 1]} : vector<16x32xf32> to vector<16x8xf32>
      %225 = vector.extract_strided_slice %188 {offsets = [0, 16], sizes = [16, 8], strides = [1, 1]} : vector<16x32xf32> to vector<16x8xf32>
      %226 = vector.extract_strided_slice %189 {offsets = [0, 16], sizes = [16, 8], strides = [1, 1]} : vector<16x32xf32> to vector<16x8xf32>
      %cst_114 = arith.constant dense<0.000000e+00> : vector<16x16xf32>
      %227 = tpu.matmul %224, %225, %cst_114 {dimension_numbers = #tpu.dot_dimension_numbers<[1], [1], [0], [0], [0, 0, 1, 0], [], []>} : vector<16x8xf32>, vector<16x8xf32>, vector<16x16xf32> -> vector<16x16xf32>
      %cst_115 = arith.constant 0.353553385 : f32
      %228 = vector.broadcast %cst_115 : f32 to vector<16x16xf32>
      %229 = arith.mulf %227, %228 : vector<16x16xf32>
      %230 = arith.addf %229, %24 : vector<16x16xf32>
      %cst_116 = arith.constant dense<0xFF800000> : vector<16xf32>
      %231 = vector.multi_reduction <maximumf>, %230, %cst_116 [1] : vector<16x16xf32> to vector<16xf32>
      %232 = vector.shape_cast %231 : vector<16xf32> to vector<16x1xf32>
      %233 = vector.broadcast %232 : vector<16x1xf32> to vector<16x16xf32>
      %234 = arith.subf %230, %233 : vector<16x16xf32>
      %235 = math.exp %234 : vector<16x16xf32>
      %cst_117 = arith.constant dense<0.000000e+00> : vector<16xf32>
      %236 = vector.multi_reduction <add>, %235, %cst_117 [1] : vector<16x16xf32> to vector<16xf32>
      %237 = vector.shape_cast %236 : vector<16xf32> to vector<16x1xf32>
      %238 = vector.broadcast %237 : vector<16x1xf32> to vector<16x16xf32>
      %239 = arith.divf %235, %238 : vector<16x16xf32>
      %cst_118 = arith.constant dense<0.000000e+00> : vector<16x8xf32>
      %240 = tpu.matmul %239, %226, %cst_118 {dimension_numbers = #tpu.dot_dimension_numbers<[1], [0], [0], [1], [0, 0, 1, 1], [], []>} : vector<16x16xf32>, vector<16x8xf32>, vector<16x8xf32> -> vector<16x8xf32>
      %241 = vector.extract_strided_slice %185 {offsets = [0, 24], sizes = [16, 8], strides = [1, 1]} : vector<16x32xf32> to vector<16x8xf32>
      %242 = vector.extract_strided_slice %188 {offsets = [0, 24], sizes = [16, 8], strides = [1, 1]} : vector<16x32xf32> to vector<16x8xf32>
      %243 = vector.extract_strided_slice %189 {offsets = [0, 24], sizes = [16, 8], strides = [1, 1]} : vector<16x32xf32> to vector<16x8xf32>
      %cst_119 = arith.constant dense<0.000000e+00> : vector<16x16xf32>
      %244 = tpu.matmul %241, %242, %cst_119 {dimension_numbers = #tpu.dot_dimension_numbers<[1], [1], [0], [0], [0, 0, 1, 0], [], []>} : vector<16x8xf32>, vector<16x8xf32>, vector<16x16xf32> -> vector<16x16xf32>
      %cst_120 = arith.constant 0.353553385 : f32
      %245 = vector.broadcast %cst_120 : f32 to vector<16x16xf32>
      %246 = arith.mulf %244, %245 : vector<16x16xf32>
      %247 = arith.addf %246, %24 : vector<16x16xf32>
      %cst_121 = arith.constant dense<0xFF800000> : vector<16xf32>
      %248 = vector.multi_reduction <maximumf>, %247, %cst_121 [1] : vector<16x16xf32> to vector<16xf32>
      %249 = vector.shape_cast %248 : vector<16xf32> to vector<16x1xf32>
      %250 = vector.broadcast %249 : vector<16x1xf32> to vector<16x16xf32>
      %251 = arith.subf %247, %250 : vector<16x16xf32>
      %252 = math.exp %251 : vector<16x16xf32>
      %cst_122 = arith.constant dense<0.000000e+00> : vector<16xf32>
      %253 = vector.multi_reduction <add>, %252, %cst_122 [1] : vector<16x16xf32> to vector<16xf32>
      %254 = vector.shape_cast %253 : vector<16xf32> to vector<16x1xf32>
      %255 = vector.broadcast %254 : vector<16x1xf32> to vector<16x16xf32>
      %256 = arith.divf %252, %255 : vector<16x16xf32>
      %cst_123 = arith.constant dense<0.000000e+00> : vector<16x8xf32>
      %257 = tpu.matmul %256, %243, %cst_123 {dimension_numbers = #tpu.dot_dimension_numbers<[1], [0], [0], [1], [0, 0, 1, 1], [], []>} : vector<16x16xf32>, vector<16x8xf32>, vector<16x8xf32> -> vector<16x8xf32>
      %258 = tpu.concatenate %206, %223, %240, %257 in 1 : vector<16x8xf32>, vector<16x8xf32>, vector<16x8xf32>, vector<16x8xf32> -> vector<16x32xf32>
      %c0_124 = arith.constant 0 : index
      %c0_125 = arith.constant 0 : index
      %c0_126 = arith.constant 0 : index
      %259 = vector.load %arg20[%c0_124, %c0_125, %c0_126] : memref<2x32x32xf32, #tpu.memory_space<vmem>>, vector<1x32x32xf32>
      %260 = vector.shape_cast %259 : vector<1x32x32xf32> to vector<32x32xf32>
      %cst_127 = arith.constant dense<0.000000e+00> : vector<16x32xf32>
      %261 = tpu.matmul %258, %260, %cst_127 {dimension_numbers = #tpu.dot_dimension_numbers<[1], [0], [0], [1], [0, 0, 1, 1], [], []>} : vector<16x32xf32>, vector<32x32xf32>, vector<16x32xf32> -> vector<16x32xf32>
      %262 = arith.addf %152, %261 : vector<16x32xf32>
      %c0_128 = arith.constant 0 : index
      %c0_129 = arith.constant 0 : index
      %c0_130 = arith.constant 0 : index
      %263 = vector.load %arg21[%c0_128, %c0_129, %c0_130] : memref<2x1x32xf32, #tpu.memory_space<vmem>>, vector<1x1x32xf32>
      %264 = vector.shape_cast %263 : vector<1x1x32xf32> to vector<1x32xf32>
      %265 = vector.broadcast %264 : vector<1x32xf32> to vector<16x32xf32>
      %266 = arith.addf %262, %265 : vector<16x32xf32>
      %c0_131 = arith.constant 0 : index
      %c0_132 = arith.constant 0 : index
      %c0_133 = arith.constant 0 : index
      %267 = vector.load %arg22[%c0_131, %c0_132, %c0_133] : memref<2x1x32xf32, #tpu.memory_space<vmem>>, vector<1x1x32xf32>
      %268 = vector.shape_cast %267 : vector<1x1x32xf32> to vector<1x32xf32>
      %c0_134 = arith.constant 0 : index
      %c0_135 = arith.constant 0 : index
      %c0_136 = arith.constant 0 : index
      %269 = vector.load %arg23[%c0_134, %c0_135, %c0_136] : memref<2x1x32xf32, #tpu.memory_space<vmem>>, vector<1x1x32xf32>
      %270 = vector.shape_cast %269 : vector<1x1x32xf32> to vector<1x32xf32>
      %cst_137 = arith.constant dense<0.000000e+00> : vector<16xf32>
      %271 = vector.multi_reduction <add>, %266, %cst_137 [1] : vector<16x32xf32> to vector<16xf32>
      %272 = vector.shape_cast %271 : vector<16xf32> to vector<16x1xf32>
      %cst_138 = arith.constant 3.200000e+01 : f32
      %273 = vector.broadcast %cst_138 : f32 to vector<16x1xf32>
      %274 = arith.divf %272, %273 : vector<16x1xf32>
      %275 = vector.broadcast %274 : vector<16x1xf32> to vector<16x32xf32>
      %276 = arith.subf %266, %275 : vector<16x32xf32>
      %277 = arith.mulf %276, %276 : vector<16x32xf32>
      %cst_139 = arith.constant dense<0.000000e+00> : vector<16xf32>
      %278 = vector.multi_reduction <add>, %277, %cst_139 [1] : vector<16x32xf32> to vector<16xf32>
      %279 = vector.shape_cast %278 : vector<16xf32> to vector<16x1xf32>
      %cst_140 = arith.constant 3.200000e+01 : f32
      %280 = vector.broadcast %cst_140 : f32 to vector<16x1xf32>
      %281 = arith.divf %279, %280 : vector<16x1xf32>
      %282 = vector.broadcast %274 : vector<16x1xf32> to vector<16x32xf32>
      %283 = arith.subf %266, %282 : vector<16x32xf32>
      %cst_141 = arith.constant 9.99999974E-6 : f32
      %284 = vector.broadcast %cst_141 : f32 to vector<16x1xf32>
      %285 = arith.addf %281, %284 : vector<16x1xf32>
      %286 = math.rsqrt %285 : vector<16x1xf32>
      %287 = vector.broadcast %286 : vector<16x1xf32> to vector<16x32xf32>
      %288 = arith.mulf %283, %287 : vector<16x32xf32>
      %289 = vector.broadcast %268 : vector<1x32xf32> to vector<16x32xf32>
      %290 = arith.mulf %288, %289 : vector<16x32xf32>
      %291 = vector.broadcast %270 : vector<1x32xf32> to vector<16x32xf32>
      %292 = arith.addf %290, %291 : vector<16x32xf32>
      %c0_142 = arith.constant 0 : index
      %c0_143 = arith.constant 0 : index
      %c0_144 = arith.constant 0 : index
      %293 = vector.load %arg24[%c0_142, %c0_143, %c0_144] : memref<2x32x64xf32, #tpu.memory_space<vmem>>, vector<1x32x64xf32>
      %294 = vector.shape_cast %293 : vector<1x32x64xf32> to vector<32x64xf32>
      %cst_145 = arith.constant dense<0.000000e+00> : vector<16x64xf32>
      %295 = tpu.matmul %292, %294, %cst_145 {dimension_numbers = #tpu.dot_dimension_numbers<[1], [0], [0], [1], [0, 0, 1, 1], [], []>} : vector<16x32xf32>, vector<32x64xf32>, vector<16x64xf32> -> vector<16x64xf32>
      %c0_146 = arith.constant 0 : index
      %c0_147 = arith.constant 0 : index
      %c0_148 = arith.constant 0 : index
      %296 = vector.load %arg25[%c0_146, %c0_147, %c0_148] : memref<2x1x64xf32, #tpu.memory_space<vmem>>, vector<1x1x64xf32>
      %297 = vector.shape_cast %296 : vector<1x1x64xf32> to vector<1x64xf32>
      %298 = vector.broadcast %297 : vector<1x64xf32> to vector<16x64xf32>
      %299 = arith.addf %295, %298 : vector<16x64xf32>
      %300 = arith.mulf %299, %299 : vector<16x64xf32>
      %301 = arith.mulf %299, %300 : vector<16x64xf32>
      %cst_149 = arith.constant 4.471500e-02 : f32
      %302 = vector.broadcast %cst_149 : f32 to vector<16x64xf32>
      %303 = arith.mulf %302, %301 : vector<16x64xf32>
      %304 = arith.addf %299, %303 : vector<16x64xf32>
      %cst_150 = arith.constant 0.797884583 : f32
      %305 = vector.broadcast %cst_150 : f32 to vector<16x64xf32>
      %306 = arith.mulf %305, %304 : vector<16x64xf32>
      %307 = math.tanh %306 : vector<16x64xf32>
      %cst_151 = arith.constant 1.000000e+00 : f32
      %308 = vector.broadcast %cst_151 : f32 to vector<16x64xf32>
      %309 = arith.addf %308, %307 : vector<16x64xf32>
      %cst_152 = arith.constant 5.000000e-01 : f32
      %310 = vector.broadcast %cst_152 : f32 to vector<16x64xf32>
      %311 = arith.mulf %310, %309 : vector<16x64xf32>
      %312 = arith.mulf %299, %311 : vector<16x64xf32>
      %c0_153 = arith.constant 0 : index
      %c0_154 = arith.constant 0 : index
      %c0_155 = arith.constant 0 : index
      %313 = vector.load %arg26[%c0_153, %c0_154, %c0_155] : memref<2x64x32xf32, #tpu.memory_space<vmem>>, vector<1x64x32xf32>
      %314 = vector.shape_cast %313 : vector<1x64x32xf32> to vector<64x32xf32>
      %cst_156 = arith.constant dense<0.000000e+00> : vector<16x32xf32>
      %315 = tpu.matmul %312, %314, %cst_156 {dimension_numbers = #tpu.dot_dimension_numbers<[1], [0], [0], [1], [0, 0, 1, 1], [], []>} : vector<16x64xf32>, vector<64x32xf32>, vector<16x32xf32> -> vector<16x32xf32>
      %316 = arith.addf %266, %315 : vector<16x32xf32>
      %c0_157 = arith.constant 0 : index
      %c0_158 = arith.constant 0 : index
      %c0_159 = arith.constant 0 : index
      %317 = vector.load %arg27[%c0_157, %c0_158, %c0_159] : memref<2x1x32xf32, #tpu.memory_space<vmem>>, vector<1x1x32xf32>
      %318 = vector.shape_cast %317 : vector<1x1x32xf32> to vector<1x32xf32>
      %319 = vector.broadcast %318 : vector<1x32xf32> to vector<16x32xf32>
      %320 = arith.addf %316, %319 : vector<16x32xf32>
      %c1_160 = arith.constant 1 : index
      %c0_161 = arith.constant 0 : index
      %c0_162 = arith.constant 0 : index
      %321 = vector.load %arg8[%c1_160, %c0_161, %c0_162] : memref<2x1x32xf32, #tpu.memory_space<vmem>>, vector<1x1x32xf32>
      %322 = vector.shape_cast %321 : vector<1x1x32xf32> to vector<1x32xf32>
      %c1_163 = arith.constant 1 : index
      %c0_164 = arith.constant 0 : index
      %c0_165 = arith.constant 0 : index
      %323 = vector.load %arg9[%c1_163, %c0_164, %c0_165] : memref<2x1x32xf32, #tpu.memory_space<vmem>>, vector<1x1x32xf32>
      %324 = vector.shape_cast %323 : vector<1x1x32xf32> to vector<1x32xf32>
      %cst_166 = arith.constant dense<0.000000e+00> : vector<16xf32>
      %325 = vector.multi_reduction <add>, %320, %cst_166 [1] : vector<16x32xf32> to vector<16xf32>
      %326 = vector.shape_cast %325 : vector<16xf32> to vector<16x1xf32>
      %cst_167 = arith.constant 3.200000e+01 : f32
      %327 = vector.broadcast %cst_167 : f32 to vector<16x1xf32>
      %328 = arith.divf %326, %327 : vector<16x1xf32>
      %329 = vector.broadcast %328 : vector<16x1xf32> to vector<16x32xf32>
      %330 = arith.subf %320, %329 : vector<16x32xf32>
      %331 = arith.mulf %330, %330 : vector<16x32xf32>
      %cst_168 = arith.constant dense<0.000000e+00> : vector<16xf32>
      %332 = vector.multi_reduction <add>, %331, %cst_168 [1] : vector<16x32xf32> to vector<16xf32>
      %333 = vector.shape_cast %332 : vector<16xf32> to vector<16x1xf32>
      %cst_169 = arith.constant 3.200000e+01 : f32
      %334 = vector.broadcast %cst_169 : f32 to vector<16x1xf32>
      %335 = arith.divf %333, %334 : vector<16x1xf32>
      %336 = vector.broadcast %328 : vector<16x1xf32> to vector<16x32xf32>
      %337 = arith.subf %320, %336 : vector<16x32xf32>
      %cst_170 = arith.constant 9.99999974E-6 : f32
      %338 = vector.broadcast %cst_170 : f32 to vector<16x1xf32>
      %339 = arith.addf %335, %338 : vector<16x1xf32>
      %340 = math.rsqrt %339 : vector<16x1xf32>
      %341 = vector.broadcast %340 : vector<16x1xf32> to vector<16x32xf32>
      %342 = arith.mulf %337, %341 : vector<16x32xf32>
      %343 = vector.broadcast %322 : vector<1x32xf32> to vector<16x32xf32>
      %344 = arith.mulf %342, %343 : vector<16x32xf32>
      %345 = vector.broadcast %324 : vector<1x32xf32> to vector<16x32xf32>
      %346 = arith.addf %344, %345 : vector<16x32xf32>
      %c1_171 = arith.constant 1 : index
      %c0_172 = arith.constant 0 : index
      %c0_173 = arith.constant 0 : index
      %347 = vector.load %arg10[%c1_171, %c0_172, %c0_173] : memref<2x32x96xf32, #tpu.memory_space<vmem>>, vector<1x32x96xf32>
      %348 = vector.shape_cast %347 : vector<1x32x96xf32> to vector<32x96xf32>
      %cst_174 = arith.constant dense<0.000000e+00> : vector<16x96xf32>
      %349 = tpu.matmul %346, %348, %cst_174 {dimension_numbers = #tpu.dot_dimension_numbers<[1], [0], [0], [1], [0, 0, 1, 1], [], []>} : vector<16x32xf32>, vector<32x96xf32>, vector<16x96xf32> -> vector<16x96xf32>
      %c1_175 = arith.constant 1 : index
      %c0_176 = arith.constant 0 : index
      %c0_177 = arith.constant 0 : index
      %350 = vector.load %arg11[%c1_175, %c0_176, %c0_177] : memref<2x1x96xf32, #tpu.memory_space<vmem>>, vector<1x1x96xf32>
      %351 = vector.shape_cast %350 : vector<1x1x96xf32> to vector<1x96xf32>
      %352 = vector.broadcast %351 : vector<1x96xf32> to vector<16x96xf32>
      %353 = arith.addf %349, %352 : vector<16x96xf32>
      %354 = vector.extract_strided_slice %353 {offsets = [0, 0], sizes = [16, 32], strides = [1, 1]} : vector<16x96xf32> to vector<16x32xf32>
      %355 = vector.extract_strided_slice %353 {offsets = [0, 32], sizes = [16, 32], strides = [1, 1]} : vector<16x96xf32> to vector<16x32xf32>
      %356 = vector.extract_strided_slice %353 {offsets = [0, 64], sizes = [16, 32], strides = [1, 1]} : vector<16x96xf32> to vector<16x32xf32>
      %357 = vector.extract_strided_slice %354 {offsets = [0, 0], sizes = [16, 8], strides = [1, 1]} : vector<16x32xf32> to vector<16x8xf32>
      %358 = vector.extract_strided_slice %355 {offsets = [0, 0], sizes = [16, 8], strides = [1, 1]} : vector<16x32xf32> to vector<16x8xf32>
      %359 = vector.extract_strided_slice %356 {offsets = [0, 0], sizes = [16, 8], strides = [1, 1]} : vector<16x32xf32> to vector<16x8xf32>
      %cst_178 = arith.constant dense<0.000000e+00> : vector<16x16xf32>
      %360 = tpu.matmul %357, %358, %cst_178 {dimension_numbers = #tpu.dot_dimension_numbers<[1], [1], [0], [0], [0, 0, 1, 0], [], []>} : vector<16x8xf32>, vector<16x8xf32>, vector<16x16xf32> -> vector<16x16xf32>
      %cst_179 = arith.constant 0.353553385 : f32
      %361 = vector.broadcast %cst_179 : f32 to vector<16x16xf32>
      %362 = arith.mulf %360, %361 : vector<16x16xf32>
      %363 = arith.addf %362, %23 : vector<16x16xf32>
      %cst_180 = arith.constant dense<0xFF800000> : vector<16xf32>
      %364 = vector.multi_reduction <maximumf>, %363, %cst_180 [1] : vector<16x16xf32> to vector<16xf32>
      %365 = vector.shape_cast %364 : vector<16xf32> to vector<16x1xf32>
      %366 = vector.broadcast %365 : vector<16x1xf32> to vector<16x16xf32>
      %367 = arith.subf %363, %366 : vector<16x16xf32>
      %368 = math.exp %367 : vector<16x16xf32>
      %cst_181 = arith.constant dense<0.000000e+00> : vector<16xf32>
      %369 = vector.multi_reduction <add>, %368, %cst_181 [1] : vector<16x16xf32> to vector<16xf32>
      %370 = vector.shape_cast %369 : vector<16xf32> to vector<16x1xf32>
      %371 = vector.broadcast %370 : vector<16x1xf32> to vector<16x16xf32>
      %372 = arith.divf %368, %371 : vector<16x16xf32>
      %cst_182 = arith.constant dense<0.000000e+00> : vector<16x8xf32>
      %373 = tpu.matmul %372, %359, %cst_182 {dimension_numbers = #tpu.dot_dimension_numbers<[1], [0], [0], [1], [0, 0, 1, 1], [], []>} : vector<16x16xf32>, vector<16x8xf32>, vector<16x8xf32> -> vector<16x8xf32>
      %374 = vector.extract_strided_slice %354 {offsets = [0, 8], sizes = [16, 8], strides = [1, 1]} : vector<16x32xf32> to vector<16x8xf32>
      %375 = vector.extract_strided_slice %355 {offsets = [0, 8], sizes = [16, 8], strides = [1, 1]} : vector<16x32xf32> to vector<16x8xf32>
      %376 = vector.extract_strided_slice %356 {offsets = [0, 8], sizes = [16, 8], strides = [1, 1]} : vector<16x32xf32> to vector<16x8xf32>
      %cst_183 = arith.constant dense<0.000000e+00> : vector<16x16xf32>
      %377 = tpu.matmul %374, %375, %cst_183 {dimension_numbers = #tpu.dot_dimension_numbers<[1], [1], [0], [0], [0, 0, 1, 0], [], []>} : vector<16x8xf32>, vector<16x8xf32>, vector<16x16xf32> -> vector<16x16xf32>
      %cst_184 = arith.constant 0.353553385 : f32
      %378 = vector.broadcast %cst_184 : f32 to vector<16x16xf32>
      %379 = arith.mulf %377, %378 : vector<16x16xf32>
      %380 = arith.addf %379, %23 : vector<16x16xf32>
      %cst_185 = arith.constant dense<0xFF800000> : vector<16xf32>
      %381 = vector.multi_reduction <maximumf>, %380, %cst_185 [1] : vector<16x16xf32> to vector<16xf32>
      %382 = vector.shape_cast %381 : vector<16xf32> to vector<16x1xf32>
      %383 = vector.broadcast %382 : vector<16x1xf32> to vector<16x16xf32>
      %384 = arith.subf %380, %383 : vector<16x16xf32>
      %385 = math.exp %384 : vector<16x16xf32>
      %cst_186 = arith.constant dense<0.000000e+00> : vector<16xf32>
      %386 = vector.multi_reduction <add>, %385, %cst_186 [1] : vector<16x16xf32> to vector<16xf32>
      %387 = vector.shape_cast %386 : vector<16xf32> to vector<16x1xf32>
      %388 = vector.broadcast %387 : vector<16x1xf32> to vector<16x16xf32>
      %389 = arith.divf %385, %388 : vector<16x16xf32>
      %cst_187 = arith.constant dense<0.000000e+00> : vector<16x8xf32>
      %390 = tpu.matmul %389, %376, %cst_187 {dimension_numbers = #tpu.dot_dimension_numbers<[1], [0], [0], [1], [0, 0, 1, 1], [], []>} : vector<16x16xf32>, vector<16x8xf32>, vector<16x8xf32> -> vector<16x8xf32>
      %391 = vector.extract_strided_slice %354 {offsets = [0, 16], sizes = [16, 8], strides = [1, 1]} : vector<16x32xf32> to vector<16x8xf32>
      %392 = vector.extract_strided_slice %355 {offsets = [0, 16], sizes = [16, 8], strides = [1, 1]} : vector<16x32xf32> to vector<16x8xf32>
      %393 = vector.extract_strided_slice %356 {offsets = [0, 16], sizes = [16, 8], strides = [1, 1]} : vector<16x32xf32> to vector<16x8xf32>
      %cst_188 = arith.constant dense<0.000000e+00> : vector<16x16xf32>
      %394 = tpu.matmul %391, %392, %cst_188 {dimension_numbers = #tpu.dot_dimension_numbers<[1], [1], [0], [0], [0, 0, 1, 0], [], []>} : vector<16x8xf32>, vector<16x8xf32>, vector<16x16xf32> -> vector<16x16xf32>
      %cst_189 = arith.constant 0.353553385 : f32
      %395 = vector.broadcast %cst_189 : f32 to vector<16x16xf32>
      %396 = arith.mulf %394, %395 : vector<16x16xf32>
      %397 = arith.addf %396, %23 : vector<16x16xf32>
      %cst_190 = arith.constant dense<0xFF800000> : vector<16xf32>
      %398 = vector.multi_reduction <maximumf>, %397, %cst_190 [1] : vector<16x16xf32> to vector<16xf32>
      %399 = vector.shape_cast %398 : vector<16xf32> to vector<16x1xf32>
      %400 = vector.broadcast %399 : vector<16x1xf32> to vector<16x16xf32>
      %401 = arith.subf %397, %400 : vector<16x16xf32>
      %402 = math.exp %401 : vector<16x16xf32>
      %cst_191 = arith.constant dense<0.000000e+00> : vector<16xf32>
      %403 = vector.multi_reduction <add>, %402, %cst_191 [1] : vector<16x16xf32> to vector<16xf32>
      %404 = vector.shape_cast %403 : vector<16xf32> to vector<16x1xf32>
      %405 = vector.broadcast %404 : vector<16x1xf32> to vector<16x16xf32>
      %406 = arith.divf %402, %405 : vector<16x16xf32>
      %cst_192 = arith.constant dense<0.000000e+00> : vector<16x8xf32>
      %407 = tpu.matmul %406, %393, %cst_192 {dimension_numbers = #tpu.dot_dimension_numbers<[1], [0], [0], [1], [0, 0, 1, 1], [], []>} : vector<16x16xf32>, vector<16x8xf32>, vector<16x8xf32> -> vector<16x8xf32>
      %408 = vector.extract_strided_slice %354 {offsets = [0, 24], sizes = [16, 8], strides = [1, 1]} : vector<16x32xf32> to vector<16x8xf32>
      %409 = vector.extract_strided_slice %355 {offsets = [0, 24], sizes = [16, 8], strides = [1, 1]} : vector<16x32xf32> to vector<16x8xf32>
      %410 = vector.extract_strided_slice %356 {offsets = [0, 24], sizes = [16, 8], strides = [1, 1]} : vector<16x32xf32> to vector<16x8xf32>
      %cst_193 = arith.constant dense<0.000000e+00> : vector<16x16xf32>
      %411 = tpu.matmul %408, %409, %cst_193 {dimension_numbers = #tpu.dot_dimension_numbers<[1], [1], [0], [0], [0, 0, 1, 0], [], []>} : vector<16x8xf32>, vector<16x8xf32>, vector<16x16xf32> -> vector<16x16xf32>
      %cst_194 = arith.constant 0.353553385 : f32
      %412 = vector.broadcast %cst_194 : f32 to vector<16x16xf32>
      %413 = arith.mulf %411, %412 : vector<16x16xf32>
      %414 = arith.addf %413, %23 : vector<16x16xf32>
      %cst_195 = arith.constant dense<0xFF800000> : vector<16xf32>
      %415 = vector.multi_reduction <maximumf>, %414, %cst_195 [1] : vector<16x16xf32> to vector<16xf32>
      %416 = vector.shape_cast %415 : vector<16xf32> to vector<16x1xf32>
      %417 = vector.broadcast %416 : vector<16x1xf32> to vector<16x16xf32>
      %418 = arith.subf %414, %417 : vector<16x16xf32>
      %419 = math.exp %418 : vector<16x16xf32>
      %cst_196 = arith.constant dense<0.000000e+00> : vector<16xf32>
      %420 = vector.multi_reduction <add>, %419, %cst_196 [1] : vector<16x16xf32> to vector<16xf32>
      %421 = vector.shape_cast %420 : vector<16xf32> to vector<16x1xf32>
      %422 = vector.broadcast %421 : vector<16x1xf32> to vector<16x16xf32>
      %423 = arith.divf %419, %422 : vector<16x16xf32>
      %cst_197 = arith.constant dense<0.000000e+00> : vector<16x8xf32>
      %424 = tpu.matmul %423, %410, %cst_197 {dimension_numbers = #tpu.dot_dimension_numbers<[1], [0], [0], [1], [0, 0, 1, 1], [], []>} : vector<16x16xf32>, vector<16x8xf32>, vector<16x8xf32> -> vector<16x8xf32>
      %425 = tpu.concatenate %373, %390, %407, %424 in 1 : vector<16x8xf32>, vector<16x8xf32>, vector<16x8xf32>, vector<16x8xf32> -> vector<16x32xf32>
      %c1_198 = arith.constant 1 : index
      %c0_199 = arith.constant 0 : index
      %c0_200 = arith.constant 0 : index
      %426 = vector.load %arg12[%c1_198, %c0_199, %c0_200] : memref<2x32x32xf32, #tpu.memory_space<vmem>>, vector<1x32x32xf32>
      %427 = vector.shape_cast %426 : vector<1x32x32xf32> to vector<32x32xf32>
      %cst_201 = arith.constant dense<0.000000e+00> : vector<16x32xf32>
      %428 = tpu.matmul %425, %427, %cst_201 {dimension_numbers = #tpu.dot_dimension_numbers<[1], [0], [0], [1], [0, 0, 1, 1], [], []>} : vector<16x32xf32>, vector<32x32xf32>, vector<16x32xf32> -> vector<16x32xf32>
      %429 = arith.addf %320, %428 : vector<16x32xf32>
      %c1_202 = arith.constant 1 : index
      %c0_203 = arith.constant 0 : index
      %c0_204 = arith.constant 0 : index
      %430 = vector.load %arg13[%c1_202, %c0_203, %c0_204] : memref<2x1x32xf32, #tpu.memory_space<vmem>>, vector<1x1x32xf32>
      %431 = vector.shape_cast %430 : vector<1x1x32xf32> to vector<1x32xf32>
      %432 = vector.broadcast %431 : vector<1x32xf32> to vector<16x32xf32>
      %433 = arith.addf %429, %432 : vector<16x32xf32>
      %c1_205 = arith.constant 1 : index
      %c0_206 = arith.constant 0 : index
      %c0_207 = arith.constant 0 : index
      %434 = vector.load %arg14[%c1_205, %c0_206, %c0_207] : memref<2x1x32xf32, #tpu.memory_space<vmem>>, vector<1x1x32xf32>
      %435 = vector.shape_cast %434 : vector<1x1x32xf32> to vector<1x32xf32>
      %c1_208 = arith.constant 1 : index
      %c0_209 = arith.constant 0 : index
      %c0_210 = arith.constant 0 : index
      %436 = vector.load %arg15[%c1_208, %c0_209, %c0_210] : memref<2x1x32xf32, #tpu.memory_space<vmem>>, vector<1x1x32xf32>
      %437 = vector.shape_cast %436 : vector<1x1x32xf32> to vector<1x32xf32>
      %cst_211 = arith.constant dense<0.000000e+00> : vector<16xf32>
      %438 = vector.multi_reduction <add>, %433, %cst_211 [1] : vector<16x32xf32> to vector<16xf32>
      %439 = vector.shape_cast %438 : vector<16xf32> to vector<16x1xf32>
      %cst_212 = arith.constant 3.200000e+01 : f32
      %440 = vector.broadcast %cst_212 : f32 to vector<16x1xf32>
      %441 = arith.divf %439, %440 : vector<16x1xf32>
      %442 = vector.broadcast %441 : vector<16x1xf32> to vector<16x32xf32>
      %443 = arith.subf %433, %442 : vector<16x32xf32>
      %444 = arith.mulf %443, %443 : vector<16x32xf32>
      %cst_213 = arith.constant dense<0.000000e+00> : vector<16xf32>
      %445 = vector.multi_reduction <add>, %444, %cst_213 [1] : vector<16x32xf32> to vector<16xf32>
      %446 = vector.shape_cast %445 : vector<16xf32> to vector<16x1xf32>
      %cst_214 = arith.constant 3.200000e+01 : f32
      %447 = vector.broadcast %cst_214 : f32 to vector<16x1xf32>
      %448 = arith.divf %446, %447 : vector<16x1xf32>
      %449 = vector.broadcast %441 : vector<16x1xf32> to vector<16x32xf32>
      %450 = arith.subf %433, %449 : vector<16x32xf32>
      %cst_215 = arith.constant 9.99999974E-6 : f32
      %451 = vector.broadcast %cst_215 : f32 to vector<16x1xf32>
      %452 = arith.addf %448, %451 : vector<16x1xf32>
      %453 = math.rsqrt %452 : vector<16x1xf32>
      %454 = vector.broadcast %453 : vector<16x1xf32> to vector<16x32xf32>
      %455 = arith.mulf %450, %454 : vector<16x32xf32>
      %456 = vector.broadcast %435 : vector<1x32xf32> to vector<16x32xf32>
      %457 = arith.mulf %455, %456 : vector<16x32xf32>
      %458 = vector.broadcast %437 : vector<1x32xf32> to vector<16x32xf32>
      %459 = arith.addf %457, %458 : vector<16x32xf32>
      %c1_216 = arith.constant 1 : index
      %c0_217 = arith.constant 0 : index
      %c0_218 = arith.constant 0 : index
      %460 = vector.load %arg16[%c1_216, %c0_217, %c0_218] : memref<2x32x32xf32, #tpu.memory_space<vmem>>, vector<1x32x32xf32>
      %461 = vector.shape_cast %460 : vector<1x32x32xf32> to vector<32x32xf32>
      %cst_219 = arith.constant dense<0.000000e+00> : vector<16x32xf32>
      %462 = tpu.matmul %459, %461, %cst_219 {dimension_numbers = #tpu.dot_dimension_numbers<[1], [0], [0], [1], [0, 0, 1, 1], [], []>} : vector<16x32xf32>, vector<32x32xf32>, vector<16x32xf32> -> vector<16x32xf32>
      %c1_220 = arith.constant 1 : index
      %c0_221 = arith.constant 0 : index
      %c0_222 = arith.constant 0 : index
      %463 = vector.load %arg17[%c1_220, %c0_221, %c0_222] : memref<2x1x32xf32, #tpu.memory_space<vmem>>, vector<1x1x32xf32>
      %464 = vector.shape_cast %463 : vector<1x1x32xf32> to vector<1x32xf32>
      %465 = vector.broadcast %464 : vector<1x32xf32> to vector<16x32xf32>
      %466 = arith.addf %462, %465 : vector<16x32xf32>
      %c1_223 = arith.constant 1 : index
      %c0_224 = arith.constant 0 : index
      %c0_225 = arith.constant 0 : index
      %467 = vector.load %arg31[%c1_223, %c0_224, %c0_225] : memref<2x16x64xf32, #tpu.memory_space<vmem>>, vector<1x16x64xf32>
      %468 = vector.shape_cast %467 : vector<1x16x64xf32> to vector<16x64xf32>
      %469 = vector.extract_strided_slice %468 {offsets = [0, 0], sizes = [16, 32], strides = [1, 1]} : vector<16x64xf32> to vector<16x32xf32>
      %470 = vector.extract_strided_slice %468 {offsets = [0, 32], sizes = [16, 32], strides = [1, 1]} : vector<16x64xf32> to vector<16x32xf32>
      %471 = vector.extract_strided_slice %466 {offsets = [0, 0], sizes = [16, 8], strides = [1, 1]} : vector<16x32xf32> to vector<16x8xf32>
      %472 = vector.extract_strided_slice %469 {offsets = [0, 0], sizes = [16, 8], strides = [1, 1]} : vector<16x32xf32> to vector<16x8xf32>
      %473 = vector.extract_strided_slice %470 {offsets = [0, 0], sizes = [16, 8], strides = [1, 1]} : vector<16x32xf32> to vector<16x8xf32>
      %cst_226 = arith.constant dense<0.000000e+00> : vector<16x16xf32>
      %474 = tpu.matmul %471, %472, %cst_226 {dimension_numbers = #tpu.dot_dimension_numbers<[1], [1], [0], [0], [0, 0, 1, 0], [], []>} : vector<16x8xf32>, vector<16x8xf32>, vector<16x16xf32> -> vector<16x16xf32>
      %cst_227 = arith.constant 0.353553385 : f32
      %475 = vector.broadcast %cst_227 : f32 to vector<16x16xf32>
      %476 = arith.mulf %474, %475 : vector<16x16xf32>
      %477 = arith.addf %476, %24 : vector<16x16xf32>
      %cst_228 = arith.constant dense<0xFF800000> : vector<16xf32>
      %478 = vector.multi_reduction <maximumf>, %477, %cst_228 [1] : vector<16x16xf32> to vector<16xf32>
      %479 = vector.shape_cast %478 : vector<16xf32> to vector<16x1xf32>
      %480 = vector.broadcast %479 : vector<16x1xf32> to vector<16x16xf32>
      %481 = arith.subf %477, %480 : vector<16x16xf32>
      %482 = math.exp %481 : vector<16x16xf32>
      %cst_229 = arith.constant dense<0.000000e+00> : vector<16xf32>
      %483 = vector.multi_reduction <add>, %482, %cst_229 [1] : vector<16x16xf32> to vector<16xf32>
      %484 = vector.shape_cast %483 : vector<16xf32> to vector<16x1xf32>
      %485 = vector.broadcast %484 : vector<16x1xf32> to vector<16x16xf32>
      %486 = arith.divf %482, %485 : vector<16x16xf32>
      %cst_230 = arith.constant dense<0.000000e+00> : vector<16x8xf32>
      %487 = tpu.matmul %486, %473, %cst_230 {dimension_numbers = #tpu.dot_dimension_numbers<[1], [0], [0], [1], [0, 0, 1, 1], [], []>} : vector<16x16xf32>, vector<16x8xf32>, vector<16x8xf32> -> vector<16x8xf32>
      %488 = vector.extract_strided_slice %466 {offsets = [0, 8], sizes = [16, 8], strides = [1, 1]} : vector<16x32xf32> to vector<16x8xf32>
      %489 = vector.extract_strided_slice %469 {offsets = [0, 8], sizes = [16, 8], strides = [1, 1]} : vector<16x32xf32> to vector<16x8xf32>
      %490 = vector.extract_strided_slice %470 {offsets = [0, 8], sizes = [16, 8], strides = [1, 1]} : vector<16x32xf32> to vector<16x8xf32>
      %cst_231 = arith.constant dense<0.000000e+00> : vector<16x16xf32>
      %491 = tpu.matmul %488, %489, %cst_231 {dimension_numbers = #tpu.dot_dimension_numbers<[1], [1], [0], [0], [0, 0, 1, 0], [], []>} : vector<16x8xf32>, vector<16x8xf32>, vector<16x16xf32> -> vector<16x16xf32>
      %cst_232 = arith.constant 0.353553385 : f32
      %492 = vector.broadcast %cst_232 : f32 to vector<16x16xf32>
      %493 = arith.mulf %491, %492 : vector<16x16xf32>
      %494 = arith.addf %493, %24 : vector<16x16xf32>
      %cst_233 = arith.constant dense<0xFF800000> : vector<16xf32>
      %495 = vector.multi_reduction <maximumf>, %494, %cst_233 [1] : vector<16x16xf32> to vector<16xf32>
      %496 = vector.shape_cast %495 : vector<16xf32> to vector<16x1xf32>
      %497 = vector.broadcast %496 : vector<16x1xf32> to vector<16x16xf32>
      %498 = arith.subf %494, %497 : vector<16x16xf32>
      %499 = math.exp %498 : vector<16x16xf32>
      %cst_234 = arith.constant dense<0.000000e+00> : vector<16xf32>
      %500 = vector.multi_reduction <add>, %499, %cst_234 [1] : vector<16x16xf32> to vector<16xf32>
      %501 = vector.shape_cast %500 : vector<16xf32> to vector<16x1xf32>
      %502 = vector.broadcast %501 : vector<16x1xf32> to vector<16x16xf32>
      %503 = arith.divf %499, %502 : vector<16x16xf32>
      %cst_235 = arith.constant dense<0.000000e+00> : vector<16x8xf32>
      %504 = tpu.matmul %503, %490, %cst_235 {dimension_numbers = #tpu.dot_dimension_numbers<[1], [0], [0], [1], [0, 0, 1, 1], [], []>} : vector<16x16xf32>, vector<16x8xf32>, vector<16x8xf32> -> vector<16x8xf32>
      %505 = vector.extract_strided_slice %466 {offsets = [0, 16], sizes = [16, 8], strides = [1, 1]} : vector<16x32xf32> to vector<16x8xf32>
      %506 = vector.extract_strided_slice %469 {offsets = [0, 16], sizes = [16, 8], strides = [1, 1]} : vector<16x32xf32> to vector<16x8xf32>
      %507 = vector.extract_strided_slice %470 {offsets = [0, 16], sizes = [16, 8], strides = [1, 1]} : vector<16x32xf32> to vector<16x8xf32>
      %cst_236 = arith.constant dense<0.000000e+00> : vector<16x16xf32>
      %508 = tpu.matmul %505, %506, %cst_236 {dimension_numbers = #tpu.dot_dimension_numbers<[1], [1], [0], [0], [0, 0, 1, 0], [], []>} : vector<16x8xf32>, vector<16x8xf32>, vector<16x16xf32> -> vector<16x16xf32>
      %cst_237 = arith.constant 0.353553385 : f32
      %509 = vector.broadcast %cst_237 : f32 to vector<16x16xf32>
      %510 = arith.mulf %508, %509 : vector<16x16xf32>
      %511 = arith.addf %510, %24 : vector<16x16xf32>
      %cst_238 = arith.constant dense<0xFF800000> : vector<16xf32>
      %512 = vector.multi_reduction <maximumf>, %511, %cst_238 [1] : vector<16x16xf32> to vector<16xf32>
      %513 = vector.shape_cast %512 : vector<16xf32> to vector<16x1xf32>
      %514 = vector.broadcast %513 : vector<16x1xf32> to vector<16x16xf32>
      %515 = arith.subf %511, %514 : vector<16x16xf32>
      %516 = math.exp %515 : vector<16x16xf32>
      %cst_239 = arith.constant dense<0.000000e+00> : vector<16xf32>
      %517 = vector.multi_reduction <add>, %516, %cst_239 [1] : vector<16x16xf32> to vector<16xf32>
      %518 = vector.shape_cast %517 : vector<16xf32> to vector<16x1xf32>
      %519 = vector.broadcast %518 : vector<16x1xf32> to vector<16x16xf32>
      %520 = arith.divf %516, %519 : vector<16x16xf32>
      %cst_240 = arith.constant dense<0.000000e+00> : vector<16x8xf32>
      %521 = tpu.matmul %520, %507, %cst_240 {dimension_numbers = #tpu.dot_dimension_numbers<[1], [0], [0], [1], [0, 0, 1, 1], [], []>} : vector<16x16xf32>, vector<16x8xf32>, vector<16x8xf32> -> vector<16x8xf32>
      %522 = vector.extract_strided_slice %466 {offsets = [0, 24], sizes = [16, 8], strides = [1, 1]} : vector<16x32xf32> to vector<16x8xf32>
      %523 = vector.extract_strided_slice %469 {offsets = [0, 24], sizes = [16, 8], strides = [1, 1]} : vector<16x32xf32> to vector<16x8xf32>
      %524 = vector.extract_strided_slice %470 {offsets = [0, 24], sizes = [16, 8], strides = [1, 1]} : vector<16x32xf32> to vector<16x8xf32>
      %cst_241 = arith.constant dense<0.000000e+00> : vector<16x16xf32>
      %525 = tpu.matmul %522, %523, %cst_241 {dimension_numbers = #tpu.dot_dimension_numbers<[1], [1], [0], [0], [0, 0, 1, 0], [], []>} : vector<16x8xf32>, vector<16x8xf32>, vector<16x16xf32> -> vector<16x16xf32>
      %cst_242 = arith.constant 0.353553385 : f32
      %526 = vector.broadcast %cst_242 : f32 to vector<16x16xf32>
      %527 = arith.mulf %525, %526 : vector<16x16xf32>
      %528 = arith.addf %527, %24 : vector<16x16xf32>
      %cst_243 = arith.constant dense<0xFF800000> : vector<16xf32>
      %529 = vector.multi_reduction <maximumf>, %528, %cst_243 [1] : vector<16x16xf32> to vector<16xf32>
      %530 = vector.shape_cast %529 : vector<16xf32> to vector<16x1xf32>
      %531 = vector.broadcast %530 : vector<16x1xf32> to vector<16x16xf32>
      %532 = arith.subf %528, %531 : vector<16x16xf32>
      %533 = math.exp %532 : vector<16x16xf32>
      %cst_244 = arith.constant dense<0.000000e+00> : vector<16xf32>
      %534 = vector.multi_reduction <add>, %533, %cst_244 [1] : vector<16x16xf32> to vector<16xf32>
      %535 = vector.shape_cast %534 : vector<16xf32> to vector<16x1xf32>
      %536 = vector.broadcast %535 : vector<16x1xf32> to vector<16x16xf32>
      %537 = arith.divf %533, %536 : vector<16x16xf32>
      %cst_245 = arith.constant dense<0.000000e+00> : vector<16x8xf32>
      %538 = tpu.matmul %537, %524, %cst_245 {dimension_numbers = #tpu.dot_dimension_numbers<[1], [0], [0], [1], [0, 0, 1, 1], [], []>} : vector<16x16xf32>, vector<16x8xf32>, vector<16x8xf32> -> vector<16x8xf32>
      %539 = tpu.concatenate %487, %504, %521, %538 in 1 : vector<16x8xf32>, vector<16x8xf32>, vector<16x8xf32>, vector<16x8xf32> -> vector<16x32xf32>
      %c1_246 = arith.constant 1 : index
      %c0_247 = arith.constant 0 : index
      %c0_248 = arith.constant 0 : index
      %540 = vector.load %arg20[%c1_246, %c0_247, %c0_248] : memref<2x32x32xf32, #tpu.memory_space<vmem>>, vector<1x32x32xf32>
      %541 = vector.shape_cast %540 : vector<1x32x32xf32> to vector<32x32xf32>
      %cst_249 = arith.constant dense<0.000000e+00> : vector<16x32xf32>
      %542 = tpu.matmul %539, %541, %cst_249 {dimension_numbers = #tpu.dot_dimension_numbers<[1], [0], [0], [1], [0, 0, 1, 1], [], []>} : vector<16x32xf32>, vector<32x32xf32>, vector<16x32xf32> -> vector<16x32xf32>
      %543 = arith.addf %433, %542 : vector<16x32xf32>
      %c1_250 = arith.constant 1 : index
      %c0_251 = arith.constant 0 : index
      %c0_252 = arith.constant 0 : index
      %544 = vector.load %arg21[%c1_250, %c0_251, %c0_252] : memref<2x1x32xf32, #tpu.memory_space<vmem>>, vector<1x1x32xf32>
      %545 = vector.shape_cast %544 : vector<1x1x32xf32> to vector<1x32xf32>
      %546 = vector.broadcast %545 : vector<1x32xf32> to vector<16x32xf32>
      %547 = arith.addf %543, %546 : vector<16x32xf32>
      %c1_253 = arith.constant 1 : index
      %c0_254 = arith.constant 0 : index
      %c0_255 = arith.constant 0 : index
      %548 = vector.load %arg22[%c1_253, %c0_254, %c0_255] : memref<2x1x32xf32, #tpu.memory_space<vmem>>, vector<1x1x32xf32>
      %549 = vector.shape_cast %548 : vector<1x1x32xf32> to vector<1x32xf32>
      %c1_256 = arith.constant 1 : index
      %c0_257 = arith.constant 0 : index
      %c0_258 = arith.constant 0 : index
      %550 = vector.load %arg23[%c1_256, %c0_257, %c0_258] : memref<2x1x32xf32, #tpu.memory_space<vmem>>, vector<1x1x32xf32>
      %551 = vector.shape_cast %550 : vector<1x1x32xf32> to vector<1x32xf32>
      %cst_259 = arith.constant dense<0.000000e+00> : vector<16xf32>
      %552 = vector.multi_reduction <add>, %547, %cst_259 [1] : vector<16x32xf32> to vector<16xf32>
      %553 = vector.shape_cast %552 : vector<16xf32> to vector<16x1xf32>
      %cst_260 = arith.constant 3.200000e+01 : f32
      %554 = vector.broadcast %cst_260 : f32 to vector<16x1xf32>
      %555 = arith.divf %553, %554 : vector<16x1xf32>
      %556 = vector.broadcast %555 : vector<16x1xf32> to vector<16x32xf32>
      %557 = arith.subf %547, %556 : vector<16x32xf32>
      %558 = arith.mulf %557, %557 : vector<16x32xf32>
      %cst_261 = arith.constant dense<0.000000e+00> : vector<16xf32>
      %559 = vector.multi_reduction <add>, %558, %cst_261 [1] : vector<16x32xf32> to vector<16xf32>
      %560 = vector.shape_cast %559 : vector<16xf32> to vector<16x1xf32>
      %cst_262 = arith.constant 3.200000e+01 : f32
      %561 = vector.broadcast %cst_262 : f32 to vector<16x1xf32>
      %562 = arith.divf %560, %561 : vector<16x1xf32>
      %563 = vector.broadcast %555 : vector<16x1xf32> to vector<16x32xf32>
      %564 = arith.subf %547, %563 : vector<16x32xf32>
      %cst_263 = arith.constant 9.99999974E-6 : f32
      %565 = vector.broadcast %cst_263 : f32 to vector<16x1xf32>
      %566 = arith.addf %562, %565 : vector<16x1xf32>
      %567 = math.rsqrt %566 : vector<16x1xf32>
      %568 = vector.broadcast %567 : vector<16x1xf32> to vector<16x32xf32>
      %569 = arith.mulf %564, %568 : vector<16x32xf32>
      %570 = vector.broadcast %549 : vector<1x32xf32> to vector<16x32xf32>
      %571 = arith.mulf %569, %570 : vector<16x32xf32>
      %572 = vector.broadcast %551 : vector<1x32xf32> to vector<16x32xf32>
      %573 = arith.addf %571, %572 : vector<16x32xf32>
      %c1_264 = arith.constant 1 : index
      %c0_265 = arith.constant 0 : index
      %c0_266 = arith.constant 0 : index
      %574 = vector.load %arg24[%c1_264, %c0_265, %c0_266] : memref<2x32x64xf32, #tpu.memory_space<vmem>>, vector<1x32x64xf32>
      %575 = vector.shape_cast %574 : vector<1x32x64xf32> to vector<32x64xf32>
      %cst_267 = arith.constant dense<0.000000e+00> : vector<16x64xf32>
      %576 = tpu.matmul %573, %575, %cst_267 {dimension_numbers = #tpu.dot_dimension_numbers<[1], [0], [0], [1], [0, 0, 1, 1], [], []>} : vector<16x32xf32>, vector<32x64xf32>, vector<16x64xf32> -> vector<16x64xf32>
      %c1_268 = arith.constant 1 : index
      %c0_269 = arith.constant 0 : index
      %c0_270 = arith.constant 0 : index
      %577 = vector.load %arg25[%c1_268, %c0_269, %c0_270] : memref<2x1x64xf32, #tpu.memory_space<vmem>>, vector<1x1x64xf32>
      %578 = vector.shape_cast %577 : vector<1x1x64xf32> to vector<1x64xf32>
      %579 = vector.broadcast %578 : vector<1x64xf32> to vector<16x64xf32>
      %580 = arith.addf %576, %579 : vector<16x64xf32>
      %581 = arith.mulf %580, %580 : vector<16x64xf32>
      %582 = arith.mulf %580, %581 : vector<16x64xf32>
      %cst_271 = arith.constant 4.471500e-02 : f32
      %583 = vector.broadcast %cst_271 : f32 to vector<16x64xf32>
      %584 = arith.mulf %583, %582 : vector<16x64xf32>
      %585 = arith.addf %580, %584 : vector<16x64xf32>
      %cst_272 = arith.constant 0.797884583 : f32
      %586 = vector.broadcast %cst_272 : f32 to vector<16x64xf32>
      %587 = arith.mulf %586, %585 : vector<16x64xf32>
      %588 = math.tanh %587 : vector<16x64xf32>
      %cst_273 = arith.constant 1.000000e+00 : f32
      %589 = vector.broadcast %cst_273 : f32 to vector<16x64xf32>
      %590 = arith.addf %589, %588 : vector<16x64xf32>
      %cst_274 = arith.constant 5.000000e-01 : f32
      %591 = vector.broadcast %cst_274 : f32 to vector<16x64xf32>
      %592 = arith.mulf %591, %590 : vector<16x64xf32>
      %593 = arith.mulf %580, %592 : vector<16x64xf32>
      %c1_275 = arith.constant 1 : index
      %c0_276 = arith.constant 0 : index
      %c0_277 = arith.constant 0 : index
      %594 = vector.load %arg26[%c1_275, %c0_276, %c0_277] : memref<2x64x32xf32, #tpu.memory_space<vmem>>, vector<1x64x32xf32>
      %595 = vector.shape_cast %594 : vector<1x64x32xf32> to vector<64x32xf32>
      %cst_278 = arith.constant dense<0.000000e+00> : vector<16x32xf32>
      %596 = tpu.matmul %593, %595, %cst_278 {dimension_numbers = #tpu.dot_dimension_numbers<[1], [0], [0], [1], [0, 0, 1, 1], [], []>} : vector<16x64xf32>, vector<64x32xf32>, vector<16x32xf32> -> vector<16x32xf32>
      %597 = arith.addf %547, %596 : vector<16x32xf32>
      %c1_279 = arith.constant 1 : index
      %c0_280 = arith.constant 0 : index
      %c0_281 = arith.constant 0 : index
      %598 = vector.load %arg27[%c1_279, %c0_280, %c0_281] : memref<2x1x32xf32, #tpu.memory_space<vmem>>, vector<1x1x32xf32>
      %599 = vector.shape_cast %598 : vector<1x1x32xf32> to vector<1x32xf32>
      %600 = vector.broadcast %599 : vector<1x32xf32> to vector<16x32xf32>
      %601 = arith.addf %597, %600 : vector<16x32xf32>
      %c8_i32 = arith.constant 8 : i32
      %602 = vector.broadcast %c8_i32 : i32 to vector<2x16xi32>
      %603 = arith.muli %28, %602 : vector<2x16xi32>
      %c1_i32_282 = arith.constant 1 : i32
      %604 = arith.subi %36, %c1_i32_282 : i32
      %605 = vector.broadcast %604 : i32 to vector<2x16xi32>
      %606 = arith.addi %603, %605 : vector<2x16xi32>
      %607 = arith.cmpi eq, %29, %606 : vector<2x16xi32>
      %608 = arith.extui %607 : vector<2x16xi1> to vector<2x16xi32>
      %609 = arith.sitofp %608 : vector<2x16xi32> to vector<2x16xf32>
      %cst_283 = arith.constant dense<0.000000e+00> : vector<2x32xf32>
      %610 = tpu.matmul %609, %601, %cst_283 {dimension_numbers = #tpu.dot_dimension_numbers<[1], [0], [0], [1], [0, 0, 1, 1], [], []>} : vector<2x16xf32>, vector<16x32xf32>, vector<2x32xf32> -> vector<2x32xf32>
      %c0_284 = arith.constant 0 : index
      %c0_285 = arith.constant 0 : index
      %611 = vector.load %arg28[%c0_284, %c0_285] : memref<1x32xf32, #tpu.memory_space<vmem>>, vector<1x32xf32>
      %c0_286 = arith.constant 0 : index
      %c0_287 = arith.constant 0 : index
      %612 = vector.load %arg29[%c0_286, %c0_287] : memref<1x32xf32, #tpu.memory_space<vmem>>, vector<1x32xf32>
      %cst_288 = arith.constant dense<0.000000e+00> : vector<2xf32>
      %613 = vector.multi_reduction <add>, %610, %cst_288 [1] : vector<2x32xf32> to vector<2xf32>
      %614 = vector.shape_cast %613 : vector<2xf32> to vector<2x1xf32>
      %cst_289 = arith.constant 3.200000e+01 : f32
      %615 = vector.broadcast %cst_289 : f32 to vector<2x1xf32>
      %616 = arith.divf %614, %615 : vector<2x1xf32>
      %617 = vector.broadcast %616 : vector<2x1xf32> to vector<2x32xf32>
      %618 = arith.subf %610, %617 : vector<2x32xf32>
      %619 = arith.mulf %618, %618 : vector<2x32xf32>
      %cst_290 = arith.constant dense<0.000000e+00> : vector<2xf32>
      %620 = vector.multi_reduction <add>, %619, %cst_290 [1] : vector<2x32xf32> to vector<2xf32>
      %621 = vector.shape_cast %620 : vector<2xf32> to vector<2x1xf32>
      %cst_291 = arith.constant 3.200000e+01 : f32
      %622 = vector.broadcast %cst_291 : f32 to vector<2x1xf32>
      %623 = arith.divf %621, %622 : vector<2x1xf32>
      %624 = vector.broadcast %616 : vector<2x1xf32> to vector<2x32xf32>
      %625 = arith.subf %610, %624 : vector<2x32xf32>
      %cst_292 = arith.constant 9.99999974E-6 : f32
      %626 = vector.broadcast %cst_292 : f32 to vector<2x1xf32>
      %627 = arith.addf %623, %626 : vector<2x1xf32>
      %628 = math.rsqrt %627 : vector<2x1xf32>
      %629 = vector.broadcast %628 : vector<2x1xf32> to vector<2x32xf32>
      %630 = arith.mulf %625, %629 : vector<2x32xf32>
      %631 = vector.broadcast %611 : vector<1x32xf32> to vector<2x32xf32>
      %632 = arith.mulf %630, %631 : vector<2x32xf32>
      %633 = vector.broadcast %612 : vector<1x32xf32> to vector<2x32xf32>
      %634 = arith.addf %632, %633 : vector<2x32xf32>
      %cst_293 = arith.constant dense<0.000000e+00> : vector<2x128xf32>
      %635 = tpu.matmul %634, %27, %cst_293 {dimension_numbers = #tpu.dot_dimension_numbers<[1], [0], [0], [1], [0, 0, 1, 1], [], []>} : vector<2x32xf32>, vector<32x128xf32>, vector<2x128xf32> -> vector<2x128xf32>
      %cst_294 = arith.constant -1.000000e+09 : f32
      %636 = vector.broadcast %cst_294 : f32 to vector<2x128xf32>
      %637 = arith.select %33, %635, %636 : vector<2x128xi1>, vector<2x128xf32>
      %cst_295 = arith.constant dense<0xFF800000> : vector<2xf32>
      %638 = vector.multi_reduction <maximumf>, %637, %cst_295 [1] : vector<2x128xf32> to vector<2xf32>
      %639 = vector.shape_cast %638 : vector<2xf32> to vector<2x1xf32>
      %640 = vector.broadcast %639 : vector<2x1xf32> to vector<2x128xf32>
      %641 = arith.cmpf oge, %637, %640 : vector<2x128xf32>
      %cst_296 = arith.constant 1.280000e+02 : f32
      %642 = vector.broadcast %cst_296 : f32 to vector<2x128xf32>
      %643 = arith.select %641, %31, %642 : vector<2x128xi1>, vector<2x128xf32>
      %cst_297 = arith.constant dense<0x7F800000> : vector<2xf32>
      %644 = vector.multi_reduction <minimumf>, %643, %cst_297 [1] : vector<2x128xf32> to vector<2xf32>
      %645 = vector.shape_cast %644 : vector<2xf32> to vector<2x1xf32>
      %646 = vector.broadcast %645 : vector<2x1xf32> to vector<2x128xf32>
      %647 = arith.cmpf oeq, %31, %646 : vector<2x128xf32>
      %648 = arith.extui %647 : vector<2x128xi1> to vector<2x128xi32>
      %649 = arith.sitofp %648 : vector<2x128xi32> to vector<2x128xf32>
      %650 = vector.extract_strided_slice %649 {offsets = [0, 0], sizes = [1, 128], strides = [1, 1]} : vector<2x128xf32> to vector<1x128xf32>
      %c0_i32_298 = arith.constant 0 : i32
      %651 = arith.addi %c0_i32_298, %36 : i32
      %652 = arith.index_cast %651 : i32 to index
      %c0_299 = arith.constant 0 : index
      %653 = vector.load %arg30[%652, %c0_299] : memref<16x128xf32, #tpu.memory_space<vmem>>, vector<1x128xf32>
      tpu.vector_store %arg30[%652, %c0_299], %650 {strides = array<i32>} : memref<16x128xf32, #tpu.memory_space<vmem>>, vector<1x128xf32>,
      %654 = vector.extract_strided_slice %649 {offsets = [1, 0], sizes = [1, 128], strides = [1, 1]} : vector<2x128xf32> to vector<1x128xf32>
      %c8_i32_300 = arith.constant 8 : i32
      %655 = arith.addi %c8_i32_300, %36 : i32
      %656 = arith.index_cast %655 : i32 to index
      %c0_301 = arith.constant 0 : index
      %657 = vector.load %arg30[%656, %c0_301] : memref<16x128xf32, #tpu.memory_space<vmem>>, vector<1x128xf32>
      tpu.vector_store %arg30[%656, %c0_301], %654 {strides = array<i32>} : memref<16x128xf32, #tpu.memory_space<vmem>>, vector<1x128xf32>,
    }
    %c5_i32_33 = arith.constant 5 : i32
    return
  }
  func.func @transform_0(%arg0: i32) -> (i32, i32) {
    %c0_i32 = arith.constant 0 : i32
    %c0_i32_0 = arith.constant 0 : i32
    %c0_i32_1 = arith.constant 0 : i32
    return %c0_i32, %c0_i32_0 : i32, i32
  }
  func.func @transform_1(%arg0: i32) -> (i32, i32) {
    %c0_i32 = arith.constant 0 : i32
    %c0_i32_0 = arith.constant 0 : i32
    %c0_i32_1 = arith.constant 0 : i32
    return %c0_i32, %c0_i32_0 : i32, i32
  }
  func.func @transform_2(%arg0: i32) -> (i32, i32) {
    %c0_i32 = arith.constant 0 : i32
    %c0_i32_0 = arith.constant 0 : i32
    %c0_i32_1 = arith.constant 0 : i32
    return %c0_i32, %c0_i32_0 : i32, i32
  }
  func.func @transform_3(%arg0: i32) -> (i32, i32) {
    %c0_i32 = arith.constant 0 : i32
    %c0_i32_0 = arith.constant 0 : i32
    %c0_i32_1 = arith.constant 0 : i32
    return %c0_i32, %c0_i32_0 : i32, i32
  }
  func.func @transform_4(%arg0: i32) -> (i32, i32) {
    %c0_i32 = arith.constant 0 : i32
    %c0_i32_0 = arith.constant 0 : i32
    %c0_i32_1 = arith.constant 0 : i32
    return %c0_i32, %c0_i32_0 : i32, i32
  }
  func.func @transform_5(%arg0: i32) -> (i32, i32) {
    %c0_i32 = arith.constant 0 : i32
    %c0_i32_0 = arith.constant 0 : i32
    %c0_i32_1 = arith.constant 0 : i32
    return %c0_i32, %c0_i32_0 : i32, i32
  }
  func.func @transform_6(%arg0: i32) -> (i32, i32) {
    %c0_i32 = arith.constant 0 : i32
    %c0_i32_0 = arith.constant 0 : i32
    %c0_i32_1 = arith.constant 0 : i32
    return %c0_i32, %c0_i32_0 : i32, i32
  }
  func.func @transform_7(%arg0: i32) -> (i32, i32, i32) {
    %c0_i32 = arith.constant 0 : i32
    %c0_i32_0 = arith.constant 0 : i32
    %c0_i32_1 = arith.constant 0 : i32
    %c0_i32_2 = arith.constant 0 : i32
    return %c0_i32, %c0_i32_0, %c0_i32_1 : i32, i32, i32
  }
  func.func @transform_8(%arg0: i32) -> (i32, i32, i32) {
    %c0_i32 = arith.constant 0 : i32
    %c0_i32_0 = arith.constant 0 : i32
    %c0_i32_1 = arith.constant 0 : i32
    %c0_i32_2 = arith.constant 0 : i32
    return %c0_i32, %c0_i32_0, %c0_i32_1 : i32, i32, i32
  }
  func.func @transform_9(%arg0: i32) -> (i32, i32, i32) {
    %c0_i32 = arith.constant 0 : i32
    %c0_i32_0 = arith.constant 0 : i32
    %c0_i32_1 = arith.constant 0 : i32
    %c0_i32_2 = arith.constant 0 : i32
    return %c0_i32, %c0_i32_0, %c0_i32_1 : i32, i32, i32
  }
  func.func @transform_10(%arg0: i32) -> (i32, i32, i32) {
    %c0_i32 = arith.constant 0 : i32
    %c0_i32_0 = arith.constant 0 : i32
    %c0_i32_1 = arith.constant 0 : i32
    %c0_i32_2 = arith.constant 0 : i32
    return %c0_i32, %c0_i32_0, %c0_i32_1 : i32, i32, i32
  }
  func.func @transform_11(%arg0: i32) -> (i32, i32, i32) {
    %c0_i32 = arith.constant 0 : i32
    %c0_i32_0 = arith.constant 0 : i32
    %c0_i32_1 = arith.constant 0 : i32
    %c0_i32_2 = arith.constant 0 : i32
    return %c0_i32, %c0_i32_0, %c0_i32_1 : i32, i32, i32
  }
  func.func @transform_12(%arg0: i32) -> (i32, i32, i32) {
    %c0_i32 = arith.constant 0 : i32
    %c0_i32_0 = arith.constant 0 : i32
    %c0_i32_1 = arith.constant 0 : i32
    %c0_i32_2 = arith.constant 0 : i32
    return %c0_i32, %c0_i32_0, %c0_i32_1 : i32, i32, i32
  }
  func.func @transform_13(%arg0: i32) -> (i32, i32, i32) {
    %c0_i32 = arith.constant 0 : i32
    %c0_i32_0 = arith.constant 0 : i32
    %c0_i32_1 = arith.constant 0 : i32
    %c0_i32_2 = arith.constant 0 : i32
    return %c0_i32, %c0_i32_0, %c0_i32_1 : i32, i32, i32
  }
  func.func @transform_14(%arg0: i32) -> (i32, i32, i32) {
    %c0_i32 = arith.constant 0 : i32
    %c0_i32_0 = arith.constant 0 : i32
    %c0_i32_1 = arith.constant 0 : i32
    %c0_i32_2 = arith.constant 0 : i32
    return %c0_i32, %c0_i32_0, %c0_i32_1 : i32, i32, i32
  }
  func.func @transform_15(%arg0: i32) -> (i32, i32, i32) {
    %c0_i32 = arith.constant 0 : i32
    %c0_i32_0 = arith.constant 0 : i32
    %c0_i32_1 = arith.constant 0 : i32
    %c0_i32_2 = arith.constant 0 : i32
    return %c0_i32, %c0_i32_0, %c0_i32_1 : i32, i32, i32
  }
  func.func @transform_16(%arg0: i32) -> (i32, i32, i32) {
    %c0_i32 = arith.constant 0 : i32
    %c0_i32_0 = arith.constant 0 : i32
    %c0_i32_1 = arith.constant 0 : i32
    %c0_i32_2 = arith.constant 0 : i32
    return %c0_i32, %c0_i32_0, %c0_i32_1 : i32, i32, i32
  }
  func.func @transform_17(%arg0: i32) -> (i32, i32, i32) {
    %c0_i32 = arith.constant 0 : i32
    %c0_i32_0 = arith.constant 0 : i32
    %c0_i32_1 = arith.constant 0 : i32
    %c0_i32_2 = arith.constant 0 : i32
    return %c0_i32, %c0_i32_0, %c0_i32_1 : i32, i32, i32
  }
  func.func @transform_18(%arg0: i32) -> (i32, i32, i32) {
    %c0_i32 = arith.constant 0 : i32
    %c0_i32_0 = arith.constant 0 : i32
    %c0_i32_1 = arith.constant 0 : i32
    %c0_i32_2 = arith.constant 0 : i32
    return %c0_i32, %c0_i32_0, %c0_i32_1 : i32, i32, i32
  }
  func.func @transform_19(%arg0: i32) -> (i32, i32, i32) {
    %c0_i32 = arith.constant 0 : i32
    %c0_i32_0 = arith.constant 0 : i32
    %c0_i32_1 = arith.constant 0 : i32
    %c0_i32_2 = arith.constant 0 : i32
    return %c0_i32, %c0_i32_0, %c0_i32_1 : i32, i32, i32
  }
  func.func @transform_20(%arg0: i32) -> (i32, i32, i32) {
    %c0_i32 = arith.constant 0 : i32
    %c0_i32_0 = arith.constant 0 : i32
    %c0_i32_1 = arith.constant 0 : i32
    %c0_i32_2 = arith.constant 0 : i32
    return %c0_i32, %c0_i32_0, %c0_i32_1 : i32, i32, i32
  }
  func.func @transform_21(%arg0: i32) -> (i32, i32, i32) {
    %c0_i32 = arith.constant 0 : i32
    %c0_i32_0 = arith.constant 0 : i32
    %c0_i32_1 = arith.constant 0 : i32
    %c0_i32_2 = arith.constant 0 : i32
    return %c0_i32, %c0_i32_0, %c0_i32_1 : i32, i32, i32
  }
  func.func @transform_22(%arg0: i32) -> (i32, i32, i32) {
    %c0_i32 = arith.constant 0 : i32
    %c0_i32_0 = arith.constant 0 : i32
    %c0_i32_1 = arith.constant 0 : i32
    %c0_i32_2 = arith.constant 0 : i32
    return %c0_i32, %c0_i32_0, %c0_i32_1 : i32, i32, i32
  }
  func.func @transform_23(%arg0: i32) -> (i32, i32, i32) {
    %c0_i32 = arith.constant 0 : i32
    %c0_i32_0 = arith.constant 0 : i32
    %c0_i32_1 = arith.constant 0 : i32
    %c0_i32_2 = arith.constant 0 : i32
    return %c0_i32, %c0_i32_0, %c0_i32_1 : i32, i32, i32
  }
  func.func @transform_24(%arg0: i32) -> (i32, i32, i32) {
    %c0_i32 = arith.constant 0 : i32
    %c0_i32_0 = arith.constant 0 : i32
    %c0_i32_1 = arith.constant 0 : i32
    %c0_i32_2 = arith.constant 0 : i32
    return %c0_i32, %c0_i32_0, %c0_i32_1 : i32, i32, i32
  }
  func.func @transform_25(%arg0: i32) -> (i32, i32, i32) {
    %c0_i32 = arith.constant 0 : i32
    %c0_i32_0 = arith.constant 0 : i32
    %c0_i32_1 = arith.constant 0 : i32
    %c0_i32_2 = arith.constant 0 : i32
    return %c0_i32, %c0_i32_0, %c0_i32_1 : i32, i32, i32
  }
  func.func @transform_26(%arg0: i32) -> (i32, i32, i32) {
    %c0_i32 = arith.constant 0 : i32
    %c0_i32_0 = arith.constant 0 : i32
    %c0_i32_1 = arith.constant 0 : i32
    %c0_i32_2 = arith.constant 0 : i32
    return %c0_i32, %c0_i32_0, %c0_i32_1 : i32, i32, i32
  }
  func.func @transform_27(%arg0: i32) -> (i32, i32) {
    %c0_i32 = arith.constant 0 : i32
    %c0_i32_0 = arith.constant 0 : i32
    %c0_i32_1 = arith.constant 0 : i32
    return %c0_i32, %c0_i32_0 : i32, i32
  }
  func.func @transform_28(%arg0: i32) -> (i32, i32) {
    %c0_i32 = arith.constant 0 : i32
    %c0_i32_0 = arith.constant 0 : i32
    %c0_i32_1 = arith.constant 0 : i32
    return %c0_i32, %c0_i32_0 : i32, i32
  }
  func.func @transform_29(%arg0: i32) -> (i32, i32) {
    %c0_i32 = arith.constant 0 : i32
    %c0_i32_0 = arith.constant 0 : i32
    %c0_i32_1 = arith.constant 0 : i32
    return %c0_i32, %c0_i32_0 : i32, i32
  }
}

</mosaic_0001>

<bundles_post_ra>
// kernel: eq.1
= control target key start
LH: loop header
LB: loop body
LE: loop exit
PB: predicated region body
PF: predicated region fallthrough
CT: control target
= control target key end

     0   :  { %vm7_vm0 = vcmask 64512   ;;  %vm13_vm1 = vcmask 130112   ;;  %s39_s0 = inlined_call_operand.vmem [shape: s32[2,8], index: 0, kind: input, shape index: {}]   ;;  %s40_s1 = inlined_call_operand.vmem [shape: s32[16], index: 1, kind: output, shape index: {}]  }
   0x1   :  { %v4_v0 = vld [vmem:[%s39_s0] sm:$0x3]  ;;  %s22_s0 = smov 8  }
   0x2   :  { %5 = vst [vmem:[#allocation1] sm:$0x3] %v4_v0 }
   0x9   :  { %v10_v1 = vld [vmem:[#allocation1 + $0x1] sm:$0x1]   ;;  %v6_v2 = vld [vmem:[#allocation1] sm:$0x1]  }
   0xa   :  { %11 = vrot.lane.b32.xlu0 %v10_v1, %s22_s0  ;;  %8 = vst.msk [vmem:[#allocation0] sm:$0x1] %vm7_vm0, %v6_v2  }
  0x7c   :  { %v12_v3 = vpop.permute.xlu0 %11  }
  0x7d   :  { %14 = vst.msk [vmem:[#allocation0] sm:$0x1] %vm13_vm1, %v12_v3  }
  0x84   :  { %v18_v4 = vld [vmem:[#allocation0] sm:$0x1] }
  0x85   :  { %20 = vst [vmem:[%s40_s1] sm:$0x1] %v18_v4 }

// kernel: whisper_generate.2
= control target key start
LH: loop header
LB: loop body
LE: loop exit
PB: predicated region body
PF: predicated region fallthrough
CT: control target
= control target key end

     0   :  { %vm95_vm0 = vcmask 523264   ;;  %vm302_vm1 = vcmask 261120   ;;  %vm416_vm2 = vcmask 130048   ;;  %vm1815_vm3 = vcmask 64512   ;;  %s5732_s29 = smov 64   ;;  %s5734_s30 = smov 88   ;;  %s6636_s1 = inlined_call_operand.vmem [shape: f32[64,32], index: 1, kind: input, shape index: {}]   ;;  %s6637_s2 = inlined_call_operand.vmem [shape: f32[64,32], index: 2, kind: input, shape index: {}]   ;;  %s6638_s0 = inlined_call_operand.vmem [shape: f32[32,64], index: 0, kind: input, shape index: {}]   ;;  %s6639_s3 = inlined_call_operand.vmem [shape: f32[32,16], index: 3, kind: input, shape index: {}]   ;;  %s6640_s4 = inlined_call_operand.vmem [shape: f32[3,32,32], index: 4, kind: input, shape index: {}]   ;;  %s6641_s6 = inlined_call_operand.vmem [shape: f32[48,32], index: 6, kind: input, shape index: {}]   ;;  %s6642_s5 = inlined_call_operand.vmem [shape: f32[3,16,32], index: 5, kind: input, shape index: {}]   ;;  %s6643_s8 = inlined_call_operand.vmem [shape: f32[96,32], index: 8, kind: input, shape index: {}]   ;;  %s6644_s7 = inlined_call_operand.vmem [shape: f32[1,32], index: 7, kind: input, shape index: {}]   ;;  %s6645_s9 = inlined_call_operand.vmem [shape: f32[1,32], index: 9, kind: input, shape index: {}]   ;;  %s6646_s10 = inlined_call_operand.vmem [shape: f32[16,32], index: 10, kind: input, shape index: {}]   ;;  %s6647_s14 = inlined_call_operand.vmem [shape: f32[2,32,96], index: 14, kind: input, shape index: {}]   ;;  %s6648_s12 = inlined_call_operand.vmem [shape: f32[2,1,32], index: 12, kind: input, shape index: {}]   ;;  %s6649_s13 = inlined_call_operand.vmem [shape: f32[2,1,32], index: 13, kind: input, shape index: {}]   ;;  %s6650_s15 = inlined_call_operand.vmem [shape: f32[2,1,96], index: 15, kind: input, shape index: {}]   ;;  %s6651_s11 = inlined_call_operand.vmem [shape: f32[16,16], index: 11, kind: input, shape index: {}]   ;;  %s6652_s16 = inlined_call_operand.vmem [shape: f32[2,32,32], index: 16, kind: input, shape index: {}]   ;;  %s6653_s17 = inlined_call_operand.vmem [shape: f32[2,1,32], index: 17, kind: input, shape index: {}]   ;;  %s6654_s20 = inlined_call_operand.vmem [shape: f32[2,32,64], index: 20, kind: input, shape index: {}]   ;;  %s6655_s18 = inlined_call_operand.vmem [shape: f32[2,1,32], index: 18, kind: input, shape index: {}]   ;;  %s6656_s19 = inlined_call_operand.vmem [shape: f32[2,1,32], index: 19, kind: input, shape index: {}]   ;;  %s6657_s22 = inlined_call_operand.vmem [shape: f32[2,64,32], index: 22, kind: input, shape index: {}]   ;;  %s6658_s21 = inlined_call_operand.vmem [shape: f32[2,1,64], index: 21, kind: input, shape index: {}]   ;;  %s6659_s23 = inlined_call_operand.vmem [shape: f32[2,1,32], index: 23, kind: input, shape index: {}]   ;;  %s6660_s24 = inlined_call_operand.vmem [shape: f32[1,32], index: 24, kind: input, shape index: {}]   ;;  %s6661_s25 = inlined_call_operand.vmem [shape: f32[1,32], index: 25, kind: input, shape index: {}]   ;;  %s6662_s26 = inlined_call_operand.vmem [shape: f32[16,32], index: 26, kind: output, shape index: {}]  }
   0x1   :  { %6683 = sst [smem:[#allocation2_spill]] %s6636_s1  ;;  %vm6173_vm4 = vmpackc.low %vm1815_vm3, %vm1815_vm3  ;;  %vm2652_vm5 = vcmask 195584  }
   0x2   :  { %6684 = sst [smem:[#allocation3_spill]] %s6637_s2 }
   0x3   :  { %6685 = sst [smem:[#allocation4_spill]] %s6638_s0  ;;  %s6695_s0 = sld [smem:[#allocation3_spill]] }
   0x4   :  { %6686 = sst [smem:[#allocation5_spill]] %s6639_s3  ;;  %s6696_s27 = sld [smem:[#allocation4_spill]] }
   0x5   :  { %6687 = sst [smem:[#allocation6_spill]] %s6640_s4  ;;  %s6675_s3 = smov 16  }
   0x6   :  { %6688 = sst [smem:[#allocation7_spill]] %s6641_s6  ;;  %s6698_s2 = sld [smem:[#allocation6_spill]] }
   0x7   :  { %6689 = sst [smem:[#allocation8_spill]] %s6642_s5  ;;  %s6699_s28 = sld [smem:[#allocation7_spill]] }
   0x8   :  { %6690 = sst [smem:[#allocation9_spill]] %s6643_s8  ;;  %s6694_s8 = sld [smem:[#allocation2_spill]] }
   0x9   :  { %6691 = sst [smem:[#allocation10_spill]] %s6644_s7  ;;  %v193_v2 = vld [vmem:[%s6695_s0] sm:$0xff]  ;;  %v194_v4 = vld [vmem:[%s6695_s0 + $0x8] sm:$0xff]  ;;  %v195_v9 = vld [vmem:[%s6695_s0 + $0x10] sm:$0xff]  ;;  %s6700_s6 = sld [smem:[#allocation8_spill]] }
   0xa   :  { %6692 = sst [smem:[#allocation11_spill]] %s6645_s9  ;;  %v5229_v7 = vpack.c.bf16 %v194_v4, %v193_v2  ;;  %v196_v10 = vld [vmem:[%s6695_s0 + $0x18] sm:$0xff]  ;;  %v197_v14 = vld [vmem:[%s6695_s0 + $0x20] sm:$0xff]  ;;  %v198_v15 = vld [vmem:[%s6695_s0 + $0x28] sm:$0xff]  ;;  %s6702_s1 = sld [smem:[#allocation10_spill]] }
   0xb   :  { %6693 = sst [smem:[#allocation12_spill]] %s6646_s10  ;;  %v5233_v12 = vpack.c.bf16 %v196_v10, %v195_v9  ;;  %v83_v17 = vld [vmem:[%s6696_s27] sm:$0xff]  ;;  %v5237_v18 = vpack.c.bf16 %v198_v15, %v197_v14  ;;  %v199_v21 = vld [vmem:[%s6695_s0 + $0x30] sm:$0xff]  ;;  %v200_v22 = vld [vmem:[%s6695_s0 + $0x38] sm:$0xff]  ;;  %s6697_s10 = sld [smem:[#allocation5_spill]] }
   0xc   :  { %5230 = vmatprep.subr.bf16.mxu1 %v5229_v7  ;;  %4817 = vmatprep.mubr.msk.f32.mxu0 %vm95_vm0, %v83_v17  ;;  %v5241_v24 = vpack.c.bf16 %v200_v22, %v199_v21  ;;  %v84_v28 = vld [vmem:[%s6696_s27 + $0x8] sm:$0xff]  ;;  %v85_v29 = vld [vmem:[%s6696_s27 + $0x10] sm:$0xff]  ;;  %v86_v30 = vld [vmem:[%s6696_s27 + $0x18] sm:$0xff]  ;;  %s5733_s9 = smov 120   ;;  %s6672_s5 = smov 40  }
   0xd   :  { %5232 = vmatpush3.bf16.msra.mxu1 %v5229_v7  ;;  %4839 = vmatprep.mubr.msk.f32.mxu1 %vm95_vm0, %v83_v17  ;;  %s6673_s0 = smov 8   ;;  %s6681_s7 = smov 24  }
   0xe   :  { %v87_v0 = vld [vmem:[%s6694_s8] sm:$0xff]  ;;  %v88_v1 = vld [vmem:[%s6694_s8 + $0x8] sm:$0xff]  ;;  %v89_v5 = vld [vmem:[%s6694_s8 + $0x10] sm:$0xff]  ;;  %5234 = vmatprep.subr.bf16.mxu1 %v5233_v12 }
   0xf   :  { %v5213_v3 = vpack.c.bf16 %v88_v1, %v87_v0  ;;  %v90_v6 = vld [vmem:[%s6694_s8 + $0x18] sm:$0xff]  ;;  %v91_v11 = vld [vmem:[%s6694_s8 + $0x20] sm:$0xff]  ;;  %v92_v13 = vld [vmem:[%s6694_s8 + $0x28] sm:$0xff] }
  0x10   :  { %v5217_v8 = vpack.c.bf16 %v90_v6, %v89_v5  ;;  %v5221_v16 = vpack.c.bf16 %v92_v13, %v91_v11  ;;  %v93_v19 = vld [vmem:[%s6694_s8 + $0x30] sm:$0xff]  ;;  %v94_v20 = vld [vmem:[%s6694_s8 + $0x38] sm:$0xff] }
  0x11   :  { %5214 = vmatprep.subr.bf16.mxu0 %v5213_v3  ;;  %5236 = vmatpush3.bf16.msra.mxu1 %v5233_v12  ;;  %v5225_v23 = vpack.c.bf16 %v94_v20, %v93_v19  ;;  %v298_v25 = vld [vmem:[%s6697_s10] sm:$0xff]  ;;  %v299_v26 = vld [vmem:[%s6697_s10 + $0x8] sm:$0xff]  ;;  %v300_v31 = vld [vmem:[%s6697_s10 + $0x10] sm:$0xff] }
  0x12   :  { %5216 = vmatpush3.bf16.msra.mxu0 %v5213_v3  ;;  %5238 = vmatprep.subr.bf16.mxu1 %v5237_v18  ;;  %v5245_v27 = vpack.c.bf16 %v299_v26, %v298_v25  ;;  %v301_v32 = vld [vmem:[%s6697_s10 + $0x18] sm:$0xff]  ;;  %s6701_s10 = sld [smem:[#allocation9_spill]] }
  0x13   :  { %5218 = vmatprep.subr.bf16.mxu0 %v5217_v8  ;;  %v5249_v33 = vpack.c.bf16 %v301_v32, %v300_v31 }
  0x15   :  { %5240 = vmatpush3.bf16.msra.mxu1 %v5237_v18 }
  0x16   :  { %5220 = vmatpush3.bf16.msra.mxu0 %v5217_v8  ;;  %5242 = vmatprep.subr.bf16.mxu1 %v5241_v24 }
  0x17   :  { %5222 = vmatprep.subr.bf16.mxu0 %v5221_v16 }
  0x19   :  { %5244 = vmatpush3.bf16.msra.mxu1 %v5241_v24 }
  0x1a   :  { %5224 = vmatpush3.bf16.msra.mxu0 %v5221_v16  ;;  %5246 = vmatprep.subr.bf16.mxu1 %v5245_v27  ;;  %v5730_v16 = vmov 0  }
  0x1b   :  { %5226 = vmatprep.subr.bf16.mxu0 %v5225_v23  ;;  %5534 = vset.pattern.permute.xlu1 %v5730_v16 }
  0x1c   :  { %4840 = vmatmul.mubr.msk.f32.vlgmr.msra.gmra.mrb[0].mxu1 %vm95_vm0, %v84_v28  ;;  %5615 = vset.pattern.permute.xlu0 %v5730_v16 }
  0x1d   :  { %4842 = vmatprep.mubr.msk.f32.mxu1 %vm95_vm0, %v85_v29  ;;  %5248 = vmatpush3.bf16.msra.mxu1 %v5245_v27 }
  0x1e   :  { %5228 = vmatpush3.bf16.msra.mxu0 %v5225_v23  ;;  %5250 = vmatprep.subr.bf16.mxu1 %v5249_v33 }
  0x20   :  { %4843 = vmatmul.mubr.msk.f32.gmra.mrb[2].mxu1 %vm95_vm0, %v86_v30 }
  0x21   :  { %4818 = vmatmul.mubr.msk.f32.vlgmr.msra.gmra.mrb[0].mxu0 %vm95_vm0, %v84_v28  ;;  %5252 = vmatpush3.bf16.msra.mxu1 %v5249_v33 }
  0x22   :  { %4820 = vmatprep.mubr.msk.f32.mxu0 %vm95_vm0, %v85_v29 }
  0x25   :  { %4821 = vmatmul.mubr.msk.f32.gmra.mrb[2].mxu0 %vm95_vm0, %v86_v30 }
  0xef   :  { %v4841_v36 = vpop.f32.mrb[0].mxu1 }
  0xf0   :  { %v291_v38 = vmul.f32 %v4841_v36, %v4841_v36  ;;  %v267_v40 = vpop.f32.mrb[1].mxu1  ;;  %v470_v36 = vld [vmem:[%s6699_s28] sm:$0xff] }
  0xf1   :  { %v290_v41 = vmul.f32 %v267_v40, %v267_v40 }
  0xf3   :  { %v4844_v46 = vpop.f32.mrb[2].mxu1 }
  0xf4   :  { %v4819_v34 = vpop.f32.mrb[0].mxu0  ;;  %v293_v48 = vmul.f32 %v4844_v46, %v4844_v46  ;;  %v277_v50 = vpop.f32.mrb[3].mxu1 }
  0xf5   :  { %v287_v35 = vmul.f32 %v4819_v34, %v4819_v34  ;;  %v174_v37 = vpop.f32.mrb[1].mxu0  ;;  %v292_v51 = vmul.f32 %v277_v50, %v277_v50 }
  0xf6   :  { %v286_v39 = vmul.f32 %v174_v37, %v174_v37  ;;  %v471_v37 = vld [vmem:[%s6699_s28 + $0x8] sm:$0xff] }
  0xf7   :  { %v295_v42 = vadd.f32 %v291_v38, %v287_v35  ;;  %v496_v35 = vld [vmem:[%s6698_s2] sm:$0xff]  ;;  %v5261_v38 = vpack.c.bf16 %v471_v37, %v470_v36 }
  0xf8   :  { %v4822_v43 = vpop.f32.mrb[2].mxu0  ;;  %v294_v44 = vadd.f32 %v290_v41, %v286_v39 }
  0xf9   :  { %v289_v45 = vmul.f32 %v4822_v43, %v4822_v43  ;;  %v184_v47 = vpop.f32.mrb[3].mxu0  ;;  %5262 = vmatprep.subr.bf16.mxu0 %v5261_v38 }
  0xfa   :  { %v288_v49 = vmul.f32 %v184_v47, %v184_v47  ;;  %4853 = vmatprep.mubr.msk.f32.mxu1 %vm302_vm1, %v294_v44  ;;  %5264 = vmatpush3.bf16.msra.mxu0 %v5261_v38 }
  0xfb   :  { %v297_v52 = vadd.f32 %v293_v48, %v289_v45  ;;  %4854 = vmatmul.mubr.msk.f32.vlgmr.msra.gmra.mrb[4].mxu1 %vm302_vm1, %v295_v42 }
  0xfc   :  { %v296_v53 = vadd.f32 %v292_v51, %v288_v49 }
  0xfe   :  { %4856 = vmatprep.mubr.msk.f32.mxu1 %vm302_vm1, %v296_v53 }
  0xff   :  { %4857 = vmatmul.mubr.msk.f32.gmra.mrb[6].mxu1 %vm302_vm1, %v297_v52 }
 0x100   :  { %4867 = vmatprep.mubr.msk.f32.mxu1 %vm302_vm1, %v496_v35 }
 0x1ce   :  { %v4855_v54 = vpop.f32.mrb[4].mxu1 }
 0x1cf   :  { %v401_v55 = vmax.f32 %v4855_v54, 1e-10  ;;  %v381_v56 = vpop.f32.mrb[5].mxu1 }
 0x1d0   :  { %v400_v57 = vmax.f32 %v381_v56, 1e-10  ;;  %v498_v56 = vld [vmem:[%s6698_s2 + $0x10] sm:$0xff] }
 0x1d1   :  { %5616 = vlog2.f32 %v401_v55  ;;  %v497_v55 = vld [vmem:[%s6698_s2 + $0x8] sm:$0xff] }
 0x1d2   :  { %5618 = vlog2.f32 %v400_v57  ;;  %v4858_v58 = vpop.f32.mrb[6].mxu1  ;;  %v499_v57 = vld [vmem:[%s6698_s2 + $0x18] sm:$0xff] }
 0x1d3   :  { %v403_v59 = vmax.f32 %v4858_v58, 1e-10  ;;  %v391_v60 = vpop.f32.mrb[7].mxu1  ;;  %v4420_v58 = vld [vmem:[%s6698_s2 + $0x20] sm:$0xff] }
 0x1d4   :  { %v402_v61 = vmax.f32 %v391_v60, 1e-10  ;;  %v4422_v60 = vld [vmem:[%s6698_s2 + $0x30] sm:$0xff] }
 0x1d5   :  { %5620 = vlog2.f32 %v403_v59  ;;  %v4421_v59 = vld [vmem:[%s6698_s2 + $0x28] sm:$0xff] }
 0x1d6   :  { %5622 = vlog2.f32 %v402_v61  ;;  %v4423_v61 = vld [vmem:[%s6698_s2 + $0x38] sm:$0xff] }
 0x1db   :  { %v5617_v62 = vpop.eup %5616 }
 0x1dc   :  { %v5619_v63 = vpop.eup %5618  ;;  %v407_v0 = vmul.f32 0.6931472, %v5617_v62  ;;  %v4432_v62 = vld [vmem:[%s6698_s2 + $0x40] sm:$0xff] }
 0x1dd   :  { %v405_v1 = vmul.f32 0.6931472, %v5619_v63  ;;  %v4433_v63 = vld [vmem:[%s6698_s2 + $0x48] sm:$0xff] }
 0x1de   :  { %v413_v2 = vmul.f32 0.4342945, %v407_v0  ;;  %v4434_v0 = vld [vmem:[%s6698_s2 + $0x50] sm:$0xff] }
 0x1df   :  { %v5621_v3 = vpop.eup %5620  ;;  %v412_v4 = vmul.f32 0.4342945, %v405_v1  ;;  %v4435_v1 = vld [vmem:[%s6698_s2 + $0x58] sm:$0xff]  ;;  %s6703_s2 = sld [smem:[#allocation11_spill]] }
 0x1e0   :  { %v5623_v5 = vpop.eup %5622  ;;  %v411_v6 = vmul.f32 0.6931472, %v5621_v3  ;;  %v418_v7 = vsel %vm416_vm2, %v413_v2, -inf  ;;  %v473_v3 = vld [vmem:[%s6699_s28 + $0x18] sm:$0xff] }
 0x1e1   :  { %v409_v8 = vmul.f32 0.6931472, %v5623_v5  ;;  %v417_v9 = vsel %vm416_vm2, %v412_v4, -inf  ;;  %v474_v5 = vld [vmem:[%s6699_s28 + $0x20] sm:$0xff] }
 0x1e2   :  { %v415_v10 = vmul.f32 0.4342945, %v411_v6  ;;  %v419_v11 = vmax.f32 %v417_v9, %v418_v7  ;;  %v475_v6 = vld [vmem:[%s6699_s28 + $0x28] sm:$0xff] }
 0x1e3   :  { %v414_v12 = vmul.f32 0.4342945, %v409_v8  ;;  %v5285_v9 = vpack.c.bf16 %v475_v6, %v474_v5 }
 0x1e4   :  { %420 = vmax.xlane.f32.xlu0 %v419_v11  ;;  %v432_v13 = vsel %vm416_vm2, %v415_v10, -inf }
 0x1e5   :  { %v431_v14 = vsel %vm416_vm2, %v414_v12, -inf }
 0x1e6   :  { %v433_v15 = vmax.f32 %v431_v14, %v432_v13 }
 0x1e8   :  { %434 = vmax.xlane.f32.xlu0 %v433_v15 }
 0x271   :  { %v421_v17 = vpop.xlane.xlu0 %420 }
 0x272   :  { %v422_v18 = vrot.slane %v421_v17, 4 }
 0x274   :  { %v423_v19 = vmax.f32 %v421_v17, %v422_v18 }
 0x275   :  { %v435_v20 = vpop.xlane.xlu0 %434 }
 0x276   :  { %v424_v21 = vrot.slane %v423_v19, 2  ;;  %v436_v22 = vrot.slane %v435_v20, 4 }
 0x278   :  { %v437_v23 = vmax.f32 %v435_v20, %v436_v22  ;;  %v425_v24 = vmax.f32 %v423_v19, %v424_v21  ;;  %v1148_v20 = vld [vmem:[%s6700_s6] sm:$0xff]  ;;  %v477_v22 = vld [vmem:[%s6701_s10 + $0x8] sm:$0xff] }
 0x279   :  { %v476_v21 = vld [vmem:[%s6701_s10] sm:$0xff] }
 0x27a   :  { %v438_v25 = vrot.slane %v437_v23, 2  ;;  %v426_v26 = vrot.slane %v425_v24, 1 }
 0x27c   :  { %v427_v27 = vmax.f32 %v425_v24, %v426_v26  ;;  %v439_v28 = vmax.f32 %v437_v23, %v438_v25  ;;  %v478_v23 = vld [vmem:[%s6701_s10 + $0x10] sm:$0xff]  ;;  %v5297_v24 = vpack.c.bf16 %v477_v22, %v476_v21  ;;  %v479_v25 = vld [vmem:[%s6701_s10 + $0x18] sm:$0xff] }
 0x27d   :  { %v5301_v26 = vpack.c.bf16 %v479_v25, %v478_v23  ;;  %v484_v23 = vld [vmem:[%s6701_s10 + $0x40] sm:$0xff] }
 0x27e   :  { %5515 = vpush %v427_v27  ;;  %v440_v29 = vrot.slane %v439_v28, 1  ;;  %v4411_v27 = vld [vmem:[%s6702_s1] ss:$0 sm:$0xff]  ;;  %s5735_s1 = smov 56  }
 0x280   :  { %v441_v30 = vmax.f32 %v439_v28, %v440_v29 }
 0x282   :  { %5517 = vpush %v441_v30 }
 0x2af   :  { %s5516_s27 = spop %5515 }
 0x2b0   :  { %v429_v31 = vstv %s5516_s27  ;;  %s6678_s27 = smov 104  }
 0x2b1   :  { %v4409_v32 = vadd.f32 -8.0, %v429_v31 }
 0x2b3   :  { %449 = vperm.xlu1 %5534, %v4409_v32   ;;  %s5518_s8 = spop %5517 }
 0x2b4   :  { %v443_v33 = vstv %s5518_s8  ;;  %s6704_s8 = sld [smem:[#allocation12_spill]] }
 0x2b5   :  { %v4410_v34 = vadd.f32 -8.0, %v443_v33 }
 0x2b7   :  { %454 = vperm.xlu1 %5534, %v4410_v34  }
 0x332   :  { %v450_v39 = vpop.permute.xlu1 %449 }
 0x333   :  { %v457_v40 = vmax.f32 %v412_v4, %v450_v39  ;;  %v458_v41 = vmax.f32 %v413_v2, %v450_v39  ;;  %v472_v2 = vld [vmem:[%s6699_s28 + $0x10] sm:$0xff]  ;;  %s6680_s28 = smov 48  }
 0x334   :  { %v5273_v4 = vpack.c.bf16 %v473_v3, %v472_v2 }
 0x335   :  { %v461_v42 = vadd.f32 4.0, %v457_v40  ;;  %v462_v43 = vadd.f32 4.0, %v458_v41 }
 0x336   :  { %v455_v44 = vpop.permute.xlu1 %454  ;;  %5274 = vmatprep.subr.bf16.mxu0 %v5273_v4 }
 0x337   :  { %v466_v45 = vmul.f32 0.25, %v461_v42  ;;  %v467_v46 = vmul.f32 0.25, %v462_v43  ;;  %v459_v47 = vmax.f32 %v414_v12, %v455_v44  ;;  %v460_v48 = vmax.f32 %v415_v10, %v455_v44 }
 0x339   :  { %v5253_v49 = vpack.c.bf16 %v467_v46, %v466_v45  ;;  %v463_v50 = vadd.f32 4.0, %v459_v47  ;;  %v464_v51 = vadd.f32 4.0, %v460_v48 }
 0x33b   :  { %v468_v52 = vmul.f32 0.25, %v463_v50  ;;  %v469_v53 = vmul.f32 0.25, %v464_v51  ;;  %5254 = vmatprep.subr.bf16.mxu1 %v5253_v49 }
 0x33c   :  { %5256 = vmatpush3.bf16.msra.mxu1 %v5253_v49 }
 0x33d   :  { %v5257_v54 = vpack.c.bf16 %v469_v53, %v468_v52 }
 0x33f   :  { %5258 = vmatprep.subr.bf16.mxu1 %v5257_v54 }
 0x340   :  { %5260 = vmatpush3.bf16.msra.mxu1 %v5257_v54 }
 0x341   :  { %5266 = vmatprep.subr.bf16.mxu1 %v5253_v49 }
 0x343   :  { %4868 = vmatmul.mubr.msk.f32.vlgmr.msra.gmra.mrb[8].mxu1 %vm302_vm1, %v497_v55 }
 0x344   :  { %5268 = vmatpush3.bf16.msra.mxu1 %v5253_v49  ;;  %4870 = vmatprep.mubr.msk.f32.mxu1 %vm302_vm1, %v498_v56 }
 0x345   :  { %5270 = vmatprep.subr.bf16.mxu1 %v5257_v54 }
 0x347   :  { %4871 = vmatmul.mubr.msk.f32.gmra.mrb[10].mxu1 %vm302_vm1, %v499_v57 }
 0x348   :  { %5272 = vmatpush3.bf16.msra.mxu1 %v5257_v54  ;;  %4891 = vmatprep.mubr.msk.f32.mxu1 %vm302_vm1, %v4420_v58 }
 0x349   :  { %5278 = vmatprep.subr.bf16.mxu1 %v5253_v49 }
 0x34b   :  { %4892 = vmatmul.mubr.msk.f32.vlgmr.msra.gmra.mrb[12].mxu1 %vm302_vm1, %v4421_v59 }
 0x34c   :  { %5280 = vmatpush3.bf16.msra.mxu1 %v5253_v49  ;;  %4894 = vmatprep.mubr.msk.f32.mxu1 %vm302_vm1, %v4422_v60 }
 0x34d   :  { %5282 = vmatprep.subr.bf16.mxu1 %v5257_v54 }
 0x34f   :  { %4895 = vmatmul.mubr.msk.f32.gmra.mrb[14].mxu1 %vm302_vm1, %v4423_v61 }
 0x350   :  { %5284 = vmatpush3.bf16.msra.mxu1 %v5257_v54  ;;  %4915 = vmatprep.mubr.msk.f32.mxu1 %vm302_vm1, %v4432_v62 }
 0x353   :  { %4916 = vmatmul.mubr.msk.f32.vlgmr.msra.gmra.mrb[16].mxu1 %vm302_vm1, %v4433_v63 }
 0x354   :  { %4918 = vmatprep.mubr.msk.f32.mxu1 %vm302_vm1, %v4434_v0 }
 0x357   :  { %4919 = vmatmul.mubr.msk.f32.gmra.mrb[18].mxu1 %vm302_vm1, %v4435_v1 }
 0x358   :  { %4939 = vmatprep.mubr.msk.f32.mxu1 %vm302_vm1, %v1148_v20 }
 0x416   :  { %v4869_v7 = vpop.f32.mrb[8].mxu1 }
 0x417   :  { %v578_v8 = vpop.f32.mrb[9].mxu1 }
 0x418   :  { %4877 = vmatprep.mubr.msk.f32.mxu0 %vm416_vm2, %v578_v8 }
 0x419   :  { %4878 = vmatmul.mubr.msk.f32.vlgmr.msra.gmra.mrb[4].mxu0 %vm416_vm2, %v4869_v7 }
 0x41a   :  { %v4872_v10 = vpop.f32.mrb[10].mxu1  ;;  %5276 = vmatpush3.bf16.msra.mxu0 %v5273_v4 }
 0x41b   :  { %v588_v11 = vpop.f32.mrb[11].mxu1  ;;  %5286 = vmatprep.subr.bf16.mxu0 %v5285_v9 }
 0x41c   :  { %4880 = vmatprep.mubr.msk.f32.mxu0 %vm416_vm2, %v588_v11  ;;  %v4449_v11 = vld [vmem:[%s6700_s6 + $0x10] sm:$0xff] }
 0x41d   :  { %4881 = vmatmul.mubr.msk.f32.gmra.mrb[6].mxu0 %vm416_vm2, %v4872_v10  ;;  %v1149_v10 = vld [vmem:[%s6700_s6 + $0x8] sm:$0xff] }
 0x41e   :  { %v4893_v12 = vpop.f32.mrb[12].mxu1 }
 0x41f   :  { %v781_v13 = vpop.f32.mrb[13].mxu1 }
 0x420   :  { %4901 = vmatprep.mubr.msk.f32.mxu0 %vm416_vm2, %v781_v13  ;;  %v4455_v13 = vld [vmem:[%s6700_s6 + $0x20] sm:$0xff] }
 0x421   :  { %4902 = vmatmul.mubr.msk.f32.vlgmr.msra.gmra.mrb[4].mxu0 %vm416_vm2, %v4893_v12  ;;  %v4450_v12 = vld [vmem:[%s6700_s6 + $0x18] sm:$0xff] }
 0x422   :  { %v4896_v14 = vpop.f32.mrb[14].mxu1  ;;  %5288 = vmatpush3.bf16.msra.mxu0 %v5285_v9 }
 0x423   :  { %v791_v15 = vpop.f32.mrb[15].mxu1  ;;  %5298 = vmatprep.subr.bf16.mxu0 %v5297_v24 }
 0x424   :  { %4904 = vmatprep.mubr.msk.f32.mxu0 %vm416_vm2, %v791_v15  ;;  %v480_v15 = vld [vmem:[%s6701_s10 + $0x20] sm:$0xff] }
 0x425   :  { %4905 = vmatmul.mubr.msk.f32.gmra.mrb[6].mxu0 %vm416_vm2, %v4896_v14  ;;  %v4456_v14 = vld [vmem:[%s6700_s6 + $0x28] sm:$0xff]  ;;  %s5731_s6 = smov 96  }
 0x426   :  { %v4917_v16 = vpop.f32.mrb[16].mxu1 }
 0x427   :  { %v984_v17 = vpop.f32.mrb[17].mxu1 }
 0x428   :  { %4925 = vmatprep.mubr.msk.f32.mxu0 %vm416_vm2, %v984_v17 }
 0x429   :  { %4926 = vmatmul.mubr.msk.f32.vlgmr.msra.gmra.mrb[4].mxu0 %vm416_vm2, %v4917_v16  ;;  %v481_v16 = vld [vmem:[%s6701_s10 + $0x28] sm:$0xff] }
 0x42a   :  { %v4920_v18 = vpop.f32.mrb[18].mxu1  ;;  %5300 = vmatpush3.bf16.msra.mxu0 %v5297_v24  ;;  %v5313_v17 = vpack.c.bf16 %v481_v16, %v480_v15  ;;  %v485_v24 = vld [vmem:[%s6701_s10 + $0x48] sm:$0xff] }
 0x42b   :  { %v994_v19 = vpop.f32.mrb[19].mxu1  ;;  %5302 = vmatprep.subr.bf16.mxu0 %v5301_v26  ;;  %v5329_v25 = vpack.c.bf16 %v485_v24, %v484_v23  ;;  %v4462_v23 = vld [vmem:[%s6649_s13] ss:$0 sm:$0xff] }
 0x42c   :  { %4928 = vmatprep.mubr.msk.f32.mxu0 %vm416_vm2, %v994_v19  ;;  %v483_v19 = vld [vmem:[%s6701_s10 + $0x38] sm:$0xff] }
 0x42d   :  { %4929 = vmatmul.mubr.msk.f32.gmra.mrb[6].mxu0 %vm416_vm2, %v4920_v18  ;;  %v482_v18 = vld [vmem:[%s6701_s10 + $0x30] sm:$0xff] }
 0x42e   :  { %5304 = vmatpush3.bf16.msra.mxu0 %v5301_v26  ;;  %v5317_v22 = vpack.c.bf16 %v483_v19, %v482_v18  ;;  %v486_v26 = vld [vmem:[%s6701_s10 + $0x50] sm:$0xff] }
 0x42f   :  { %5314 = vmatprep.subr.bf16.mxu0 %v5313_v17 }
 0x4fc   :  { %v4927_v28 = vpop.f32.mrb[4].mxu0 }
 0x4fd   :  { %v5497_v29 = vadd.f32 %v4927_v28, %v4411_v27  ;;  %v1081_v30 = vpop.f32.mrb[5].mxu0 }
 0x4fe   :  { %v5498_v31 = vadd.f32 %v4411_v27, %v1081_v30 }
 0x4ff   :  { %v1105_v32 = vmul.f32 %v5497_v29, %v5497_v29 }
 0x500   :  { %v1104_v33 = vmul.f32 %v5498_v31, %v5498_v31  ;;  %v4930_v34 = vpop.f32.mrb[6].mxu0 }
 0x501   :  { %v1109_v35 = vmul.f32 %v5497_v29, %v1105_v32  ;;  %v5499_v36 = vadd.f32 %v4930_v34, %v4411_v27  ;;  %v1091_v37 = vpop.f32.mrb[7].mxu0 }
 0x502   :  { %v1108_v38 = vmul.f32 %v5498_v31, %v1104_v33  ;;  %v5500_v39 = vadd.f32 %v4411_v27, %v1091_v37  ;;  %v487_v27 = vld [vmem:[%s6701_s10 + $0x58] sm:$0xff]  ;;  %v4444_v33 = vld [vmem:[%s6703_s2] ss:$0 sm:$0xff]  ;;  %s5736_s10 = smov 80   ;;  %s5737_s2 = smov 112  }
 0x503   :  { %v1113_v40 = vmul.f32 0.044715, %v1109_v35  ;;  %v1107_v41 = vmul.f32 %v5499_v36, %v5499_v36  ;;  %v5333_v30 = vpack.c.bf16 %v487_v27, %v486_v26 }
 0x504   :  { %v1112_v42 = vmul.f32 0.044715, %v1108_v38  ;;  %v1106_v43 = vmul.f32 %v5500_v39, %v5500_v39 }
 0x505   :  { %v1117_v44 = vadd.f32 %v5497_v29, %v1113_v40  ;;  %v1111_v45 = vmul.f32 %v5499_v36, %v1107_v41 }
 0x506   :  { %v1116_v46 = vadd.f32 %v5498_v31, %v1112_v42  ;;  %v1110_v47 = vmul.f32 %v5500_v39, %v1106_v43 }
 0x507   :  { %v1121_v48 = vmul.f32 0.7978846, %v1117_v44  ;;  %v1115_v49 = vmul.f32 0.044715, %v1111_v45 }
 0x508   :  { %v1120_v50 = vmul.f32 0.7978846, %v1116_v46  ;;  %v1114_v51 = vmul.f32 0.044715, %v1110_v47 }
 0x509   :  { %5624 = vtanh.f32 %v1121_v48  ;;  %v1119_v52 = vadd.f32 %v5499_v36, %v1115_v49 }
 0x50a   :  { %5626 = vtanh.f32 %v1120_v50  ;;  %v1118_v53 = vadd.f32 %v5500_v39, %v1114_v51 }
 0x50b   :  { %v1123_v54 = vmul.f32 0.7978846, %v1119_v52 }
 0x50c   :  { %v1122_v55 = vmul.f32 0.7978846, %v1118_v53  ;;  %v1667_v53 = vld [vmem:[%s6704_s8 + $0x8] sm:$0xff] }
 0x50d   :  { %5628 = vtanh.f32 %v1123_v54 }
 0x50e   :  { %5630 = vtanh.f32 %v1122_v55 }
 0x513   :  { %v5625_v56 = vpop.eup %5624 }
 0x514   :  { %v5627_v57 = vpop.eup %5626  ;;  %v1129_v58 = vadd.f32 1.0, %v5625_v56  ;;  %v1666_v56 = vld [vmem:[%s6704_s8] sm:$0xff]  ;;  %s6677_s8 = smov 72  }
 0x515   :  { %v1128_v59 = vadd.f32 1.0, %v5627_v57 }
 0x516   :  { %v1133_v60 = vmul.f32 0.5, %v1129_v58 }
 0x517   :  { %v5629_v61 = vpop.eup %5628  ;;  %v1132_v62 = vmul.f32 0.5, %v1128_v59 }
 0x518   :  { %v5631_v63 = vpop.eup %5630  ;;  %v1137_v0 = vmul.f32 %v5497_v29, %v1133_v60  ;;  %v1131_v1 = vadd.f32 1.0, %v5629_v61 }
 0x519   :  { %v1136_v2 = vmul.f32 %v5498_v31, %v1132_v62  ;;  %v1130_v3 = vadd.f32 1.0, %v5631_v63 }
 0x51a   :  { %v1135_v4 = vmul.f32 0.5, %v1131_v1 }
 0x51b   :  { %v5289_v5 = vpack.c.bf16 %v1137_v0, %v1136_v2  ;;  %v1134_v6 = vmul.f32 0.5, %v1130_v3 }
 0x51c   :  { %v1139_v7 = vmul.f32 %v5499_v36, %v1135_v4 }
 0x51d   :  { %v1138_v8 = vmul.f32 %v5500_v39, %v1134_v6  ;;  %5290 = vmatprep.subr.bf16.mxu1 %v5289_v5 }
 0x51e   :  { %5292 = vmatpush3.bf16.msra.mxu1 %v5289_v5 }
 0x51f   :  { %v5293_v9 = vpack.c.bf16 %v1139_v7, %v1138_v8  ;;  %v1717_v8 = vld [vmem:[%s6647_s14] sm:$0xff] }
 0x521   :  { %5294 = vmatprep.subr.bf16.mxu1 %v5293_v9 }
 0x522   :  { %5296 = vmatpush3.bf16.msra.mxu1 %v5293_v9 }
 0x523   :  { %5306 = vmatprep.subr.bf16.mxu1 %v5289_v5 }
 0x525   :  { %4940 = vmatmul.mubr.msk.f32.vlgmr.msra.gmra.mrb[20].mxu1 %vm302_vm1, %v1149_v10 }
 0x526   :  { %5308 = vmatpush3.bf16.msra.mxu1 %v5289_v5  ;;  %4961 = vmatprep.mubr.msk.f32.mxu1 %vm302_vm1, %v4449_v11  ;;  %v1719_v11 = vld [vmem:[%s6647_s14 + $0x10] sm:$0xff] }
 0x527   :  { %5310 = vmatprep.subr.bf16.mxu1 %v5293_v9 }
 0x52a   :  { %5312 = vmatpush3.bf16.msra.mxu1 %v5293_v9 }
 0x52b   :  { %5322 = vmatprep.subr.bf16.mxu1 %v5289_v5 }
 0x52d   :  { %4962 = vmatmul.mubr.msk.f32.vlgmr.msra.gmra.mrb[22].mxu1 %vm302_vm1, %v4450_v12  ;;  %v1720_v12 = vld [vmem:[%s6647_s14 + $0x18] sm:$0xff] }
 0x52e   :  { %5324 = vmatpush3.bf16.msra.mxu1 %v5289_v5  ;;  %4983 = vmatprep.mubr.msk.f32.mxu1 %vm302_vm1, %v4455_v13  ;;  %v5341_v13 = vpack.c.bf16 %v1720_v12, %v1719_v11 }
 0x52f   :  { %5326 = vmatprep.subr.bf16.mxu1 %v5293_v9 }
 0x532   :  { %5328 = vmatpush3.bf16.msra.mxu1 %v5293_v9  ;;  %v1718_v9 = vld [vmem:[%s6647_s14 + $0x8] sm:$0xff] }
 0x533   :  { %v5337_v10 = vpack.c.bf16 %v1718_v9, %v1717_v8 }
 0x535   :  { %4984 = vmatmul.mubr.msk.f32.vlgmr.msra.gmra.mrb[24].mxu1 %vm302_vm1, %v4456_v14  ;;  %5338 = vmatprep.subr.bf16.mxu1 %v5337_v10 }
 0x536   :  { %5340 = vmatpush3.bf16.msra.mxu1 %v5337_v10 }
 0x537   :  { %5342 = vmatprep.subr.bf16.mxu1 %v5341_v13 }
 0x53a   :  { %5344 = vmatpush3.bf16.msra.mxu1 %v5341_v13 }
 0x5f8   :  { %v4941_v20 = vpop.f32.mrb[20].mxu1 }
 0x5f9   :  { %v1222_v21 = vpop.f32.mrb[21].mxu1 }
 0x5fa   :  { %4950 = vmatprep.mubr.msk.f32.mxu0 %vm302_vm1, %v1222_v21  ;;  %v4461_v21 = vld [vmem:[%s6648_s12] ss:$0 sm:$0xff] }
 0x5fb   :  { %4951 = vmatmul.mubr.msk.f32.vlgmr.msra.gmra.mrb[8].mxu0 %vm302_vm1, %v4941_v20 }
 0x5fc   :  { %5316 = vmatpush3.bf16.msra.mxu0 %v5313_v17 }
 0x5fd   :  { %5318 = vmatprep.subr.bf16.mxu0 %v5317_v22 }
 0x600   :  { %v4963_v28 = vpop.f32.mrb[22].mxu1  ;;  %5320 = vmatpush3.bf16.msra.mxu0 %v5317_v22 }
 0x601   :  { %v1389_v29 = vpop.f32.mrb[23].mxu1  ;;  %5330 = vmatprep.subr.bf16.mxu0 %v5329_v25 }
 0x602   :  { %4972 = vmatprep.mubr.msk.f32.mxu0 %vm302_vm1, %v1389_v29 }
 0x603   :  { %4973 = vmatmul.mubr.msk.f32.vlgmr.msra.gmra.mrb[8].mxu0 %vm302_vm1, %v4963_v28 }
 0x604   :  { %5332 = vmatpush3.bf16.msra.mxu0 %v5329_v25 }
 0x605   :  { %5334 = vmatprep.subr.bf16.mxu0 %v5333_v30 }
 0x608   :  { %v4985_v31 = vpop.f32.mrb[24].mxu1  ;;  %5336 = vmatpush3.bf16.msra.mxu0 %v5333_v30  ;;  %v4463_v30 = vld [vmem:[%s6650_s15] ss:$0 sm:$0xff] }
 0x609   :  { %v1556_v32 = vpop.f32.mrb[25].mxu1 }
 0x60a   :  { %4994 = vmatprep.mubr.msk.f32.mxu0 %vm302_vm1, %v1556_v32 }
 0x60b   :  { %4995 = vmatmul.mubr.msk.f32.vlgmr.msra.gmra.mrb[8].mxu0 %vm302_vm1, %v4985_v31 }
 0x6de   :  { %v4996_v34 = vpop.f32.mrb[8].mxu0 }
 0x6df   :  { %v5501_v35 = vadd.f32 %v4996_v34, %v4444_v33  ;;  %v1637_v36 = vpop.f32.mrb[9].mxu0 }
 0x6e0   :  { %v5502_v37 = vadd.f32 %v4444_v33, %v1637_v36 }
 0x6e1   :  { %v1649_v38 = vmul.f32 %v5501_v35, %v5501_v35 }
 0x6e2   :  { %v1648_v39 = vmul.f32 %v5502_v37, %v5502_v37 }
 0x6e3   :  { %v1651_v40 = vmul.f32 %v5501_v35, %v1649_v38 }
 0x6e4   :  { %v1650_v41 = vmul.f32 %v5502_v37, %v1648_v39 }
 0x6e5   :  { %v1653_v42 = vmul.f32 0.044715, %v1651_v40 }
 0x6e6   :  { %v1652_v43 = vmul.f32 0.044715, %v1650_v41 }
 0x6e7   :  { %v1655_v44 = vadd.f32 %v5501_v35, %v1653_v42  ;;  %v6186_v42 = vld [vmem:[%s6651_s11 + $0x8] sm:$0xff] }
 0x6e8   :  { %v1654_v45 = vadd.f32 %v5502_v37, %v1652_v43 }
 0x6e9   :  { %v1657_v46 = vmul.f32 0.7978846, %v1655_v44 }
 0x6ea   :  { %v1656_v47 = vmul.f32 0.7978846, %v1654_v45  ;;  %v6191_v45 = vld [vmem:[%s6651_s11] sm:$0xff] }
 0x6eb   :  { %5632 = vtanh.f32 %v1657_v46 }
 0x6ec   :  { %5634 = vtanh.f32 %v1656_v47 }
 0x6f5   :  { %v5633_v48 = vpop.eup %5632 }
 0x6f6   :  { %v5635_v49 = vpop.eup %5634  ;;  %v1661_v50 = vadd.f32 1.0, %v5633_v48 }
 0x6f7   :  { %v1660_v51 = vadd.f32 1.0, %v5635_v49 }
 0x6f8   :  { %v1663_v52 = vmul.f32 0.5, %v1661_v50 }
 0x6f9   :  { %v1662_v54 = vmul.f32 0.5, %v1660_v51 }
 0x6fa   :  { %v1665_v55 = vmul.f32 %v5501_v35, %v1663_v52 }
 0x6fb   :  { %v1664_v57 = vmul.f32 %v5502_v37, %v1662_v54 }
 0x6fc   :  { %v6124_v58 = vadd.f32 %v1667_v53, %v1665_v55 }
 0x6fd   :  { %v6126_v59 = vadd.f32 %v1666_v56, %v1664_v57 }
 0x6fe   :  { %v1677_v60 = vsel %vm302_vm1, %v6124_v58, 0.0 }
 0x6ff   :  { %1678 = vadd.xlane.f32.xlu1 %v1677_v60  ;;  %v1674_v61 = vsel %vm302_vm1, %v6126_v59, 0.0 }
 0x700   :  { %1675 = vadd.xlane.f32.xlu0 %v1674_v61 }
 0x78c   :  { %v1679_v62 = vpop.xlane.xlu1 %1678 }
 0x78d   :  { %v1682_v63 = vmul.f32 0.03125, %v1679_v62  ;;  %v1676_v0 = vpop.xlane.xlu0 %1675 }
 0x78e   :  { %v1681_v1 = vmul.f32 0.03125, %v1676_v0 }
 0x78f   :  { %v1684_v2 = vsub.f32 %v6124_v58, %v1682_v63 }
 0x790   :  { %v1683_v3 = vsub.f32 %v6126_v59, %v1681_v1 }
 0x791   :  { %v1686_v6 = vmul.f32 %v1684_v2, %v1684_v2 }
 0x792   :  { %v1685_v4 = vmul.f32 %v1683_v3, %v1683_v3 }
 0x793   :  { %v1690_v7 = vsel %vm302_vm1, %v1686_v6, 0.0 }
 0x794   :  { %v1687_v5 = vsel %vm302_vm1, %v1685_v4, 0.0 }
 0x795   :  { %1688 = vadd.xlane.f32.xlu0 %v1687_v5 }
 0x799   :  { %1691 = vadd.xlane.f32.xlu0 %v1690_v7 }
 0x822   :  { %v1689_v14 = vpop.xlane.xlu0 %1688 }
 0x823   :  { %v1693_v15 = vmul.f32 0.03125, %v1689_v14 }
 0x825   :  { %v1695_v16 = vadd.f32 1e-05, %v1693_v15 }
 0x826   :  { %v1692_v17 = vpop.xlane.xlu0 %1691 }
 0x827   :  { %5636 = vrsqrt.f32 %v1695_v16  ;;  %v1694_v18 = vmul.f32 0.03125, %v1692_v17 }
 0x829   :  { %v1696_v19 = vadd.f32 1e-05, %v1694_v18 }
 0x82b   :  { %5638 = vrsqrt.f32 %v1696_v19 }
 0x831   :  { %v5637_v20 = vpop.eup %5636 }
 0x832   :  { %v1699_v22 = vmul.f32 %v5637_v20, %v1683_v3 }
 0x834   :  { %v1707_v24 = vmul.f32 %v4461_v21, %v1699_v22 }
 0x835   :  { %v5639_v25 = vpop.eup %5638 }
 0x836   :  { %v1700_v26 = vmul.f32 %v5639_v25, %v1684_v2  ;;  %v1715_v27 = vadd.f32 %v4462_v23, %v1707_v24 }
 0x838   :  { %v1708_v28 = vmul.f32 %v4461_v21, %v1700_v26  ;;  %5005 = vmatprep.mubr.msk.f32.mxu1 %vm302_vm1, %v1715_v27 }
 0x83a   :  { %v1716_v29 = vadd.f32 %v4462_v23, %v1708_v28 }
 0x83c   :  { %5006 = vmatmul.mubr.msk.f32.vlgmr.msra.gmra.mrb[26].mxu1 %vm302_vm1, %v1716_v29 }
 0x90f   :  { %v5007_v31 = vpop.f32.mrb[26].mxu1 }
 0x910   :  { %v6159_v32 = vadd.f32 %v5007_v31, %v4463_v30  ;;  %v1800_v33 = vpop.f32.mrb[27].mxu1 }
 0x911   :  { %v6161_v34 = vadd.f32 %v4463_v30, %v1800_v33 }
 0x913   :  { %5012 = vmatprep.mubr.msk.f32.mxu0 %vm1815_vm3, %v6161_v34  ;;  %v6167_v35 = vpack.i.bf16 %v6159_v32, %v6161_v34 }
 0x915   :  { %5536 = vrot.lane.b32.xlu0 %v6167_v35, %s5731_s6 }
 0x987   :  { %v5537_v36 = vpop.permute.xlu0 %5536 }
 0x988   :  { %v5539_v37 = vunpack.i.h.bf16 %v5537_v36  ;;  %v5538_v38 = vunpack.i.l.bf16 %v5537_v36 }
 0x98a   :  { %v5345_v40 = vpack.c.bf16 %v5539_v37, %v5538_v38 }
 0x98c   :  { %5347 = vmatprep.subr.msk.bf16.mxu0 %vm6173_vm4, %v5345_v40 }
 0x98d   :  { %5350 = vmatpush3.bf16.xpose.msk.msra.mxu0 %vm6173_vm4, %v5345_v40 }
 0x994   :  { %5013 = vmatmul.mubr.msk.f32.vlgmr.msra.gmra.mrb[10].mxu0 %vm1815_vm3, %v6159_v32 }
 0xa67   :  { %v5014_v41 = vpop.f32.mrb[10].mxu0 }
 0xa68   :  { %v1900_v43 = vmul.f32 0.35355338, %v5014_v41  ;;  %v1890_v44 = vpop.f32.mrb[11].mxu0 }
 0xa69   :  { %v1899_v46 = vmul.f32 0.35355338, %v1890_v44 }
 0xa6a   :  { %v1902_v47 = vadd.f32 %v1900_v43, %v6186_v42 }
 0xa6b   :  { %v1901_v48 = vadd.f32 %v1899_v46, %v6191_v45 }
 0xa6c   :  { %v1906_v49 = vsel %vm416_vm2, %v1902_v47, -inf }
 0xa6d   :  { %1907 = vmax.xlane.f32.xlu1 %v1906_v49  ;;  %v1903_v50 = vsel %vm416_vm2, %v1901_v48, -inf }
 0xa6e   :  { %1904 = vmax.xlane.f32.xlu0 %v1903_v50 }
 0xa7e   :  { %5541 = vrot.lane.b32.xlu1 %v6167_v35, %s5732_s29 }
 0xa82   :  { %2012 = vrot.lane.b32.xlu1 %v6161_v34, %s5733_s9 }
 0xa84   :  { %5546 = vrot.lane.b32.xlu0 %v6167_v35, %s5734_s30 }
 0xafa   :  { %v1908_v51 = vpop.xlane.xlu1 %1907 }
 0xafb   :  { %v1910_v52 = vsub.f32 %v1902_v47, %v1908_v51  ;;  %v1905_v53 = vpop.xlane.xlu0 %1904 }
 0xafc   :  { %v1909_v54 = vsub.f32 %v1901_v48, %v1905_v53 }
 0xafd   :  { %v1913_v55 = vmul.f32 1.442695, %v1910_v52 }
 0xafe   :  { %v1911_v56 = vmul.f32 1.442695, %v1909_v54  ;;  %v5542_v57 = vpop.permute.xlu1 %5541 }
 0xaff   :  { %5640 = vpow2.f32 %v1913_v55  ;;  %v5544_v60 = vunpack.i.h.bf16 %v5542_v57  ;;  %v5543_v61 = vunpack.i.l.bf16 %v5542_v57  ;;  %v5547_v62 = vpop.permute.xlu0 %5546 }
 0xb00   :  { %v5549_v63 = vunpack.i.h.bf16 %v5547_v62  ;;  %v5548_v0 = vunpack.i.l.bf16 %v5547_v62  ;;  %5642 = vpow2.f32 %v1911_v56 }
 0xb01   :  { %v5351_v1 = vpack.c.bf16 %v5544_v60, %v5543_v61 }
 0xb02   :  { %v5355_v2 = vpack.c.bf16 %v5549_v63, %v5548_v0  ;;  %v2013_v7 = vpop.permute.xlu1 %2012 }
 0xb03   :  { %5352 = vmatprep.subr.bf16.mxu1 %v5351_v1 }
 0xb04   :  { %5354 = vmatpush3.bf16.msra.mxu1 %v5351_v1 }
 0xb05   :  { %5357 = vmatprep.subr.msk.bf16.mxu1 %vm6173_vm4, %v5355_v2 }
 0xb09   :  { %v5641_v3 = vpop.eup %5640 }
 0xb0a   :  { %v1918_v4 = vsel %vm416_vm2, %v5641_v3, 0.0  ;;  %v5643_v5 = vpop.eup %5642 }
 0xb0b   :  { %1919 = vadd.xlane.f32.xlu1 %v1918_v4  ;;  %v1915_v6 = vsel %vm416_vm2, %v5643_v5, 0.0 }
 0xb0f   :  { %1916 = vadd.xlane.f32.xlu1 %v1915_v6 }
 0xb20   :  { %2014 = vrot.lane.b32.xlu1 %v6159_v32, %s5733_s9 }
 0xb98   :  { %v1920_v8 = vpop.xlane.xlu1 %1919 }
 0xb99   :  { %5644 = vrcp.f32 %v1920_v8 }
 0xb9c   :  { %v1917_v9 = vpop.xlane.xlu1 %1916 }
 0xb9d   :  { %5646 = vrcp.f32 %v1917_v9 }
 0xba0   :  { %v2015_v14 = vpop.permute.xlu1 %2014 }
 0xba3   :  { %v5645_v10 = vpop.eup %5644 }
 0xba4   :  { %v1924_v13 = vmul.f32 %v5645_v10, %v5641_v3 }
 0xba7   :  { %v5647_v11 = vpop.eup %5646 }
 0xba8   :  { %v1922_v12 = vmul.f32 %v5647_v11, %v5643_v5 }
 0xbaa   :  { %5019 = vmatprep.mubr.msk.f32.mxu1 %vm416_vm2, %v1922_v12 }
 0xbab   :  { %5020 = vmatmul.mubr.msk.f32.vlgmr.msra.gmra.mrb[28].mxu1 %vm416_vm2, %v1924_v13 }
 0xbac   :  { %5360 = vmatpush3.bf16.xpose.msk.msra.mxu1 %vm6173_vm4, %v5355_v2  ;;  %5026 = vmatprep.mubr.msk.f32.mxu1 %vm1815_vm3, %v2013_v7 }
 0xbb3   :  { %5027 = vmatmul.mubr.msk.f32.vlgmr.msra.gmra.mrb[30].mxu1 %vm1815_vm3, %v2015_v14 }
 0xc7e   :  { %v6215_v15 = vpop.f32.mrb[28].mxu1 }
 0xc7f   :  { %v6217_v16 = vpop.f32.mrb[29].mxu1 }
 0xc86   :  { %v5028_v17 = vpop.f32.mrb[30].mxu1 }
 0xc87   :  { %v2104_v18 = vmul.f32 0.35355338, %v5028_v17  ;;  %v2094_v19 = vpop.f32.mrb[31].mxu1 }
 0xc88   :  { %v2103_v20 = vmul.f32 0.35355338, %v2094_v19 }
 0xc89   :  { %v2106_v21 = vadd.f32 %v2104_v18, %v6186_v42 }
 0xc8a   :  { %v2105_v22 = vadd.f32 %v2103_v20, %v6191_v45 }
 0xc8b   :  { %v2110_v23 = vsel %vm416_vm2, %v2106_v21, -inf }
 0xc8c   :  { %2111 = vmax.xlane.f32.xlu0 %v2110_v23  ;;  %v2107_v24 = vsel %vm416_vm2, %v2105_v22, -inf }
 0xc8d   :  { %2108 = vmax.xlane.f32.xlu1 %v2107_v24 }
 0xc9e   :  { %5551 = vrot.lane.b32.xlu1 %v6167_v35, %s5735_s1 }
 0xca2   :  { %5556 = vrot.lane.b32.xlu0 %v6167_v35, %s5736_s10  ;;  %2216 = vrot.lane.b32.xlu1 %v6161_v34, %s5737_s2 }
 0xd19   :  { %v2112_v25 = vpop.xlane.xlu0 %2111 }
 0xd1a   :  { %v2114_v26 = vsub.f32 %v2106_v21, %v2112_v25  ;;  %v2109_v27 = vpop.xlane.xlu1 %2108 }
 0xd1b   :  { %v2113_v28 = vsub.f32 %v2105_v22, %v2109_v27 }
 0xd1c   :  { %v2117_v29 = vmul.f32 1.442695, %v2114_v26 }
 0xd1d   :  { %v2115_v30 = vmul.f32 1.442695, %v2113_v28  ;;  %v5557_v31 = vpop.permute.xlu0 %5556 }
 0xd1e   :  { %5648 = vpow2.f32 %v2117_v29  ;;  %v5552_v33 = vpop.permute.xlu1 %5551  ;;  %v5559_v36 = vunpack.i.h.bf16 %v5557_v31  ;;  %v5558_v37 = vunpack.i.l.bf16 %v5557_v31 }
 0xd1f   :  { %v5554_v38 = vunpack.i.h.bf16 %v5552_v33  ;;  %v5553_v40 = vunpack.i.l.bf16 %v5552_v33  ;;  %5650 = vpow2.f32 %v2115_v30 }
 0xd20   :  { %v5365_v43 = vpack.c.bf16 %v5559_v36, %v5558_v37 }
 0xd21   :  { %v5361_v41 = vpack.c.bf16 %v5554_v38, %v5553_v40 }
 0xd22   :  { %v2217_v49 = vpop.permute.xlu1 %2216 }
 0xd23   :  { %5362 = vmatprep.subr.bf16.mxu0 %v5361_v41 }
 0xd24   :  { %5364 = vmatpush3.bf16.msra.mxu0 %v5361_v41 }
 0xd25   :  { %5367 = vmatprep.subr.msk.bf16.mxu0 %vm6173_vm4, %v5365_v43 }
 0xd28   :  { %v5649_v44 = vpop.eup %5648 }
 0xd29   :  { %v2122_v46 = vsel %vm416_vm2, %v5649_v44, 0.0  ;;  %v5651_v47 = vpop.eup %5650 }
 0xd2a   :  { %2123 = vadd.xlane.f32.xlu1 %v2122_v46  ;;  %v2119_v48 = vsel %vm416_vm2, %v5651_v47, 0.0 }
 0xd2e   :  { %2120 = vadd.xlane.f32.xlu1 %v2119_v48 }
 0xd3f   :  { %2218 = vrot.lane.b32.xlu1 %v6159_v32, %s5737_s2 }
 0xdb7   :  { %v2124_v50 = vpop.xlane.xlu1 %2123 }
 0xdb8   :  { %5652 = vrcp.f32 %v2124_v50 }
 0xdbb   :  { %v2121_v51 = vpop.xlane.xlu1 %2120 }
 0xdbc   :  { %5654 = vrcp.f32 %v2121_v51 }
 0xdbf   :  { %v2219_v56 = vpop.permute.xlu1 %2218 }
 0xdc2   :  { %v5653_v52 = vpop.eup %5652 }
 0xdc3   :  { %v2128_v55 = vmul.f32 %v5653_v52, %v5649_v44 }
 0xdc6   :  { %v5655_v53 = vpop.eup %5654 }
 0xdc7   :  { %v2126_v54 = vmul.f32 %v5655_v53, %v5651_v47 }
 0xdc9   :  { %5033 = vmatprep.mubr.msk.f32.mxu0 %vm416_vm2, %v2126_v54 }
 0xdca   :  { %5034 = vmatmul.mubr.msk.f32.vlgmr.msra.gmra.mrb[12].mxu0 %vm416_vm2, %v2128_v55 }
 0xdcb   :  { %5370 = vmatpush3.bf16.xpose.msk.msra.mxu0 %vm6173_vm4, %v5365_v43  ;;  %5040 = vmatprep.mubr.msk.f32.mxu0 %vm1815_vm3, %v2217_v49 }
 0xdd2   :  { %5041 = vmatmul.mubr.msk.f32.vlgmr.msra.gmra.mrb[14].mxu0 %vm1815_vm3, %v2219_v56 }
 0xe9d   :  { %v6241_v57 = vpop.f32.mrb[12].mxu0 }
 0xe9e   :  { %v6243_v60 = vpop.f32.mrb[13].mxu0 }
 0xea5   :  { %v5042_v61 = vpop.f32.mrb[14].mxu0 }
 0xea6   :  { %v2308_v62 = vmul.f32 0.35355338, %v5042_v61  ;;  %v2298_v63 = vpop.f32.mrb[15].mxu0 }
 0xea7   :  { %v2307_v0 = vmul.f32 0.35355338, %v2298_v63 }
 0xea8   :  { %v2310_v1 = vadd.f32 %v2308_v62, %v6186_v42 }
 0xea9   :  { %v2309_v2 = vadd.f32 %v2307_v0, %v6191_v45 }
 0xeaa   :  { %v2314_v3 = vsel %vm416_vm2, %v2310_v1, -inf }
 0xeab   :  { %2315 = vmax.xlane.f32.xlu1 %v2314_v3  ;;  %v2311_v4 = vsel %vm416_vm2, %v2309_v2, -inf }
 0xeac   :  { %2312 = vmax.xlane.f32.xlu0 %v2311_v4 }
 0xebc   :  { %5561 = vrot.lane.b32.xlu1 %v6167_v35, %s6680_s28 }
 0xec0   :  { %2420 = vrot.lane.b32.xlu1 %v6161_v34, %s6678_s27 }
 0xec4   :  { %2422 = vrot.lane.b32.xlu1 %v6159_v32, %s6678_s27 }
 0xf38   :  { %v2316_v5 = vpop.xlane.xlu1 %2315 }
 0xf39   :  { %v2318_v6 = vsub.f32 %v2310_v1, %v2316_v5  ;;  %v2313_v7 = vpop.xlane.xlu0 %2312  ;;  %v2655_v5 = vld [vmem:[%s6652_s16] sm:$0xff] }
 0xf3a   :  { %v2317_v8 = vsub.f32 %v2309_v2, %v2313_v7 }
 0xf3b   :  { %v2321_v9 = vmul.f32 1.442695, %v2318_v6  ;;  %v2657_v6 = vld [vmem:[%s6652_s16 + $0x10] sm:$0xff] }
 0xf3c   :  { %v2319_v10 = vmul.f32 1.442695, %v2317_v8  ;;  %v5562_v11 = vpop.permute.xlu1 %5561  ;;  %v2658_v8 = vld [vmem:[%s6652_s16 + $0x18] sm:$0xff] }
 0xf3d   :  { %5656 = vpow2.f32 %v2321_v9  ;;  %v5564_v12 = vunpack.i.h.bf16 %v5562_v11  ;;  %v5563_v13 = vunpack.i.l.bf16 %v5562_v11  ;;  %v5389_v9 = vpack.c.bf16 %v2658_v8, %v2657_v6  ;;  %v2908_v8 = vld [vmem:[%s6657_s22 + $0x18] sm:$0xff] }
 0xf3e   :  { %5658 = vpow2.f32 %v2319_v10 }
 0xf3f   :  { %v5371_v14 = vpack.c.bf16 %v5564_v12, %v5563_v13 }
 0xf40   :  { %v2421_v29 = vpop.permute.xlu1 %2420 }
 0xf41   :  { %5372 = vmatprep.subr.bf16.mxu1 %v5371_v14 }
 0xf42   :  { %5374 = vmatpush3.bf16.msra.mxu1 %v5371_v14 }
 0xf44   :  { %v2423_v30 = vpop.permute.xlu1 %2422 }
 0xf47   :  { %v5657_v17 = vpop.eup %5656 }
 0xf48   :  { %v2326_v34 = vsel %vm416_vm2, %v5657_v17, 0.0  ;;  %v5659_v18 = vpop.eup %5658 }
 0xf49   :  { %2327 = vadd.xlane.f32.xlu0 %v2326_v34  ;;  %v2323_v32 = vsel %vm416_vm2, %v5659_v18, 0.0 }
 0xf4d   :  { %2324 = vadd.xlane.f32.xlu0 %v2323_v32 }
 0xf63   :  { %5566 = vrot.lane.b32.xlu0 %v6167_v35, %s6677_s8 }
 0xfd6   :  { %v2328_v19 = vpop.xlane.xlu0 %2327 }
 0xfd7   :  { %5660 = vrcp.f32 %v2328_v19 }
 0xfda   :  { %v2325_v20 = vpop.xlane.xlu0 %2324 }
 0xfdb   :  { %5662 = vrcp.f32 %v2325_v20 }
 0xfde   :  { %v5567_v21 = vpop.permute.xlu0 %5566 }
 0xfdf   :  { %v5569_v22 = vunpack.i.h.bf16 %v5567_v21  ;;  %v5568_v23 = vunpack.i.l.bf16 %v5567_v21 }
 0xfe1   :  { %v5375_v24 = vpack.c.bf16 %v5569_v22, %v5568_v23  ;;  %v5661_v25 = vpop.eup %5660 }
 0xfe2   :  { %v2332_v28 = vmul.f32 %v5661_v25, %v5657_v17 }
 0xfe3   :  { %5377 = vmatprep.subr.msk.bf16.mxu1 %vm6173_vm4, %v5375_v24 }
 0xfe5   :  { %v5663_v26 = vpop.eup %5662 }
 0xfe6   :  { %v2330_v27 = vmul.f32 %v5663_v26, %v5659_v18 }
 0xfe8   :  { %5047 = vmatprep.mubr.msk.f32.mxu1 %vm416_vm2, %v2330_v27 }
 0xfe9   :  { %5048 = vmatmul.mubr.msk.f32.vlgmr.msra.gmra.mrb[32].mxu1 %vm416_vm2, %v2332_v28 }
 0xfea   :  { %5380 = vmatpush3.bf16.xpose.msk.msra.mxu1 %vm6173_vm4, %v5375_v24  ;;  %5054 = vmatprep.mubr.msk.f32.mxu1 %vm1815_vm3, %v2421_v29 }
 0xff1   :  { %5055 = vmatmul.mubr.msk.f32.vlgmr.msra.gmra.mrb[34].mxu1 %vm1815_vm3, %v2423_v30 }
0x10bc   :  { %v5049_v31 = vpop.f32.mrb[32].mxu1 }
0x10bd   :  { %v2411_v33 = vpop.f32.mrb[33].mxu1 }
0x10c4   :  { %v5056_v36 = vpop.f32.mrb[34].mxu1 }
0x10c5   :  { %v2512_v37 = vmul.f32 0.35355338, %v5056_v36  ;;  %v2502_v38 = vpop.f32.mrb[35].mxu1 }
0x10c6   :  { %v2511_v40 = vmul.f32 0.35355338, %v2502_v38 }
0x10c7   :  { %v2514_v41 = vadd.f32 %v2512_v37, %v6186_v42 }
0x10c8   :  { %v2513_v43 = vadd.f32 %v2511_v40, %v6191_v45 }
0x10c9   :  { %v2518_v44 = vsel %vm416_vm2, %v2514_v41, -inf }
0x10ca   :  { %2519 = vmax.xlane.f32.xlu1 %v2518_v44  ;;  %v2515_v46 = vsel %vm416_vm2, %v2513_v43, -inf  ;;  %v2795_v44 = vld [vmem:[%s6654_s20] sm:$0xff] }
0x10cb   :  { %2516 = vmax.xlane.f32.xlu0 %v2515_v46  ;;  %v2796_v46 = vld [vmem:[%s6654_s20 + $0x8] sm:$0xff] }
0x10db   :  { %5571 = vrot.lane.b32.xlu1 %v6167_v35, %s6672_s5 }
0x10df   :  { %2628 = vrot.lane.b32.xlu1 %v6241_v57, %s6673_s0 }
0x10e3   :  { %2634 = vrot.lane.b32.xlu1 %v2411_v33, %s6675_s3 }
0x1157   :  { %v2520_v47 = vpop.xlane.xlu1 %2519 }
0x1158   :  { %v2522_v48 = vsub.f32 %v2514_v41, %v2520_v47  ;;  %v2517_v49 = vpop.xlane.xlu0 %2516  ;;  %v5393_v47 = vpack.c.bf16 %v2796_v46, %v2795_v44 }
0x1159   :  { %v2521_v50 = vsub.f32 %v2513_v43, %v2517_v49  ;;  %v2798_v49 = vld [vmem:[%s6654_s20 + $0x18] sm:$0xff] }
0x115a   :  { %v2525_v51 = vmul.f32 1.442695, %v2522_v48  ;;  %5394 = vmatprep.subr.bf16.mxu1 %v5393_v47  ;;  %v2797_v48 = vld [vmem:[%s6654_s20 + $0x10] sm:$0xff] }
0x115b   :  { %v2523_v52 = vmul.f32 1.442695, %v2521_v50  ;;  %v5572_v53 = vpop.permute.xlu1 %5571  ;;  %5396 = vmatpush3.bf16.msra.mxu1 %v5393_v47  ;;  %v5397_v50 = vpack.c.bf16 %v2798_v49, %v2797_v48 }
0x115c   :  { %v5574_v54 = vunpack.i.h.bf16 %v5572_v53  ;;  %v5573_v55 = vunpack.i.l.bf16 %v5572_v53 }
0x115d   :  { %5664 = vpow2.f32 %v2523_v52  ;;  %5398 = vmatprep.subr.bf16.mxu1 %v5397_v50 }
0x115e   :  { %v5381_v56 = vpack.c.bf16 %v5574_v54, %v5573_v55  ;;  %5666 = vpow2.f32 %v2525_v51 }
0x115f   :  { %v2629_v13 = vpop.permute.xlu1 %2628  ;;  %5400 = vmatpush3.bf16.msra.mxu1 %v5397_v50 }
0x1160   :  { %5382 = vmatprep.subr.bf16.mxu0 %v5381_v56  ;;  %v2649_v32 = vsel %vm1815_vm3, %v6215_v15, %v2629_v13  ;;  %v2911_v13 = vld [vmem:[%s6657_s22 + $0x30] sm:$0xff] }
0x1161   :  { %5384 = vmatpush3.bf16.msra.mxu0 %v5381_v56 }
0x1163   :  { %v2635_v17 = vpop.permute.xlu1 %2634 }
0x1167   :  { %v5665_v35 = vpop.eup %5664 }
0x1168   :  { %v2527_v57 = vsel %vm416_vm2, %v5665_v35, 0.0  ;;  %v5667_v61 = vpop.eup %5666 }
0x1169   :  { %2528 = vadd.xlane.f32.xlu0 %v2527_v57  ;;  %v2530_v62 = vsel %vm416_vm2, %v5667_v61, 0.0  ;;  %v4493_v57 = vld [vmem:[%s6655_s18] ss:$0 sm:$0xff] }
0x116d   :  { %2531 = vadd.xlane.f32.xlu0 %v2530_v62 }
0x1183   :  { %2626 = vrot.lane.b32.xlu0 %v6243_v60, %s6673_s0  ;;  %v2656_v60 = vld [vmem:[%s6652_s16 + $0x8] sm:$0xff]  ;;  %s6713_s0 = smov 24  }
0x1184   :  { %v5385_v7 = vpack.c.bf16 %v2656_v60, %v2655_v5  ;;  %v2905_v5 = vld [vmem:[%s6657_s22] sm:$0xff]  ;;  %v2906_v60 = vld [vmem:[%s6657_s22 + $0x8] sm:$0xff] }
0x1185   :  { %v5401_v6 = vpack.c.bf16 %v2906_v60, %v2905_v5 }
0x1186   :  { %5386 = vmatprep.subr.bf16.mxu0 %v5385_v7 }
0x1187   :  { %2636 = vrot.lane.b32.xlu0 %v5049_v31, %s6675_s3 }
0x11f6   :  { %v2529_v63 = vpop.xlane.xlu0 %2528 }
0x11f7   :  { %5668 = vrcp.f32 %v2529_v63 }
0x11fa   :  { %v2532_v0 = vpop.xlane.xlu0 %2531 }
0x11fb   :  { %5670 = vrcp.f32 %v2532_v0  ;;  %v4494_v0 = vld [vmem:[%s6656_s19] ss:$0 sm:$0xff] }
0x11fe   :  { %v2627_v12 = vpop.permute.xlu0 %2626 }
0x11ff   :  { %v2648_v34 = vsel %vm1815_vm3, %v6217_v16, %v2627_v12  ;;  %v4492_v16 = vld [vmem:[%s6653_s17] ss:$0 sm:$0xff] }
0x1200   :  { %v2650_v20 = vsel %vm416_vm2, %v2648_v34, %v2635_v17  ;;  %v4495_v34 = vld [vmem:[%s6658_s21] ss:$0 sm:$0xff] }
0x1201   :  { %v5669_v1 = vpop.eup %5668 }
0x1202   :  { %v2534_v2 = vmul.f32 %v5669_v1, %v5665_v35  ;;  %v2637_v14 = vpop.permute.xlu0 %2636 }
0x1203   :  { %v2651_v21 = vsel %vm416_vm2, %v2649_v32, %v2637_v14  ;;  %v2912_v14 = vld [vmem:[%s6657_s22 + $0x38] sm:$0xff] }
0x1204   :  { %5061 = vmatprep.mubr.msk.f32.mxu0 %vm416_vm2, %v2534_v2  ;;  %v5413_v17 = vpack.c.bf16 %v2912_v14, %v2911_v13  ;;  %v4504_v14 = vld [vmem:[%s6649_s13 + $0x1] ss:$0 sm:$0xff] }
0x1205   :  { %v5671_v3 = vpop.eup %5670 }
0x1206   :  { %v2536_v4 = vmul.f32 %v5671_v3, %v5667_v61 }
0x1208   :  { %5062 = vmatmul.mubr.msk.f32.vlgmr.msra.gmra.mrb[16].mxu0 %vm416_vm2, %v2536_v4 }
0x1209   :  { %5388 = vmatpush3.bf16.msra.mxu0 %v5385_v7  ;;  %v2907_v7 = vld [vmem:[%s6657_s22 + $0x10] sm:$0xff] }
0x120a   :  { %5390 = vmatprep.subr.bf16.mxu0 %v5389_v9 }
0x120d   :  { %5392 = vmatpush3.bf16.msra.mxu0 %v5389_v9  ;;  %v5405_v9 = vpack.c.bf16 %v2908_v8, %v2907_v7 }
0x120e   :  { %5402 = vmatprep.subr.bf16.mxu0 %v5401_v6 }
0x12db   :  { %v5063_v10 = vpop.f32.mrb[16].mxu0 }
0x12dc   :  { %2644 = vrot.lane.b32.xlu0 %v5063_v10, %s6681_s7  ;;  %v2615_v11 = vpop.f32.mrb[17].mxu0  ;;  %v2909_v10 = vld [vmem:[%s6657_s22 + $0x20] sm:$0xff] }
0x12dd   :  { %2642 = vrot.lane.b32.xlu1 %v2615_v11, %s6681_s7  ;;  %v2910_v11 = vld [vmem:[%s6657_s22 + $0x28] sm:$0xff] }
0x12de   :  { %v5409_v12 = vpack.c.bf16 %v2910_v11, %v2909_v10  ;;  %v4503_v10 = vld [vmem:[%s6648_s12 + $0x1] ss:$0 sm:$0xff] }
0x134e   :  { %v2645_v18 = vpop.permute.xlu0 %2644 }
0x134f   :  { %v2643_v19 = vpop.permute.xlu1 %2642  ;;  %v2654_v23 = vsel %vm2652_vm5, %v2651_v21, %v2645_v18 }
0x1350   :  { %v2653_v22 = vsel %vm2652_vm5, %v2650_v20, %v2643_v19 }
0x1351   :  { %5072 = vmatprep.mubr.msk.f32.mxu0 %vm302_vm1, %v2653_v22 }
0x1352   :  { %5073 = vmatmul.mubr.msk.f32.vlgmr.msra.gmra.mrb[18].mxu0 %vm302_vm1, %v2654_v23 }
0x1353   :  { %5404 = vmatpush3.bf16.msra.mxu0 %v5401_v6 }
0x1354   :  { %5406 = vmatprep.subr.bf16.mxu0 %v5405_v9 }
0x1357   :  { %5408 = vmatpush3.bf16.msra.mxu0 %v5405_v9 }
0x1358   :  { %5410 = vmatprep.subr.bf16.mxu0 %v5409_v12 }
0x135b   :  { %5412 = vmatpush3.bf16.msra.mxu0 %v5409_v12 }
0x135c   :  { %5414 = vmatprep.subr.bf16.mxu0 %v5413_v17 }
0x135f   :  { %5416 = vmatpush3.bf16.msra.mxu0 %v5413_v17 }
0x1425   :  { %v5074_v24 = vpop.f32.mrb[18].mxu0 }
0x1426   :  { %v2741_v15 = vadd.f32 %v5074_v24, %v6124_v58  ;;  %v2731_v25 = vpop.f32.mrb[19].mxu0 }
0x1427   :  { %v2740_v26 = vadd.f32 %v2731_v25, %v6126_v59 }
0x1428   :  { %v6312_v27 = vadd.f32 %v4492_v16, %v2741_v15 }
0x1429   :  { %v6314_v28 = vadd.f32 %v4492_v16, %v2740_v26 }
0x142a   :  { %v2756_v29 = vsel %vm302_vm1, %v6312_v27, 0.0 }
0x142b   :  { %2757 = vadd.xlane.f32.xlu0 %v2756_v29  ;;  %v2753_v30 = vsel %vm302_vm1, %v6314_v28, 0.0 }
0x142c   :  { %2754 = vadd.xlane.f32.xlu1 %v2753_v30 }
0x14b8   :  { %v2758_v31 = vpop.xlane.xlu0 %2757 }
0x14b9   :  { %v2760_v33 = vmul.f32 0.03125, %v2758_v31  ;;  %v2755_v36 = vpop.xlane.xlu1 %2754 }
0x14ba   :  { %v2759_v37 = vmul.f32 0.03125, %v2755_v36 }
0x14bb   :  { %v2762_v58 = vsub.f32 %v6312_v27, %v2760_v33 }
0x14bc   :  { %v2761_v59 = vsub.f32 %v6314_v28, %v2759_v37 }
0x14bd   :  { %v2764_v38 = vmul.f32 %v2762_v58, %v2762_v58 }
0x14be   :  { %v2763_v40 = vmul.f32 %v2761_v59, %v2761_v59 }
0x14bf   :  { %v2768_v41 = vsel %vm302_vm1, %v2764_v38, 0.0 }
0x14c0   :  { %2769 = vadd.xlane.f32.xlu1 %v2768_v41  ;;  %v2765_v43 = vsel %vm302_vm1, %v2763_v40, 0.0 }
0x14c1   :  { %2766 = vadd.xlane.f32.xlu0 %v2765_v43  ;;  %v4500_v43 = vld [vmem:[%s6659_s23] ss:$0 sm:$0xff] }
0x154d   :  { %v2770_v51 = vpop.xlane.xlu1 %2769 }
0x154e   :  { %v2772_v52 = vmul.f32 0.03125, %v2770_v51  ;;  %v2767_v53 = vpop.xlane.xlu0 %2766 }
0x154f   :  { %v2771_v54 = vmul.f32 0.03125, %v2767_v53 }
0x1550   :  { %v2774_v55 = vadd.f32 1e-05, %v2772_v52 }
0x1551   :  { %v2773_v56 = vadd.f32 1e-05, %v2771_v54 }
0x1552   :  { %5672 = vrsqrt.f32 %v2774_v55 }
0x1553   :  { %5674 = vrsqrt.f32 %v2773_v56 }
0x155c   :  { %v5673_v35 = vpop.eup %5672 }
0x155d   :  { %v5675_v61 = vpop.eup %5674  ;;  %v2778_v62 = vmul.f32 %v5673_v35, %v2762_v58 }
0x155e   :  { %v2777_v63 = vmul.f32 %v5675_v61, %v2761_v59 }
0x155f   :  { %v2786_v1 = vmul.f32 %v4493_v57, %v2778_v62  ;;  %v4505_v62 = vld [vmem:[%s6647_s14 + $0x20] sm:$0xff] }
0x1560   :  { %v2785_v2 = vmul.f32 %v4493_v57, %v2777_v63  ;;  %v4506_v63 = vld [vmem:[%s6647_s14 + $0x28] sm:$0xff] }
0x1561   :  { %v2794_v4 = vadd.f32 %v4494_v0, %v2786_v1  ;;  %v4507_v1 = vld [vmem:[%s6647_s14 + $0x30] sm:$0xff] }
0x1562   :  { %v2793_v3 = vadd.f32 %v4494_v0, %v2785_v2  ;;  %v5417_v0 = vpack.c.bf16 %v4506_v63, %v4505_v62  ;;  %v4508_v2 = vld [vmem:[%s6647_s14 + $0x38] sm:$0xff] }
0x1564   :  { %5083 = vmatprep.mubr.msk.f32.mxu1 %vm302_vm1, %v2793_v3  ;;  %5418 = vmatprep.subr.bf16.mxu1 %v5417_v0  ;;  %v5421_v3 = vpack.c.bf16 %v4508_v2, %v4507_v1 }
0x1565   :  { %5084 = vmatmul.mubr.msk.f32.vlgmr.msra.gmra.mrb[36].mxu1 %vm302_vm1, %v2794_v4 }
0x1566   :  { %5420 = vmatpush3.bf16.msra.mxu1 %v5417_v0 }
0x1567   :  { %5422 = vmatprep.subr.bf16.mxu1 %v5421_v3 }
0x156a   :  { %5424 = vmatpush3.bf16.msra.mxu1 %v5421_v3 }
0x1638   :  { %v5085_v18 = vpop.f32.mrb[36].mxu1 }
0x1639   :  { %v2884_v32 = vadd.f32 %v5085_v18, %v4495_v34  ;;  %v2878_v19 = vpop.f32.mrb[37].mxu1 }
0x163a   :  { %v2879_v20 = vadd.f32 %v4495_v34, %v2878_v19  ;;  %v4510_v19 = vld [vmem:[%s6650_s15 + $0x1] ss:$0 sm:$0xff] }
0x163b   :  { %v2888_v21 = vmul.f32 %v2884_v32, %v2884_v32 }
0x163c   :  { %v2887_v22 = vmul.f32 %v2879_v20, %v2879_v20 }
0x163d   :  { %v2890_v23 = vmul.f32 %v2888_v21, %v2884_v32 }
0x163e   :  { %v2889_v24 = vmul.f32 %v2887_v22, %v2879_v20 }
0x163f   :  { %v2892_v16 = vmul.f32 0.044715, %v2890_v23 }
0x1640   :  { %v2891_v15 = vmul.f32 0.044715, %v2889_v24 }
0x1641   :  { %v2894_v25 = vadd.f32 %v2892_v16, %v2884_v32 }
0x1642   :  { %v2893_v26 = vadd.f32 %v2891_v15, %v2879_v20 }
0x1643   :  { %v2896_v29 = vmul.f32 0.7978846, %v2894_v25 }
0x1644   :  { %v2895_v30 = vmul.f32 0.7978846, %v2893_v26 }
0x1645   :  { %5676 = vtanh.f32 %v2896_v29 }
0x1646   :  { %5678 = vtanh.f32 %v2895_v30 }
0x164f   :  { %v5677_v31 = vpop.eup %5676 }
0x1650   :  { %v5679_v33 = vpop.eup %5678  ;;  %v2900_v36 = vadd.f32 1.0, %v5677_v31 }
0x1651   :  { %v2899_v37 = vadd.f32 1.0, %v5679_v33 }
0x1652   :  { %v2902_v58 = vmul.f32 0.5, %v2900_v36 }
0x1653   :  { %v2901_v59 = vmul.f32 0.5, %v2899_v37 }
0x1654   :  { %v2904_v40 = vmul.f32 %v2902_v58, %v2884_v32 }
0x1655   :  { %v2903_v38 = vmul.f32 %v2901_v59, %v2879_v20 }
0x1657   :  { %5102 = vmatprep.mubr.msk.f32.mxu0 %vm95_vm0, %v2903_v38 }
0x1658   :  { %5103 = vmatmul.mubr.msk.f32.vlgmr.msra.gmra.mrb[20].mxu0 %vm95_vm0, %v2904_v40 }
0x172b   :  { %v5104_v41 = vpop.f32.mrb[20].mxu0 }
0x172c   :  { %v2995_v44 = vadd.f32 %v5104_v41, %v6312_v27  ;;  %v2985_v46 = vpop.f32.mrb[21].mxu0 }
0x172d   :  { %v2994_v47 = vadd.f32 %v2985_v46, %v6314_v28 }
0x172e   :  { %v6378_v48 = vadd.f32 %v4500_v43, %v2995_v44 }
0x172f   :  { %v6380_v49 = vadd.f32 %v4500_v43, %v2994_v47 }
0x1730   :  { %v3012_v50 = vsel %vm302_vm1, %v6378_v48, 0.0 }
0x1731   :  { %3013 = vadd.xlane.f32.xlu1 %v3012_v50  ;;  %v3009_v51 = vsel %vm302_vm1, %v6380_v49, 0.0 }
0x1732   :  { %3010 = vadd.xlane.f32.xlu0 %v3009_v51 }
0x17be   :  { %v3014_v52 = vpop.xlane.xlu1 %3013 }
0x17bf   :  { %v3016_v53 = vmul.f32 0.03125, %v3014_v52  ;;  %v3011_v54 = vpop.xlane.xlu0 %3010 }
0x17c0   :  { %v3015_v55 = vmul.f32 0.03125, %v3011_v54 }
0x17c1   :  { %v3018_v27 = vsub.f32 %v6378_v48, %v3016_v53 }
0x17c2   :  { %v3017_v28 = vsub.f32 %v6380_v49, %v3015_v55 }
0x17c3   :  { %v3020_v56 = vmul.f32 %v3018_v27, %v3018_v27 }
0x17c4   :  { %v3019_v35 = vmul.f32 %v3017_v28, %v3017_v28 }
0x17c5   :  { %v3024_v57 = vsel %vm302_vm1, %v3020_v56, 0.0 }
0x17c6   :  { %3025 = vadd.xlane.f32.xlu1 %v3024_v57  ;;  %v3021_v61 = vsel %vm302_vm1, %v3019_v35, 0.0 }
0x17c7   :  { %3022 = vadd.xlane.f32.xlu0 %v3021_v61 }
0x1853   :  { %v3026_v4 = vpop.xlane.xlu1 %3025 }
0x1854   :  { %v3028_v5 = vmul.f32 0.03125, %v3026_v4  ;;  %v3023_v60 = vpop.xlane.xlu0 %3022 }
0x1855   :  { %v3027_v6 = vmul.f32 0.03125, %v3023_v60 }
0x1856   :  { %v3030_v7 = vadd.f32 1e-05, %v3028_v5 }
0x1857   :  { %v3029_v8 = vadd.f32 1e-05, %v3027_v6 }
0x1858   :  { %5680 = vrsqrt.f32 %v3030_v7 }
0x1859   :  { %5682 = vrsqrt.f32 %v3029_v8 }
0x1862   :  { %v5681_v9 = vpop.eup %5680 }
0x1863   :  { %v5683_v11 = vpop.eup %5682  ;;  %v3034_v12 = vmul.f32 %v5681_v9, %v3018_v27 }
0x1864   :  { %v3033_v13 = vmul.f32 %v5683_v11, %v3017_v28 }
0x1865   :  { %v3042_v17 = vmul.f32 %v4503_v10, %v3034_v12 }
0x1866   :  { %v3041_v34 = vmul.f32 %v4503_v10, %v3033_v13 }
0x1867   :  { %v3050_v32 = vadd.f32 %v4504_v14, %v3042_v17 }
0x1868   :  { %v3049_v18 = vadd.f32 %v4504_v14, %v3041_v34 }
0x186a   :  { %5113 = vmatprep.mubr.msk.f32.mxu1 %vm302_vm1, %v3049_v18 }
0x186b   :  { %5114 = vmatmul.mubr.msk.f32.vlgmr.msra.gmra.mrb[38].mxu1 %vm302_vm1, %v3050_v32 }
0x193e   :  { %v5115_v20 = vpop.f32.mrb[38].mxu1 }
0x193f   :  { %v6413_v21 = vadd.f32 %v5115_v20, %v4510_v19  ;;  %v3136_v22 = vpop.f32.mrb[39].mxu1 }
0x1940   :  { %v6415_v23 = vadd.f32 %v4510_v19, %v3136_v22 }
0x1942   :  { %5120 = vmatprep.mubr.msk.f32.mxu1 %vm1815_vm3, %v6415_v23  ;;  %v6421_v24 = vpack.i.bf16 %v6413_v21, %v6415_v23 }
0x1944   :  { %5581 = vrot.lane.b32.xlu1 %v6421_v24, %s5734_s30  ;;  %5576 = vrot.lane.b32.xlu0 %v6421_v24, %s5731_s6  ;;  %s6710_s30 = smov 40  }
0x1948   :  { %3347 = vrot.lane.b32.xlu1 %v6415_v23, %s5733_s9  ;;  %3349 = vrot.lane.b32.xlu0 %v6413_v21, %s5733_s9  ;;  %s6708_s9 = smov 104  }
0x19b6   :  { %v5582_v16 = vpop.permute.xlu1 %5581  ;;  %v5577_v15 = vpop.permute.xlu0 %5576 }
0x19b7   :  { %v5584_v25 = vunpack.i.h.bf16 %v5582_v16  ;;  %v5583_v26 = vunpack.i.l.bf16 %v5582_v16  ;;  %v5579_v29 = vunpack.i.h.bf16 %v5577_v15  ;;  %v5578_v30 = vunpack.i.l.bf16 %v5577_v15 }
0x19b9   :  { %v5425_v31 = vpack.c.bf16 %v5579_v29, %v5578_v30  ;;  %v5435_v33 = vpack.c.bf16 %v5584_v25, %v5583_v26 }
0x19ba   :  { %v3348_v36 = vpop.permute.xlu1 %3347  ;;  %v3350_v37 = vpop.permute.xlu0 %3349 }
0x19bb   :  { %5427 = vmatprep.subr.msk.bf16.mxu1 %vm6173_vm4, %v5425_v31 }
0x19bc   :  { %5430 = vmatpush3.bf16.xpose.msk.msra.mxu1 %vm6173_vm4, %v5425_v31 }
0x19bd   :  { %5437 = vmatprep.subr.msk.bf16.mxu1 %vm6173_vm4, %v5435_v33 }
0x19c3   :  { %5121 = vmatmul.mubr.msk.f32.vlgmr.msra.gmra.mrb[40].mxu1 %vm1815_vm3, %v6413_v21 }
0x19c4   :  { %5440 = vmatpush3.bf16.xpose.msk.msra.mxu1 %vm6173_vm4, %v5435_v33  ;;  %5134 = vmatprep.mubr.msk.f32.mxu1 %vm1815_vm3, %v3348_v36 }
0x19cb   :  { %5135 = vmatmul.mubr.msk.f32.vlgmr.msra.gmra.mrb[42].mxu1 %vm1815_vm3, %v3350_v37 }
0x1a96   :  { %v5122_v58 = vpop.f32.mrb[40].mxu1 }
0x1a97   :  { %v3235_v59 = vmul.f32 0.35355338, %v5122_v58  ;;  %v3225_v38 = vpop.f32.mrb[41].mxu1 }
0x1a98   :  { %v3234_v40 = vmul.f32 0.35355338, %v3225_v38 }
0x1a99   :  { %v3237_v41 = vadd.f32 %v3235_v59, %v6186_v42 }
0x1a9a   :  { %v3236_v43 = vadd.f32 %v3234_v40, %v6191_v45 }
0x1a9b   :  { %v3241_v44 = vsel %vm416_vm2, %v3237_v41, -inf }
0x1a9c   :  { %3242 = vmax.xlane.f32.xlu0 %v3241_v44  ;;  %v3238_v46 = vsel %vm416_vm2, %v3236_v43, -inf }
0x1a9d   :  { %3239 = vmax.xlane.f32.xlu1 %v3238_v46 }
0x1a9e   :  { %v5136_v47 = vpop.f32.mrb[42].mxu1 }
0x1a9f   :  { %v3439_v50 = vmul.f32 0.35355338, %v5136_v47  ;;  %v3429_v51 = vpop.f32.mrb[43].mxu1 }
0x1aa0   :  { %v3438_v52 = vmul.f32 0.35355338, %v3429_v51 }
0x1aa1   :  { %v3441_v53 = vadd.f32 %v3439_v50, %v6186_v42 }
0x1aa2   :  { %v3440_v54 = vadd.f32 %v3438_v52, %v6191_v45 }
0x1aa3   :  { %v3445_v55 = vsel %vm416_vm2, %v3441_v53, -inf }
0x1aa4   :  { %3446 = vmax.xlane.f32.xlu1 %v3445_v55  ;;  %v3442_v27 = vsel %vm416_vm2, %v3440_v54, -inf  ;;  %v5729_v55 = vld [vmem:[%s6651_s11] sm:$0xff] }
0x1aa5   :  { %3443 = vmax.xlane.f32.xlu0 %v3442_v27 }
0x1b29   :  { %v3243_v28 = vpop.xlane.xlu0 %3242 }
0x1b2a   :  { %v3245_v56 = vsub.f32 %v3237_v41, %v3243_v28  ;;  %v3240_v35 = vpop.xlane.xlu1 %3239 }
0x1b2b   :  { %v3244_v57 = vsub.f32 %v3236_v43, %v3240_v35 }
0x1b2c   :  { %v3248_v61 = vmul.f32 1.442695, %v3245_v56 }
0x1b2d   :  { %v3246_v62 = vmul.f32 1.442695, %v3244_v57 }
0x1b2e   :  { %5684 = vpow2.f32 %v3248_v61 }
0x1b2f   :  { %5686 = vpow2.f32 %v3246_v62 }
0x1b31   :  { %v3447_v63 = vpop.xlane.xlu1 %3446 }
0x1b32   :  { %v3449_v0 = vsub.f32 %v3441_v53, %v3447_v63  ;;  %v3444_v1 = vpop.xlane.xlu0 %3443  ;;  %v5728_v53 = vld [vmem:[%s6651_s11 + $0x8] sm:$0xff]  ;;  %s6709_s11 = smov 72  }
0x1b33   :  { %v3448_v42 = vsub.f32 %v3440_v54, %v3444_v1 }
0x1b34   :  { %v3452_v2 = vmul.f32 1.442695, %v3449_v0 }
0x1b35   :  { %v3450_v45 = vmul.f32 1.442695, %v3448_v42 }
0x1b36   :  { %5688 = vpow2.f32 %v3452_v2 }
0x1b37   :  { %5690 = vpow2.f32 %v3450_v45 }
0x1b38   :  { %v5685_v3 = vpop.eup %5684 }
0x1b39   :  { %v5687_v4 = vpop.eup %5686  ;;  %v3253_v5 = vsel %vm416_vm2, %v5685_v3, 0.0 }
0x1b3a   :  { %3254 = vadd.xlane.f32.xlu1 %v3253_v5  ;;  %v3250_v60 = vsel %vm416_vm2, %v5687_v4, 0.0 }
0x1b3b   :  { %3251 = vadd.xlane.f32.xlu0 %v3250_v60 }
0x1b40   :  { %v5689_v6 = vpop.eup %5688 }
0x1b41   :  { %v5691_v7 = vpop.eup %5690  ;;  %v3457_v8 = vsel %vm416_vm2, %v5689_v6, 0.0 }
0x1b42   :  { %3458 = vadd.xlane.f32.xlu1 %v3457_v8  ;;  %v3454_v9 = vsel %vm416_vm2, %v5691_v7, 0.0 }
0x1b43   :  { %3455 = vadd.xlane.f32.xlu0 %v3454_v9 }
0x1b53   :  { %5591 = vrot.lane.b32.xlu1 %v6421_v24, %s5735_s1  ;;  %s6711_s1 = smov 8  }
0x1b57   :  { %5596 = vrot.lane.b32.xlu1 %v6421_v24, %s5736_s10  ;;  %s6712_s10 = smov 16  }
0x1b59   :  { %5586 = vrot.lane.b32.xlu0 %v6421_v24, %s5732_s29  ;;  %s6707_s29 = smov 48  }
0x1b5b   :  { %3553 = vrot.lane.b32.xlu1 %v6413_v21, %s5737_s2 }
0x1b5d   :  { %3551 = vrot.lane.b32.xlu0 %v6415_v23, %s5737_s2 }
0x1bc7   :  { %v3255_v11 = vpop.xlane.xlu1 %3254 }
0x1bc8   :  { %v3252_v10 = vpop.xlane.xlu0 %3251 }
0x1bc9   :  { %5692 = vrcp.f32 %v3252_v10 }
0x1bca   :  { %5694 = vrcp.f32 %v3255_v11 }
0x1bcf   :  { %v3459_v12 = vpop.xlane.xlu1 %3458 }
0x1bd0   :  { %v3456_v13 = vpop.xlane.xlu0 %3455 }
0x1bd1   :  { %5696 = vrcp.f32 %v3456_v13 }
0x1bd2   :  { %5698 = vrcp.f32 %v3459_v12 }
0x1bd3   :  { %v5693_v14 = vpop.eup %5692  ;;  %v5592_v17 = vpop.permute.xlu1 %5591 }
0x1bd4   :  { %v5587_v34 = vpop.permute.xlu0 %5586  ;;  %v3257_v18 = vmul.f32 %v5693_v14, %v5687_v4  ;;  %v5594_v32 = vunpack.i.h.bf16 %v5592_v17  ;;  %v5593_v19 = vunpack.i.l.bf16 %v5592_v17  ;;  %v5695_v25 = vpop.eup %5694 }
0x1bd5   :  { %v5589_v20 = vunpack.i.h.bf16 %v5587_v34  ;;  %v5588_v22 = vunpack.i.l.bf16 %v5587_v34  ;;  %v3259_v33 = vmul.f32 %v5695_v25, %v5685_v3 }
0x1bd6   :  { %5127 = vmatprep.mubr.msk.f32.mxu0 %vm416_vm2, %v3257_v18  ;;  %v5441_v26 = vpack.c.bf16 %v5594_v32, %v5593_v19 }
0x1bd7   :  { %v5431_v16 = vpack.c.bf16 %v5589_v20, %v5588_v22  ;;  %v5597_v15 = vpop.permute.xlu1 %5596 }
0x1bd8   :  { %v5599_v29 = vunpack.i.h.bf16 %v5597_v15  ;;  %v5598_v30 = vunpack.i.l.bf16 %v5597_v15  ;;  %v3552_v38 = vpop.permute.xlu0 %3551 }
0x1bd9   :  { %5432 = vmatprep.subr.bf16.mxu0 %v5431_v16 }
0x1bda   :  { %5434 = vmatpush3.bf16.msra.mxu0 %v5431_v16  ;;  %v5445_v58 = vpack.c.bf16 %v5599_v29, %v5598_v30 }
0x1bdb   :  { %v5697_v31 = vpop.eup %5696  ;;  %5442 = vmatprep.subr.bf16.mxu0 %v5441_v26  ;;  %v3554_v40 = vpop.permute.xlu1 %3553 }
0x1bdc   :  { %v5699_v36 = vpop.eup %5698  ;;  %v3461_v37 = vmul.f32 %v5697_v31, %v5691_v7 }
0x1bdd   :  { %5128 = vmatmul.mubr.msk.f32.vlgmr.msra.gmra.mrb[22].mxu0 %vm416_vm2, %v3259_v33  ;;  %v3463_v59 = vmul.f32 %v5699_v36, %v5689_v6 }
0x1bde   :  { %5444 = vmatpush3.bf16.msra.mxu0 %v5441_v26  ;;  %5141 = vmatprep.mubr.msk.f32.mxu0 %vm416_vm2, %v3461_v37 }
0x1bdf   :  { %5447 = vmatprep.subr.msk.bf16.mxu0 %vm6173_vm4, %v5445_v58 }
0x1be1   :  { %5142 = vmatmul.mubr.msk.f32.vlgmr.msra.gmra.mrb[24].mxu0 %vm416_vm2, %v3463_v59 }
0x1be2   :  { %5148 = vmatprep.mubr.msk.f32.mxu0 %vm1815_vm3, %v3552_v38 }
0x1be7   :  { %5450 = vmatpush3.bf16.xpose.msk.msra.mxu0 %vm6173_vm4, %v5445_v58 }
0x1bee   :  { %5149 = vmatmul.mubr.msk.f32.vlgmr.msra.gmra.mrb[26].mxu0 %vm1815_vm3, %v3554_v40 }
0x1cb0   :  { %v6475_v41 = vpop.f32.mrb[22].mxu0 }
0x1cb1   :  { %v6477_v43 = vpop.f32.mrb[23].mxu0 }
0x1cb4   :  { %v6479_v44 = vpop.f32.mrb[24].mxu0 }
0x1cb5   :  { %v6481_v46 = vpop.f32.mrb[25].mxu0 }
0x1cc1   :  { %v5150_v47 = vpop.f32.mrb[26].mxu0 }
0x1cc2   :  { %v3643_v50 = vmul.f32 0.35355338, %v5150_v47  ;;  %v3633_v51 = vpop.f32.mrb[27].mxu0 }
0x1cc3   :  { %v3642_v52 = vmul.f32 0.35355338, %v3633_v51 }
0x1cc4   :  { %v3645_v54 = vadd.f32 %v5728_v53, %v3643_v50 }
0x1cc5   :  { %v3644_v27 = vadd.f32 %v5729_v55, %v3642_v52 }
0x1cc6   :  { %v3649_v28 = vsel %vm416_vm2, %v3645_v54, -inf }
0x1cc7   :  { %3650 = vmax.xlane.f32.xlu1 %v3649_v28  ;;  %v3646_v56 = vsel %vm416_vm2, %v3644_v27, -inf  ;;  %v4539_v28 = vld [vmem:[%s6652_s16 + $0x30] sm:$0xff] }
0x1cc8   :  { %3647 = vmax.xlane.f32.xlu0 %v3646_v56 }
0x1cd8   :  { %5601 = vrot.lane.b32.xlu1 %v6421_v24, %s6707_s29 }
0x1cdc   :  { %3755 = vrot.lane.b32.xlu1 %v6415_v23, %s6708_s9 }
0x1ce0   :  { %3757 = vrot.lane.b32.xlu1 %v6413_v21, %s6708_s9 }
0x1d54   :  { %v3651_v35 = vpop.xlane.xlu1 %3650 }
0x1d55   :  { %v3653_v57 = vsub.f32 %v3645_v54, %v3651_v35  ;;  %v3648_v61 = vpop.xlane.xlu0 %3647  ;;  %v4540_v35 = vld [vmem:[%s6652_s16 + $0x38] sm:$0xff] }
0x1d56   :  { %v3652_v62 = vsub.f32 %v3644_v27, %v3648_v61  ;;  %v4537_v27 = vld [vmem:[%s6652_s16 + $0x20] sm:$0xff] }
0x1d57   :  { %v3656_v63 = vmul.f32 1.442695, %v3653_v57  ;;  %v5469_v57 = vpack.c.bf16 %v4540_v35, %v4539_v28  ;;  %v4562_v35 = vld [vmem:[%s6657_s22 + $0x68] sm:$0xff] }
0x1d58   :  { %v3654_v0 = vmul.f32 1.442695, %v3652_v62  ;;  %v5602_v1 = vpop.permute.xlu1 %5601 }
0x1d59   :  { %5700 = vpow2.f32 %v3656_v63  ;;  %v5604_v42 = vunpack.i.h.bf16 %v5602_v1  ;;  %v5603_v2 = vunpack.i.l.bf16 %v5602_v1 }
0x1d5a   :  { %5702 = vpow2.f32 %v3654_v0 }
0x1d5b   :  { %v5451_v45 = vpack.c.bf16 %v5604_v42, %v5603_v2 }
0x1d5c   :  { %v3756_v14 = vpop.permute.xlu1 %3755 }
0x1d5d   :  { %5452 = vmatprep.subr.bf16.mxu1 %v5451_v45 }
0x1d5e   :  { %5454 = vmatpush3.bf16.msra.mxu1 %v5451_v45 }
0x1d60   :  { %v3758_v17 = vpop.permute.xlu1 %3757 }
0x1d63   :  { %v5701_v3 = vpop.eup %5700 }
0x1d64   :  { %v3661_v23 = vsel %vm416_vm2, %v5701_v3, 0.0  ;;  %v5703_v4 = vpop.eup %5702 }
0x1d65   :  { %3662 = vadd.xlane.f32.xlu0 %v3661_v23  ;;  %v3658_v21 = vsel %vm416_vm2, %v5703_v4, 0.0 }
0x1d69   :  { %3659 = vadd.xlane.f32.xlu0 %v3658_v21 }
0x1d7f   :  { %5606 = vrot.lane.b32.xlu0 %v6421_v24, %s6709_s11 }
0x1df2   :  { %v3663_v5 = vpop.xlane.xlu0 %3662 }
0x1df3   :  { %5704 = vrcp.f32 %v3663_v5 }
0x1df6   :  { %v3660_v60 = vpop.xlane.xlu0 %3659 }
0x1df7   :  { %5706 = vrcp.f32 %v3660_v60 }
0x1dfa   :  { %v5607_v6 = vpop.permute.xlu0 %5606 }
0x1dfb   :  { %v5609_v7 = vunpack.i.h.bf16 %v5607_v6  ;;  %v5608_v8 = vunpack.i.l.bf16 %v5607_v6 }
0x1dfd   :  { %v5455_v9 = vpack.c.bf16 %v5609_v7, %v5608_v8  ;;  %v5705_v10 = vpop.eup %5704 }
0x1dfe   :  { %v3667_v13 = vmul.f32 %v5705_v10, %v5701_v3 }
0x1dff   :  { %5457 = vmatprep.subr.msk.bf16.mxu1 %vm6173_vm4, %v5455_v9 }
0x1e01   :  { %v5707_v11 = vpop.eup %5706 }
0x1e02   :  { %v3665_v12 = vmul.f32 %v5707_v11, %v5703_v4 }
0x1e04   :  { %5155 = vmatprep.mubr.msk.f32.mxu1 %vm416_vm2, %v3665_v12 }
0x1e05   :  { %5156 = vmatmul.mubr.msk.f32.vlgmr.msra.gmra.mrb[44].mxu1 %vm416_vm2, %v3667_v13 }
0x1e06   :  { %5460 = vmatpush3.bf16.xpose.msk.msra.mxu1 %vm6173_vm4, %v5455_v9  ;;  %5162 = vmatprep.mubr.msk.f32.mxu1 %vm1815_vm3, %v3756_v14 }
0x1e0d   :  { %5163 = vmatmul.mubr.msk.f32.vlgmr.msra.gmra.mrb[46].mxu1 %vm1815_vm3, %v3758_v17 }
0x1ed8   :  { %v5157_v34 = vpop.f32.mrb[44].mxu1 }
0x1ed9   :  { %v3746_v18 = vpop.f32.mrb[45].mxu1 }
0x1ee0   :  { %v5164_v32 = vpop.f32.mrb[46].mxu1 }
0x1ee1   :  { %v3847_v19 = vmul.f32 0.35355338, %v5164_v32  ;;  %v3837_v20 = vpop.f32.mrb[47].mxu1 }
0x1ee2   :  { %v3846_v22 = vmul.f32 0.35355338, %v3837_v20 }
0x1ee3   :  { %v3849_v16 = vadd.f32 %v5728_v53, %v3847_v19 }
0x1ee4   :  { %v3848_v15 = vadd.f32 %v5729_v55, %v3846_v22  ;;  %v4549_v22 = vld [vmem:[%s6654_s20 + $0x20] sm:$0xff] }
0x1ee5   :  { %v3853_v25 = vsel %vm416_vm2, %v3849_v16, -inf }
0x1ee6   :  { %3854 = vmax.xlane.f32.xlu1 %v3853_v25  ;;  %v3850_v26 = vsel %vm416_vm2, %v3848_v15, -inf  ;;  %v4551_v25 = vld [vmem:[%s6654_s20 + $0x30] sm:$0xff] }
0x1ee7   :  { %3851 = vmax.xlane.f32.xlu0 %v3850_v26  ;;  %v4552_v26 = vld [vmem:[%s6654_s20 + $0x38] sm:$0xff] }
0x1ef7   :  { %5611 = vrot.lane.b32.xlu1 %v6421_v24, %s6710_s30 }
0x1efb   :  { %3963 = vrot.lane.b32.xlu1 %v6479_v44, %s6711_s1 }
0x1eff   :  { %3969 = vrot.lane.b32.xlu1 %v3746_v18, %s6712_s10 }
0x1f73   :  { %v3855_v39 = vpop.xlane.xlu1 %3854 }
0x1f74   :  { %v3857_v29 = vsub.f32 %v3849_v16, %v3855_v39  ;;  %v3852_v30 = vpop.xlane.xlu0 %3851  ;;  %v4550_v16 = vld [vmem:[%s6654_s20 + $0x28] sm:$0xff]  ;;  %v5477_v39 = vpack.c.bf16 %v4552_v26, %v4551_v25 }
0x1f75   :  { %v3856_v31 = vsub.f32 %v3848_v15, %v3852_v30  ;;  %v5473_v15 = vpack.c.bf16 %v4550_v16, %v4549_v22 }
0x1f76   :  { %v3860_v33 = vmul.f32 1.442695, %v3857_v29 }
0x1f77   :  { %v3858_v36 = vmul.f32 1.442695, %v3856_v31  ;;  %v5612_v37 = vpop.permute.xlu1 %5611  ;;  %5474 = vmatprep.subr.bf16.mxu1 %v5473_v15 }
0x1f78   :  { %v5614_v58 = vunpack.i.h.bf16 %v5612_v37  ;;  %v5613_v59 = vunpack.i.l.bf16 %v5612_v37  ;;  %5476 = vmatpush3.bf16.msra.mxu1 %v5473_v15 }
0x1f79   :  { %5708 = vpow2.f32 %v3858_v36  ;;  %5478 = vmatprep.subr.bf16.mxu1 %v5477_v39 }
0x1f7a   :  { %v5461_v38 = vpack.c.bf16 %v5614_v58, %v5613_v59  ;;  %5710 = vpow2.f32 %v3860_v33  ;;  %v4547_v59 = vld [vmem:[%s6655_s18 + $0x1] ss:$0 sm:$0xff] }
0x1f7b   :  { %v3964_v0 = vpop.permute.xlu1 %3963 }
0x1f7c   :  { %5462 = vmatprep.subr.bf16.mxu0 %v5461_v38  ;;  %v3984_v3 = vsel %vm1815_vm3, %v6475_v41, %v3964_v0  ;;  %5480 = vmatpush3.bf16.msra.mxu1 %v5477_v39  ;;  %v4554_v0 = vld [vmem:[%s6658_s21 + $0x1] ss:$0 sm:$0xff] }
0x1f7d   :  { %5464 = vmatpush3.bf16.msra.mxu0 %v5461_v38 }
0x1f7f   :  { %v3970_v42 = vpop.permute.xlu1 %3969 }
0x1f83   :  { %v5709_v24 = vpop.eup %5708 }
0x1f84   :  { %v3862_v40 = vsel %vm416_vm2, %v5709_v24, 0.0  ;;  %v5711_v44 = vpop.eup %5710 }
0x1f85   :  { %3863 = vadd.xlane.f32.xlu0 %v3862_v40  ;;  %v3865_v47 = vsel %vm416_vm2, %v5711_v44, 0.0 }
0x1f89   :  { %3866 = vadd.xlane.f32.xlu0 %v3865_v47 }
0x1f9f   :  { %3961 = vrot.lane.b32.xlu0 %v6481_v46, %s6711_s1  ;;  %v4538_v46 = vld [vmem:[%s6652_s16 + $0x28] sm:$0xff] }
0x1fa0   :  { %v5465_v56 = vpack.c.bf16 %v4538_v46, %v4537_v27  ;;  %v4559_v27 = vld [vmem:[%s6657_s22 + $0x50] sm:$0xff]  ;;  %v4560_v46 = vld [vmem:[%s6657_s22 + $0x58] sm:$0xff] }
0x1fa1   :  { %v5485_v28 = vpack.c.bf16 %v4560_v46, %v4559_v27 }
0x1fa2   :  { %5466 = vmatprep.subr.bf16.mxu0 %v5465_v56 }
0x1fa3   :  { %3971 = vrot.lane.b32.xlu0 %v5157_v34, %s6712_s10 }
0x2012   :  { %v3864_v50 = vpop.xlane.xlu0 %3863 }
0x2013   :  { %5712 = vrcp.f32 %v3864_v50 }
0x2016   :  { %v3867_v51 = vpop.xlane.xlu0 %3866 }
0x2017   :  { %5714 = vrcp.f32 %v3867_v51 }
0x201a   :  { %v3962_v63 = vpop.permute.xlu0 %3961 }
0x201b   :  { %v3983_v2 = vsel %vm1815_vm3, %v6477_v43, %v3962_v63  ;;  %v4544_v43 = vld [vmem:[%s6653_s17 + $0x1] ss:$0 sm:$0xff] }
0x201c   :  { %v3985_v4 = vsel %vm416_vm2, %v3983_v2, %v3970_v42 }
0x201d   :  { %v5713_v52 = vpop.eup %5712 }
0x201e   :  { %v3869_v53 = vmul.f32 %v5713_v52, %v5709_v24  ;;  %v3972_v1 = vpop.permute.xlu0 %3971 }
0x201f   :  { %v3986_v21 = vsel %vm416_vm2, %v3984_v3, %v3972_v1 }
0x2020   :  { %5169 = vmatprep.mubr.msk.f32.mxu0 %vm416_vm2, %v3869_v53  ;;  %v4557_v53 = vld [vmem:[%s6657_s22 + $0x40] sm:$0xff] }
0x2021   :  { %v5715_v54 = vpop.eup %5714 }
0x2022   :  { %v3871_v55 = vmul.f32 %v5715_v54, %v5711_v44  ;;  %v4548_v44 = vld [vmem:[%s6656_s19 + $0x1] ss:$0 sm:$0xff]  ;;  %v4558_v54 = vld [vmem:[%s6657_s22 + $0x48] sm:$0xff] }
0x2024   :  { %5170 = vmatmul.mubr.msk.f32.vlgmr.msra.gmra.mrb[28].mxu0 %vm416_vm2, %v3871_v55  ;;  %v5481_v55 = vpack.c.bf16 %v4558_v54, %v4557_v53  ;;  %v4570_v53 = vld [vmem:[%s6661_s25] ss:$0 sm:$0xff] }
0x2025   :  { %5468 = vmatpush3.bf16.msra.mxu0 %v5465_v56  ;;  %v4561_v56 = vld [vmem:[%s6657_s22 + $0x60] sm:$0xff] }
0x2026   :  { %5470 = vmatprep.subr.bf16.mxu0 %v5469_v57 }
0x2029   :  { %5472 = vmatpush3.bf16.msra.mxu0 %v5469_v57  ;;  %v5489_v57 = vpack.c.bf16 %v4562_v35, %v4561_v56 }
0x202a   :  { %5482 = vmatprep.subr.bf16.mxu0 %v5481_v55 }
0x20f7   :  { %v5171_v61 = vpop.f32.mrb[28].mxu0 }
0x20f8   :  { %3979 = vrot.lane.b32.xlu0 %v5171_v61, %s6713_s0  ;;  %v3950_v62 = vpop.f32.mrb[29].mxu0  ;;  %v4563_v61 = vld [vmem:[%s6657_s22 + $0x70] sm:$0xff] }
0x20f9   :  { %3977 = vrot.lane.b32.xlu1 %v3950_v62, %s6713_s0  ;;  %v4564_v62 = vld [vmem:[%s6657_s22 + $0x78] sm:$0xff] }
0x20fa   :  { %v5493_v63 = vpack.c.bf16 %v4564_v62, %v4563_v61 }
0x216a   :  { %v3980_v45 = vpop.permute.xlu0 %3979 }
0x216b   :  { %v3978_v23 = vpop.permute.xlu1 %3977  ;;  %v3988_v60 = vsel %vm2652_vm5, %v3986_v21, %v3980_v45 }
0x216c   :  { %v3987_v5 = vsel %vm2652_vm5, %v3985_v4, %v3978_v23 }
0x216d   :  { %5180 = vmatprep.mubr.msk.f32.mxu0 %vm302_vm1, %v3987_v5 }
0x216e   :  { %5181 = vmatmul.mubr.msk.f32.vlgmr.msra.gmra.mrb[30].mxu0 %vm302_vm1, %v3988_v60 }
0x216f   :  { %5484 = vmatpush3.bf16.msra.mxu0 %v5481_v55 }
0x2170   :  { %5486 = vmatprep.subr.bf16.mxu0 %v5485_v28 }
0x2173   :  { %5488 = vmatpush3.bf16.msra.mxu0 %v5485_v28 }
0x2174   :  { %5490 = vmatprep.subr.bf16.mxu0 %v5489_v57 }
0x2177   :  { %5492 = vmatpush3.bf16.msra.mxu0 %v5489_v57 }
0x2178   :  { %5494 = vmatprep.subr.bf16.mxu0 %v5493_v63 }
0x217b   :  { %5496 = vmatpush3.bf16.msra.mxu0 %v5493_v63 }
0x2241   :  { %v5182_v6 = vpop.f32.mrb[30].mxu0 }
0x2242   :  { %v4076_v41 = vadd.f32 %v5182_v6, %v6378_v48  ;;  %v4066_v7 = vpop.f32.mrb[31].mxu0 }
0x2243   :  { %v4075_v8 = vadd.f32 %v4066_v7, %v6380_v49 }
0x2244   :  { %v6552_v9 = vadd.f32 %v4544_v43, %v4076_v41 }
0x2245   :  { %v6554_v10 = vadd.f32 %v4544_v43, %v4075_v8 }
0x2246   :  { %v4094_v11 = vsel %vm302_vm1, %v6552_v9, 0.0 }
0x2247   :  { %4095 = vadd.xlane.f32.xlu0 %v4094_v11  ;;  %v4091_v12 = vsel %vm302_vm1, %v6554_v10, 0.0 }
0x2248   :  { %4092 = vadd.xlane.f32.xlu1 %v4091_v12 }
0x22d4   :  { %v4096_v13 = vpop.xlane.xlu0 %4095 }
0x22d5   :  { %v4098_v14 = vmul.f32 0.03125, %v4096_v13  ;;  %v4093_v17 = vpop.xlane.xlu1 %4092 }
0x22d6   :  { %v4097_v34 = vmul.f32 0.03125, %v4093_v17 }
0x22d7   :  { %v4100_v48 = vsub.f32 %v6552_v9, %v4098_v14 }
0x22d8   :  { %v4099_v49 = vsub.f32 %v6554_v10, %v4097_v34 }
0x22d9   :  { %v4102_v18 = vmul.f32 %v4100_v48, %v4100_v48 }
0x22da   :  { %v4101_v32 = vmul.f32 %v4099_v49, %v4099_v49 }
0x22db   :  { %v4106_v19 = vsel %vm302_vm1, %v4102_v18, 0.0  ;;  %v4568_v18 = vld [vmem:[%s6659_s23 + $0x1] ss:$0 sm:$0xff] }
0x22dc   :  { %4107 = vadd.xlane.f32.xlu1 %v4106_v19  ;;  %v4103_v20 = vsel %vm302_vm1, %v4101_v32, 0.0 }
0x22dd   :  { %4104 = vadd.xlane.f32.xlu0 %v4103_v20 }
0x2369   :  { %v4108_v29 = vpop.xlane.xlu1 %4107 }
0x236a   :  { %v4110_v30 = vmul.f32 0.03125, %v4108_v29  ;;  %v4105_v31 = vpop.xlane.xlu0 %4104 }
0x236b   :  { %v4109_v33 = vmul.f32 0.03125, %v4105_v31 }
0x236c   :  { %v4112_v36 = vadd.f32 1e-05, %v4110_v30 }
0x236d   :  { %v4111_v37 = vadd.f32 1e-05, %v4109_v33 }
0x236e   :  { %5716 = vrsqrt.f32 %v4112_v36 }
0x236f   :  { %5718 = vrsqrt.f32 %v4111_v37 }
0x2378   :  { %v5717_v58 = vpop.eup %5716 }
0x2379   :  { %v5719_v38 = vpop.eup %5718  ;;  %v4116_v24 = vmul.f32 %v5717_v58, %v4100_v48 }
0x237a   :  { %v4115_v40 = vmul.f32 %v5719_v38, %v4099_v49 }
0x237b   :  { %v4124_v47 = vmul.f32 %v4547_v59, %v4116_v24 }
0x237c   :  { %v4123_v50 = vmul.f32 %v4547_v59, %v4115_v40 }
0x237d   :  { %v4132_v52 = vadd.f32 %v4548_v44, %v4124_v47 }
0x237e   :  { %v4131_v51 = vadd.f32 %v4548_v44, %v4123_v50  ;;  %v4569_v50 = vld [vmem:[%s6660_s24] ss:$0 sm:$0xff] }
0x2380   :  { %5191 = vmatprep.mubr.msk.f32.mxu1 %vm302_vm1, %v4131_v51 }
0x2381   :  { %5192 = vmatmul.mubr.msk.f32.vlgmr.msra.gmra.mrb[48].mxu1 %vm302_vm1, %v4132_v52 }
0x2454   :  { %v5193_v1 = vpop.f32.mrb[48].mxu1 }
0x2455   :  { %v4224_v42 = vadd.f32 %v5193_v1, %v4554_v0  ;;  %v4218_v2 = vpop.f32.mrb[49].mxu1 }
0x2456   :  { %v4219_v45 = vadd.f32 %v4554_v0, %v4218_v2 }
0x2457   :  { %v4228_v3 = vmul.f32 %v4224_v42, %v4224_v42 }
0x2458   :  { %v4227_v23 = vmul.f32 %v4219_v45, %v4219_v45 }
0x2459   :  { %v4230_v4 = vmul.f32 %v4228_v3, %v4224_v42 }
0x245a   :  { %v4229_v21 = vmul.f32 %v4227_v23, %v4219_v45 }
0x245b   :  { %v4232_v5 = vmul.f32 0.044715, %v4230_v4 }
0x245c   :  { %v4231_v60 = vmul.f32 0.044715, %v4229_v21 }
0x245d   :  { %v4234_v6 = vadd.f32 %v4232_v5, %v4224_v42 }
0x245e   :  { %v4233_v43 = vadd.f32 %v4231_v60, %v4219_v45 }
0x245f   :  { %v4236_v41 = vmul.f32 0.7978846, %v4234_v6 }
0x2460   :  { %v4235_v7 = vmul.f32 0.7978846, %v4233_v43 }
0x2461   :  { %5720 = vtanh.f32 %v4236_v41 }
0x2462   :  { %5722 = vtanh.f32 %v4235_v7 }
0x246b   :  { %v5721_v8 = vpop.eup %5720 }
0x246c   :  { %v5723_v11 = vpop.eup %5722  ;;  %v4240_v12 = vadd.f32 1.0, %v5721_v8 }
0x246d   :  { %v4239_v13 = vadd.f32 1.0, %v5723_v11 }
0x246e   :  { %v4242_v14 = vmul.f32 0.5, %v4240_v12 }
0x246f   :  { %v4241_v17 = vmul.f32 0.5, %v4239_v13 }
0x2470   :  { %v4244_v48 = vmul.f32 %v4242_v14, %v4224_v42 }
0x2471   :  { %v4243_v34 = vmul.f32 %v4241_v17, %v4219_v45 }
0x2473   :  { %5210 = vmatprep.mubr.msk.f32.mxu0 %vm95_vm0, %v4243_v34 }
0x2474   :  { %5211 = vmatmul.mubr.msk.f32.vlgmr.msra.gmra.mrb[32].mxu0 %vm95_vm0, %v4244_v48 }
0x2547   :  { %v5212_v49 = vpop.f32.mrb[32].mxu0 }
0x2548   :  { %v4336_v32 = vadd.f32 %v5212_v49, %v6552_v9  ;;  %v4326_v19 = vpop.f32.mrb[33].mxu0 }
0x2549   :  { %v4335_v20 = vadd.f32 %v4326_v19, %v6554_v10 }
0x254a   :  { %v4346_v22 = vadd.f32 %v4568_v18, %v4336_v32 }
0x254b   :  { %v4345_v16 = vadd.f32 %v4568_v18, %v4335_v20 }
0x254c   :  { %v4352_v15 = vsel %vm302_vm1, %v4346_v22, 0.0 }
0x254d   :  { %4353 = vadd.xlane.f32.xlu1 %v4352_v15  ;;  %v4349_v25 = vsel %vm302_vm1, %v4345_v16, 0.0 }
0x254e   :  { %4350 = vadd.xlane.f32.xlu0 %v4349_v25 }
0x25da   :  { %v4354_v26 = vpop.xlane.xlu1 %4353 }
0x25db   :  { %v4356_v39 = vmul.f32 0.03125, %v4354_v26  ;;  %v4351_v29 = vpop.xlane.xlu0 %4350 }
0x25dc   :  { %v4355_v30 = vmul.f32 0.03125, %v4351_v29 }
0x25dd   :  { %v4358_v31 = vsub.f32 %v4346_v22, %v4356_v39 }
0x25de   :  { %v4357_v33 = vsub.f32 %v4345_v16, %v4355_v30 }
0x25df   :  { %v4360_v36 = vmul.f32 %v4358_v31, %v4358_v31 }
0x25e0   :  { %v4359_v37 = vmul.f32 %v4357_v33, %v4357_v33 }
0x25e1   :  { %v4364_v9 = vsel %vm302_vm1, %v4360_v36, 0.0 }
0x25e2   :  { %4365 = vadd.xlane.f32.xlu1 %v4364_v9  ;;  %v4361_v10 = vsel %vm302_vm1, %v4359_v37, 0.0 }
0x25e3   :  { %4362 = vadd.xlane.f32.xlu0 %v4361_v10 }
0x266f   :  { %v4366_v58 = vpop.xlane.xlu1 %4365 }
0x2670   :  { %v4368_v59 = vmul.f32 0.03125, %v4366_v58  ;;  %v4363_v38 = vpop.xlane.xlu0 %4362 }
0x2671   :  { %v4367_v24 = vmul.f32 0.03125, %v4363_v38 }
0x2672   :  { %v4370_v40 = vadd.f32 1e-05, %v4368_v59 }
0x2673   :  { %v4369_v44 = vadd.f32 1e-05, %v4367_v24 }
0x2674   :  { %5724 = vrsqrt.f32 %v4370_v40 }
0x2675   :  { %5726 = vrsqrt.f32 %v4369_v44 }
0x267e   :  { %v5725_v47 = vpop.eup %5724 }
0x267f   :  { %v5727_v51 = vpop.eup %5726  ;;  %v4374_v52 = vmul.f32 %v5725_v47, %v4358_v31 }
0x2680   :  { %v4373_v54 = vmul.f32 %v5727_v51, %v4357_v33 }
0x2681   :  { %v4382_v55 = vmul.f32 %v4569_v50, %v4374_v52 }
0x2682   :  { %v4381_v27 = vmul.f32 %v4569_v50, %v4373_v54 }
0x2683   :  { %v4390_v46 = vadd.f32 %v4570_v53, %v4382_v55 }
0x2684   :  { %v4389_v28 = vadd.f32 %v4570_v53, %v4381_v27 }
0x2685   :  { %4392 = vst.msk [vmem:[%s6662_s26 + $0x8] sm:$0xff] %vm302_vm1, %v4390_v46 }
0x2686   :  { %4391 = vst.msk [vmem:[%s6662_s26] sm:$0xff] %vm302_vm1, %v4389_v28 }

// kernel: whisper_generate.3
= control target key start
LH: loop header
LB: loop body
LE: loop exit
PB: predicated region body
PF: predicated region fallthrough
CT: control target
= control target key end

     0   :  { %s7183_s6 = smov 1   ;;  %s7184_s10 = smov 2   ;;  %s8198_s0 = inlined_call_operand.smem [shape: u32[30], index: -1, kind: input, shape index: {}] }
   0x1   :  { %s7239_s5 = sld [smem:[%s8198_s0]]   ;;  %s7185_s14 = smov 3  }
   0x2   :  { %s7244_s9 = sld [smem:[%s8198_s0 + %s7183_s6]]   ;;  %s7186_s18 = smov 4  }
   0x3   :  { %s7249_s13 = sld [smem:[%s8198_s0 + %s7184_s10]]   ;;  %s7187_s22 = smov 5  }
   0x4   :  { %s7254_s17 = sld [smem:[%s8198_s0 + %s7185_s14]]   ;;  %s7188_s26 = smov 6  }
   0x5   :  { %s7259_s21 = sld [smem:[%s8198_s0 + %s7186_s18]]   ;;  %s7189_s30 = smov 7  }
   0x6   :  { %s7264_s25 = sld [smem:[%s8198_s0 + %s7187_s22]]   ;;  %s7190_s4 = smov 8  }
   0x7   :  { %s7269_s29 = sld [smem:[%s8198_s0 + %s7188_s26]]   ;;  %s7191_s10 = smov 9  }
   0x8   :  { %s7274_s3 = sld [smem:[%s8198_s0 + %s7189_s30]]   ;;  %s7192_s15 = smov 10  }
   0x9   :  { %s7279_s8 = sld [smem:[%s8198_s0 + %s7190_s4]]   ;;  %s7193_s20 = smov 11  }
   0xa   :  { %s7284_s14 = sld [smem:[%s8198_s0 + %s7191_s10]]   ;;  %s7194_s26 = smov 12  }
   0xb   :  { %s7289_s19 = sld [smem:[%s8198_s0 + %s7192_s15]]   ;;  %s7195_s1 = smov 13  }
   0xc   :  { %s7294_s24 = sld [smem:[%s8198_s0 + %s7193_s20]]   ;;  %s7196_s7 = smov 14  }
   0xd   :  { %s7299_s30 = sld [smem:[%s8198_s0 + %s7194_s26]]   ;;  %s7197_s15 = smov 15  }
   0xe   :  { %s7304_s6 = sld [smem:[%s8198_s0 + %s7195_s1]]   ;;  %s7198_s22 = smov 16  }
   0xf   :  { %s7309_s12 = sld [smem:[%s8198_s0 + %s7196_s7]]   ;;  %s7199_s28 = smov 17  }
  0x10   :  { %s7314_s20 = sld [smem:[%s8198_s0 + %s7197_s15]]   ;;  %s7200_s7 = smov 18  }
  0x11   :  { %s7319_s27 = sld [smem:[%s8198_s0 + %s7198_s22]]   ;;  %s7201_s15 = smov 19  }
  0x12   :  { %s7324_s4 = sld [smem:[%s8198_s0 + %s7199_s28]]   ;;  %s7202_s22 = smov 20  }
  0x13   :  { %8217 = sst [smem:[#allocation9_spill]] %s7299_s30  ;;  %s7203_s28 = smov 21  }
  0x14   :  { %8218 = sst [smem:[#allocation10_spill]] %s7304_s6  ;;  %s7210_s23 = smov 28  }
  0x15   :  { %8219 = sst [smem:[#allocation11_spill]] %s7309_s12  ;;  %s7211_s1 = smov 29  }
  0x16   :  { %8220 = sst [smem:[#allocation12_spill]] %s7314_s20 }
  0x17   :  { %8221 = sst [smem:[#allocation13_spill]] %s7319_s27 }
  0x18   :  { %s7329_s12 = sld [smem:[%s8198_s0 + %s7200_s7]]   ;;  %s7204_s7 = smov 22  }
  0x19   :  { %s7334_s6 = sld [smem:[%s8198_s0 + %s7201_s15]]   ;;  %s7205_s15 = smov 23  }
  0x1a   :  { %s7339_s27 = sld [smem:[%s8198_s0 + %s7202_s22]]   ;;  %s7206_s22 = smov 24  }
  0x1b   :  { %s7344_s20 = sld [smem:[%s8198_s0 + %s7203_s28]]   ;;  %s7207_s28 = smov 25  }
  0x1c   :  { %s7349_s30 = sld [smem:[%s8198_s0 + %s7204_s7]]   ;;  %s7208_s7 = smov 26  }
  0x1f   :  { %8222 = sst [smem:[#allocation14_spill]] %s7334_s6 }
  0x20   :  { %8223 = sst [smem:[#allocation15_spill]] %s7339_s27 }
  0x21   :  { %8224 = sst [smem:[#allocation16_spill]] %s7344_s20 }
  0x22   :  { %8225 = sst [smem:[#allocation17_spill]] %s7349_s30 }
  0x23   :  { %s7354_s6 = sld [smem:[%s8198_s0 + %s7205_s15]]   ;;  %s7209_s15 = smov 27  }
  0x24   :  { %s7359_s27 = sld [smem:[%s8198_s0 + %s7206_s22]]  }
  0x25   :  { %s7364_s20 = sld [smem:[%s8198_s0 + %s7207_s28]]  }
  0x26   :  { %s7369_s30 = sld [smem:[%s8198_s0 + %s7208_s7]]  }
  0x29   :  { %8226 = sst [smem:[#allocation18_spill]] %s7354_s6 }
  0x2a   :  { %8227 = sst [smem:[#allocation19_spill]] %s7359_s27 }
  0x2b   :  { %8228 = sst [smem:[#allocation20_spill]] %s7364_s20 }
  0x2c   :  { %8229 = sst [smem:[#allocation21_spill]] %s7369_s30 }
  0x2d   :  { %s5531_s6 = sld [smem:[%s8198_s0 + %s7209_s15]]  }
  0x2e   :  { %s7377_s27 = sld [smem:[%s8198_s0 + %s7210_s23]]  }
  0x2f   :  { %s7382_s20 = sld [smem:[%s8198_s0 + %s7211_s1]]  }
  0x30   :  { %64 = vsyncpa [#allocation4], 0 }
  0x31   :  { %65 = vsyncpa [#allocation6], 0  ;;  %s7212_s7 = smov [#allocation3]   ;;  %s7213_s11 = smov [#allocation5]  }
  0x32   :  { %s126_s10 = sshll.u32 %s7212_s7, 4  ;;  %s136_s30 = sshll.u32 %s7213_s11, 4  ;;  %s127_s10 = int_to_ptr.vmem [resolvable:$true] %s126_s10  ;;  %s137_s30 = int_to_ptr.vmem [resolvable:$true] %s136_s30 }
  0x33   :  { %s7127_s15 = scalar_lea.hbm %s5531_s6, 16 }
  0x34   :  { %p7128_p0 = scmp.ne.s32.totalorder %s5531_s6, %s7127_s15  ;;  %p7131_p1 = scmp.lt.u32.totalorder %s7127_s15, %s5531_s6 }
  0x36   :  { %p7133_p2 = pnand %p7131_p1, %p7128_p0 }
  0x38   :  { %7136 = shalt.err (!%p7133_p2)
}
  0x39   :  { %s7137_s16 = scalar_lea.vmem %s127_s10, 16  ;;  %s7141_s18 = scalar_lea.vmem %s127_s10, 32 }
  0x3a   :  { %p7138_p3 = scmp.ne.s32.totalorder %s127_s10, %s7137_s16  ;;  %p7142_p4 = scmp.lt.s32.totalorder %s127_s10, %s127_s10 }
  0x3b   :  { %p7143_p5 = scmp.lt.s32.totalorder %s7141_s18, %s7137_s16 }
  0x3d   :  { %p7144_p6 = por %p7143_p5, %p7142_p4 }
  0x3f   :  { %p7145_p7 = pnand %p7144_p6, %p7138_p3 }
  0x41   :  { %7148 = shalt.err (!%p7145_p7)
}
  0x42   :  { %129 = dma.hbm_to_vmem [thread:$0]  %s5531_s6, 16, %s127_s10, [#allocation4]  }
  0x43   :  { %s7149_s0 = scalar_lea.hbm %s7377_s27, 16 }
  0x44   :  { %p7150_p8 = scmp.ne.s32.totalorder %s7377_s27, %s7149_s0  ;;  %p7153_p9 = scmp.lt.u32.totalorder %s7149_s0, %s7377_s27 }
  0x46   :  { %p7155_p10 = pnand %p7153_p9, %p7150_p8 }
  0x48   :  { %7158 = shalt.err (!%p7155_p10)
}
  0x49   :  { %s7159_s23 = scalar_lea.vmem %s137_s30, 16  ;;  %s7163_s22 = scalar_lea.vmem %s137_s30, 32 }
  0x4a   :  { %p7160_p11 = scmp.ne.s32.totalorder %s137_s30, %s7159_s23  ;;  %p7164_p12 = scmp.lt.s32.totalorder %s137_s30, %s137_s30 }
  0x4b   :  { %p7165_p13 = scmp.lt.s32.totalorder %s7163_s22, %s7159_s23 }
  0x4d   :  { %p7166_p0 = por %p7165_p13, %p7164_p12 }
  0x4f   :  { %p7167_p1 = pnand %p7166_p0, %p7160_p11 }
  0x51   :  { %7170 = shalt.err (!%p7167_p1)
}
  0x52   :  { %139 = dma.hbm_to_vmem [thread:$0]  %s7377_s27, 16, %s137_s30, [#allocation6]  }
  0x53   :  { %7175 = dma.done.wait [#allocation4], 16  }
  0x54   :  { %7176 = vsyncadd [#allocation4], 4294967280 }
  0x55   :  { %7177 = dma.done.wait [#allocation6], 16  }
  0x56   :  { %7178 = vsyncadd [#allocation6], 4294967280  ;;  %v146_v0 = vld [vmem:[%s7244_s9] sm:$0xff]  ;;  %v147_v1 = vld [vmem:[%s7244_s9 + $0x8] sm:$0xff]  ;;  %vm163_vm0 = vcmask 261120   ;;  %v365_v42 = vlaneseq  ;;  %vm245_vm2 = vcmask 523264  }
  0x57   :  { %v7391_v2 = vld [vmem:[%s7264_s25] sm:$0xff]  ;;  %148 = vst [vmem:[%s7382_s20] sm:$0xff] %v146_v0  ;;  %149 = vst [vmem:[%s7382_s20 + $0x8] sm:$0xff] %v147_v1  ;;  %v7396_v3 = vld [vmem:[%s7264_s25 + $0x8] sm:$0xff] }
  0x58   :  { %v7399_v4 = vld [vmem:[%s7269_s29] sm:$0xff]  ;;  %v7402_v5 = vld [vmem:[%s7269_s29 + $0x8] sm:$0xff]  ;;  %v7417_v10 = vld [vmem:[%s7249_s13 + $0x10] sm:$0xff]  ;;  %v7484_v43 = vand.u32 127, %v365_v42  ;;  %v7486_v44 = vshrl.u32 %v365_v42, 7 }
  0x59   :  { %v7405_v6 = vld [vmem:[%s7259_s21] sm:$0xff]  ;;  %v7408_v7 = vld [vmem:[%s7259_s21 + $0x8] sm:$0xff]  ;;  %v7420_v11 = vld [vmem:[%s7249_s13 + $0x18] sm:$0xff] }
  0x5a   :  { %v7411_v8 = vld [vmem:[%s7249_s13] sm:$0xff]  ;;  %v7414_v9 = vld [vmem:[%s7249_s13 + $0x8] sm:$0xff]  ;;  %v7429_v14 = vld [vmem:[%s7249_s13 + $0x30] sm:$0xff]  ;;  %v369_v45 = vcvt.s32.f32 %v7484_v43  ;;  %vm370_vm1 = vcmp.lt.s32.totalorder %v7484_v43, 50 }
  0x5b   :  { %v7423_v12 = vld [vmem:[%s7249_s13 + $0x20] sm:$0xff]  ;;  %v7426_v13 = vld [vmem:[%s7249_s13 + $0x28] sm:$0xff]  ;;  %v7432_v15 = vld [vmem:[%s7249_s13 + $0x38] sm:$0xff] }
  0x5c   :  { %v7435_v16 = vld [vmem:[%s7249_s13 + $0x40] sm:$0xff]  ;;  %v7438_v17 = vld [vmem:[%s7249_s13 + $0x48] sm:$0xff]  ;;  %v7441_v18 = vld [vmem:[%s7249_s13 + $0x50] sm:$0xff] }
  0x5d   :  { %v7444_v19 = vld [vmem:[%s7249_s13 + $0x58] sm:$0xff]  ;;  %v7447_v20 = vld [vmem:[%s7249_s13 + $0x60] sm:$0xff]  ;;  %v7450_v21 = vld [vmem:[%s7249_s13 + $0x68] sm:$0xff] }
  0x5e   :  { %v7453_v22 = vld [vmem:[%s7249_s13 + $0x70] sm:$0xff]  ;;  %v7456_v23 = vld [vmem:[%s7249_s13 + $0x78] sm:$0xff]  ;;  %v7459_v24 = vld [vmem:[%s7254_s17] sm:$0xff] }
  0x5f   :  { %v7462_v25 = vld [vmem:[%s7254_s17 + $0x8] sm:$0xff]  ;;  %v7465_v26 = vld [vmem:[%s7254_s17 + $0x10] sm:$0xff]  ;;  %v7468_v27 = vld [vmem:[%s7254_s17 + $0x18] sm:$0xff] }
  0x60   :  { %v152_v28 = vld [vmem:[%s7324_s4] sm:$0xff]  ;;  %v153_v29 = vld [vmem:[%s7324_s4 + $0x8] sm:$0xff]  ;;  %v154_v33 = vld [vmem:[%s7324_s4 + $0x10] sm:$0xff] }
  0x61   :  { %v6430_v30 = vpack.c.bf16 %v153_v29, %v152_v28  ;;  %v5537_v31 = vld [vmem:[%s7324_s4 + $0x20] sm:$0xff]  ;;  %v5538_v32 = vld [vmem:[%s7324_s4 + $0x28] sm:$0xff]  ;;  %v155_v35 = vld [vmem:[%s7324_s4 + $0x18] sm:$0xff] }
  0x62   :  { %v6438_v34 = vpack.c.bf16 %v5538_v32, %v5537_v31  ;;  %v5539_v36 = vld [vmem:[%s7324_s4 + $0x30] sm:$0xff]  ;;  %v5540_v37 = vld [vmem:[%s7324_s4 + $0x38] sm:$0xff]  ;;  %v6434_v38 = vpack.c.bf16 %v155_v35, %v154_v33  ;;  %v150_v40 = vld [vmem:[%s7239_s5] sm:$0xff] }
  0x63   :  { %6431 = vmatprep.subr.bf16.mxu0 %v6430_v30  ;;  %v6442_v39 = vpack.c.bf16 %v5540_v37, %v5539_v36  ;;  %5991 = vmatprep.mubr.msk.f32.mxu0 %vm163_vm0, %v150_v40  ;;  %v151_v41 = vld [vmem:[%s7239_s5 + $0x8] sm:$0xff]  ;;  %v5534_v46 = vld [vmem:[%s7329_s12] ss:$0 sm:$0xff]  ;;  %v5542_v47 = vld [vmem:[%s7329_s12 + $0x1] ss:$0 sm:$0xff]  ;;  %s7496_s5 = smov 0  }
  0x64   :  { %6439 = vmatprep.subr.bf16.mxu1 %v6438_v34  ;;  %6433 = vmatpush3.bf16.msra.mxu0 %v6430_v30 }
  0x65   :  { %6441 = vmatpush3.bf16.msra.mxu1 %v6438_v34  ;;  %6435 = vmatprep.subr.bf16.mxu0 %v6434_v38 }
  0x66   :  { %6443 = vmatprep.subr.bf16.mxu1 %v6442_v39  ;;  %6002 = vmatprep.mubr.msk.f32.mxu1 %vm163_vm0, %v150_v40 }
  0x68   :  { %6437 = vmatpush3.bf16.msra.mxu0 %v6434_v38 }
  0x69   :  { %6445 = vmatpush3.bf16.msra.mxu1 %v6442_v39 }
  0x6b   :  { %5992 = vmatmul.mubr.msk.f32.vlgmr.msra.gmra.mrb[0].mxu0 %vm163_vm0, %v151_v41 }
  0x6c   :  { %6003 = vmatmul.mubr.msk.f32.vlgmr.msra.gmra.mrb[0].mxu1 %vm163_vm0, %v151_v41 }
 0x13e   :  { %v5993_v48 = vpop.f32.mrb[0].mxu0 }
 0x13f   :  { %v242_v49 = vadd.f32 %v5993_v48, %v5534_v46  ;;  %v6004_v50 = vpop.f32.mrb[0].mxu1  ;;  %v236_v51 = vpop.f32.mrb[1].mxu0 }
 0x140   :  { %v333_v52 = vadd.f32 %v6004_v50, %v5542_v47  ;;  %v237_v53 = vadd.f32 %v5534_v46, %v236_v51  ;;  %v327_v54 = vpop.f32.mrb[1].mxu1 }
 0x141   :  { %247 = vst.msk [vmem:[#allocation2 + $0x8] sm:$0xff] %vm245_vm2, %v242_v49  ;;  %v328_v55 = vadd.f32 %v5542_v47, %v327_v54 }
 0x142   :  { %338 = vst.msk [vmem:[#allocation2 + $0x18] sm:$0xff] %vm245_vm2, %v333_v52  ;;  %246 = vst.msk [vmem:[#allocation2] sm:$0xff] %vm245_vm2, %v237_v53 }
 0x143   :  { %337 = vst.msk [vmem:[#allocation2 + $0x10] sm:$0xff] %vm245_vm2, %v328_v55 }
 0x144 LB: > { %v6446_v56 = vpack.c.bf16 %v7414_v9, %v7411_v8  ;;  %v6450_v57 = vpack.c.bf16 %v7420_v11, %v7417_v10  ;;  %v378_v58 = vld [vmem:[%s7382_s20] sm:$0xff]  ;;  %v6454_v59 = vpack.c.bf16 %v7426_v13, %v7423_v12  ;;  %v6458_v60 = vpack.c.bf16 %v7432_v15, %v7429_v14  ;;  %v379_v1 = vld [vmem:[%s7382_s20 + $0x8] sm:$0xff]  ;;  %v502_v49 = vld [vmem:[%s7284_s14 + $0x10] sm:$0xff]  ;;  %s7214_s9 = smov 96   ;;  %s7215_s13 = smov 88   ;;  %s7181_s5 = sphi %s7496_s5, %s376_s5  }
 0x145   : > { %6037 = vmatprep.mubr.f32.mxu0 %v378_v58  ;;  %v6462_v61 = vpack.c.bf16 %v7438_v17, %v7435_v16  ;;  %v6466_v62 = vpack.c.bf16 %v7444_v19, %v7441_v18  ;;  %v6470_v63 = vpack.c.bf16 %v7450_v21, %v7447_v20  ;;  %v6474_v0 = vpack.c.bf16 %v7456_v23, %v7453_v22  ;;  %v500_v47 = vld [vmem:[%s7284_s14] sm:$0xff]  ;;  %v501_v48 = vld [vmem:[%s7284_s14 + $0x8] sm:$0xff]  ;;  %v503_v51 = vld [vmem:[%s7284_s14 + $0x18] sm:$0xff]  ;;  %s7216_s17 = smov 120   ;;  %s7217_s21 = smov 80  }
 0x146   : > { %6447 = vmatprep.subr.bf16.mxu0 %v6446_v56  ;;  %v6478_v50 = vpack.c.bf16 %v501_v48, %v500_v47  ;;  %v6482_v52 = vpack.c.bf16 %v503_v51, %v502_v49  ;;  %vm598_vm3 = vcmask 64512   ;;  %s7218_s25 = smov 112   ;;  %vm686_vm5 = vcmask 130048   ;;  %s7219_s29 = smov 64  }
 0x147   : > { %6449 = vmatpush3.bf16.msra.mxu0 %v6446_v56  ;;  %vm7564_vm4 = vmpackc.low %vm598_vm3, %vm598_vm3  ;;  %s7220_s30 = smov 48   ;;  %s7221_s6 = smov 56   ;;  %vm1436_vm6 = vcmask 195584   ;;  %vm7229_vm7 = vmmov 0   ;;  %vm5371_vm9 = vcmask 254976   ;;  %vm5473_vm10 = vcmask 1041408  }
 0x148   : > { %6451 = vmatprep.subr.bf16.mxu0 %v6450_v57  ;;  %6479 = vmatprep.subr.bf16.mxu1 %v6478_v50  ;;  %s7222_s12 = smov 72   ;;  %s7223_s27 = smov 104  }
 0x149   : > { %6481 = vmatpush3.bf16.msra.mxu1 %v6478_v50  ;;  %s8214_s4 = smov 40   ;;  %s7225_s26 = smov 8  }
 0x14a   : > { %6483 = vmatprep.subr.bf16.mxu1 %v6482_v52  ;;  %s8215_s1 = smov 16   ;;  %s8212_s28 = smov 24  }
 0x14b   : > { %6453 = vmatpush3.bf16.msra.mxu0 %v6450_v57  ;;  %s8232_s2 = sld [smem:[#allocation9_spill]]  ;;  %s8233_s7 = sld [smem:[#allocation12_spill]] }
 0x14c   : > { %6455 = vmatprep.subr.bf16.mxu0 %v6454_v59  ;;  %s8234_s10 = sld [smem:[#allocation10_spill]]  ;;  %s8235_s11 = sld [smem:[#allocation11_spill]] }
 0x14d   : > { %6485 = vmatpush3.bf16.msra.mxu1 %v6482_v52  ;;  %s8236_s15 = sld [smem:[#allocation13_spill]]  ;;  %s8237_s16 = sld [smem:[#allocation14_spill]] }
 0x14e   : > { %s8238_s18 = sld [smem:[#allocation15_spill]]  ;;  %s8239_s0 = sld [smem:[#allocation18_spill]] }
 0x14f   : > { %6457 = vmatpush3.bf16.msra.mxu0 %v6454_v59  ;;  %s8240_s23 = sld [smem:[#allocation16_spill]]  ;;  %s8241_s22 = sld [smem:[#allocation17_spill]] }
 0x150   : > { %6459 = vmatprep.subr.bf16.mxu0 %v6458_v60 }
 0x153   : > { %6461 = vmatpush3.bf16.msra.mxu0 %v6458_v60  ;;  %v5545_v60 = vld [vmem:[%s7274_s3] ss:$0 sm:$0xff] }
 0x154   : > { %6463 = vmatprep.subr.bf16.mxu0 %v6462_v61 }
 0x157   : > { %6465 = vmatpush3.bf16.msra.mxu0 %v6462_v61 }
 0x158   : > { %6467 = vmatprep.subr.bf16.mxu0 %v6466_v62 }
 0x15b   : > { %6469 = vmatpush3.bf16.msra.mxu0 %v6466_v62  ;;  %v5546_v62 = vld [vmem:[%s7279_s8] ss:$0 sm:$0xff] }
 0x15c   : > { %6471 = vmatprep.subr.bf16.mxu0 %v6470_v63 }
 0x15f   : > { %6473 = vmatpush3.bf16.msra.mxu0 %v6470_v63 }
 0x160   : > { %6475 = vmatprep.subr.bf16.mxu0 %v6474_v0 }
 0x163   : > { %6477 = vmatpush3.bf16.msra.mxu0 %v6474_v0 }
 0x166   : > { %6038 = vmatmul.mubr.f32.vlgmr.msra.gmra.mrb[0].mxu0 %v379_v1 }
 0x239   : > { %v6039_v28 = vpop.f32.mrb[0].mxu0 }
 0x23a   : > { %v446_v29 = vpop.f32.mrb[1].mxu0  ;;  %v7523_v31 = vadd.f32 %v6039_v28, %v7408_v7 }
 0x23b   : > { %v7520_v30 = vadd.f32 %v446_v29, %v7405_v6 }
 0x23c   : > { %v460_v33 = vsel %vm163_vm0, %v7523_v31, 0.0 }
 0x23d   : > { %v457_v32 = vsel %vm163_vm0, %v7520_v30, 0.0 }
 0x23e   : > { %458 = vadd.xlane.f32.xlu0 %v457_v32 }
 0x242   : > { %461 = vadd.xlane.f32.xlu0 %v460_v33  ;;  %v5547_v33 = vld [vmem:[%s7289_s19] ss:$0 sm:$0xff] }
 0x2cb   : > { %v459_v34 = vpop.xlane.xlu0 %458 }
 0x2cc   : > { %v464_v35 = vmul.f32 0.03125, %v459_v34 }
 0x2ce   : > { %v466_v36 = vsub.f32 %v7520_v30, %v464_v35 }
 0x2cf   : > { %v462_v37 = vpop.xlane.xlu0 %461 }
 0x2d0   : > { %v465_v38 = vmul.f32 0.03125, %v462_v37  ;;  %v468_v39 = vmul.f32 %v466_v36, %v466_v36 }
 0x2d2   : > { %v470_v40 = vsel %vm163_vm0, %v468_v39, 0.0  ;;  %v467_v41 = vsub.f32 %v7523_v31, %v465_v38 }
 0x2d3   : > { %471 = vadd.xlane.f32.xlu1 %v470_v40 }
 0x2d4   : > { %v469_v42 = vmul.f32 %v467_v41, %v467_v41 }
 0x2d6   : > { %v473_v46 = vsel %vm163_vm0, %v469_v42, 0.0 }
 0x2d7   : > { %474 = vadd.xlane.f32.xlu1 %v473_v46 }
 0x360   : > { %v472_v53 = vpop.xlane.xlu1 %471 }
 0x361   : > { %v476_v54 = vmul.f32 0.03125, %v472_v53 }
 0x363   : > { %v478_v55 = vadd.f32 1e-05, %v476_v54 }
 0x364   : > { %v475_v56 = vpop.xlane.xlu1 %474 }
 0x365   : > { %6965 = vrsqrt.f32 %v478_v55  ;;  %v477_v57 = vmul.f32 0.03125, %v475_v56 }
 0x367   : > { %v479_v58 = vadd.f32 1e-05, %v477_v57 }
 0x369   : > { %6967 = vrsqrt.f32 %v479_v58 }
 0x36f   : > { %v6966_v59 = vpop.eup %6965 }
 0x370   : > { %v482_v61 = vmul.f32 %v6966_v59, %v466_v36 }
 0x372   : > { %v490_v63 = vmul.f32 %v5545_v60, %v482_v61 }
 0x373   : > { %v6968_v0 = vpop.eup %6967 }
 0x374   : > { %v483_v1 = vmul.f32 %v6968_v0, %v467_v41  ;;  %v498_v28 = vadd.f32 %v5546_v62, %v490_v63 }
 0x376   : > { %v491_v29 = vmul.f32 %v5545_v60, %v483_v1  ;;  %6048 = vmatprep.mubr.msk.f32.mxu1 %vm163_vm0, %v498_v28 }
 0x378   : > { %v499_v32 = vadd.f32 %v5546_v62, %v491_v29 }
 0x37a   : > { %6049 = vmatmul.mubr.msk.f32.vlgmr.msra.gmra.mrb[0].mxu1 %vm163_vm0, %v499_v32 }
 0x44d   : > { %v6050_v34 = vpop.f32.mrb[0].mxu1 }
 0x44e   : > { %v7542_v35 = vadd.f32 %v6050_v34, %v5547_v33  ;;  %v583_v37 = vpop.f32.mrb[1].mxu1 }
 0x44f   : > { %v7544_v38 = vadd.f32 %v5547_v33, %v583_v37 }
 0x451   : > { %6055 = vmatprep.mubr.msk.f32.mxu1 %vm598_vm3, %v7544_v38  ;;  %v7550_v36 = vpack.i.bf16 %v7542_v35, %v7544_v38 }
 0x453   : > { %6816 = vrot.lane.b32.xlu0 %v7550_v36, %s7214_s9 }
 0x457   : > { %6826 = vrot.lane.b32.xlu0 %v7550_v36, %s7215_s13 }
 0x45b   : > { %796 = vrot.lane.b32.xlu0 %v7544_v38, %s7216_s17 }
 0x45f   : > { %6831 = vrot.lane.b32.xlu0 %v7550_v36, %s7217_s21 }
 0x463   : > { %1000 = vrot.lane.b32.xlu0 %v7544_v38, %s7218_s25 }
 0x4c5   : > { %v6817_v39 = vpop.permute.xlu0 %6816 }
 0x4c6   : > { %v6819_v40 = vunpack.i.h.bf16 %v6817_v39  ;;  %v6818_v41 = vunpack.i.l.bf16 %v6817_v39 }
 0x4c8   : > { %v6486_v46 = vpack.c.bf16 %v6819_v40, %v6818_v41 }
 0x4c9   : > { %v6827_v47 = vpop.permute.xlu0 %6826 }
 0x4ca   : > { %6488 = vmatprep.subr.msk.bf16.mxu1 %vm7564_vm4, %v6486_v46  ;;  %v6829_v32 = vunpack.i.h.bf16 %v6827_v47  ;;  %v6828_v34 = vunpack.i.l.bf16 %v6827_v47 }
 0x4cb   : > { %6491 = vmatpush3.bf16.xpose.msk.msra.mxu1 %vm7564_vm4, %v6486_v46 }
 0x4cc   : > { %v6496_v41 = vpack.c.bf16 %v6829_v32, %v6828_v34 }
 0x4cd   : > { %v7572_v48 = vpop.permute.xlu0 %796 }
 0x4d1   : > { %v6832_v49 = vpop.permute.xlu0 %6831 }
 0x4d2   : > { %v6834_v50 = vunpack.i.h.bf16 %v6832_v49  ;;  %v6833_v51 = vunpack.i.l.bf16 %v6832_v49  ;;  %6056 = vmatmul.mubr.msk.f32.vlgmr.msra.gmra.mrb[2].mxu1 %vm598_vm3, %v7542_v35 }
 0x4d4   : > { %v6506_v52 = vpack.c.bf16 %v6834_v50, %v6833_v51 }
 0x4d5   : > { %v1001_v53 = vpop.permute.xlu0 %1000 }
 0x4d6   : > { %6508 = vmatprep.subr.msk.bf16.mxu0 %vm7564_vm4, %v6506_v52  ;;  %6083 = vmatprep.mubr.msk.f32.mxu0 %vm598_vm3, %v1001_v53 }
 0x4d7   : > { %6511 = vmatpush3.bf16.xpose.msk.msra.mxu0 %vm7564_vm4, %v6506_v52 }
 0x5a5   : > { %v6057_v54 = vpop.f32.mrb[2].mxu1 }
 0x5a6   : > { %v673_v55 = vpop.f32.mrb[3].mxu1  ;;  %v683_v56 = vmul.f32 0.35355338, %v6057_v54 }
 0x5a7   : > { %v682_v57 = vmul.f32 0.35355338, %v673_v55 }
 0x5a8   : > { %v685_v59 = vadd.f32 %v683_v56, %v7396_v3 }
 0x5a9   : > { %v684_v58 = vadd.f32 %v682_v57, %v7391_v2 }
 0x5aa   : > { %v690_v61 = vsel %vm686_vm5, %v685_v59, -inf }
 0x5ab   : > { %v687_v60 = vsel %vm686_vm5, %v684_v58, -inf }
 0x5ac   : > { %688 = vmax.xlane.f32.xlu1 %v687_v60 }
 0x5b0   : > { %691 = vmax.xlane.f32.xlu1 %v690_v61 }
 0x5c1   : > { %6821 = vrot.lane.b32.xlu1 %v7550_v36, %s7219_s29 }
 0x639   : > { %v689_v62 = vpop.xlane.xlu1 %688 }
 0x63a   : > { %v693_v63 = vsub.f32 %v684_v58, %v689_v62 }
 0x63c   : > { %v695_v28 = vmul.f32 1.442695, %v693_v63 }
 0x63d   : > { %v692_v0 = vpop.xlane.xlu1 %691 }
 0x63e   : > { %v694_v1 = vsub.f32 %v685_v59, %v692_v0 }
 0x640   : > { %v697_v29 = vmul.f32 1.442695, %v694_v1 }
 0x641   : > { %v6822_v33 = vpop.permute.xlu1 %6821 }
 0x642   : > { %6969 = vpow2.f32 %v697_v29  ;;  %v6824_v37 = vunpack.i.h.bf16 %v6822_v33  ;;  %v6823_v39 = vunpack.i.l.bf16 %v6822_v33 }
 0x643   : > { %6971 = vpow2.f32 %v695_v28 }
 0x644   : > { %v6492_v40 = vpack.c.bf16 %v6824_v37, %v6823_v39 }
 0x646   : > { %6493 = vmatprep.subr.bf16.mxu1 %v6492_v40 }
 0x647   : > { %6495 = vmatpush3.bf16.msra.mxu1 %v6492_v40 }
 0x648   : > { %6498 = vmatprep.subr.msk.bf16.mxu1 %vm7564_vm4, %v6496_v41 }
 0x64c   : > { %v6970_v46 = vpop.eup %6969 }
 0x64d   : > { %v702_v49 = vsel %vm686_vm5, %v6970_v46, 0.0  ;;  %v6972_v50 = vpop.eup %6971 }
 0x64e   : > { %703 = vadd.xlane.f32.xlu1 %v702_v49  ;;  %v699_v51 = vsel %vm686_vm5, %v6972_v50, 0.0 }
 0x652   : > { %700 = vadd.xlane.f32.xlu1 %v699_v51 }
 0x663   : > { %798 = vrot.lane.b32.xlu1 %v7542_v35, %s7216_s17 }
 0x667   : > { %1002 = vrot.lane.b32.xlu1 %v7542_v35, %s7218_s25 }
 0x6db   : > { %v704_v47 = vpop.xlane.xlu1 %703 }
 0x6dc   : > { %6973 = vrcp.f32 %v704_v47 }
 0x6df   : > { %v701_v52 = vpop.xlane.xlu1 %700 }
 0x6e0   : > { %6975 = vrcp.f32 %v701_v52 }
 0x6e3   : > { %v799_v53 = vpop.permute.xlu1 %798 }
 0x6e6   : > { %v6974_v55 = vpop.eup %6973 }
 0x6e7   : > { %v1003_v54 = vpop.permute.xlu1 %1002  ;;  %v708_v58 = vmul.f32 %v6974_v55, %v6970_v46 }
 0x6e8   : > { %6084 = vmatmul.mubr.msk.f32.vlgmr.msra.gmra.mrb[2].mxu0 %vm598_vm3, %v1003_v54 }
 0x6ea   : > { %v6976_v56 = vpop.eup %6975 }
 0x6eb   : > { %v706_v57 = vmul.f32 %v6976_v56, %v6972_v50 }
 0x6ed   : > { %6062 = vmatprep.mubr.msk.f32.mxu1 %vm686_vm5, %v706_v57 }
 0x6ee   : > { %6063 = vmatmul.mubr.msk.f32.vlgmr.msra.gmra.mrb[4].mxu1 %vm686_vm5, %v708_v58 }
 0x6ef   : > { %6501 = vmatpush3.bf16.xpose.msk.msra.mxu1 %vm7564_vm4, %v6496_v41  ;;  %6069 = vmatprep.mubr.msk.f32.mxu1 %vm598_vm3, %v7572_v48 }
 0x6f6   : > { %6070 = vmatmul.mubr.msk.f32.vlgmr.msra.gmra.mrb[6].mxu1 %vm598_vm3, %v799_v53 }
 0x7bb   : > { %v6085_v59 = vpop.f32.mrb[2].mxu0 }
 0x7bc   : > { %v1082_v60 = vpop.f32.mrb[3].mxu0  ;;  %v1092_v48 = vmul.f32 0.35355338, %v6085_v59 }
 0x7bd   : > { %v1091_v28 = vmul.f32 0.35355338, %v1082_v60 }
 0x7be   : > { %v1094_v40 = vadd.f32 %v1092_v48, %v7396_v3 }
 0x7bf   : > { %v1093_v37 = vadd.f32 %v1091_v28, %v7391_v2 }
 0x7c0   : > { %v1098_v46 = vsel %vm686_vm5, %v1094_v40, -inf }
 0x7c1   : > { %v7603_v61 = vpop.f32.mrb[4].mxu1  ;;  %v1095_v41 = vsel %vm686_vm5, %v1093_v37, -inf }
 0x7c2   : > { %v7605_v62 = vpop.f32.mrb[5].mxu1 }
 0x7c9   : > { %v6071_v63 = vpop.f32.mrb[6].mxu1 }
 0x7ca   : > { %v888_v0 = vmul.f32 0.35355338, %v6071_v63  ;;  %v878_v1 = vpop.f32.mrb[7].mxu1 }
 0x7cb   : > { %v887_v29 = vmul.f32 0.35355338, %v878_v1 }
 0x7cc   : > { %v890_v32 = vadd.f32 %v888_v0, %v7396_v3 }
 0x7cd   : > { %v889_v33 = vadd.f32 %v887_v29, %v7391_v2 }
 0x7ce   : > { %v894_v34 = vsel %vm686_vm5, %v890_v32, -inf }
 0x7cf   : > { %895 = vmax.xlane.f32.xlu1 %v894_v34  ;;  %v891_v39 = vsel %vm686_vm5, %v889_v33, -inf }
 0x7d0   : > { %892 = vmax.xlane.f32.xlu0 %v891_v39 }
 0x7d4   : > { %1096 = vmax.xlane.f32.xlu0 %v1095_v41 }
 0x7d8   : > { %1099 = vmax.xlane.f32.xlu0 %v1098_v46 }
 0x85c   : > { %v896_v51 = vpop.xlane.xlu1 %895 }
 0x85d   : > { %v893_v49 = vpop.xlane.xlu0 %892  ;;  %v898_v53 = vsub.f32 %v890_v32, %v896_v51 }
 0x85e   : > { %v897_v50 = vsub.f32 %v889_v33, %v893_v49 }
 0x85f   : > { %v901_v58 = vmul.f32 1.442695, %v898_v53 }
 0x860   : > { %v899_v54 = vmul.f32 1.442695, %v897_v50 }
 0x861   : > { %v1097_v47 = vpop.xlane.xlu0 %1096 }
 0x862   : > { %v1101_v52 = vsub.f32 %v1093_v37, %v1097_v47 }
 0x864   : > { %v1103_v55 = vmul.f32 1.442695, %v1101_v52 }
 0x865   : > { %v1100_v56 = vpop.xlane.xlu0 %1099 }
 0x866   : > { %6977 = vpow2.f32 %v1103_v55  ;;  %v1102_v57 = vsub.f32 %v1094_v40, %v1100_v56 }
 0x867   : > { %6979 = vpow2.f32 %v899_v54 }
 0x868   : > { %v1105_v59 = vmul.f32 1.442695, %v1102_v57 }
 0x86a   : > { %6981 = vpow2.f32 %v1105_v59 }
 0x86b   : > { %6983 = vpow2.f32 %v901_v58 }
 0x870   : > { %v6978_v60 = vpop.eup %6977 }
 0x871   : > { %v1107_v63 = vsel %vm686_vm5, %v6978_v60, 0.0  ;;  %v6980_v0 = vpop.eup %6979 }
 0x872   : > { %1108 = vadd.xlane.f32.xlu0 %v1107_v63  ;;  %v903_v28 = vsel %vm686_vm5, %v6980_v0, 0.0 }
 0x874   : > { %v6982_v1 = vpop.eup %6981 }
 0x875   : > { %v1110_v29 = vsel %vm686_vm5, %v6982_v1, 0.0  ;;  %v6984_v32 = vpop.eup %6983 }
 0x876   : > { %904 = vadd.xlane.f32.xlu0 %v903_v28  ;;  %1111 = vadd.xlane.f32.xlu1 %v1110_v29  ;;  %v906_v33 = vsel %vm686_vm5, %v6984_v32, 0.0 }
 0x87a   : > { %907 = vadd.xlane.f32.xlu1 %v906_v33 }
 0x88b   : > { %6841 = vrot.lane.b32.xlu1 %v7550_v36, %s7220_s30 }
 0x88c   : > { %6836 = vrot.lane.b32.xlu0 %v7550_v36, %s7221_s6 }
 0x88f   : > { %6846 = vrot.lane.b32.xlu1 %v7550_v36, %s7222_s12 }
 0x890   : > { %1206 = vrot.lane.b32.xlu0 %v7542_v35, %s7223_s27 }
 0x893   : > { %1204 = vrot.lane.b32.xlu1 %v7544_v38, %s7223_s27 }
 0x8ff   : > { %v1109_v34 = vpop.xlane.xlu0 %1108 }
 0x903   : > { %v1112_v48 = vpop.xlane.xlu1 %1111  ;;  %v905_v37 = vpop.xlane.xlu0 %904 }
 0x904   : > { %6985 = vrcp.f32 %v905_v37 }
 0x905   : > { %6987 = vrcp.f32 %v1109_v34 }
 0x907   : > { %v908_v39 = vpop.xlane.xlu1 %907  ;;  %v6837_v40 = vpop.permute.xlu0 %6836 }
 0x908   : > { %6989 = vrcp.f32 %v908_v39  ;;  %v6839_v41 = vunpack.i.h.bf16 %v6837_v40  ;;  %v6838_v46 = vunpack.i.l.bf16 %v6837_v40 }
 0x909   : > { %6991 = vrcp.f32 %v1112_v48 }
 0x90a   : > { %v6502_v49 = vpack.c.bf16 %v6839_v41, %v6838_v46 }
 0x90b   : > { %v6842_v50 = vpop.permute.xlu1 %6841 }
 0x90c   : > { %v6844_v51 = vunpack.i.h.bf16 %v6842_v50  ;;  %v6843_v47 = vunpack.i.l.bf16 %v6842_v50  ;;  %6503 = vmatprep.subr.bf16.mxu1 %v6502_v49 }
 0x90d   : > { %6505 = vmatpush3.bf16.msra.mxu1 %v6502_v49 }
 0x90e   : > { %v6512_v35 = vpack.c.bf16 %v6844_v51, %v6843_v47  ;;  %v6986_v52 = vpop.eup %6985 }
 0x90f   : > { %v6847_v38 = vpop.permute.xlu1 %6846  ;;  %v910_v53 = vmul.f32 %v6986_v52, %v6980_v0  ;;  %v6988_v54 = vpop.eup %6987 }
 0x910   : > { %6513 = vmatprep.subr.bf16.mxu1 %v6512_v35  ;;  %v6849_v55 = vunpack.i.h.bf16 %v6847_v38  ;;  %v6848_v56 = vunpack.i.l.bf16 %v6847_v38  ;;  %v1114_v63 = vmul.f32 %v6988_v54, %v6978_v60 }
 0x911   : > { %6076 = vmatprep.mubr.msk.f32.mxu1 %vm686_vm5, %v910_v53 }
 0x912   : > { %v6990_v57 = vpop.eup %6989  ;;  %v6516_v28 = vpack.c.bf16 %v6849_v55, %v6848_v56 }
 0x913   : > { %v912_v58 = vmul.f32 %v6990_v57, %v6984_v32  ;;  %v6992_v59 = vpop.eup %6991  ;;  %v1205_v0 = vpop.permute.xlu1 %1204 }
 0x914   : > { %v1116_v29 = vmul.f32 %v6992_v59, %v6982_v1  ;;  %v1207_v32 = vpop.permute.xlu0 %1206 }
 0x915   : > { %6077 = vmatmul.mubr.msk.f32.vlgmr.msra.gmra.mrb[8].mxu1 %vm686_vm5, %v912_v58 }
 0x916   : > { %6515 = vmatpush3.bf16.msra.mxu1 %v6512_v35  ;;  %6090 = vmatprep.mubr.msk.f32.mxu1 %vm686_vm5, %v1114_v63 }
 0x917   : > { %6518 = vmatprep.subr.msk.bf16.mxu1 %vm7564_vm4, %v6516_v28 }
 0x919   : > { %6091 = vmatmul.mubr.msk.f32.vlgmr.msra.gmra.mrb[10].mxu1 %vm686_vm5, %v1116_v29 }
 0x91a   : > { %6097 = vmatprep.mubr.msk.f32.mxu1 %vm598_vm3, %v1205_v0 }
 0x91f   : > { %6521 = vmatpush3.bf16.xpose.msk.msra.mxu1 %vm7564_vm4, %v6516_v28 }
 0x926   : > { %6098 = vmatmul.mubr.msk.f32.vlgmr.msra.gmra.mrb[12].mxu1 %vm598_vm3, %v1207_v32 }
 0x9e8   : > { %v6078_v60 = vpop.f32.mrb[8].mxu1 }
 0x9e9   : > { %v991_v33 = vpop.f32.mrb[9].mxu1 }
 0x9ec   : > { %v6092_v34 = vpop.f32.mrb[10].mxu1 }
 0x9ed   : > { %v1195_v48 = vpop.f32.mrb[11].mxu1 }
 0x9f9   : > { %v6099_v37 = vpop.f32.mrb[12].mxu1 }
 0x9fa   : > { %v1296_v39 = vmul.f32 0.35355338, %v6099_v37  ;;  %v1286_v40 = vpop.f32.mrb[13].mxu1  ;;  %v1440_v37 = vld [vmem:[%s7294_s24 + $0x8] sm:$0xff] }
 0x9fb   : > { %v1295_v41 = vmul.f32 0.35355338, %v1286_v40 }
 0x9fc   : > { %v1298_v1 = vadd.f32 %v1296_v39, %v7396_v3  ;;  %v1441_v39 = vld [vmem:[%s7294_s24 + $0x10] sm:$0xff] }
 0x9fd   : > { %v1297_v46 = vadd.f32 %v1295_v41, %v7391_v2  ;;  %v1442_v41 = vld [vmem:[%s7294_s24 + $0x18] sm:$0xff] }
 0x9fe   : > { %v1302_v49 = vsel %vm686_vm5, %v1298_v1, -inf }
 0x9ff   : > { %1303 = vmax.xlane.f32.xlu0 %v1302_v49  ;;  %v1299_v50 = vsel %vm686_vm5, %v1297_v46, -inf }
 0xa00   : > { %1300 = vmax.xlane.f32.xlu1 %v1299_v50 }
 0xa11   : > { %6851 = vrot.lane.b32.xlu1 %v7550_v36, %s8214_s4  ;;  %s8243_s4 = sld [smem:[#allocation19_spill]] }
 0xa15   : > { %1412 = vrot.lane.b32.xlu1 %v6078_v60, %s7225_s26 }
 0xa19   : > { %1418 = vrot.lane.b32.xlu1 %v1195_v48, %s8215_s1  ;;  %v1439_v48 = vld [vmem:[%s7294_s24] sm:$0xff] }
 0xa1a   : > { %v6526_v40 = vpack.c.bf16 %v1440_v37, %v1439_v48 }
 0xa1d   : > { %1420 = vrot.lane.b32.xlu1 %v6092_v34, %s8215_s1 }
 0xa8c   : > { %v1304_v51 = vpop.xlane.xlu0 %1303 }
 0xa8d   : > { %v1306_v47 = vsub.f32 %v1298_v1, %v1304_v51  ;;  %v1301_v35 = vpop.xlane.xlu1 %1300  ;;  %v6530_v1 = vpack.c.bf16 %v1442_v41, %v1441_v39 }
 0xa8e   : > { %v1305_v52 = vsub.f32 %v1297_v46, %v1301_v35 }
 0xa8f   : > { %v1309_v38 = vmul.f32 1.442695, %v1306_v47 }
 0xa90   : > { %v1307_v53 = vmul.f32 1.442695, %v1305_v52 }
 0xa91   : > { %v6852_v54 = vpop.permute.xlu1 %6851 }
 0xa92   : > { %6993 = vpow2.f32 %v1307_v53  ;;  %v6854_v55 = vunpack.i.h.bf16 %v6852_v54  ;;  %v6853_v56 = vunpack.i.l.bf16 %v6852_v54 }
 0xa93   : > { %6995 = vpow2.f32 %v1309_v38 }
 0xa94   : > { %v6522_v36 = vpack.c.bf16 %v6854_v55, %v6853_v56 }
 0xa95   : > { %v1413_v49 = vpop.permute.xlu1 %1412 }
 0xa96   : > { %6523 = vmatprep.subr.bf16.mxu0 %v6522_v36  ;;  %v1433_v38 = vsel %vm598_vm3, %v7603_v61, %v1413_v49 }
 0xa97   : > { %6525 = vmatpush3.bf16.msra.mxu0 %v6522_v36 }
 0xa98   : > { %6527 = vmatprep.subr.bf16.mxu0 %v6526_v40 }
 0xa99   : > { %v1419_v50 = vpop.permute.xlu1 %1418 }
 0xa9c   : > { %v6994_v57 = vpop.eup %6993 }
 0xa9d   : > { %v1311_v58 = vsel %vm686_vm5, %v6994_v57, 0.0  ;;  %v6996_v59 = vpop.eup %6995  ;;  %v1421_v47 = vpop.permute.xlu1 %1420 }
 0xa9e   : > { %1312 = vadd.xlane.f32.xlu0 %v1311_v58  ;;  %v1314_v63 = vsel %vm686_vm5, %v6996_v59, 0.0  ;;  %v1435_v55 = vsel %vm686_vm5, %v1433_v38, %v1421_v47  ;;  %v1671_v47 = vld [vmem:[#allocation2] sm:$0xff] }
 0xaa2   : > { %1315 = vadd.xlane.f32.xlu0 %v1314_v63 }
 0xab8   : > { %1410 = vrot.lane.b32.xlu0 %v991_v33, %s7225_s26 }
 0xb2b   : > { %v1313_v28 = vpop.xlane.xlu0 %1312 }
 0xb2c   : > { %6997 = vrcp.f32 %v1313_v28 }
 0xb2f   : > { %v1316_v29 = vpop.xlane.xlu0 %1315 }
 0xb30   : > { %6999 = vrcp.f32 %v1316_v29 }
 0xb33   : > { %v1411_v51 = vpop.permute.xlu0 %1410 }
 0xb34   : > { %v1432_v35 = vsel %vm598_vm3, %v7605_v62, %v1411_v51  ;;  %v5576_v62 = vld [vmem:[%s8232_s2] ss:$0 sm:$0xff] }
 0xb35   : > { %v1434_v54 = vsel %vm686_vm5, %v1432_v35, %v1419_v50  ;;  %v1582_v50 = vld [vmem:[%s8233_s7 + $0x18] sm:$0xff]  ;;  %v1672_v35 = vld [vmem:[#allocation2 + $0x8] sm:$0xff] }
 0xb36   : > { %v6998_v0 = vpop.eup %6997 }
 0xb37   : > { %v1318_v32 = vmul.f32 %v6998_v0, %v6994_v57 }
 0xb39   : > { %6104 = vmatprep.mubr.msk.f32.mxu0 %vm686_vm5, %v1318_v32 }
 0xb3a   : > { %v7000_v60 = vpop.eup %6999 }
 0xb3b   : > { %v1320_v34 = vmul.f32 %v7000_v60, %v6996_v59 }
 0xb3d   : > { %6105 = vmatmul.mubr.msk.f32.vlgmr.msra.gmra.mrb[4].mxu0 %vm686_vm5, %v1320_v34 }
 0xb3e   : > { %6529 = vmatpush3.bf16.msra.mxu0 %v6526_v40 }
 0xb3f   : > { %6531 = vmatprep.subr.bf16.mxu0 %v6530_v1 }
 0xb42   : > { %6533 = vmatpush3.bf16.msra.mxu0 %v6530_v1  ;;  %v1579_v1 = vld [vmem:[%s8233_s7] sm:$0xff] }
 0xc10   : > { %v6106_v33 = vpop.f32.mrb[4].mxu0 }
 0xc11   : > { %1428 = vrot.lane.b32.xlu1 %v6106_v33, %s8212_s28  ;;  %v1399_v46 = vpop.f32.mrb[5].mxu0  ;;  %v1580_v33 = vld [vmem:[%s8233_s7 + $0x8] sm:$0xff] }
 0xc12   : > { %1426 = vrot.lane.b32.xlu0 %v1399_v46, %s8212_s28  ;;  %v1581_v46 = vld [vmem:[%s8233_s7 + $0x10] sm:$0xff]  ;;  %v6534_v49 = vpack.c.bf16 %v1580_v33, %v1579_v1 }
 0xc13   : > { %v6538_v51 = vpack.c.bf16 %v1582_v50, %v1581_v46 }
 0xc14   : > { %6535 = vmatprep.subr.bf16.mxu1 %v6534_v49 }
 0xc15   : > { %6537 = vmatpush3.bf16.msra.mxu1 %v6534_v49 }
 0xc16   : > { %6539 = vmatprep.subr.bf16.mxu1 %v6538_v51 }
 0xc19   : > { %6541 = vmatpush3.bf16.msra.mxu1 %v6538_v51 }
 0xc83   : > { %v1429_v52 = vpop.permute.xlu1 %1428 }
 0xc84   : > { %v1427_v53 = vpop.permute.xlu0 %1426  ;;  %v1438_v36 = vsel %vm1436_vm6, %v1435_v55, %v1429_v52  ;;  %v6542_v52 = vpack.c.bf16 %v1672_v35, %v1671_v47 }
 0xc85   : > { %v1437_v56 = vsel %vm1436_vm6, %v1434_v54, %v1427_v53 }
 0xc86   : > { %6115 = vmatprep.mubr.msk.f32.mxu0 %vm163_vm0, %v1437_v56  ;;  %6544 = vmatprep.subr.msk.bf16.mxu0 %vm7564_vm4, %v6542_v52 }
 0xc87   : > { %6116 = vmatmul.mubr.msk.f32.vlgmr.msra.gmra.mrb[6].mxu0 %vm163_vm0, %v1438_v36 }
 0xc88   : > { %6547 = vmatpush3.bf16.xpose.msk.msra.mxu0 %vm7564_vm4, %v6542_v52 }
 0xd5a   : > { %v6117_v57 = vpop.f32.mrb[6].mxu0 }
 0xd5b   : > { %v1525_v58 = vadd.f32 %v6117_v57, %v7523_v31  ;;  %v1515_v59 = vpop.f32.mrb[7].mxu0 }
 0xd5c   : > { %v1524_v61 = vadd.f32 %v1515_v59, %v7520_v30  ;;  %v5578_v59 = vld [vmem:[%s8235_s11] ss:$0 sm:$0xff] }
 0xd5d   : > { %v7672_v63 = vadd.f32 %v5576_v62, %v1525_v58 }
 0xd5e   : > { %v7674_v28 = vadd.f32 %v5576_v62, %v1524_v61  ;;  %v5577_v62 = vld [vmem:[%s8234_s10] ss:$0 sm:$0xff] }
 0xd5f   : > { %v1540_v29 = vsel %vm163_vm0, %v7672_v63, 0.0 }
 0xd60   : > { %1541 = vadd.xlane.f32.xlu1 %v1540_v29  ;;  %v1537_v0 = vsel %vm163_vm0, %v7674_v28, 0.0 }
 0xd61   : > { %1538 = vadd.xlane.f32.xlu0 %v1537_v0 }
 0xded   : > { %v1542_v32 = vpop.xlane.xlu1 %1541 }
 0xdee   : > { %v1544_v31 = vmul.f32 0.03125, %v1542_v32  ;;  %v1539_v60 = vpop.xlane.xlu0 %1538 }
 0xdef   : > { %v1543_v30 = vmul.f32 0.03125, %v1539_v60 }
 0xdf0   : > { %v1546_v48 = vsub.f32 %v7672_v63, %v1544_v31 }
 0xdf1   : > { %v1545_v34 = vsub.f32 %v7674_v28, %v1543_v30  ;;  %v5579_v30 = vld [vmem:[%s8236_s15] ss:$0 sm:$0xff] }
 0xdf2   : > { %v1548_v40 = vmul.f32 %v1546_v48, %v1546_v48 }
 0xdf3   : > { %v1547_v37 = vmul.f32 %v1545_v34, %v1545_v34 }
 0xdf4   : > { %v1552_v41 = vsel %vm163_vm0, %v1548_v40, 0.0 }
 0xdf5   : > { %v1549_v39 = vsel %vm163_vm0, %v1547_v37, 0.0 }
 0xdf6   : > { %1550 = vadd.xlane.f32.xlu0 %v1549_v39 }
 0xdfa   : > { %1553 = vadd.xlane.f32.xlu0 %v1552_v41 }
 0xe83   : > { %v1551_v38 = vpop.xlane.xlu0 %1550 }
 0xe84   : > { %v1555_v53 = vmul.f32 0.03125, %v1551_v38 }
 0xe86   : > { %v1557_v54 = vadd.f32 1e-05, %v1555_v53 }
 0xe87   : > { %v1554_v55 = vpop.xlane.xlu0 %1553 }
 0xe88   : > { %7001 = vrsqrt.f32 %v1557_v54  ;;  %v1556_v56 = vmul.f32 0.03125, %v1554_v55 }
 0xe8a   : > { %v1558_v36 = vadd.f32 1e-05, %v1556_v56 }
 0xe8c   : > { %7003 = vrsqrt.f32 %v1558_v36 }
 0xe92   : > { %v7002_v57 = vpop.eup %7001 }
 0xe93   : > { %v1561_v58 = vmul.f32 %v7002_v57, %v1545_v34 }
 0xe95   : > { %v1569_v61 = vmul.f32 %v5577_v62, %v1561_v58 }
 0xe96   : > { %v7004_v29 = vpop.eup %7003 }
 0xe97   : > { %v1562_v0 = vmul.f32 %v7004_v29, %v1546_v48  ;;  %v1577_v32 = vadd.f32 %v5578_v59, %v1569_v61 }
 0xe99   : > { %v1570_v31 = vmul.f32 %v5577_v62, %v1562_v0  ;;  %6126 = vmatprep.mubr.msk.f32.mxu1 %vm163_vm0, %v1577_v32 }
 0xe9b   : > { %v1578_v60 = vadd.f32 %v5578_v59, %v1570_v31  ;;  %v7711_v59 = vpack.i.bf16 %v1672_v35, %v1671_v47 }
 0xe9d   : > { %6127 = vmatmul.mubr.msk.f32.vlgmr.msra.gmra.mrb[14].mxu1 %vm163_vm0, %v1578_v60 }
 0xf70   : > { %v6128_v37 = vpop.f32.mrb[14].mxu1 }
 0xf71   : > { %v1662_v39 = vpop.f32.mrb[15].mxu1  ;;  %v7699_v41 = vadd.f32 %v6128_v37, %v5579_v30 }
 0xf72   : > { %v7697_v40 = vadd.f32 %v5579_v30, %v1662_v39 }
 0xf74   : > { %6133 = vmatprep.mubr.msk.f32.mxu0 %vm598_vm3, %v7697_v40 }
 0xf75   : > { %6134 = vmatmul.mubr.msk.f32.vlgmr.msra.gmra.mrb[8].mxu0 %vm598_vm3, %v7699_v41 }
0x1048   : > { %v6135_v34 = vpop.f32.mrb[8].mxu0 }
0x1049   : > { %v1761_v48 = vmul.f32 0.35355338, %v6135_v34  ;;  %v1751_v1 = vpop.f32.mrb[9].mxu0 }
0x104a   : > { %v1760_v33 = vmul.f32 0.35355338, %v1751_v1 }
0x104b   : > { %v1763_v46 = vadd.f32 %v1761_v48, %v7402_v5 }
0x104c   : > { %v1762_v49 = vadd.f32 %v1760_v33, %v7399_v4 }
0x104d   : > { %v1767_v50 = vsel %vm686_vm5, %v1763_v46, -inf }
0x104e   : > { %1768 = vmax.xlane.f32.xlu1 %v1767_v50  ;;  %v1764_v51 = vsel %vm686_vm5, %v1762_v49, -inf }
0x104f   : > { %1765 = vmax.xlane.f32.xlu0 %v1764_v51 }
0x10db   : > { %v1769_v52 = vpop.xlane.xlu1 %1768 }
0x10dc   : > { %v1771_v38 = vsub.f32 %v1763_v46, %v1769_v52  ;;  %v1766_v53 = vpop.xlane.xlu0 %1765 }
0x10dd   : > { %v1770_v54 = vsub.f32 %v1762_v49, %v1766_v53 }
0x10de   : > { %v1774_v55 = vmul.f32 1.442695, %v1771_v38 }
0x10df   : > { %v1772_v56 = vmul.f32 1.442695, %v1770_v54 }
0x10e0   : > { %7005 = vpow2.f32 %v1774_v55 }
0x10e1   : > { %7007 = vpow2.f32 %v1772_v56 }
0x10ea   : > { %v7006_v36 = vpop.eup %7005 }
0x10eb   : > { %v7008_v57 = vpop.eup %7007  ;;  %v1779_v62 = vsel %vm686_vm5, %v7006_v36, 0.0 }
0x10ec   : > { %1780 = vadd.xlane.f32.xlu1 %v1779_v62  ;;  %v1776_v58 = vsel %vm686_vm5, %v7008_v57, 0.0 }
0x10ed   : > { %1777 = vadd.xlane.f32.xlu0 %v1776_v58 }
0x10fd   : > { %6861 = vrot.lane.b32.xlu1 %v7711_v59, %s7216_s17 }
0x1101   : > { %1873 = vrot.lane.b32.xlu1 %v7697_v40, %s7216_s17 }
0x1103   : > { %6856 = vrot.lane.b32.xlu0 %v7711_v59, %s7214_s9 }
0x1105   : > { %1875 = vrot.lane.b32.xlu1 %v7699_v41, %s7216_s17 }
0x1179   : > { %v1781_v61 = vpop.xlane.xlu1 %1780 }
0x117a   : > { %7009 = vrcp.f32 %v1781_v61  ;;  %v1778_v29 = vpop.xlane.xlu0 %1777 }
0x117b   : > { %7011 = vrcp.f32 %v1778_v29 }
0x117d   : > { %v6862_v0 = vpop.permute.xlu1 %6861 }
0x117e   : > { %v6864_v32 = vunpack.i.h.bf16 %v6862_v0  ;;  %v6863_v47 = vunpack.i.l.bf16 %v6862_v0  ;;  %v6857_v35 = vpop.permute.xlu0 %6856 }
0x117f   : > { %v6859_v31 = vunpack.i.h.bf16 %v6857_v35  ;;  %v6858_v60 = vunpack.i.l.bf16 %v6857_v35 }
0x1180   : > { %v6552_v30 = vpack.c.bf16 %v6864_v32, %v6863_v47 }
0x1181   : > { %v6548_v37 = vpack.c.bf16 %v6859_v31, %v6858_v60  ;;  %v1874_v33 = vpop.permute.xlu1 %1873 }
0x1183   : > { %6549 = vmatprep.subr.bf16.mxu1 %v6548_v37 }
0x1184   : > { %v7010_v39 = vpop.eup %7009  ;;  %6551 = vmatpush3.bf16.msra.mxu1 %v6548_v37 }
0x1185   : > { %v7012_v34 = vpop.eup %7011  ;;  %6554 = vmatprep.subr.msk.bf16.mxu1 %vm7564_vm4, %v6552_v30  ;;  %v1785_v1 = vmul.f32 %v7010_v39, %v7006_v36  ;;  %v1876_v46 = vpop.permute.xlu1 %1875 }
0x1186   : > { %v1783_v48 = vmul.f32 %v7012_v34, %v7008_v57 }
0x1188   : > { %6140 = vmatprep.mubr.msk.f32.mxu1 %vm686_vm5, %v1783_v48 }
0x1189   : > { %6141 = vmatmul.mubr.msk.f32.vlgmr.msra.gmra.mrb[16].mxu1 %vm686_vm5, %v1785_v1 }
0x118a   : > { %6147 = vmatprep.mubr.msk.f32.mxu1 %vm598_vm3, %v1874_v33 }
0x118d   : > { %6557 = vmatpush3.bf16.xpose.msk.msra.mxu1 %vm7564_vm4, %v6552_v30 }
0x1194   : > { %6148 = vmatmul.mubr.msk.f32.vlgmr.msra.gmra.mrb[18].mxu1 %vm598_vm3, %v1876_v46 }
0x125c   : > { %v7729_v49 = vpop.f32.mrb[16].mxu1 }
0x125d   : > { %v7731_v50 = vpop.f32.mrb[17].mxu1 }
0x1267   : > { %v6149_v51 = vpop.f32.mrb[18].mxu1 }
0x1268   : > { %v1965_v52 = vmul.f32 0.35355338, %v6149_v51  ;;  %v1955_v38 = vpop.f32.mrb[19].mxu1 }
0x1269   : > { %v1964_v53 = vmul.f32 0.35355338, %v1955_v38 }
0x126a   : > { %v1967_v54 = vadd.f32 %v1965_v52, %v7402_v5 }
0x126b   : > { %v1966_v55 = vadd.f32 %v1964_v53, %v7399_v4 }
0x126c   : > { %v1971_v56 = vsel %vm686_vm5, %v1967_v54, -inf }
0x126d   : > { %1972 = vmax.xlane.f32.xlu1 %v1971_v56  ;;  %v1968_v36 = vsel %vm686_vm5, %v1966_v55, -inf }
0x126e   : > { %1969 = vmax.xlane.f32.xlu0 %v1968_v36 }
0x127e   : > { %6871 = vrot.lane.b32.xlu1 %v7711_v59, %s7218_s25 }
0x1282   : > { %2077 = vrot.lane.b32.xlu1 %v7697_v40, %s7218_s25 }
0x1286   : > { %2079 = vrot.lane.b32.xlu1 %v7699_v41, %s7218_s25 }
0x12fa   : > { %v1973_v57 = vpop.xlane.xlu1 %1972 }
0x12fb   : > { %v1975_v62 = vsub.f32 %v1967_v54, %v1973_v57  ;;  %v1970_v58 = vpop.xlane.xlu0 %1969 }
0x12fc   : > { %v1974_v61 = vsub.f32 %v1966_v55, %v1970_v58 }
0x12fd   : > { %v1978_v29 = vmul.f32 1.442695, %v1975_v62 }
0x12fe   : > { %v1976_v0 = vmul.f32 1.442695, %v1974_v61  ;;  %v6872_v37 = vpop.permute.xlu1 %6871 }
0x12ff   : > { %7013 = vpow2.f32 %v1978_v29  ;;  %v6874_v39 = vunpack.i.h.bf16 %v6872_v37  ;;  %v6873_v34 = vunpack.i.l.bf16 %v6872_v37 }
0x1300   : > { %7015 = vpow2.f32 %v1976_v0 }
0x1301   : > { %v6562_v46 = vpack.c.bf16 %v6874_v39, %v6873_v34 }
0x1302   : > { %v2078_v55 = vpop.permute.xlu1 %2077 }
0x1306   : > { %v2080_v56 = vpop.permute.xlu1 %2079 }
0x1309   : > { %v7014_v32 = vpop.eup %7013 }
0x130a   : > { %v1983_v47 = vsel %vm686_vm5, %v7014_v32, 0.0  ;;  %v7016_v35 = vpop.eup %7015 }
0x130b   : > { %1984 = vadd.xlane.f32.xlu0 %v1983_v47  ;;  %v1980_v31 = vsel %vm686_vm5, %v7016_v35, 0.0 }
0x130f   : > { %1981 = vadd.xlane.f32.xlu0 %v1980_v31 }
0x1325   : > { %6866 = vrot.lane.b32.xlu0 %v7711_v59, %s7215_s13 }
0x1398   : > { %v1985_v60 = vpop.xlane.xlu0 %1984 }
0x1399   : > { %7017 = vrcp.f32 %v1985_v60 }
0x139c   : > { %v1982_v30 = vpop.xlane.xlu0 %1981 }
0x139d   : > { %7019 = vrcp.f32 %v1982_v30 }
0x13a0   : > { %v6867_v48 = vpop.permute.xlu0 %6866 }
0x13a1   : > { %v6869_v1 = vunpack.i.h.bf16 %v6867_v48  ;;  %v6868_v33 = vunpack.i.l.bf16 %v6867_v48 }
0x13a3   : > { %v6558_v51 = vpack.c.bf16 %v6869_v1, %v6868_v33  ;;  %v7018_v52 = vpop.eup %7017 }
0x13a4   : > { %v1989_v54 = vmul.f32 %v7018_v52, %v7014_v32 }
0x13a5   : > { %6559 = vmatprep.subr.bf16.mxu0 %v6558_v51 }
0x13a6   : > { %6561 = vmatpush3.bf16.msra.mxu0 %v6558_v51 }
0x13a7   : > { %v7020_v38 = vpop.eup %7019  ;;  %6564 = vmatprep.subr.msk.bf16.mxu0 %vm7564_vm4, %v6562_v46 }
0x13a8   : > { %v1987_v53 = vmul.f32 %v7020_v38, %v7016_v35 }
0x13aa   : > { %6154 = vmatprep.mubr.msk.f32.mxu0 %vm686_vm5, %v1987_v53 }
0x13ab   : > { %6155 = vmatmul.mubr.msk.f32.vlgmr.msra.gmra.mrb[10].mxu0 %vm686_vm5, %v1989_v54 }
0x13ac   : > { %6161 = vmatprep.mubr.msk.f32.mxu0 %vm598_vm3, %v2078_v55 }
0x13af   : > { %6567 = vmatpush3.bf16.xpose.msk.msra.mxu0 %vm7564_vm4, %v6562_v46 }
0x13b6   : > { %6162 = vmatmul.mubr.msk.f32.vlgmr.msra.gmra.mrb[12].mxu0 %vm598_vm3, %v2080_v56 }
0x147e   : > { %v7755_v36 = vpop.f32.mrb[10].mxu0 }
0x147f   : > { %v7757_v57 = vpop.f32.mrb[11].mxu0 }
0x1489   : > { %v6163_v62 = vpop.f32.mrb[12].mxu0 }
0x148a   : > { %v2169_v58 = vmul.f32 0.35355338, %v6163_v62  ;;  %v2159_v61 = vpop.f32.mrb[13].mxu0 }
0x148b   : > { %v2168_v29 = vmul.f32 0.35355338, %v2159_v61 }
0x148c   : > { %v2171_v0 = vadd.f32 %v2169_v58, %v7402_v5 }
0x148d   : > { %v2170_v32 = vadd.f32 %v2168_v29, %v7399_v4 }
0x148e   : > { %v2175_v47 = vsel %vm686_vm5, %v2171_v0, -inf }
0x148f   : > { %2176 = vmax.xlane.f32.xlu1 %v2175_v47  ;;  %v2172_v35 = vsel %vm686_vm5, %v2170_v32, -inf }
0x1490   : > { %2173 = vmax.xlane.f32.xlu0 %v2172_v35 }
0x14a0   : > { %6881 = vrot.lane.b32.xlu1 %v7711_v59, %s7223_s27 }
0x14a4   : > { %2281 = vrot.lane.b32.xlu1 %v7697_v40, %s7223_s27 }
0x14a8   : > { %2283 = vrot.lane.b32.xlu1 %v7699_v41, %s7223_s27 }
0x151c   : > { %v2177_v31 = vpop.xlane.xlu1 %2176 }
0x151d   : > { %v2179_v60 = vsub.f32 %v2171_v0, %v2177_v31  ;;  %v2174_v30 = vpop.xlane.xlu0 %2173 }
0x151e   : > { %v2178_v37 = vsub.f32 %v2170_v32, %v2174_v30 }
0x151f   : > { %v2182_v39 = vmul.f32 1.442695, %v2179_v60 }
0x1520   : > { %v2180_v34 = vmul.f32 1.442695, %v2178_v37  ;;  %v6882_v51 = vpop.permute.xlu1 %6881 }
0x1521   : > { %7021 = vpow2.f32 %v2182_v39  ;;  %v6884_v52 = vunpack.i.h.bf16 %v6882_v51  ;;  %v6883_v38 = vunpack.i.l.bf16 %v6882_v51 }
0x1522   : > { %7023 = vpow2.f32 %v2180_v34 }
0x1523   : > { %v6572_v56 = vpack.c.bf16 %v6884_v52, %v6883_v38 }
0x1524   : > { %v2282_v32 = vpop.permute.xlu1 %2281 }
0x1528   : > { %v2284_v47 = vpop.permute.xlu1 %2283 }
0x152b   : > { %v7022_v48 = vpop.eup %7021 }
0x152c   : > { %v2187_v1 = vsel %vm686_vm5, %v7022_v48, 0.0  ;;  %v7024_v33 = vpop.eup %7023 }
0x152d   : > { %2188 = vadd.xlane.f32.xlu0 %v2187_v1  ;;  %v2184_v46 = vsel %vm686_vm5, %v7024_v33, 0.0 }
0x1531   : > { %2185 = vadd.xlane.f32.xlu0 %v2184_v46 }
0x1547   : > { %6876 = vrot.lane.b32.xlu0 %v7711_v59, %s7217_s21 }
0x15ba   : > { %v2189_v40 = vpop.xlane.xlu0 %2188 }
0x15bb   : > { %7025 = vrcp.f32 %v2189_v40 }
0x15be   : > { %v2186_v41 = vpop.xlane.xlu0 %2185 }
0x15bf   : > { %7027 = vrcp.f32 %v2186_v41 }
0x15c2   : > { %v6877_v53 = vpop.permute.xlu0 %6876 }
0x15c3   : > { %v6879_v54 = vunpack.i.h.bf16 %v6877_v53  ;;  %v6878_v55 = vunpack.i.l.bf16 %v6877_v53 }
0x15c5   : > { %v6568_v62 = vpack.c.bf16 %v6879_v54, %v6878_v55  ;;  %v7026_v58 = vpop.eup %7025 }
0x15c6   : > { %v2193_v0 = vmul.f32 %v7026_v58, %v7022_v48 }
0x15c7   : > { %6569 = vmatprep.subr.bf16.mxu1 %v6568_v62 }
0x15c8   : > { %6571 = vmatpush3.bf16.msra.mxu1 %v6568_v62 }
0x15c9   : > { %v7028_v61 = vpop.eup %7027  ;;  %6574 = vmatprep.subr.msk.bf16.mxu1 %vm7564_vm4, %v6572_v56 }
0x15ca   : > { %v2191_v29 = vmul.f32 %v7028_v61, %v7024_v33 }
0x15cc   : > { %6168 = vmatprep.mubr.msk.f32.mxu1 %vm686_vm5, %v2191_v29 }
0x15cd   : > { %6169 = vmatmul.mubr.msk.f32.vlgmr.msra.gmra.mrb[20].mxu1 %vm686_vm5, %v2193_v0 }
0x15ce   : > { %6175 = vmatprep.mubr.msk.f32.mxu1 %vm598_vm3, %v2282_v32 }
0x15d1   : > { %6577 = vmatpush3.bf16.xpose.msk.msra.mxu1 %vm7564_vm4, %v6572_v56 }
0x15d8   : > { %6176 = vmatmul.mubr.msk.f32.vlgmr.msra.gmra.mrb[22].mxu1 %vm598_vm3, %v2284_v47 }
0x16a0   : > { %v6170_v35 = vpop.f32.mrb[20].mxu1 }
0x16a1   : > { %v2272_v31 = vpop.f32.mrb[21].mxu1 }
0x16ab   : > { %v6177_v60 = vpop.f32.mrb[22].mxu1 }
0x16ac   : > { %v2373_v30 = vmul.f32 0.35355338, %v6177_v60  ;;  %v2363_v37 = vpop.f32.mrb[23].mxu1  ;;  %v2517_v60 = vld [vmem:[%s8237_s16 + $0x10] sm:$0xff] }
0x16ad   : > { %v2372_v39 = vmul.f32 0.35355338, %v2363_v37  ;;  %v2518_v37 = vld [vmem:[%s8237_s16 + $0x18] sm:$0xff] }
0x16ae   : > { %v2375_v34 = vadd.f32 %v2373_v30, %v7402_v5 }
0x16af   : > { %v2374_v48 = vadd.f32 %v2372_v39, %v7399_v4  ;;  %v6586_v39 = vpack.c.bf16 %v2518_v37, %v2517_v60 }
0x16b0   : > { %v2379_v1 = vsel %vm686_vm5, %v2375_v34, -inf }
0x16b1   : > { %2380 = vmax.xlane.f32.xlu1 %v2379_v1  ;;  %v2376_v33 = vsel %vm686_vm5, %v2374_v48, -inf }
0x16b2   : > { %2377 = vmax.xlane.f32.xlu0 %v2376_v33 }
0x16c2   : > { %2487 = vrot.lane.b32.xlu1 %v7757_v57, %s7225_s26 }
0x16c6   : > { %2489 = vrot.lane.b32.xlu1 %v7755_v36, %s7225_s26 }
0x16ca   : > { %2495 = vrot.lane.b32.xlu1 %v2272_v31, %s8215_s1  ;;  %v2516_v31 = vld [vmem:[%s8237_s16 + $0x8] sm:$0xff] }
0x173e   : > { %v2381_v46 = vpop.xlane.xlu1 %2380 }
0x173f   : > { %v2383_v40 = vsub.f32 %v2375_v34, %v2381_v46  ;;  %v2378_v41 = vpop.xlane.xlu0 %2377 }
0x1740   : > { %v2382_v51 = vsub.f32 %v2374_v48, %v2378_v41 }
0x1741   : > { %v2386_v52 = vmul.f32 1.442695, %v2383_v40 }
0x1742   : > { %v2384_v38 = vmul.f32 1.442695, %v2382_v51  ;;  %v2488_v1 = vpop.permute.xlu1 %2487 }
0x1743   : > { %7029 = vpow2.f32 %v2386_v52  ;;  %v2509_v41 = vsel %vm598_vm3, %v7731_v50, %v2488_v1 }
0x1744   : > { %7031 = vpow2.f32 %v2384_v38 }
0x1746   : > { %v2490_v33 = vpop.permute.xlu1 %2489 }
0x1747   : > { %v2510_v52 = vsel %vm598_vm3, %v7729_v49, %v2490_v33  ;;  %v2658_v33 = vld [vmem:[%s8239_s0 + $0x18] sm:$0xff] }
0x174a   : > { %v2496_v40 = vpop.permute.xlu1 %2495 }
0x174b   : > { %v2511_v38 = vsel %vm686_vm5, %v2509_v41, %v2496_v40 }
0x174d   : > { %v7030_v53 = vpop.eup %7029 }
0x174e   : > { %v2391_v54 = vsel %vm686_vm5, %v7030_v53, 0.0  ;;  %v7032_v55 = vpop.eup %7031 }
0x174f   : > { %2392 = vadd.xlane.f32.xlu0 %v2391_v54  ;;  %v2388_v57 = vsel %vm686_vm5, %v7032_v55, 0.0 }
0x1753   : > { %2389 = vadd.xlane.f32.xlu0 %v2388_v57 }
0x1769   : > { %6886 = vrot.lane.b32.xlu0 %v7711_v59, %s7222_s12 }
0x176d   : > { %2497 = vrot.lane.b32.xlu0 %v6170_v35, %s8215_s1  ;;  %v2515_v35 = vld [vmem:[%s8237_s16] sm:$0xff]  ;;  %s8244_s1 = sld [smem:[#allocation21_spill]] }
0x176e   : > { %v6582_v30 = vpack.c.bf16 %v2516_v31, %v2515_v35 }
0x17dc   : > { %v2393_v36 = vpop.xlane.xlu0 %2392 }
0x17dd   : > { %7033 = vrcp.f32 %v2393_v36 }
0x17e0   : > { %v2390_v56 = vpop.xlane.xlu0 %2389 }
0x17e1   : > { %7035 = vrcp.f32 %v2390_v56  ;;  %v5608_v56 = vld [vmem:[%s8238_s18] ss:$0 sm:$0xff] }
0x17e4   : > { %v6887_v62 = vpop.permute.xlu0 %6886 }
0x17e5   : > { %v6889_v58 = vunpack.i.h.bf16 %v6887_v62  ;;  %v6888_v61 = vunpack.i.l.bf16 %v6887_v62 }
0x17e7   : > { %v6578_v29 = vpack.c.bf16 %v6889_v58, %v6888_v61  ;;  %v7034_v0 = vpop.eup %7033 }
0x17e8   : > { %v2397_v59 = vmul.f32 %v7034_v0, %v7030_v53  ;;  %v2498_v46 = vpop.permute.xlu0 %2497 }
0x17e9   : > { %6579 = vmatprep.subr.bf16.mxu0 %v6578_v29  ;;  %v2512_v54 = vsel %vm686_vm5, %v2510_v52, %v2498_v46 }
0x17ea   : > { %6581 = vmatpush3.bf16.msra.mxu0 %v6578_v29 }
0x17eb   : > { %v7036_v32 = vpop.eup %7035  ;;  %6583 = vmatprep.subr.bf16.mxu0 %v6582_v30 }
0x17ec   : > { %v2395_v47 = vmul.f32 %v7036_v32, %v7032_v55 }
0x17ee   : > { %6182 = vmatprep.mubr.msk.f32.mxu0 %vm686_vm5, %v2395_v47 }
0x17ef   : > { %6183 = vmatmul.mubr.msk.f32.vlgmr.msra.gmra.mrb[14].mxu0 %vm686_vm5, %v2397_v59 }
0x17f0   : > { %6585 = vmatpush3.bf16.msra.mxu0 %v6582_v30 }
0x17f1   : > { %6587 = vmatprep.subr.bf16.mxu0 %v6586_v39 }
0x17f4   : > { %6589 = vmatpush3.bf16.msra.mxu0 %v6586_v39  ;;  %v2655_v39 = vld [vmem:[%s8239_s0] sm:$0xff] }
0x18c2   : > { %v6184_v34 = vpop.f32.mrb[14].mxu0 }
0x18c3   : > { %2505 = vrot.lane.b32.xlu0 %v6184_v34, %s8212_s28  ;;  %v2476_v48 = vpop.f32.mrb[15].mxu0  ;;  %v2656_v34 = vld [vmem:[%s8239_s0 + $0x8] sm:$0xff] }
0x18c4   : > { %2503 = vrot.lane.b32.xlu1 %v2476_v48, %s8212_s28  ;;  %v2657_v48 = vld [vmem:[%s8239_s0 + $0x10] sm:$0xff]  ;;  %v6590_v1 = vpack.c.bf16 %v2656_v34, %v2655_v39  ;;  %s8242_s28 = sld [smem:[#allocation20_spill]] }
0x18c5   : > { %v6594_v46 = vpack.c.bf16 %v2658_v33, %v2657_v48  ;;  %v5611_v48 = vld [vmem:[%s8243_s4] ss:$0 sm:$0xff] }
0x18c6   : > { %6591 = vmatprep.subr.bf16.mxu1 %v6590_v1 }
0x18c7   : > { %6593 = vmatpush3.bf16.msra.mxu1 %v6590_v1 }
0x18c8   : > { %6595 = vmatprep.subr.bf16.mxu1 %v6594_v46 }
0x18ca   : > { %v2772_v39 = vld [vmem:[%s8242_s28 + $0x38] sm:$0xff] }
0x18cb   : > { %6597 = vmatpush3.bf16.msra.mxu1 %v6594_v46 }
0x1935   : > { %v2506_v51 = vpop.permute.xlu0 %2505 }
0x1936   : > { %v2504_v53 = vpop.permute.xlu1 %2503  ;;  %v2514_v57 = vsel %vm1436_vm6, %v2512_v54, %v2506_v51 }
0x1937   : > { %v2513_v55 = vsel %vm1436_vm6, %v2511_v38, %v2504_v53 }
0x1938   : > { %6193 = vmatprep.mubr.msk.f32.mxu0 %vm163_vm0, %v2513_v55  ;;  %v5609_v55 = vld [vmem:[%s8240_s23] ss:$0 sm:$0xff] }
0x1939   : > { %6194 = vmatmul.mubr.msk.f32.vlgmr.msra.gmra.mrb[16].mxu0 %vm163_vm0, %v2514_v57 }
0x1a0c   : > { %v6195_v36 = vpop.f32.mrb[16].mxu0 }
0x1a0d   : > { %v2601_v50 = vadd.f32 %v6195_v36, %v7672_v63  ;;  %v2591_v62 = vpop.f32.mrb[17].mxu0  ;;  %v5610_v36 = vld [vmem:[%s8241_s22] ss:$0 sm:$0xff] }
0x1a0e   : > { %v2600_v49 = vadd.f32 %v2591_v62, %v7674_v28 }
0x1a0f   : > { %v7816_v58 = vadd.f32 %v5608_v56, %v2601_v50 }
0x1a10   : > { %v7818_v61 = vadd.f32 %v5608_v56, %v2600_v49 }
0x1a11   : > { %v2616_v29 = vsel %vm163_vm0, %v7816_v58, 0.0 }
0x1a12   : > { %2617 = vadd.xlane.f32.xlu0 %v2616_v29  ;;  %v2613_v0 = vsel %vm163_vm0, %v7818_v61, 0.0 }
0x1a13   : > { %2614 = vadd.xlane.f32.xlu1 %v2613_v0 }
0x1a9f   : > { %v2618_v32 = vpop.xlane.xlu0 %2617 }
0x1aa0   : > { %v2620_v63 = vmul.f32 0.03125, %v2618_v32  ;;  %v2615_v47 = vpop.xlane.xlu1 %2614  ;;  %v2765_v32 = vld [vmem:[%s8242_s28] sm:$0xff] }
0x1aa1   : > { %v2619_v28 = vmul.f32 0.03125, %v2615_v47  ;;  %v2767_v47 = vld [vmem:[%s8242_s28 + $0x10] sm:$0xff] }
0x1aa2   : > { %v2622_v59 = vsub.f32 %v7816_v58, %v2620_v63  ;;  %v2766_v63 = vld [vmem:[%s8242_s28 + $0x8] sm:$0xff] }
0x1aa3   : > { %v2621_v35 = vsub.f32 %v7818_v61, %v2619_v28  ;;  %v6598_v28 = vpack.c.bf16 %v2766_v63, %v2765_v32 }
0x1aa4   : > { %v2624_v30 = vmul.f32 %v2622_v59, %v2622_v59 }
0x1aa5   : > { %v2623_v31 = vmul.f32 %v2621_v35, %v2621_v35  ;;  %6599 = vmatprep.subr.bf16.mxu0 %v6598_v28 }
0x1aa6   : > { %v2628_v37 = vsel %vm163_vm0, %v2624_v30, 0.0  ;;  %v2770_v30 = vld [vmem:[%s8242_s28 + $0x28] sm:$0xff]  ;;  %6601 = vmatpush3.bf16.msra.mxu0 %v6598_v28 }
0x1aa7   : > { %v2625_v60 = vsel %vm163_vm0, %v2623_v31, 0.0 }
0x1aa8   : > { %2626 = vadd.xlane.f32.xlu0 %v2625_v60  ;;  %v2769_v60 = vld [vmem:[%s8242_s28 + $0x20] sm:$0xff] }
0x1aac   : > { %2629 = vadd.xlane.f32.xlu0 %v2628_v37  ;;  %v2771_v37 = vld [vmem:[%s8242_s28 + $0x30] sm:$0xff] }
0x1aad   : > { %v6610_v34 = vpack.c.bf16 %v2772_v39, %v2771_v37 }
0x1b35   : > { %v2627_v40 = vpop.xlane.xlu0 %2626 }
0x1b36   : > { %v2631_v41 = vmul.f32 0.03125, %v2627_v40 }
0x1b38   : > { %v2633_v51 = vadd.f32 1e-05, %v2631_v41 }
0x1b39   : > { %v2630_v52 = vpop.xlane.xlu0 %2629 }
0x1b3a   : > { %7037 = vrsqrt.f32 %v2633_v51  ;;  %v2632_v38 = vmul.f32 0.03125, %v2630_v52 }
0x1b3c   : > { %v2634_v53 = vadd.f32 1e-05, %v2632_v38 }
0x1b3e   : > { %7039 = vrsqrt.f32 %v2634_v53 }
0x1b44   : > { %v7038_v54 = vpop.eup %7037 }
0x1b45   : > { %v2637_v57 = vmul.f32 %v7038_v54, %v2621_v35  ;;  %v2768_v35 = vld [vmem:[%s8242_s28 + $0x18] sm:$0xff] }
0x1b46   : > { %v6602_v31 = vpack.c.bf16 %v2768_v35, %v2767_v47  ;;  %v5616_v35 = vld [vmem:[%s8244_s1] ss:$0 sm:$0xff] }
0x1b47   : > { %v2645_v56 = vmul.f32 %v5609_v55, %v2637_v57 }
0x1b48   : > { %v7040_v50 = vpop.eup %7039  ;;  %6603 = vmatprep.subr.bf16.mxu0 %v6602_v31 }
0x1b49   : > { %v2638_v62 = vmul.f32 %v7040_v50, %v2622_v59  ;;  %v2653_v49 = vadd.f32 %v5610_v36, %v2645_v56  ;;  %v6606_v59 = vpack.c.bf16 %v2770_v30, %v2769_v60  ;;  %6605 = vmatpush3.bf16.msra.mxu0 %v6602_v31 }
0x1b4b   : > { %v2646_v29 = vmul.f32 %v5609_v55, %v2638_v62  ;;  %6204 = vmatprep.mubr.msk.f32.mxu1 %vm163_vm0, %v2653_v49  ;;  %6607 = vmatprep.subr.bf16.mxu0 %v6606_v59 }
0x1b4d   : > { %v2654_v0 = vadd.f32 %v5610_v36, %v2646_v29  ;;  %6609 = vmatpush3.bf16.msra.mxu0 %v6606_v59 }
0x1b4e   : > { %6611 = vmatprep.subr.bf16.mxu0 %v6610_v34 }
0x1b4f   : > { %6205 = vmatmul.mubr.msk.f32.vlgmr.msra.gmra.mrb[24].mxu1 %vm163_vm0, %v2654_v0 }
0x1b51   : > { %6613 = vmatpush3.bf16.msra.mxu0 %v6610_v34 }
0x1c22   : > { %v6206_v1 = vpop.f32.mrb[24].mxu1 }
0x1c23   : > { %v2744_v33 = vadd.f32 %v6206_v1, %v5611_v48  ;;  %v2738_v46 = vpop.f32.mrb[25].mxu1 }
0x1c24   : > { %v2739_v40 = vadd.f32 %v5611_v48, %v2738_v46 }
0x1c25   : > { %v2748_v41 = vmul.f32 %v2744_v33, %v2744_v33 }
0x1c26   : > { %v2747_v51 = vmul.f32 %v2739_v40, %v2739_v40 }
0x1c27   : > { %v2750_v52 = vmul.f32 %v2748_v41, %v2744_v33 }
0x1c28   : > { %v2749_v38 = vmul.f32 %v2747_v51, %v2739_v40 }
0x1c29   : > { %v2752_v53 = vmul.f32 0.044715, %v2750_v52 }
0x1c2a   : > { %v2751_v54 = vmul.f32 0.044715, %v2749_v38  ;;  %v5621_v38 = vld [vmem:[%s7284_s14 + $0x20] sm:$0xff] }
0x1c2b   : > { %v2754_v55 = vadd.f32 %v2752_v53, %v2744_v33  ;;  %v5622_v53 = vld [vmem:[%s7284_s14 + $0x28] sm:$0xff] }
0x1c2c   : > { %v2753_v57 = vadd.f32 %v2751_v54, %v2739_v40  ;;  %v5623_v54 = vld [vmem:[%s7284_s14 + $0x30] sm:$0xff] }
0x1c2d   : > { %v2756_v36 = vmul.f32 0.7978846, %v2754_v55  ;;  %v6614_v55 = vpack.c.bf16 %v5622_v53, %v5621_v38 }
0x1c2e   : > { %v2755_v56 = vmul.f32 0.7978846, %v2753_v57  ;;  %v5624_v57 = vld [vmem:[%s7284_s14 + $0x38] sm:$0xff] }
0x1c2f   : > { %7041 = vtanh.f32 %v2756_v36  ;;  %v6618_v36 = vpack.c.bf16 %v5624_v57, %v5623_v54  ;;  %6615 = vmatprep.subr.bf16.mxu1 %v6614_v55 }
0x1c30   : > { %7043 = vtanh.f32 %v2755_v56  ;;  %6617 = vmatpush3.bf16.msra.mxu1 %v6614_v55 }
0x1c31   : > { %6619 = vmatprep.subr.bf16.mxu1 %v6618_v36 }
0x1c34   : > { %6621 = vmatpush3.bf16.msra.mxu1 %v6618_v36 }
0x1c39   : > { %v7042_v50 = vpop.eup %7041 }
0x1c3a   : > { %v7044_v62 = vpop.eup %7043  ;;  %v2760_v49 = vadd.f32 1.0, %v7042_v50 }
0x1c3b   : > { %v2759_v29 = vadd.f32 1.0, %v7044_v62 }
0x1c3c   : > { %v2762_v0 = vmul.f32 0.5, %v2760_v49 }
0x1c3d   : > { %v2761_v32 = vmul.f32 0.5, %v2759_v29 }
0x1c3e   : > { %v2764_v47 = vmul.f32 %v2762_v0, %v2744_v33 }
0x1c3f   : > { %v2763_v63 = vmul.f32 %v2761_v32, %v2739_v40 }
0x1c41   : > { %6223 = vmatprep.mubr.msk.f32.mxu0 %vm245_vm2, %v2763_v63  ;;  %v5619_v63 = vld [vmem:[%s7274_s3 + $0x1] ss:$0 sm:$0xff] }
0x1c42   : > { %6224 = vmatmul.mubr.msk.f32.vlgmr.msra.gmra.mrb[18].mxu0 %vm245_vm2, %v2764_v47 }
0x1d15   : > { %v6225_v28 = vpop.f32.mrb[18].mxu0 }
0x1d16   : > { %v2855_v31 = vadd.f32 %v6225_v28, %v7816_v58  ;;  %v2845_v60 = vpop.f32.mrb[19].mxu0 }
0x1d17   : > { %v2854_v30 = vadd.f32 %v2845_v60, %v7818_v61 }
0x1d18   : > { %v7850_v59 = vadd.f32 %v5616_v35, %v2855_v31  ;;  %v5620_v31 = vld [vmem:[%s7279_s8 + $0x1] ss:$0 sm:$0xff] }
0x1d19   : > { %v7852_v37 = vadd.f32 %v5616_v35, %v2854_v30 }
0x1d1a   : > { %v2872_v39 = vsel %vm163_vm0, %v7850_v59, 0.0 }
0x1d1b   : > { %2873 = vadd.xlane.f32.xlu0 %v2872_v39  ;;  %v2869_v34 = vsel %vm163_vm0, %v7852_v37, 0.0 }
0x1d1c   : > { %2870 = vadd.xlane.f32.xlu1 %v2869_v34 }
0x1da8   : > { %v2874_v48 = vpop.xlane.xlu0 %2873 }
0x1da9   : > { %v2876_v58 = vmul.f32 0.03125, %v2874_v48  ;;  %v2871_v1 = vpop.xlane.xlu1 %2870  ;;  %v5626_v48 = vld [vmem:[%s7289_s19 + $0x1] ss:$0 sm:$0xff] }
0x1daa   : > { %v2875_v61 = vmul.f32 0.03125, %v2871_v1 }
0x1dab   : > { %v2878_v33 = vsub.f32 %v7850_v59, %v2876_v58 }
0x1dac   : > { %v2877_v46 = vsub.f32 %v7852_v37, %v2875_v61 }
0x1dad   : > { %v2880_v40 = vmul.f32 %v2878_v33, %v2878_v33 }
0x1dae   : > { %v2879_v41 = vmul.f32 %v2877_v46, %v2877_v46 }
0x1daf   : > { %v2884_v51 = vsel %vm163_vm0, %v2880_v40, 0.0 }
0x1db0   : > { %2885 = vadd.xlane.f32.xlu0 %v2884_v51  ;;  %v2881_v52 = vsel %vm163_vm0, %v2879_v41, 0.0 }
0x1db1   : > { %2882 = vadd.xlane.f32.xlu1 %v2881_v52 }
0x1e3d   : > { %v2886_v56 = vpop.xlane.xlu0 %2885 }
0x1e3e   : > { %v2888_v50 = vmul.f32 0.03125, %v2886_v56  ;;  %v2883_v62 = vpop.xlane.xlu1 %2882 }
0x1e3f   : > { %v2887_v49 = vmul.f32 0.03125, %v2883_v62 }
0x1e40   : > { %v2890_v29 = vadd.f32 1e-05, %v2888_v50 }
0x1e41   : > { %v2889_v0 = vadd.f32 1e-05, %v2887_v49 }
0x1e42   : > { %7045 = vrsqrt.f32 %v2890_v29 }
0x1e43   : > { %7047 = vrsqrt.f32 %v2889_v0 }
0x1e4c   : > { %v7046_v32 = vpop.eup %7045 }
0x1e4d   : > { %v7048_v47 = vpop.eup %7047  ;;  %v2894_v28 = vmul.f32 %v7046_v32, %v2878_v33 }
0x1e4e   : > { %v2893_v35 = vmul.f32 %v7048_v47, %v2877_v46 }
0x1e4f   : > { %v2902_v60 = vmul.f32 %v5619_v63, %v2894_v28 }
0x1e50   : > { %v2901_v30 = vmul.f32 %v5619_v63, %v2893_v35 }
0x1e51   : > { %v2910_v34 = vadd.f32 %v5620_v31, %v2902_v60 }
0x1e52   : > { %v2909_v39 = vadd.f32 %v5620_v31, %v2901_v30 }
0x1e54   : > { %6234 = vmatprep.mubr.msk.f32.mxu1 %vm163_vm0, %v2909_v39 }
0x1e55   : > { %6235 = vmatmul.mubr.msk.f32.vlgmr.msra.gmra.mrb[26].mxu1 %vm163_vm0, %v2910_v34 }
0x1f28   : > { %v6236_v58 = vpop.f32.mrb[26].mxu1 }
0x1f29   : > { %v7871_v1 = vadd.f32 %v6236_v58, %v5626_v48  ;;  %v2996_v61 = vpop.f32.mrb[27].mxu1 }
0x1f2a   : > { %v7873_v40 = vadd.f32 %v5626_v48, %v2996_v61 }
0x1f2c   : > { %6241 = vmatprep.mubr.msk.f32.mxu1 %vm598_vm3, %v7873_v40  ;;  %v7879_v33 = vpack.i.bf16 %v7871_v1, %v7873_v40 }
0x1f2e   : > { %6896 = vrot.lane.b32.xlu0 %v7879_v33, %s7215_s13  ;;  %6891 = vrot.lane.b32.xlu1 %v7879_v33, %s7214_s9 }
0x1f32   : > { %3207 = vrot.lane.b32.xlu1 %v7873_v40, %s7216_s17 }
0x1f36   : > { %3209 = vrot.lane.b32.xlu1 %v7871_v1, %s7216_s17 }
0x1fa0   : > { %v6897_v46 = vpop.permute.xlu0 %6896  ;;  %v6892_v41 = vpop.permute.xlu1 %6891 }
0x1fa1   : > { %v6899_v51 = vunpack.i.h.bf16 %v6897_v46  ;;  %v6898_v52 = vunpack.i.l.bf16 %v6897_v46  ;;  %v6894_v38 = vunpack.i.h.bf16 %v6892_v41  ;;  %v6893_v53 = vunpack.i.l.bf16 %v6892_v41 }
0x1fa3   : > { %v6622_v54 = vpack.c.bf16 %v6894_v38, %v6893_v53  ;;  %v6632_v55 = vpack.c.bf16 %v6899_v51, %v6898_v52 }
0x1fa4   : > { %v3208_v57 = vpop.permute.xlu1 %3207 }
0x1fa5   : > { %6624 = vmatprep.subr.msk.bf16.mxu1 %vm7564_vm4, %v6622_v54 }
0x1fa6   : > { %6627 = vmatpush3.bf16.xpose.msk.msra.mxu1 %vm7564_vm4, %v6622_v54 }
0x1fa7   : > { %6634 = vmatprep.subr.msk.bf16.mxu1 %vm7564_vm4, %v6632_v55 }
0x1fa8   : > { %v3210_v36 = vpop.permute.xlu1 %3209 }
0x1fad   : > { %6242 = vmatmul.mubr.msk.f32.vlgmr.msra.gmra.mrb[28].mxu1 %vm598_vm3, %v7871_v1 }
0x1fae   : > { %6637 = vmatpush3.bf16.xpose.msk.msra.mxu1 %vm7564_vm4, %v6632_v55  ;;  %6255 = vmatprep.mubr.msk.f32.mxu1 %vm598_vm3, %v3208_v57 }
0x1fb5   : > { %6256 = vmatmul.mubr.msk.f32.vlgmr.msra.gmra.mrb[30].mxu1 %vm598_vm3, %v3210_v36 }
0x2080   : > { %v6243_v56 = vpop.f32.mrb[28].mxu1 }
0x2081   : > { %v3095_v50 = vmul.f32 0.35355338, %v6243_v56  ;;  %v3085_v62 = vpop.f32.mrb[29].mxu1 }
0x2082   : > { %v3094_v49 = vmul.f32 0.35355338, %v3085_v62 }
0x2083   : > { %v3097_v29 = vadd.f32 %v3095_v50, %v7396_v3 }
0x2084   : > { %v3096_v0 = vadd.f32 %v3094_v49, %v7391_v2 }
0x2085   : > { %v3101_v32 = vsel %vm686_vm5, %v3097_v29, -inf }
0x2086   : > { %3102 = vmax.xlane.f32.xlu0 %v3101_v32  ;;  %v3098_v63 = vsel %vm686_vm5, %v3096_v0, -inf }
0x2087   : > { %3099 = vmax.xlane.f32.xlu1 %v3098_v63 }
0x2088   : > { %v6257_v47 = vpop.f32.mrb[30].mxu1 }
0x2089   : > { %v3289_v28 = vpop.f32.mrb[31].mxu1  ;;  %v3299_v35 = vmul.f32 0.35355338, %v6257_v47 }
0x208a   : > { %v3298_v31 = vmul.f32 0.35355338, %v3289_v28 }
0x208b   : > { %v3301_v30 = vadd.f32 %v3299_v35, %v7396_v3 }
0x208c   : > { %v3300_v60 = vadd.f32 %v3298_v31, %v7391_v2 }
0x208d   : > { %v3305_v34 = vsel %vm686_vm5, %v3301_v30, -inf }
0x208e   : > { %v3302_v39 = vsel %vm686_vm5, %v3300_v60, -inf }
0x208f   : > { %3303 = vmax.xlane.f32.xlu0 %v3302_v39 }
0x2093   : > { %3306 = vmax.xlane.f32.xlu0 %v3305_v34 }
0x2098   : > { %6901 = vrot.lane.b32.xlu1 %v7879_v33, %s7219_s29  ;;  %s8245_s29 = smov 16  }
0x2113   : > { %v3103_v48 = vpop.xlane.xlu0 %3102 }
0x2114   : > { %v3105_v58 = vsub.f32 %v3097_v29, %v3103_v48  ;;  %v3100_v61 = vpop.xlane.xlu1 %3099 }
0x2115   : > { %v3104_v46 = vsub.f32 %v3096_v0, %v3100_v61 }
0x2116   : > { %v3108_v41 = vmul.f32 1.442695, %v3105_v58 }
0x2117   : > { %v3106_v51 = vmul.f32 1.442695, %v3104_v46 }
0x2118   : > { %7049 = vpow2.f32 %v3108_v41  ;;  %v6902_v52 = vpop.permute.xlu1 %6901 }
0x2119   : > { %7051 = vpow2.f32 %v3106_v51  ;;  %v6904_v38 = vunpack.i.h.bf16 %v6902_v52  ;;  %v6903_v53 = vunpack.i.l.bf16 %v6902_v52 }
0x211b   : > { %v6628_v54 = vpack.c.bf16 %v6904_v38, %v6903_v53 }
0x211c   : > { %v3304_v55 = vpop.xlane.xlu0 %3303 }
0x211d   : > { %6629 = vmatprep.subr.bf16.mxu0 %v6628_v54  ;;  %v3308_v63 = vsub.f32 %v3300_v60, %v3304_v55 }
0x211e   : > { %6631 = vmatpush3.bf16.msra.mxu0 %v6628_v54 }
0x211f   : > { %v3310_v47 = vmul.f32 1.442695, %v3308_v63 }
0x2120   : > { %v3307_v57 = vpop.xlane.xlu0 %3306 }
0x2121   : > { %v3309_v36 = vsub.f32 %v3301_v30, %v3307_v57 }
0x2122   : > { %v7050_v56 = vpop.eup %7049 }
0x2123   : > { %v7052_v50 = vpop.eup %7051  ;;  %v3312_v62 = vmul.f32 1.442695, %v3309_v36  ;;  %v3113_v49 = vsel %vm686_vm5, %v7050_v56, 0.0 }
0x2124   : > { %3114 = vadd.xlane.f32.xlu0 %v3113_v49  ;;  %v3110_v29 = vsel %vm686_vm5, %v7052_v50, 0.0 }
0x2125   : > { %7053 = vpow2.f32 %v3312_v62  ;;  %3111 = vadd.xlane.f32.xlu1 %v3110_v29 }
0x2126   : > { %7055 = vpow2.f32 %v3310_v47 }
0x212f   : > { %v7054_v0 = vpop.eup %7053 }
0x2130   : > { %v3317_v32 = vsel %vm686_vm5, %v7054_v0, 0.0  ;;  %v7056_v28 = vpop.eup %7055 }
0x2131   : > { %3318 = vadd.xlane.f32.xlu0 %v3317_v32  ;;  %v3314_v35 = vsel %vm686_vm5, %v7056_v28, 0.0 }
0x2136   : > { %6911 = vrot.lane.b32.xlu1 %v7879_v33, %s7217_s21 }
0x213a   : > { %3411 = vrot.lane.b32.xlu1 %v7873_v40, %s7218_s25 }
0x2147   : > { %6906 = vrot.lane.b32.xlu0 %v7879_v33, %s7221_s6  ;;  %s8247_s6 = smov 24  }
0x215e   : > { %3315 = vadd.xlane.f32.xlu1 %v3314_v35 }
0x216f   : > { %3413 = vrot.lane.b32.xlu1 %v7871_v1, %s7218_s25 }
0x21b1   : > { %v3115_v31 = vpop.xlane.xlu0 %3114 }
0x21b2   : > { %7057 = vrcp.f32 %v3115_v31  ;;  %v3112_v30 = vpop.xlane.xlu1 %3111 }
0x21b3   : > { %7059 = vrcp.f32 %v3112_v30 }
0x21b6   : > { %v6912_v46 = vpop.permute.xlu1 %6911 }
0x21b7   : > { %v6914_v41 = vunpack.i.h.bf16 %v6912_v46  ;;  %v6913_v51 = vunpack.i.l.bf16 %v6912_v46 }
0x21b9   : > { %v6642_v54 = vpack.c.bf16 %v6914_v41, %v6913_v51 }
0x21ba   : > { %v3412_v55 = vpop.permute.xlu1 %3411 }
0x21bc   : > { %v7058_v39 = vpop.eup %7057 }
0x21bd   : > { %v7060_v34 = vpop.eup %7059  ;;  %v3119_v61 = vmul.f32 %v7058_v39, %v7050_v56 }
0x21be   : > { %v3319_v48 = vpop.xlane.xlu0 %3318  ;;  %v3117_v58 = vmul.f32 %v7060_v34, %v7052_v50 }
0x21bf   : > { %7061 = vrcp.f32 %v3319_v48 }
0x21c0   : > { %6248 = vmatprep.mubr.msk.f32.mxu0 %vm686_vm5, %v3117_v58 }
0x21c1   : > { %6249 = vmatmul.mubr.msk.f32.vlgmr.msra.gmra.mrb[20].mxu0 %vm686_vm5, %v3119_v61 }
0x21c2   : > { %v6907_v60 = vpop.permute.xlu0 %6906 }
0x21c3   : > { %v6909_v52 = vunpack.i.h.bf16 %v6907_v60  ;;  %v6908_v38 = vunpack.i.l.bf16 %v6907_v60 }
0x21c5   : > { %v6638_v53 = vpack.c.bf16 %v6909_v52, %v6908_v38 }
0x21c7   : > { %6639 = vmatprep.subr.bf16.mxu0 %v6638_v53 }
0x21c8   : > { %6641 = vmatpush3.bf16.msra.mxu0 %v6638_v53 }
0x21c9   : > { %6644 = vmatprep.subr.msk.bf16.mxu0 %vm7564_vm4, %v6642_v54  ;;  %v7062_v36 = vpop.eup %7061 }
0x21ca   : > { %v3323_v62 = vmul.f32 %v7062_v36, %v7054_v0 }
0x21eb   : > { %v3316_v57 = vpop.xlane.xlu1 %3315 }
0x21ec   : > { %7063 = vrcp.f32 %v3316_v57 }
0x21ef   : > { %v3414_v49 = vpop.permute.xlu1 %3413 }
0x21f6   : > { %v7064_v56 = vpop.eup %7063 }
0x21f7   : > { %v3321_v50 = vmul.f32 %v7064_v56, %v7056_v28 }
0x21f9   : > { %6262 = vmatprep.mubr.msk.f32.mxu0 %vm686_vm5, %v3321_v50 }
0x21fa   : > { %6263 = vmatmul.mubr.msk.f32.vlgmr.msra.gmra.mrb[22].mxu0 %vm686_vm5, %v3323_v62 }
0x21fb   : > { %6647 = vmatpush3.bf16.xpose.msk.msra.mxu0 %vm7564_vm4, %v6642_v54  ;;  %6269 = vmatprep.mubr.msk.f32.mxu0 %vm598_vm3, %v3412_v55 }
0x2202   : > { %6270 = vmatmul.mubr.msk.f32.vlgmr.msra.gmra.mrb[24].mxu0 %vm598_vm3, %v3414_v49 }
0x2294   : > { %v7933_v29 = vpop.f32.mrb[20].mxu0 }
0x2295   : > { %v7935_v32 = vpop.f32.mrb[21].mxu0 }
0x22cd   : > { %v7937_v63 = vpop.f32.mrb[22].mxu0 }
0x22ce   : > { %v7939_v47 = vpop.f32.mrb[23].mxu0 }
0x22d5   : > { %v6271_v0 = vpop.f32.mrb[24].mxu0 }
0x22d6   : > { %v3503_v28 = vmul.f32 0.35355338, %v6271_v0  ;;  %v3493_v35 = vpop.f32.mrb[25].mxu0 }
0x22d7   : > { %v3502_v31 = vmul.f32 0.35355338, %v3493_v35 }
0x22d8   : > { %v3505_v30 = vadd.f32 %v3503_v28, %v7396_v3 }
0x22d9   : > { %v3504_v39 = vadd.f32 %v3502_v31, %v7391_v2 }
0x22da   : > { %v3509_v34 = vsel %vm686_vm5, %v3505_v30, -inf }
0x22db   : > { %3510 = vmax.xlane.f32.xlu1 %v3509_v34  ;;  %v3506_v48 = vsel %vm686_vm5, %v3504_v39, -inf }
0x22dc   : > { %3507 = vmax.xlane.f32.xlu0 %v3506_v48 }
0x22ec   : > { %6921 = vrot.lane.b32.xlu1 %v7879_v33, %s7222_s12 }
0x22f0   : > { %3615 = vrot.lane.b32.xlu1 %v7873_v40, %s7223_s27 }
0x22f4   : > { %3617 = vrot.lane.b32.xlu1 %v7871_v1, %s7223_s27 }
0x2368   : > { %v3511_v58 = vpop.xlane.xlu1 %3510 }
0x2369   : > { %v3513_v61 = vsub.f32 %v3505_v30, %v3511_v58  ;;  %v3508_v46 = vpop.xlane.xlu0 %3507 }
0x236a   : > { %v3512_v60 = vsub.f32 %v3504_v39, %v3508_v46 }
0x236b   : > { %v3516_v41 = vmul.f32 1.442695, %v3513_v61 }
0x236c   : > { %v3514_v51 = vmul.f32 1.442695, %v3512_v60  ;;  %v6922_v55 = vpop.permute.xlu1 %6921 }
0x236d   : > { %7065 = vpow2.f32 %v3516_v41  ;;  %v6924_v36 = vunpack.i.h.bf16 %v6922_v55  ;;  %v6923_v56 = vunpack.i.l.bf16 %v6922_v55 }
0x236e   : > { %7067 = vpow2.f32 %v3514_v51 }
0x236f   : > { %v6652_v0 = vpack.c.bf16 %v6924_v36, %v6923_v56 }
0x2370   : > { %v3616_v39 = vpop.permute.xlu1 %3615 }
0x2374   : > { %v3618_v34 = vpop.permute.xlu1 %3617 }
0x2377   : > { %v7066_v52 = vpop.eup %7065 }
0x2378   : > { %v3521_v38 = vsel %vm686_vm5, %v7066_v52, 0.0  ;;  %v7068_v53 = vpop.eup %7067 }
0x2379   : > { %3522 = vadd.xlane.f32.xlu0 %v3521_v38  ;;  %v3518_v54 = vsel %vm686_vm5, %v7068_v53, 0.0 }
0x237d   : > { %3519 = vadd.xlane.f32.xlu0 %v3518_v54 }
0x2393   : > { %6916 = vrot.lane.b32.xlu0 %v7879_v33, %s7220_s30  ;;  %s8246_s30 = smov 40  }
0x2406   : > { %v3523_v1 = vpop.xlane.xlu0 %3522 }
0x2407   : > { %7069 = vrcp.f32 %v3523_v1 }
0x240a   : > { %v3520_v40 = vpop.xlane.xlu0 %3519 }
0x240b   : > { %7071 = vrcp.f32 %v3520_v40 }
0x240e   : > { %v6917_v57 = vpop.permute.xlu0 %6916 }
0x240f   : > { %v6919_v50 = vunpack.i.h.bf16 %v6917_v57  ;;  %v6918_v62 = vunpack.i.l.bf16 %v6917_v57 }
0x2411   : > { %v6648_v49 = vpack.c.bf16 %v6919_v50, %v6918_v62  ;;  %v7070_v28 = vpop.eup %7069 }
0x2412   : > { %v3527_v30 = vmul.f32 %v7070_v28, %v7066_v52 }
0x2413   : > { %6649 = vmatprep.subr.bf16.mxu1 %v6648_v49 }
0x2414   : > { %6651 = vmatpush3.bf16.msra.mxu1 %v6648_v49 }
0x2415   : > { %v7072_v35 = vpop.eup %7071  ;;  %6654 = vmatprep.subr.msk.bf16.mxu1 %vm7564_vm4, %v6652_v0 }
0x2416   : > { %v3525_v31 = vmul.f32 %v7072_v35, %v7068_v53 }
0x2418   : > { %6276 = vmatprep.mubr.msk.f32.mxu1 %vm686_vm5, %v3525_v31 }
0x2419   : > { %6277 = vmatmul.mubr.msk.f32.vlgmr.msra.gmra.mrb[32].mxu1 %vm686_vm5, %v3527_v30 }
0x241a   : > { %6283 = vmatprep.mubr.msk.f32.mxu1 %vm598_vm3, %v3616_v39 }
0x241d   : > { %6657 = vmatpush3.bf16.xpose.msk.msra.mxu1 %vm7564_vm4, %v6652_v0 }
0x2424   : > { %6284 = vmatmul.mubr.msk.f32.vlgmr.msra.gmra.mrb[34].mxu1 %vm598_vm3, %v3618_v34 }
0x24ec   : > { %v6278_v48 = vpop.f32.mrb[32].mxu1 }
0x24ed   : > { %v3606_v58 = vpop.f32.mrb[33].mxu1 }
0x24f7   : > { %v6285_v61 = vpop.f32.mrb[34].mxu1 }
0x24f8   : > { %v3707_v46 = vmul.f32 0.35355338, %v6285_v61  ;;  %v3697_v60 = vpop.f32.mrb[35].mxu1  ;;  %v5655_v61 = vld [vmem:[%s7294_s24 + $0x30] sm:$0xff] }
0x24f9   : > { %v3706_v41 = vmul.f32 0.35355338, %v3697_v60  ;;  %v5656_v60 = vld [vmem:[%s7294_s24 + $0x38] sm:$0xff] }
0x24fa   : > { %v3709_v51 = vadd.f32 %v3707_v46, %v7396_v3 }
0x24fb   : > { %v3708_v52 = vadd.f32 %v3706_v41, %v7391_v2  ;;  %v6666_v41 = vpack.c.bf16 %v5656_v60, %v5655_v61 }
0x24fc   : > { %v3713_v38 = vsel %vm686_vm5, %v3709_v51, -inf }
0x24fd   : > { %3714 = vmax.xlane.f32.xlu1 %v3713_v38  ;;  %v3710_v53 = vsel %vm686_vm5, %v3708_v52, -inf }
0x24fe   : > { %3711 = vmax.xlane.f32.xlu0 %v3710_v53 }
0x250e   : > { %3821 = vrot.lane.b32.xlu1 %v7939_v47, %s7225_s26 }
0x2512   : > { %3823 = vrot.lane.b32.xlu1 %v7937_v63, %s7225_s26 }
0x2516   : > { %3829 = vrot.lane.b32.xlu1 %v3606_v58, %s8245_s29  ;;  %v5654_v58 = vld [vmem:[%s7294_s24 + $0x28] sm:$0xff] }
0x258a   : > { %v3715_v54 = vpop.xlane.xlu1 %3714 }
0x258b   : > { %v3717_v1 = vsub.f32 %v3709_v51, %v3715_v54  ;;  %v3712_v40 = vpop.xlane.xlu0 %3711 }
0x258c   : > { %v3716_v55 = vsub.f32 %v3708_v52, %v3712_v40 }
0x258d   : > { %v3720_v57 = vmul.f32 1.442695, %v3717_v1 }
0x258e   : > { %v3718_v36 = vmul.f32 1.442695, %v3716_v55  ;;  %v3822_v38 = vpop.permute.xlu1 %3821 }
0x258f   : > { %7073 = vpow2.f32 %v3720_v57  ;;  %v3843_v40 = vsel %vm598_vm3, %v7935_v32, %v3822_v38 }
0x2590   : > { %7075 = vpow2.f32 %v3718_v36 }
0x2592   : > { %v3824_v53 = vpop.permute.xlu1 %3823 }
0x2593   : > { %v3844_v57 = vsel %vm598_vm3, %v7933_v29, %v3824_v53  ;;  %v5668_v53 = vld [vmem:[%s8233_s7 + $0x38] sm:$0xff] }
0x2596   : > { %v3830_v1 = vpop.permute.xlu1 %3829 }
0x2597   : > { %v3845_v36 = vsel %vm686_vm5, %v3843_v40, %v3830_v1  ;;  %v4087_v1 = vld [vmem:[#allocation2 + $0x10] sm:$0xff]  ;;  %v4088_v40 = vld [vmem:[#allocation2 + $0x18] sm:$0xff] }
0x2599   : > { %v7074_v56 = vpop.eup %7073 }
0x259a   : > { %v3725_v50 = vsel %vm686_vm5, %v7074_v56, 0.0  ;;  %v7076_v62 = vpop.eup %7075 }
0x259b   : > { %3726 = vadd.xlane.f32.xlu0 %v3725_v50  ;;  %v3722_v47 = vsel %vm686_vm5, %v7076_v62, 0.0 }
0x259f   : > { %3723 = vadd.xlane.f32.xlu0 %v3722_v47 }
0x25b5   : > { %6926 = vrot.lane.b32.xlu0 %v7879_v33, %s8246_s30 }
0x25b9   : > { %3831 = vrot.lane.b32.xlu0 %v6278_v48, %s8245_s29  ;;  %v5653_v48 = vld [vmem:[%s7294_s24 + $0x20] sm:$0xff] }
0x25ba   : > { %v6662_v46 = vpack.c.bf16 %v5654_v58, %v5653_v48 }
0x2628   : > { %v3727_v63 = vpop.xlane.xlu0 %3726 }
0x2629   : > { %7077 = vrcp.f32 %v3727_v63 }
0x262c   : > { %v3724_v49 = vpop.xlane.xlu0 %3723 }
0x262d   : > { %7079 = vrcp.f32 %v3724_v49  ;;  %v5660_v49 = vld [vmem:[%s8232_s2 + $0x1] ss:$0 sm:$0xff] }
0x2630   : > { %v6927_v0 = vpop.permute.xlu0 %6926 }
0x2631   : > { %v6929_v28 = vunpack.i.h.bf16 %v6927_v0  ;;  %v6928_v35 = vunpack.i.l.bf16 %v6927_v0 }
0x2633   : > { %v6658_v31 = vpack.c.bf16 %v6929_v28, %v6928_v35  ;;  %v7078_v30 = vpop.eup %7077 }
0x2634   : > { %v3731_v33 = vmul.f32 %v7078_v30, %v7074_v56  ;;  %v3832_v54 = vpop.permute.xlu0 %3831 }
0x2635   : > { %6659 = vmatprep.subr.bf16.mxu0 %v6658_v31  ;;  %v3846_v50 = vsel %vm686_vm5, %v3844_v57, %v3832_v54 }
0x2636   : > { %6661 = vmatpush3.bf16.msra.mxu0 %v6658_v31 }
0x2637   : > { %v7080_v39 = vpop.eup %7079  ;;  %6663 = vmatprep.subr.bf16.mxu0 %v6662_v46 }
0x2638   : > { %v3729_v34 = vmul.f32 %v7080_v39, %v7076_v62 }
0x263a   : > { %6290 = vmatprep.mubr.msk.f32.mxu0 %vm686_vm5, %v3729_v34 }
0x263b   : > { %6291 = vmatmul.mubr.msk.f32.vlgmr.msra.gmra.mrb[26].mxu0 %vm686_vm5, %v3731_v33 }
0x263c   : > { %6665 = vmatpush3.bf16.msra.mxu0 %v6662_v46 }
0x263d   : > { %6667 = vmatprep.subr.bf16.mxu0 %v6666_v41 }
0x2640   : > { %6669 = vmatpush3.bf16.msra.mxu0 %v6666_v41  ;;  %v5665_v41 = vld [vmem:[%s8233_s7 + $0x20] sm:$0xff] }
0x270e   : > { %v6292_v51 = vpop.f32.mrb[26].mxu0 }
0x270f   : > { %3839 = vrot.lane.b32.xlu0 %v6292_v51, %s8247_s6  ;;  %v3810_v52 = vpop.f32.mrb[27].mxu0  ;;  %v5666_v51 = vld [vmem:[%s8233_s7 + $0x28] sm:$0xff] }
0x2710   : > { %3837 = vrot.lane.b32.xlu1 %v3810_v52, %s8247_s6  ;;  %v5667_v52 = vld [vmem:[%s8233_s7 + $0x30] sm:$0xff]  ;;  %v6670_v38 = vpack.c.bf16 %v5666_v51, %v5665_v41 }
0x2711   : > { %v6674_v54 = vpack.c.bf16 %v5668_v53, %v5667_v52 }
0x2712   : > { %6671 = vmatprep.subr.bf16.mxu1 %v6670_v38 }
0x2713   : > { %6673 = vmatpush3.bf16.msra.mxu1 %v6670_v38 }
0x2714   : > { %6675 = vmatprep.subr.bf16.mxu1 %v6674_v54 }
0x2717   : > { %6677 = vmatpush3.bf16.msra.mxu1 %v6674_v54 }
0x2781   : > { %v3840_v55 = vpop.permute.xlu0 %3839 }
0x2782   : > { %v3838_v56 = vpop.permute.xlu1 %3837  ;;  %v3848_v47 = vsel %vm1436_vm6, %v3846_v50, %v3840_v55  ;;  %v6678_v55 = vpack.c.bf16 %v4088_v40, %v4087_v1 }
0x2783   : > { %v3847_v62 = vsel %vm1436_vm6, %v3845_v36, %v3838_v56 }
0x2784   : > { %6301 = vmatprep.mubr.msk.f32.mxu0 %vm163_vm0, %v3847_v62  ;;  %6680 = vmatprep.subr.msk.bf16.mxu0 %vm7564_vm4, %v6678_v55 }
0x2785   : > { %6302 = vmatmul.mubr.msk.f32.vlgmr.msra.gmra.mrb[28].mxu0 %vm163_vm0, %v3848_v47 }
0x2786   : > { %6683 = vmatpush3.bf16.xpose.msk.msra.mxu0 %vm7564_vm4, %v6678_v55  ;;  %v8035_v55 = vpack.i.bf16 %v4088_v40, %v4087_v1 }
0x2858   : > { %v6303_v63 = vpop.f32.mrb[28].mxu0 }
0x2859   : > { %v3936_v32 = vadd.f32 %v6303_v63, %v7850_v59  ;;  %v3926_v0 = vpop.f32.mrb[29].mxu0 }
0x285a   : > { %v3935_v29 = vadd.f32 %v3926_v0, %v7852_v37  ;;  %v5664_v0 = vld [vmem:[%s8235_s11 + $0x1] ss:$0 sm:$0xff] }
0x285b   : > { %v7998_v28 = vadd.f32 %v5660_v49, %v3936_v32 }
0x285c   : > { %v8000_v35 = vadd.f32 %v5660_v49, %v3935_v29  ;;  %v5663_v49 = vld [vmem:[%s8234_s10 + $0x1] ss:$0 sm:$0xff] }
0x285d   : > { %v3954_v31 = vsel %vm163_vm0, %v7998_v28, 0.0 }
0x285e   : > { %3955 = vadd.xlane.f32.xlu0 %v3954_v31  ;;  %v3951_v30 = vsel %vm163_vm0, %v8000_v35, 0.0 }
0x285f   : > { %3952 = vadd.xlane.f32.xlu1 %v3951_v30 }
0x28eb   : > { %v3956_v39 = vpop.xlane.xlu0 %3955 }
0x28ec   : > { %v3958_v59 = vmul.f32 0.03125, %v3956_v39  ;;  %v3953_v34 = vpop.xlane.xlu1 %3952 }
0x28ed   : > { %v3957_v37 = vmul.f32 0.03125, %v3953_v34 }
0x28ee   : > { %v3960_v33 = vsub.f32 %v7998_v28, %v3958_v59 }
0x28ef   : > { %v3959_v48 = vsub.f32 %v8000_v35, %v3957_v37  ;;  %v5670_v37 = vld [vmem:[%s8236_s15 + $0x1] ss:$0 sm:$0xff] }
0x28f0   : > { %v3962_v46 = vmul.f32 %v3960_v33, %v3960_v33 }
0x28f1   : > { %v3961_v58 = vmul.f32 %v3959_v48, %v3959_v48 }
0x28f2   : > { %v3966_v60 = vsel %vm163_vm0, %v3962_v46, 0.0 }
0x28f3   : > { %v3963_v61 = vsel %vm163_vm0, %v3961_v58, 0.0 }
0x28f4   : > { %3964 = vadd.xlane.f32.xlu0 %v3963_v61 }
0x28f8   : > { %3967 = vadd.xlane.f32.xlu0 %v3966_v60 }
0x2981   : > { %v3965_v57 = vpop.xlane.xlu0 %3964 }
0x2982   : > { %v3969_v36 = vmul.f32 0.03125, %v3965_v57 }
0x2984   : > { %v3971_v56 = vadd.f32 1e-05, %v3969_v36 }
0x2985   : > { %v3968_v50 = vpop.xlane.xlu0 %3967 }
0x2986   : > { %7081 = vrsqrt.f32 %v3971_v56  ;;  %v3970_v62 = vmul.f32 0.03125, %v3968_v50 }
0x2988   : > { %v3972_v47 = vadd.f32 1e-05, %v3970_v62 }
0x298a   : > { %7083 = vrsqrt.f32 %v3972_v47 }
0x2990   : > { %v7082_v63 = vpop.eup %7081 }
0x2991   : > { %v3975_v32 = vmul.f32 %v7082_v63, %v3959_v48 }
0x2993   : > { %v3983_v29 = vmul.f32 %v5663_v49, %v3975_v32 }
0x2994   : > { %v7084_v31 = vpop.eup %7083 }
0x2995   : > { %v3976_v30 = vmul.f32 %v7084_v31, %v3960_v33  ;;  %v3991_v39 = vadd.f32 %v5664_v0, %v3983_v29 }
0x2997   : > { %v3984_v59 = vmul.f32 %v5663_v49, %v3976_v30  ;;  %6312 = vmatprep.mubr.msk.f32.mxu1 %vm163_vm0, %v3991_v39 }
0x2999   : > { %v3992_v34 = vadd.f32 %v5664_v0, %v3984_v59 }
0x299b   : > { %6313 = vmatmul.mubr.msk.f32.vlgmr.msra.gmra.mrb[36].mxu1 %vm163_vm0, %v3992_v34 }
0x2a6e   : > { %v6314_v58 = vpop.f32.mrb[36].mxu1 }
0x2a6f   : > { %v4078_v61 = vpop.f32.mrb[37].mxu1  ;;  %v8025_v60 = vadd.f32 %v6314_v58, %v5670_v37 }
0x2a70   : > { %v8023_v46 = vadd.f32 %v5670_v37, %v4078_v61 }
0x2a72   : > { %6319 = vmatprep.mubr.msk.f32.mxu0 %vm598_vm3, %v8023_v46 }
0x2a73   : > { %6320 = vmatmul.mubr.msk.f32.vlgmr.msra.gmra.mrb[30].mxu0 %vm598_vm3, %v8025_v60 }
0x2b46   : > { %v6321_v33 = vpop.f32.mrb[30].mxu0 }
0x2b47   : > { %v4177_v48 = vmul.f32 0.35355338, %v6321_v33  ;;  %v4167_v41 = vpop.f32.mrb[31].mxu0 }
0x2b48   : > { %v4176_v51 = vmul.f32 0.35355338, %v4167_v41 }
0x2b49   : > { %v4179_v52 = vadd.f32 %v4177_v48, %v7402_v5 }
0x2b4a   : > { %v4178_v38 = vadd.f32 %v4176_v51, %v7399_v4 }
0x2b4b   : > { %v4183_v53 = vsel %vm686_vm5, %v4179_v52, -inf }
0x2b4c   : > { %4184 = vmax.xlane.f32.xlu0 %v4183_v53  ;;  %v4180_v54 = vsel %vm686_vm5, %v4178_v38, -inf }
0x2b4d   : > { %4181 = vmax.xlane.f32.xlu1 %v4180_v54 }
0x2b5e   : > { %6931 = vrot.lane.b32.xlu1 %v8035_v55, %s7214_s9  ;;  %s5290_s9 = sadd.s32 2, %s7181_s5 }
0x2b62   : > { %4289 = vrot.lane.b32.xlu1 %v8023_v46, %s7216_s17 }
0x2bd9   : > { %v4185_v57 = vpop.xlane.xlu0 %4184 }
0x2bda   : > { %v4187_v36 = vsub.f32 %v4179_v52, %v4185_v57  ;;  %v4182_v56 = vpop.xlane.xlu1 %4181 }
0x2bdb   : > { %v4186_v50 = vsub.f32 %v4178_v38, %v4182_v56 }
0x2bdc   : > { %v4190_v62 = vmul.f32 1.442695, %v4187_v36 }
0x2bdd   : > { %v4188_v47 = vmul.f32 1.442695, %v4186_v50 }
0x2bde   : > { %7085 = vpow2.f32 %v4190_v62  ;;  %v6932_v63 = vpop.permute.xlu1 %6931 }
0x2bdf   : > { %7087 = vpow2.f32 %v4188_v47  ;;  %v6934_v49 = vunpack.i.h.bf16 %v6932_v63  ;;  %v6933_v32 = vunpack.i.l.bf16 %v6932_v63 }
0x2be1   : > { %v6684_v0 = vpack.c.bf16 %v6934_v49, %v6933_v32 }
0x2be2   : > { %v4290_v30 = vpop.permute.xlu1 %4289 }
0x2be3   : > { %6685 = vmatprep.subr.bf16.mxu1 %v6684_v0 }
0x2be4   : > { %6687 = vmatpush3.bf16.msra.mxu1 %v6684_v0 }
0x2be8   : > { %v7086_v1 = vpop.eup %7085 }
0x2be9   : > { %v7088_v40 = vpop.eup %7087  ;;  %v4195_v29 = vsel %vm686_vm5, %v7086_v1, 0.0 }
0x2bea   : > { %4196 = vadd.xlane.f32.xlu0 %v4195_v29  ;;  %v4192_v31 = vsel %vm686_vm5, %v7088_v40, 0.0 }
0x2beb   : > { %4193 = vadd.xlane.f32.xlu1 %v4192_v31 }
0x2bfc   : > { %4291 = vrot.lane.b32.xlu1 %v8025_v60, %s7216_s17 }
0x2c00   : > { %6936 = vrot.lane.b32.xlu0 %v8035_v55, %s7216_s17 }
0x2c77   : > { %v4197_v39 = vpop.xlane.xlu0 %4196 }
0x2c78   : > { %7089 = vrcp.f32 %v4197_v39  ;;  %v4194_v59 = vpop.xlane.xlu1 %4193 }
0x2c79   : > { %7091 = vrcp.f32 %v4194_v59 }
0x2c7b   : > { %v6937_v34 = vpop.permute.xlu0 %6936 }
0x2c7c   : > { %v6939_v37 = vunpack.i.h.bf16 %v6937_v34  ;;  %v6938_v58 = vunpack.i.l.bf16 %v6937_v34  ;;  %v4292_v52 = vpop.permute.xlu1 %4291 }
0x2c7e   : > { %v6688_v61 = vpack.c.bf16 %v6939_v37, %v6938_v58 }
0x2c80   : > { %6690 = vmatprep.subr.msk.bf16.mxu1 %vm7564_vm4, %v6688_v61 }
0x2c82   : > { %v7090_v33 = vpop.eup %7089 }
0x2c83   : > { %v7092_v48 = vpop.eup %7091  ;;  %v4201_v51 = vmul.f32 %v7090_v33, %v7086_v1 }
0x2c84   : > { %v4199_v41 = vmul.f32 %v7092_v48, %v7088_v40 }
0x2c86   : > { %6326 = vmatprep.mubr.msk.f32.mxu1 %vm686_vm5, %v4199_v41 }
0x2c87   : > { %6327 = vmatmul.mubr.msk.f32.vlgmr.msra.gmra.mrb[38].mxu1 %vm686_vm5, %v4201_v51 }
0x2c88   : > { %6693 = vmatpush3.bf16.xpose.msk.msra.mxu1 %vm7564_vm4, %v6688_v61  ;;  %6333 = vmatprep.mubr.msk.f32.mxu1 %vm598_vm3, %v4290_v30 }
0x2c8f   : > { %6334 = vmatmul.mubr.msk.f32.vlgmr.msra.gmra.mrb[40].mxu1 %vm598_vm3, %v4292_v52 }
0x2d5a   : > { %v8055_v38 = vpop.f32.mrb[38].mxu1 }
0x2d5b   : > { %v8057_v53 = vpop.f32.mrb[39].mxu1 }
0x2d62   : > { %v6335_v54 = vpop.f32.mrb[40].mxu1 }
0x2d63   : > { %v4381_v57 = vmul.f32 0.35355338, %v6335_v54  ;;  %v4371_v36 = vpop.f32.mrb[41].mxu1 }
0x2d64   : > { %v4380_v56 = vmul.f32 0.35355338, %v4371_v36 }
0x2d65   : > { %v4383_v50 = vadd.f32 %v4381_v57, %v7402_v5 }
0x2d66   : > { %v4382_v62 = vadd.f32 %v4380_v56, %v7399_v4 }
0x2d67   : > { %v4387_v47 = vsel %vm686_vm5, %v4383_v50, -inf }
0x2d68   : > { %4388 = vmax.xlane.f32.xlu0 %v4387_v47  ;;  %v4384_v63 = vsel %vm686_vm5, %v4382_v62, -inf }
0x2d69   : > { %4385 = vmax.xlane.f32.xlu1 %v4384_v63 }
0x2d7a   : > { %6941 = vrot.lane.b32.xlu1 %v8035_v55, %s7215_s13  ;;  %s5496_s13 = scalar_lea.vmem %s7382_s20, %s7181_s5  ;;  %s376_s5 = sadd.s32 1, %s7181_s5  }
0x2d7b   : > { %p373_p2 = scmp.ge.s32.totalorder %s376_s5, 5  }
0x2d7e   : > { %4493 = vrot.lane.b32.xlu1 %v8023_v46, %s7218_s25 }
0x2d82   : > { %4495 = vrot.lane.b32.xlu1 %v8025_v60, %s7218_s25 }
0x2df5   : > { %v4389_v49 = vpop.xlane.xlu0 %4388 }
0x2df6   : > { %v4391_v32 = vsub.f32 %v4383_v50, %v4389_v49  ;;  %v4386_v0 = vpop.xlane.xlu1 %4385 }
0x2df7   : > { %v4390_v1 = vsub.f32 %v4382_v62, %v4386_v0 }
0x2df8   : > { %v4394_v40 = vmul.f32 1.442695, %v4391_v32 }
0x2df9   : > { %v4392_v29 = vmul.f32 1.442695, %v4390_v1 }
0x2dfa   : > { %7093 = vpow2.f32 %v4394_v40  ;;  %v6942_v31 = vpop.permute.xlu1 %6941 }
0x2dfb   : > { %v6944_v30 = vunpack.i.h.bf16 %v6942_v31  ;;  %v6943_v39 = vunpack.i.l.bf16 %v6942_v31  ;;  %7095 = vpow2.f32 %v4392_v29 }
0x2dfd   : > { %v6694_v59 = vpack.c.bf16 %v6944_v30, %v6943_v39 }
0x2dfe   : > { %v4494_v62 = vpop.permute.xlu1 %4493 }
0x2dff   : > { %6695 = vmatprep.subr.bf16.mxu0 %v6694_v59 }
0x2e00   : > { %6697 = vmatpush3.bf16.msra.mxu0 %v6694_v59 }
0x2e02   : > { %v4496_v47 = vpop.permute.xlu1 %4495 }
0x2e04   : > { %v7094_v34 = vpop.eup %7093 }
0x2e05   : > { %v4399_v37 = vsel %vm686_vm5, %v7094_v34, 0.0  ;;  %v7096_v58 = vpop.eup %7095 }
0x2e06   : > { %4400 = vadd.xlane.f32.xlu0 %v4399_v37  ;;  %v4396_v61 = vsel %vm686_vm5, %v7096_v58, 0.0 }
0x2e0a   : > { %4397 = vadd.xlane.f32.xlu0 %v4396_v61 }
0x2e20   : > { %6946 = vrot.lane.b32.xlu0 %v8035_v55, %s7218_s25 }
0x2e93   : > { %v4401_v33 = vpop.xlane.xlu0 %4400 }
0x2e94   : > { %7097 = vrcp.f32 %v4401_v33 }
0x2e97   : > { %v4398_v48 = vpop.xlane.xlu0 %4397 }
0x2e98   : > { %7099 = vrcp.f32 %v4398_v48 }
0x2e9b   : > { %v6947_v41 = vpop.permute.xlu0 %6946 }
0x2e9c   : > { %v6949_v51 = vunpack.i.h.bf16 %v6947_v41  ;;  %v6948_v52 = vunpack.i.l.bf16 %v6947_v41 }
0x2e9e   : > { %v6698_v54 = vpack.c.bf16 %v6949_v51, %v6948_v52  ;;  %v7098_v57 = vpop.eup %7097 }
0x2e9f   : > { %v4405_v50 = vmul.f32 %v7098_v57, %v7094_v34 }
0x2ea0   : > { %6700 = vmatprep.subr.msk.bf16.mxu0 %vm7564_vm4, %v6698_v54 }
0x2ea2   : > { %v7100_v36 = vpop.eup %7099 }
0x2ea3   : > { %v4403_v56 = vmul.f32 %v7100_v36, %v7096_v58 }
0x2ea5   : > { %6340 = vmatprep.mubr.msk.f32.mxu0 %vm686_vm5, %v4403_v56 }
0x2ea6   : > { %6341 = vmatmul.mubr.msk.f32.vlgmr.msra.gmra.mrb[32].mxu0 %vm686_vm5, %v4405_v50 }
0x2ea7   : > { %6703 = vmatpush3.bf16.xpose.msk.msra.mxu0 %vm7564_vm4, %v6698_v54  ;;  %6347 = vmatprep.mubr.msk.f32.mxu0 %vm598_vm3, %v4494_v62 }
0x2eae   : > { %6348 = vmatmul.mubr.msk.f32.vlgmr.msra.gmra.mrb[34].mxu0 %vm598_vm3, %v4496_v47 }
0x2f79   : > { %v8081_v63 = vpop.f32.mrb[32].mxu0 }
0x2f7a   : > { %v8083_v49 = vpop.f32.mrb[33].mxu0 }
0x2f81   : > { %v6349_v32 = vpop.f32.mrb[34].mxu0 }
0x2f82   : > { %v4585_v0 = vmul.f32 0.35355338, %v6349_v32  ;;  %v4575_v1 = vpop.f32.mrb[35].mxu0 }
0x2f83   : > { %v4584_v40 = vmul.f32 0.35355338, %v4575_v1 }
0x2f84   : > { %v4587_v29 = vadd.f32 %v4585_v0, %v7402_v5 }
0x2f85   : > { %v4586_v31 = vadd.f32 %v4584_v40, %v7399_v4 }
0x2f86   : > { %v4591_v30 = vsel %vm686_vm5, %v4587_v29, -inf }
0x2f87   : > { %4592 = vmax.xlane.f32.xlu0 %v4591_v30  ;;  %v4588_v39 = vsel %vm686_vm5, %v4586_v31, -inf }
0x2f88   : > { %4589 = vmax.xlane.f32.xlu1 %v4588_v39 }
0x2f99   : > { %6951 = vrot.lane.b32.xlu1 %v8035_v55, %s7217_s21 }
0x2f9d   : > { %4697 = vrot.lane.b32.xlu1 %v8023_v46, %s7223_s27 }
0x2fa1   : > { %4699 = vrot.lane.b32.xlu1 %v8025_v60, %s7223_s27 }
0x3014   : > { %v4593_v59 = vpop.xlane.xlu0 %4592 }
0x3015   : > { %v4595_v34 = vsub.f32 %v4587_v29, %v4593_v59  ;;  %v4590_v37 = vpop.xlane.xlu1 %4589 }
0x3016   : > { %v4594_v58 = vsub.f32 %v4586_v31, %v4590_v37 }
0x3017   : > { %v4598_v61 = vmul.f32 1.442695, %v4595_v34 }
0x3018   : > { %v4596_v33 = vmul.f32 1.442695, %v4594_v58 }
0x3019   : > { %7101 = vpow2.f32 %v4598_v61  ;;  %v6952_v48 = vpop.permute.xlu1 %6951 }
0x301a   : > { %v6954_v41 = vunpack.i.h.bf16 %v6952_v48  ;;  %v6953_v51 = vunpack.i.l.bf16 %v6952_v48  ;;  %7103 = vpow2.f32 %v4596_v33 }
0x301c   : > { %v6704_v52 = vpack.c.bf16 %v6954_v41, %v6953_v51 }
0x301d   : > { %v4698_v31 = vpop.permute.xlu1 %4697 }
0x301e   : > { %6705 = vmatprep.subr.bf16.mxu1 %v6704_v52 }
0x301f   : > { %6707 = vmatpush3.bf16.msra.mxu1 %v6704_v52 }
0x3021   : > { %v4700_v30 = vpop.permute.xlu1 %4699 }
0x3023   : > { %v7102_v54 = vpop.eup %7101 }
0x3024   : > { %v4603_v46 = vsel %vm686_vm5, %v7102_v54, 0.0  ;;  %v7104_v57 = vpop.eup %7103 }
0x3025   : > { %4604 = vadd.xlane.f32.xlu0 %v4603_v46  ;;  %v4600_v60 = vsel %vm686_vm5, %v7104_v57, 0.0 }
0x3029   : > { %4601 = vadd.xlane.f32.xlu0 %v4600_v60 }
0x303f   : > { %6956 = vrot.lane.b32.xlu0 %v8035_v55, %s7223_s27 }
0x30b2   : > { %v4605_v36 = vpop.xlane.xlu0 %4604 }
0x30b3   : > { %7105 = vrcp.f32 %v4605_v36 }
0x30b6   : > { %v4602_v56 = vpop.xlane.xlu0 %4601 }
0x30b7   : > { %7107 = vrcp.f32 %v4602_v56 }
0x30ba   : > { %v6957_v50 = vpop.permute.xlu0 %6956 }
0x30bb   : > { %v6959_v62 = vunpack.i.h.bf16 %v6957_v50  ;;  %v6958_v47 = vunpack.i.l.bf16 %v6957_v50 }
0x30bd   : > { %v6708_v32 = vpack.c.bf16 %v6959_v62, %v6958_v47  ;;  %v7106_v0 = vpop.eup %7105 }
0x30be   : > { %v4609_v29 = vmul.f32 %v7106_v0, %v7102_v54 }
0x30bf   : > { %6710 = vmatprep.subr.msk.bf16.mxu1 %vm7564_vm4, %v6708_v32 }
0x30c1   : > { %v7108_v1 = vpop.eup %7107 }
0x30c2   : > { %v4607_v40 = vmul.f32 %v7108_v1, %v7104_v57 }
0x30c4   : > { %6354 = vmatprep.mubr.msk.f32.mxu1 %vm686_vm5, %v4607_v40 }
0x30c5   : > { %6355 = vmatmul.mubr.msk.f32.vlgmr.msra.gmra.mrb[42].mxu1 %vm686_vm5, %v4609_v29 }
0x30c6   : > { %6713 = vmatpush3.bf16.xpose.msk.msra.mxu1 %vm7564_vm4, %v6708_v32  ;;  %6361 = vmatprep.mubr.msk.f32.mxu1 %vm598_vm3, %v4698_v31 }
0x30cd   : > { %6362 = vmatmul.mubr.msk.f32.vlgmr.msra.gmra.mrb[44].mxu1 %vm598_vm3, %v4700_v30 }
0x3198   : > { %v6356_v39 = vpop.f32.mrb[42].mxu1 }
0x3199   : > { %v4688_v59 = vpop.f32.mrb[43].mxu1 }
0x31a0   : > { %v6363_v34 = vpop.f32.mrb[44].mxu1 }
0x31a1   : > { %v4789_v37 = vmul.f32 0.35355338, %v6363_v34  ;;  %v4779_v58 = vpop.f32.mrb[45].mxu1  ;;  %v5699_v34 = vld [vmem:[%s8237_s16 + $0x30] sm:$0xff] }
0x31a2   : > { %v4788_v61 = vmul.f32 0.35355338, %v4779_v58  ;;  %v5700_v58 = vld [vmem:[%s8237_s16 + $0x38] sm:$0xff] }
0x31a3   : > { %v4791_v33 = vadd.f32 %v4789_v37, %v7402_v5 }
0x31a4   : > { %v4790_v48 = vadd.f32 %v4788_v61, %v7399_v4  ;;  %v6722_v61 = vpack.c.bf16 %v5700_v58, %v5699_v34  ;;  %v5709_v58 = vld [vmem:[%s8239_s0 + $0x20] sm:$0xff] }
0x31a5   : > { %v4795_v41 = vsel %vm686_vm5, %v4791_v33, -inf }
0x31a6   : > { %4796 = vmax.xlane.f32.xlu0 %v4795_v41  ;;  %v4792_v42 = vsel %vm686_vm5, %v4790_v48, -inf }
0x31a7   : > { %4793 = vmax.xlane.f32.xlu1 %v4792_v42 }
0x31b8   : > { %6961 = vrot.lane.b32.xlu1 %v8035_v55, %s7222_s12 }
0x31bc   : > { %4905 = vrot.lane.b32.xlu1 %v8081_v63, %s7225_s26 }
0x31c0   : > { %4911 = vrot.lane.b32.xlu1 %v4688_v59, %s8245_s29  ;;  %v5698_v59 = vld [vmem:[%s8237_s16 + $0x28] sm:$0xff] }
0x31c4   : > { %4913 = vrot.lane.b32.xlu1 %v6356_v39, %s8245_s29  ;;  %v5697_v39 = vld [vmem:[%s8237_s16 + $0x20] sm:$0xff] }
0x31c5   : > { %v6718_v37 = vpack.c.bf16 %v5698_v59, %v5697_v39 }
0x3233   : > { %v4797_v51 = vpop.xlane.xlu0 %4796 }
0x3234   : > { %v4799_v52 = vsub.f32 %v4791_v33, %v4797_v51  ;;  %v4794_v54 = vpop.xlane.xlu1 %4793 }
0x3235   : > { %v4798_v46 = vsub.f32 %v4790_v48, %v4794_v54 }
0x3236   : > { %v4802_v57 = vmul.f32 1.442695, %v4799_v52 }
0x3237   : > { %v4800_v60 = vmul.f32 1.442695, %v4798_v46 }
0x3238   : > { %v6962_v36 = vpop.permute.xlu1 %6961 }
0x3239   : > { %7109 = vpow2.f32 %v4800_v60  ;;  %v6964_v56 = vunpack.i.h.bf16 %v6962_v36  ;;  %v6963_v50 = vunpack.i.l.bf16 %v6962_v36 }
0x323a   : > { %7111 = vpow2.f32 %v4802_v57 }
0x323b   : > { %v6714_v62 = vpack.c.bf16 %v6964_v56, %v6963_v50 }
0x323c   : > { %v4906_v48 = vpop.permute.xlu1 %4905 }
0x323d   : > { %6715 = vmatprep.subr.bf16.mxu0 %v6714_v62  ;;  %v4926_v46 = vsel %vm598_vm3, %v8055_v38, %v4906_v48  ;;  %v5712_v48 = vld [vmem:[%s8239_s0 + $0x38] sm:$0xff] }
0x323e   : > { %6717 = vmatpush3.bf16.msra.mxu0 %v6714_v62 }
0x323f   : > { %6719 = vmatprep.subr.bf16.mxu0 %v6718_v37 }
0x3240   : > { %v4912_v41 = vpop.permute.xlu1 %4911 }
0x3243   : > { %v7110_v55 = vpop.eup %7109 }
0x3244   : > { %v4804_v63 = vsel %vm686_vm5, %v7110_v55, 0.0  ;;  %v7112_v47 = vpop.eup %7111  ;;  %v4914_v51 = vpop.permute.xlu1 %4913 }
0x3245   : > { %4805 = vadd.xlane.f32.xlu0 %v4804_v63  ;;  %v4807_v32 = vsel %vm686_vm5, %v7112_v47, 0.0  ;;  %v4928_v36 = vsel %vm686_vm5, %v4926_v46, %v4914_v51 }
0x3249   : > { %4808 = vadd.xlane.f32.xlu0 %v4807_v32 }
0x325f   : > { %4903 = vrot.lane.b32.xlu0 %v8083_v49, %s7225_s26 }
0x32d2   : > { %v4806_v0 = vpop.xlane.xlu0 %4805 }
0x32d3   : > { %7113 = vrcp.f32 %v4806_v0 }
0x32d6   : > { %v4809_v1 = vpop.xlane.xlu0 %4808 }
0x32d7   : > { %7115 = vrcp.f32 %v4809_v1 }
0x32da   : > { %v4904_v42 = vpop.permute.xlu0 %4903 }
0x32db   : > { %v4925_v52 = vsel %vm598_vm3, %v8057_v53, %v4904_v42 }
0x32dc   : > { %v4927_v60 = vsel %vm686_vm5, %v4925_v52, %v4912_v41 }
0x32dd   : > { %v7114_v40 = vpop.eup %7113 }
0x32de   : > { %v4811_v29 = vmul.f32 %v7114_v40, %v7110_v55  ;;  %v5704_v55 = vld [vmem:[%s8238_s18 + $0x1] ss:$0 sm:$0xff] }
0x32e0   : > { %6368 = vmatprep.mubr.msk.f32.mxu0 %vm686_vm5, %v4811_v29 }
0x32e1   : > { %v7116_v31 = vpop.eup %7115 }
0x32e2   : > { %v4813_v30 = vmul.f32 %v7116_v31, %v7112_v47 }
0x32e4   : > { %6369 = vmatmul.mubr.msk.f32.vlgmr.msra.gmra.mrb[36].mxu0 %vm686_vm5, %v4813_v30 }
0x32e5   : > { %6721 = vmatpush3.bf16.msra.mxu0 %v6718_v37 }
0x32e6   : > { %6723 = vmatprep.subr.bf16.mxu0 %v6722_v61 }
0x32e9   : > { %6725 = vmatpush3.bf16.msra.mxu0 %v6722_v61  ;;  %v5710_v61 = vld [vmem:[%s8239_s0 + $0x28] sm:$0xff] }
0x33b7   : > { %v6370_v49 = vpop.f32.mrb[36].mxu0 }
0x33b8   : > { %4921 = vrot.lane.b32.xlu1 %v6370_v49, %s8247_s6  ;;  %v4892_v33 = vpop.f32.mrb[37].mxu0  ;;  %v5711_v49 = vld [vmem:[%s8239_s0 + $0x30] sm:$0xff] }
0x33b9   : > { %4919 = vrot.lane.b32.xlu0 %v4892_v33, %s8247_s6  ;;  %v6726_v33 = vpack.c.bf16 %v5710_v61, %v5709_v58  ;;  %v6730_v41 = vpack.c.bf16 %v5712_v48, %v5711_v49  ;;  %v5714_v61 = vld [vmem:[%s8243_s4 + $0x1] ss:$0 sm:$0xff] }
0x33bb   : > { %6727 = vmatprep.subr.bf16.mxu1 %v6726_v33 }
0x33bc   : > { %6729 = vmatpush3.bf16.msra.mxu1 %v6726_v33 }
0x33bd   : > { %6731 = vmatprep.subr.bf16.mxu1 %v6730_v41 }
0x33c0   : > { %6733 = vmatpush3.bf16.msra.mxu1 %v6730_v41 }
0x342a   : > { %v4922_v54 = vpop.permute.xlu1 %4921 }
0x342b   : > { %v4920_v57 = vpop.permute.xlu0 %4919  ;;  %v4930_v50 = vsel %vm1436_vm6, %v4928_v36, %v4922_v54  ;;  %v5707_v36 = vld [vmem:[%s8240_s23 + $0x1] ss:$0 sm:$0xff] }
0x342c   : > { %v4929_v56 = vsel %vm1436_vm6, %v4927_v60, %v4920_v57 }
0x342d   : > { %6379 = vmatprep.mubr.msk.f32.mxu0 %vm163_vm0, %v4929_v56 }
0x342e   : > { %6380 = vmatmul.mubr.msk.f32.vlgmr.msra.gmra.mrb[38].mxu0 %vm163_vm0, %v4930_v50  ;;  %v5708_v50 = vld [vmem:[%s8241_s22 + $0x1] ss:$0 sm:$0xff] }
0x3501   : > { %v6381_v62 = vpop.f32.mrb[38].mxu0 }
0x3502   : > { %v5018_v53 = vadd.f32 %v6381_v62, %v7998_v28  ;;  %v5008_v63 = vpop.f32.mrb[39].mxu0 }
0x3503   : > { %v5017_v38 = vadd.f32 %v5008_v63, %v8000_v35 }
0x3504   : > { %v8142_v47 = vadd.f32 %v5704_v55, %v5018_v53 }
0x3505   : > { %v8144_v32 = vadd.f32 %v5704_v55, %v5017_v38 }
0x3506   : > { %v5036_v0 = vsel %vm163_vm0, %v8142_v47, 0.0 }
0x3507   : > { %5037 = vadd.xlane.f32.xlu1 %v5036_v0  ;;  %v5033_v1 = vsel %vm163_vm0, %v8144_v32, 0.0 }
0x3508   : > { %5034 = vadd.xlane.f32.xlu0 %v5033_v1  ;;  %v5717_v1 = vld [vmem:[%s8242_s28 + $0x40] sm:$0xff] }
0x3594   : > { %v5038_v40 = vpop.xlane.xlu1 %5037 }
0x3595   : > { %v5040_v28 = vmul.f32 0.03125, %v5038_v40  ;;  %v5035_v29 = vpop.xlane.xlu0 %5034  ;;  %v5718_v40 = vld [vmem:[%s8242_s28 + $0x48] sm:$0xff] }
0x3596   : > { %v5039_v35 = vmul.f32 0.03125, %v5035_v29  ;;  %v6734_v29 = vpack.c.bf16 %v5718_v40, %v5717_v1 }
0x3597   : > { %v5042_v31 = vsub.f32 %v8142_v47, %v5040_v28  ;;  %v5719_v28 = vld [vmem:[%s8242_s28 + $0x50] sm:$0xff] }
0x3598   : > { %v5041_v30 = vsub.f32 %v8144_v32, %v5039_v35  ;;  %v5720_v35 = vld [vmem:[%s8242_s28 + $0x58] sm:$0xff]  ;;  %6735 = vmatprep.subr.bf16.mxu0 %v6734_v29 }
0x3599   : > { %v5044_v34 = vmul.f32 %v5042_v31, %v5042_v31  ;;  %6737 = vmatpush3.bf16.msra.mxu0 %v6734_v29  ;;  %v7230_v29 = vmov 0.0  }
0x359a   : > { %v5043_v39 = vmul.f32 %v5041_v30, %v5041_v30 }
0x359b   : > { %v5048_v37 = vsel %vm163_vm0, %v5044_v34, 0.0  ;;  %v5723_v34 = vld [vmem:[%s8242_s28 + $0x70] sm:$0xff] }
0x359c   : > { %v5045_v59 = vsel %vm163_vm0, %v5043_v39, 0.0  ;;  %v5721_v39 = vld [vmem:[%s8242_s28 + $0x60] sm:$0xff] }
0x359d   : > { %5046 = vadd.xlane.f32.xlu0 %v5045_v59  ;;  %v5722_v59 = vld [vmem:[%s8242_s28 + $0x68] sm:$0xff] }
0x35a1   : > { %5049 = vadd.xlane.f32.xlu0 %v5048_v37  ;;  %v5724_v37 = vld [vmem:[%s8242_s28 + $0x78] sm:$0xff] }
0x35a2   : > { %v6746_v58 = vpack.c.bf16 %v5724_v37, %v5723_v34 }
0x362a   : > { %v5047_v42 = vpop.xlane.xlu0 %5046 }
0x362b   : > { %v5051_v51 = vmul.f32 0.03125, %v5047_v42 }
0x362d   : > { %v5053_v52 = vadd.f32 1e-05, %v5051_v51 }
0x362e   : > { %v5050_v54 = vpop.xlane.xlu0 %5049 }
0x362f   : > { %7117 = vrsqrt.f32 %v5053_v52  ;;  %v5052_v46 = vmul.f32 0.03125, %v5050_v54 }
0x3631   : > { %v5054_v57 = vadd.f32 1e-05, %v5052_v46 }
0x3633   : > { %7119 = vrsqrt.f32 %v5054_v57 }
0x3639   : > { %v7118_v60 = vpop.eup %7117 }
0x363a   : > { %v5057_v56 = vmul.f32 %v7118_v60, %v5041_v30  ;;  %v6738_v30 = vpack.c.bf16 %v5720_v35, %v5719_v28  ;;  %v7228_v28 = vmov 0.0|0.0   ;;  %v5289_v35 = vmul.u32 8, %v7486_v44 }
0x363b   : > { %6750 = vmatprep.subr.bf16.mxu1 %v7228_v28 }
0x363c   : > { %v5065_v62 = vmul.f32 %v5707_v36, %v5057_v56  ;;  %6739 = vmatprep.subr.bf16.mxu0 %v6738_v30 }
0x363d   : > { %v7120_v55 = vpop.eup %7119  ;;  %6741 = vmatpush3.bf16.msra.mxu0 %v6738_v30  ;;  %v5291_v30 = vstv %s5290_s9 }
0x363e   : > { %v5058_v53 = vmul.f32 %v7120_v55, %v5042_v31  ;;  %v5073_v63 = vadd.f32 %v5708_v50, %v5065_v62  ;;  %v6742_v31 = vpack.c.bf16 %v5722_v59, %v5721_v39  ;;  %v5728_v59 = vld [vmem:[%s8244_s1 + $0x1] ss:$0 sm:$0xff]  ;;  %v5292_v37 = vadd.s32 %v5291_v30, %v5289_v35 }
0x3640   : > { %v5066_v38 = vmul.f32 %v5707_v36, %v5058_v53  ;;  %6390 = vmatprep.mubr.msk.f32.mxu1 %vm163_vm0, %v5073_v63  ;;  %6743 = vmatprep.subr.bf16.mxu0 %v6742_v31  ;;  %vm5293_vm8 = vcmp.eq.s32.totalorder %v7484_v43, %v5292_v37 }
0x3641   : > { %6745 = vmatpush3.bf16.msra.mxu0 %v6742_v31 }
0x3642   : > { %v5074_v0 = vadd.f32 %v5708_v50, %v5066_v38  ;;  %6747 = vmatprep.subr.bf16.mxu0 %v6746_v58 }
0x3644   : > { %6391 = vmatmul.mubr.msk.f32.vlgmr.msra.gmra.mrb[46].mxu1 %vm163_vm0, %v5074_v0 }
0x3645   : > { %6749 = vmatpush3.bf16.msra.mxu0 %v6746_v58  ;;  %6416 = vmatprep.mubr.msk.f32.mxu1 %vm7229_vm7, %v7230_v29 }
0x3717   : > { %v6392_v49 = vpop.f32.mrb[46].mxu1 }
0x3718   : > { %v5166_v33 = vadd.f32 %v6392_v49, %v5714_v61  ;;  %v5160_v48 = vpop.f32.mrb[47].mxu1 }
0x3719   : > { %v5161_v41 = vadd.f32 %v5714_v61, %v5160_v48  ;;  %v5729_v48 = vsel %vm5293_vm8, 1.0, %v7230_v29 }
0x371a   : > { %v5170_v42 = vmul.f32 %v5166_v33, %v5166_v33 }
0x371b   : > { %v5169_v51 = vmul.f32 %v5161_v41, %v5161_v41 }
0x371c   : > { %v5172_v52 = vmul.f32 %v5170_v42, %v5166_v33 }
0x371d   : > { %v5171_v54 = vmul.f32 %v5169_v51, %v5161_v41 }
0x371e   : > { %v5174_v46 = vmul.f32 0.044715, %v5172_v52 }
0x371f   : > { %v5173_v57 = vmul.f32 0.044715, %v5171_v54 }
0x3720   : > { %v5176_v60 = vadd.f32 %v5174_v46, %v5166_v33 }
0x3721   : > { %v5175_v36 = vadd.f32 %v5173_v57, %v5161_v41  ;;  %v6754_v57 = vpack.c.bf16 %v7462_v25, %v7459_v24 }
0x3722   : > { %v5178_v56 = vmul.f32 0.7978846, %v5176_v60  ;;  %v6757_v60 = vpack.c.bf16 %v7468_v27, %v7465_v26 }
0x3723   : > { %v5177_v50 = vmul.f32 0.7978846, %v5175_v36 }
0x3724   : > { %7121 = vtanh.f32 %v5178_v56 }
0x3725   : > { %7123 = vtanh.f32 %v5177_v50 }
0x372e   : > { %v7122_v62 = vpop.eup %7121 }
0x372f   : > { %v7124_v55 = vpop.eup %7123  ;;  %v5182_v53 = vadd.f32 1.0, %v7122_v62 }
0x3730   : > { %v5181_v63 = vadd.f32 1.0, %v7124_v55  ;;  %v5731_v55 = vld [vmem:[#allocation3] ss:$0 sm:$0xff] }
0x3731   : > { %v5184_v38 = vmul.f32 0.5, %v5182_v53 }
0x3732   : > { %v5183_v0 = vmul.f32 0.5, %v5181_v63  ;;  %v5732_v63 = vld [vmem:[#allocation5] ss:$0 sm:$0xff] }
0x3733   : > { %v5186_v40 = vmul.f32 %v5184_v38, %v5166_v33 }
0x3734   : > { %v5185_v1 = vmul.f32 %v5183_v0, %v5161_v41 }
0x3736   : > { %6409 = vmatprep.mubr.msk.f32.mxu0 %vm245_vm2, %v5185_v1 }
0x3737   : > { %6410 = vmatmul.mubr.msk.f32.vlgmr.msra.gmra.mrb[40].mxu0 %vm245_vm2, %v5186_v40 }
0x380a   : > { %v6411_v39 = vpop.f32.mrb[40].mxu0 }
0x380b   : > { %v5278_v31 = vadd.f32 %v6411_v39, %v8142_v47  ;;  %v5268_v34 = vpop.f32.mrb[41].mxu0 }
0x380c   : > { %v5277_v58 = vadd.f32 %v5268_v34, %v8144_v32 }
0x380d   : > { %v5288_v61 = vadd.f32 %v5728_v59, %v5278_v31 }
0x380e   : > { %v5287_v49 = vadd.f32 %v5728_v59, %v5277_v58 }
0x3810   : > { %v6751_v33 = vpack.c.bf16 %v5288_v61, %v5287_v49 }
0x3812   : > { %6752 = vmatpush3.bf16.msra.mxu1 %v6751_v33 }
0x3813   : > { %6753 = vmatprep.subr.bf16.mxu1 %v7228_v28 }
0x3815   : > { %6417 = vmatmul.mubr.msk.f32.vlgmr.msra.gmra.mrb[48].mxu1 %vm686_vm5, %v5729_v48 }
0x3816   : > { %6427 = vmatprep.mubr.msk.f32.mxu1 %vm7229_vm7, %v7230_v29  ;;  %6755 = vmatpush3.bf16.msra.mxu1 %v6754_v57 }
0x3817   : > { %6756 = vmatprep.subr.bf16.mxu1 %v7228_v28 }
0x381a   : > { %6758 = vmatpush3.bf16.msra.mxu1 %v6757_v60 }
0x38e8   : > { %v5365_v41 = vpop.f32.mrb[48].mxu1 }
0x38e9   : > { %v6418_v42 = vpop.f32.mrb[49].mxu1  ;;  %v5372_v47 = vsel %vm5371_vm9, %v5365_v41, 0.0 }
0x38ea   : > { %5373 = vadd.xlane.f32.xlu0 %v5372_v47 }
0x3977   : > { %v5374_v51 = vpop.xlane.xlu0 %5373 }
0x3978   : > { %v5375_v52 = vmul.f32 0.03125, %v5374_v51 }
0x397a   : > { %v5376_v32 = vsub.f32 %v5365_v41, %v5375_v52 }
0x397c   : > { %v5377_v54 = vmul.f32 %v5376_v32, %v5376_v32 }
0x397e   : > { %v5378_v46 = vsel %vm5371_vm9, %v5377_v54, 0.0 }
0x397f   : > { %5379 = vadd.xlane.f32.xlu1 %v5378_v46 }
0x3a0c   : > { %v5380_v36 = vpop.xlane.xlu1 %5379 }
0x3a0d   : > { %v5381_v56 = vmul.f32 0.03125, %v5380_v36 }
0x3a0f   : > { %v5382_v50 = vadd.f32 1e-05, %v5381_v56 }
0x3a11   : > { %7125 = vrsqrt.f32 %v5382_v50 }
0x3a1b   : > { %v7126_v62 = vpop.eup %7125 }
0x3a1c   : > { %v5384_v53 = vmul.f32 %v7126_v62, %v5376_v32 }
0x3a1e   : > { %v5391_v38 = vmul.f32 %v5731_v55, %v5384_v53 }
0x3a20   : > { %v5398_v0 = vadd.f32 %v5732_v63, %v5391_v38 }
0x3a22   : > { %6428 = vmatmul.mubr.msk.f32.vlgmr.msra.gmra.mrb[50].mxu1 %vm163_vm0, %v5398_v0 }
0x3af5   : > { %v5468_v1 = vpop.f32.mrb[50].mxu1 }
0x3af6   : > { %v5472_v40 = vsel %vm370_vm1, %v5468_v1, -1e+09  ;;  %v6429_v28 = vpop.f32.mrb[51].mxu1 }
0x3af7   : > { %v5474_v35 = vsel %vm5473_vm10, %v5472_v40, -inf }
0x3af8   : > { %5475 = vmax.xlane.f32.xlu0 %v5474_v35 }
0x3b85   : > { %v5476_v30 = vpop.xlane.xlu0 %5475 }
0x3b86   : > { %vm5477_vm11 = vcmp.ge.f32.partialorder %v5472_v40, %v5476_v30 }
0x3b87   : > { %v5478_v39 = vsel %vm5477_vm11, %v369_v45, 128.0 }
0x3b88   : > { %v5479_v59 = vsel %vm5473_vm10, %v5478_v39, inf }
0x3b89   : > { %5480 = vmin.xlane.f32.xlu1 %v5479_v59 }
0x3c13   :  { %375 = sbr.rel (!%p373_p2) target bundleno = 324 (0x144), region = 203 }
0x3c16   : > { %v5481_v31 = vpop.xlane.xlu1 %5480 }
0x3c17   : > { %vm5482_vm12 = vcmp.eq.f32.partialorder %v369_v45, %v5481_v31 }
0x3c18   : > { %v5734_v34 = vsel %vm5482_vm12, 1.0, %v7230_v29 }
0x3c19   : > { %5735 = vst [vmem:[%s5496_s13 + $0x3] sm:$0x1] %v5734_v34  ;;  %5736 = vst [vmem:[%s5496_s13 + $0xa] sm:$0x2] %v5734_v34 }
0x3c1a   :  { %5494 = vsyncpa [#allocation4], 1 }
0x3c1b   :  { %5495 = vsyncpa [#allocation6], 1 }

</bundles_post_ra>
